<compile_context>
chip_gen: v7x
topology: tpu7x:2x2x1
jax: 0.10.0
libtpu: 0.0.40
codegen_flags: <defaults>
</compile_context>

<pallas_src>
import numpy as np
import jax
import jax.numpy as jnp
from jax.experimental import pallas as pl
from jax.experimental.pallas import tpu as pltpu

C_PAD = 128          # pad nClass to a full lane group -> unmasked output stores
_F32 = jnp.float32
_BF16 = jnp.bfloat16


def _cplx_lmul(cr, ci, xr, xi, conj):
    """(cr -+ i*ci) @ (xr + i*xi): classical 4-dot complex matmul, bf16 MXU
    operands, f32 accumulation (no Gauss trick -> no cancellation, and only the
    re/im bf16 constant variants need to be resident)."""
    xrb = xr.astype(_BF16)
    xib = xi.astype(_BF16)
    rr = jnp.dot(cr, xrb, preferred_element_type=_F32)
    ii = jnp.dot(ci, xib, preferred_element_type=_F32)
    ri = jnp.dot(cr, xib, preferred_element_type=_F32)
    ir = jnp.dot(ci, xrb, preferred_element_type=_F32)
    if conj:
        return rr + ii, ri - ir
    return rr - ii, ri + ir


def _cplx_rmul(xr, xi, cr, ci, conj):
    """(xr + i*xi) @ (cr -+ i*ci)."""
    xrb = xr.astype(_BF16)
    xib = xi.astype(_BF16)
    rr = jnp.dot(xrb, cr, preferred_element_type=_F32)
    ii = jnp.dot(xib, ci, preferred_element_type=_F32)
    ri = jnp.dot(xrb, ci, preferred_element_type=_F32)
    ir = jnp.dot(xib, cr, preferred_element_type=_F32)
    if conj:
        return rr + ii, ir - ri
    return rr - ii, ri + ir


def make_d2nnet_kernel(M, N, bt, n_layers, c_pad, input_scale):
    def kernel(x_ref, fm_ref, fnb_ref, hw_ref, pcs_ref, w_ref, fcw_hbm, fcb_ref,
               out_ref,
               ur_ref, ui_ref, sr_ref, si_ref, modt_ref, fcw_ref, fc_sem):
        l_idx = pl.program_id(1)

        # ---- layer 0: D2NNet.input_trans + zero highway accumulator ----------
        @pl.when(l_idx == 0)
        def _init():
            xt = jnp.sqrt(x_ref[...] * input_scale)        # (M, bt*N), lane-packed
            ur_ref[...] = xt
            ui_ref[...] = jnp.zeros_like(xt)
            sr_ref[...] = jnp.zeros_like(xt)
            si_ref[...] = jnp.zeros_like(xt)
            # Stream the FC weight HBM->VMEM once per batch tile, overlapped with
            # the diffractive layers; consumed only at the classify step.
            pltpu.make_async_copy(fcw_hbm, fcw_ref, fc_sem.at[0]).start()

        # ---- one DiffractiveLayer over the whole lane-packed batch tile -------
        fmr = fm_ref[0]                                    # (M, M) bf16
        fmi = fm_ref[1]
        fnr = fnb_ref[0]                                   # (bt*N, bt*N) bf16, block-diag
        fni = fnb_ref[1]

        ur = ur_ref[...]
        ui = ui_ref[...]
        ar, ai = _cplx_lmul(fmr, fmi, ur, ui, conj=False)  # F_M @ U
        vr, vi = _cplx_rmul(ar, ai, fnr, fni, conj=False)  # ... @ blkdiag(F_N)
        hr = hw_ref[0]                                     # H/(M*N), lane-tiled
        hi = hw_ref[1]
        tr = vr * hr - vi * hi                             # (.) * H
        ti = vr * hi + vi * hr
        br, bi = _cplx_lmul(fmr, fmi, tr, ti, conj=True)   # conj(F_M) @ T
        dr, di = _cplx_rmul(br, bi, fnr, fni, conj=True)   # ... @ blkdiag(conj(F_N))
        c = pcs_ref[0]                                     # cos(phi_l), lane-tiled
        s = pcs_ref[1]                                     # sin(phi_l)
        nr = dr * c - di * s                               # (.) * exp(i*phi_l)
        ni = dr * s + di * c
        ur_ref[...] = nr
        ui_ref[...] = ni
        wl = w_ref[l_idx]                                  # highWay == 1 weight (SMEM)
        sr_ref[...] = sr_ref[...] + nr * wl
        si_ref[...] = si_ref[...] + ni * wl

        # ---- last layer: z_modulus(summary) + fused FC classifier epilogue ----
        @pl.when(l_idx == n_layers - 1)
        def _classify():
            pltpu.make_async_copy(fcw_hbm, fcw_ref, fc_sem.at[0]).wait()
            sr = sr_ref[...]
            si = si_ref[...]
            mod = jnp.sqrt(sr * sr + si * si)              # z_modulus, (M, bt*N)
            # de-interleave the lane-packed slab into per-image (M, N) panels
            for b in range(bt):
                modt_ref[pl.ds(b * M, M), :] = mod[:, b * N:(b + 1) * N]
            # flatten(mod_b) @ W + bias as M image-batched (bt, N)@(N, c_pad) dots
            # (a literal single (bt, M*N) matmul would need a lanes<->sublanes
            #  relayout of the modulus; this form avoids it and is run once/tile).
            # TODO(synk): for large M, chunk this loop via lax.fori_loop.
            acc = jnp.zeros((bt, c_pad), _F32)
            for m in range(M):
                rows = modt_ref[pl.ds(m, bt, stride=M), :].astype(_BF16)  # (bt, N)
                acc = acc + jnp.dot(rows, fcw_ref[pl.ds(m * N, N), :],
                                    preferred_element_type=_F32)
            out_ref[...] = acc + fcb_ref[...]              # single dense (bt, 128) store

    return kernel


def pick_bt(B, N):
    """Batch-tile size: satisfy the BlockSpec last-two-dim constraints
    (bt % 8 == 0 and (bt*N) % 128 == 0, or bt == B), bound the block-diagonal
    right-DFT operand (bt*N <= 512), and prefer >= 2 batch tiles so both v7x
    TensorCores get work while bt*N fills 128-256 MXU lanes."""
    cands = []
    for d in range(1, B + 1):
        if B % d:
            continue
        if d < B and (d % 8 or (d * N) % 128):
            continue
        if d * N > 512:
            continue
        cands.append(d)
    if not cands:
        # TODO(synk): for very large N, replace the block-diagonal right-DFT with
        # a per-image batched contraction instead of falling back to bt == B.
        cands = [B]
    multi = [d for d in cands if B // d >= 2]
    return max(multi) if multi else max(cands)


def _vmem_limit_bytes():
    # Generation-aware VMEM budget (128 MiB on v5e/v6e, 64 MiB per core on v7x):
    # take ~75% of capacity, capped at 96 MiB.
    try:
        cap = int(pltpu.get_tpu_info().vmem_capacity_bytes)
    except Exception:
        cap = 64 * 1024 * 1024
    return int(min(cap * 3 // 4, 96 * 1024 * 1024))


def d2nnet_forward(x, params, n_class, *, input_scale=1.0, bt=None):
    """D2NNet forward (isFC=True, highWay=1). x: (B, 1, M, N) float32 NCHW."""
    B, C, M, N = x.shape
    assert C == 1, "D2NNet.forward asserts a single input channel"
    L = params["phase_cos"].shape[0]
    c_pad = params["fc_w"].shape[1]
    assert n_class <= c_pad

    if bt is None:
        bt = pick_bt(B, N)
    assert B % bt == 0
    WN = bt * N

    # ---- wrapper-side layout plumbing (XLA ops, outside the kernel) ----------
    # lane-packed field layout: x_wide[m, b*N + n] = x[b, 0, m, n]
    x_wide = jnp.transpose(x[:, 0, :, :], (1, 0, 2)).reshape(M, B * N)
    fm = jnp.stack([params["fm_r"], params["fm_i"]])                  # (2, M, M) bf16
    eye = jnp.eye(bt, dtype=params["fn_r"].dtype)
    fnb = jnp.stack([jnp.kron(eye, params["fn_r"]),
                     jnp.kron(eye, params["fn_i"])])                  # (2, WN, WN) bf16
    hw = jnp.stack([jnp.tile(params["h_r"], (1, bt)),
                    jnp.tile(params["h_i"], (1, bt))])                # (2, M, WN) f32
    pcs = jnp.tile(
        jnp.stack([params["phase_cos"], params["phase_sin"]],
                  axis=1).reshape(2 * L, M, N),
        (1, 1, bt))                                                   # (2L, M, WN) f32

    kernel = make_d2nnet_kernel(M, N, bt, L, c_pad, float(input_scale))
    const2 = lambda g, l: (0, 0)
    const3 = lambda g, l: (0, 0, 0)

    out = pl.pallas_call(
        kernel,
        out_shape=jax.ShapeDtypeStruct((B, c_pad), jnp.float32),
        grid_spec=pltpu.PrefetchScalarGridSpec(
            num_scalar_prefetch=0,
            grid=(B // bt, L),                       # batch tiles outer, layers inner
            in_specs=[
                pl.BlockSpec((M, WN), lambda g, l: (0, g)),         # x (lane-packed)
                pl.BlockSpec((2, M, M), const3),                    # F_M re/im (bf16)
                pl.BlockSpec((2, WN, WN), const3),                  # blkdiag(F_N) re/im
                pl.BlockSpec((2, M, WN), const3),                   # H re/im (lane-tiled)
                pl.BlockSpec((2, M, WN), lambda g, l: (l, 0, 0)),   # cos/sin(phi_l), streamed
                pl.BlockSpec(memory_space=pltpu.MemorySpace.SMEM),  # wLayer
                pl.BlockSpec(memory_space=pl.ANY),                  # fc weight (HBM, manual DMA)
                pl.BlockSpec((1, c_pad), const2),                   # fc bias
            ],
            out_specs=pl.BlockSpec((bt, c_pad), lambda g, l: (g, 0)),
            scratch_shapes=[
                pltpu.VMEM((M, WN), jnp.float32),        # field re
                pltpu.VMEM((M, WN), jnp.float32),        # field im
                pltpu.VMEM((M, WN), jnp.float32),        # highway sum re
                pltpu.VMEM((M, WN), jnp.float32),        # highway sum im
                pltpu.VMEM((bt * M, N), jnp.float32),    # modulus staging panels
                pltpu.VMEM((M * N, c_pad), jnp.bfloat16),  # fc weight landing buffer
                pltpu.SemaphoreType.DMA((1,)),           # fc weight copy semaphore
            ],
        ),
        compiler_params=pltpu.CompilerParams(
            dimension_semantics=("parallel", "arbitrary"),
            vmem_limit_bytes=_vmem_limit_bytes(),
        ),
    )(x_wide, fm, fnb, hw, pcs, params["wLayer"], params["fc_w"], params["fc_b"])

    return out[:, :n_class]


def dft_matrix(n):
    idx = np.arange(n)
    return np.exp(-2j * np.pi * np.outer(idx, idx) / n).astype(np.complex64)


def make_H(M, N):
    # Angular-spectrum transfer function (onnet-style constants; deterministic).
    c, hz = 3.0e8, 0.4e12
    lmb = c / hz
    dL, dz = 0.02, 0.03
    k = 2.0 * np.pi / lmb
    df = 1.0 / dL
    ii = (np.arange(M) - M // 2) * df
    jj = (np.arange(N) - N // 2) * df
    ph = ii[:, None] ** 2 + jj[None, :] ** 2
    H = np.exp(1j * k * dz) * np.exp(-1j * lmb * np.pi * dz * ph)
    return np.fft.fftshift(H).astype(np.complex64)


def init_params(M, N, n_class, n_difrac, key, c_pad=C_PAD):
    kp, kw, kb = jax.random.split(key, 3)
    FM = dft_matrix(M)
    FN = dft_matrix(N)
    # Fold the 1/(M*N) scale of the inverse DFT (IF = conj(F)/n) into H.
    H = make_H(M, N) / float(M * N)
    # Learned per-layer phase masks (DiffractiveLayer.transmission), deterministic init.
    phi = jax.random.uniform(kp, (n_difrac, M, N), minval=0.0,
                             maxval=2.0 * np.pi, dtype=jnp.float32)
    bound = 1.0 / np.sqrt(M * N)
    fc_w = jax.random.uniform(kw, (M * N, n_class), minval=-bound,
                              maxval=bound, dtype=jnp.float32)
    fc_b = jax.random.uniform(kb, (n_class,), minval=-bound,
                              maxval=bound, dtype=jnp.float32)
    fc_w_pad = jnp.zeros((M * N, c_pad), jnp.float32).at[:, :n_class].set(fc_w)
    fc_b_pad = jnp.zeros((1, c_pad), jnp.float32).at[0, :n_class].set(fc_b)
    return dict(
        # bf16 MXU operand variants precomputed host-side (no per-grid-step casts)
        fm_r=jnp.asarray(FM.real, jnp.bfloat16), fm_i=jnp.asarray(FM.imag, jnp.bfloat16),
        fn_r=jnp.asarray(FN.real, jnp.bfloat16), fn_i=jnp.asarray(FN.imag, jnp.bfloat16),
        h_r=jnp.asarray(H.real, jnp.float32), h_i=jnp.asarray(H.imag, jnp.float32),
        phase_cos=jnp.cos(phi), phase_sin=jnp.sin(phi),
        wLayer=jnp.ones((n_difrac,), jnp.float32),   # highWay == 1 init: ones(nDifrac)
        fc_w=fc_w_pad.astype(jnp.bfloat16),          # (M*N, c_pad), class-dim lane-padded
        fc_b=fc_b_pad,                               # (1, c_pad)
    )


if __name__ == "__main__":
    # Small MNIST-like shapes; B=32 so the bt heuristic can both fill 256 MXU
    # lanes (bt*N=256) and leave 2 parallel batch tiles for v7x's two cores.
    B, M, N = 32, 16, 16
    n_class, n_difrac = 10, 4
    key = jax.random.PRNGKey(0)
    kx, kparam = jax.random.split(key)
    params = init_params(M, N, n_class, n_difrac, kparam)
    # NCHW single-channel, non-negative (sqrt in input_trans)
    x = jax.random.uniform(kx, (B, 1, M, N), dtype=jnp.float32)

    fwd = jax.jit(lambda xx: d2nnet_forward(xx, params, n_class, input_scale=1.0))
    out = jax.block_until_ready(fwd(x))
    assert out.shape == (B, n_class) and out.dtype == jnp.float32
    assert bool(jnp.all(jnp.isfinite(out)))
    print("KERNEL_OK")
</pallas_src>

<mosaic_0001>
module attributes {stable_mosaic.version = 11 : i64} {
  func.func @kernel(%arg0: i32, %arg1: i32, %arg2: memref<16x256xf32, #tpu.memory_space<vmem>>, %arg3: memref<2x16x16xbf16, #tpu.memory_space<vmem>>, %arg4: memref<2x256x256xbf16, #tpu.memory_space<vmem>>, %arg5: memref<2x16x256xf32, #tpu.memory_space<vmem>>, %arg6: memref<2x16x256xf32, #tpu.memory_space<vmem>>, %arg7: memref<4xf32, #tpu.memory_space<smem>>, %arg8: memref<256x128xbf16, #tpu.memory_space<any>>, %arg9: memref<1x128xf32, #tpu.memory_space<vmem>>, %arg10: memref<16x128xf32, #tpu.memory_space<vmem>>, %arg11: memref<16x256xf32, #tpu.memory_space<vmem>>, %arg12: memref<16x256xf32, #tpu.memory_space<vmem>>, %arg13: memref<16x256xf32, #tpu.memory_space<vmem>>, %arg14: memref<16x256xf32, #tpu.memory_space<vmem>>, %arg15: memref<256x16xf32, #tpu.memory_space<vmem>>, %arg16: memref<256x128xbf16, #tpu.memory_space<vmem>>, %arg17: memref<1x!tpu.dma_semaphore, #tpu.memory_space<semaphore_mem>>) attributes {dimension_semantics = [#tpu.dimension_semantics<parallel>, #tpu.dimension_semantics<arbitrary>], iteration_bounds = array<i64: 2, 4>, scalar_prefetch = 0 : i64, scratch_operands = 7 : i64, tpu.core_type = #tpu.core_type<tc>, window_params = [{transform_indices = @transform_0, window_bounds = array<i64: 16, 256>}, {pipeline_mode = #tpu.pipeline_mode<synchronous>, transform_indices = @transform_1, window_bounds = array<i64: 2, 16, 16>}, {pipeline_mode = #tpu.pipeline_mode<synchronous>, transform_indices = @transform_2, window_bounds = array<i64: 2, 256, 256>}, {pipeline_mode = #tpu.pipeline_mode<synchronous>, transform_indices = @transform_3, window_bounds = array<i64: 2, 16, 256>}, {transform_indices = @transform_4, window_bounds = array<i64: 2, 16, 256>}, {transform_indices = @transform_5, window_bounds = array<i64: 4>}, {}, {pipeline_mode = #tpu.pipeline_mode<synchronous>, transform_indices = @transform_7, window_bounds = array<i64: 1, 128>}, {transform_indices = @transform_8, window_bounds = array<i64: 16, 128>}]} {
    %c0_i32 = arith.constant 0 : i32
    %0 = arith.cmpi eq, %arg1, %c0_i32 : i32
    %1 = arith.extui %0 : i1 to i32
    %c0_i32_0 = arith.constant 0 : i32
    %2 = arith.cmpi ne, %1, %c0_i32_0 : i32
    scf.if %2 {
      %c0_55 = arith.constant 0 : index
      %c0_56 = arith.constant 0 : index
      %82 = vector.load %arg2[%c0_55, %c0_56] : memref<16x256xf32, #tpu.memory_space<vmem>>, vector<16x256xf32>
      %cst_57 = arith.constant 1.000000e+00 : f32
      %83 = vector.broadcast %cst_57 : f32 to vector<16x256xf32>
      %84 = arith.mulf %82, %83 : vector<16x256xf32>
      %85 = math.sqrt %84 : vector<16x256xf32>
      %c0_58 = arith.constant 0 : index
      %c0_59 = arith.constant 0 : index
      %86 = vector.load %arg11[%c0_58, %c0_59] : memref<16x256xf32, #tpu.memory_space<vmem>>, vector<16x256xf32>
      tpu.vector_store %arg11[%c0_58, %c0_59], %85 {strides = array<i32>} : memref<16x256xf32, #tpu.memory_space<vmem>>, vector<16x256xf32>,
      %cst_60 = arith.constant 0.000000e+00 : f32
      %87 = vector.broadcast %cst_60 : f32 to vector<16x256xf32>
      %c0_61 = arith.constant 0 : index
      %c0_62 = arith.constant 0 : index
      %88 = vector.load %arg12[%c0_61, %c0_62] : memref<16x256xf32, #tpu.memory_space<vmem>>, vector<16x256xf32>
      tpu.vector_store %arg12[%c0_61, %c0_62], %87 {strides = array<i32>} : memref<16x256xf32, #tpu.memory_space<vmem>>, vector<16x256xf32>,
      %cst_63 = arith.constant 0.000000e+00 : f32
      %89 = vector.broadcast %cst_63 : f32 to vector<16x256xf32>
      %c0_64 = arith.constant 0 : index
      %c0_65 = arith.constant 0 : index
      %90 = vector.load %arg13[%c0_64, %c0_65] : memref<16x256xf32, #tpu.memory_space<vmem>>, vector<16x256xf32>
      tpu.vector_store %arg13[%c0_64, %c0_65], %89 {strides = array<i32>} : memref<16x256xf32, #tpu.memory_space<vmem>>, vector<16x256xf32>,
      %cst_66 = arith.constant 0.000000e+00 : f32
      %91 = vector.broadcast %cst_66 : f32 to vector<16x256xf32>
      %c0_67 = arith.constant 0 : index
      %c0_68 = arith.constant 0 : index
      %92 = vector.load %arg14[%c0_67, %c0_68] : memref<16x256xf32, #tpu.memory_space<vmem>>, vector<16x256xf32>
      tpu.vector_store %arg14[%c0_67, %c0_68], %91 {strides = array<i32>} : memref<16x256xf32, #tpu.memory_space<vmem>>, vector<16x256xf32>,
      %c0_i32_69 = arith.constant 0 : i32
      %93 = tpu.memref_slice %arg17[%c0_i32_69] : memref<1x!tpu.dma_semaphore, #tpu.memory_space<semaphore_mem>> -> memref<1x!tpu.dma_semaphore, #tpu.memory_space<semaphore_mem>>
      %94 = tpu.memref_squeeze %93 : memref<1x!tpu.dma_semaphore, #tpu.memory_space<semaphore_mem>> -> memref<!tpu.dma_semaphore, #tpu.memory_space<semaphore_mem>>
      tpu.enqueue_dma source(%arg8 : memref<256x128xbf16, #tpu.memory_space<any>>) target(%arg16 : memref<256x128xbf16, #tpu.memory_space<vmem>>) target_semaphore(%94 : memref<!tpu.dma_semaphore, #tpu.memory_space<semaphore_mem>>)
    } else {
    }
    %c0 = arith.constant 0 : index
    %c0_1 = arith.constant 0 : index
    %c0_2 = arith.constant 0 : index
    %3 = vector.load %arg3[%c0, %c0_1, %c0_2] : memref<2x16x16xbf16, #tpu.memory_space<vmem>>, vector<1x16x16xbf16>
    %4 = vector.shape_cast %3 : vector<1x16x16xbf16> to vector<16x16xbf16>
    %c1 = arith.constant 1 : index
    %c0_3 = arith.constant 0 : index
    %c0_4 = arith.constant 0 : index
    %5 = vector.load %arg3[%c1, %c0_3, %c0_4] : memref<2x16x16xbf16, #tpu.memory_space<vmem>>, vector<1x16x16xbf16>
    %6 = vector.shape_cast %5 : vector<1x16x16xbf16> to vector<16x16xbf16>
    %c0_5 = arith.constant 0 : index
    %c0_6 = arith.constant 0 : index
    %c0_7 = arith.constant 0 : index
    %7 = vector.load %arg4[%c0_5, %c0_6, %c0_7] : memref<2x256x256xbf16, #tpu.memory_space<vmem>>, vector<1x256x256xbf16>
    %8 = vector.shape_cast %7 : vector<1x256x256xbf16> to vector<256x256xbf16>
    %c1_8 = arith.constant 1 : index
    %c0_9 = arith.constant 0 : index
    %c0_10 = arith.constant 0 : index
    %9 = vector.load %arg4[%c1_8, %c0_9, %c0_10] : memref<2x256x256xbf16, #tpu.memory_space<vmem>>, vector<1x256x256xbf16>
    %10 = vector.shape_cast %9 : vector<1x256x256xbf16> to vector<256x256xbf16>
    %c0_11 = arith.constant 0 : index
    %c0_12 = arith.constant 0 : index
    %11 = vector.load %arg11[%c0_11, %c0_12] : memref<16x256xf32, #tpu.memory_space<vmem>>, vector<16x256xf32>
    %c0_13 = arith.constant 0 : index
    %c0_14 = arith.constant 0 : index
    %12 = vector.load %arg12[%c0_13, %c0_14] : memref<16x256xf32, #tpu.memory_space<vmem>>, vector<16x256xf32>
    %13 = arith.truncf %11 : vector<16x256xf32> to vector<16x256xbf16>
    %14 = arith.truncf %12 : vector<16x256xf32> to vector<16x256xbf16>
    %cst = arith.constant dense<0.000000e+00> : vector<16x256xf32>
    %15 = tpu.matmul %4, %13, %cst {dimension_numbers = #tpu.dot_dimension_numbers<[1], [0], [0], [1], [0, 0, 1, 1], [], []>} : vector<16x16xbf16>, vector<16x256xbf16>, vector<16x256xf32> -> vector<16x256xf32>
    %cst_15 = arith.constant dense<0.000000e+00> : vector<16x256xf32>
    %16 = tpu.matmul %6, %14, %cst_15 {dimension_numbers = #tpu.dot_dimension_numbers<[1], [0], [0], [1], [0, 0, 1, 1], [], []>} : vector<16x16xbf16>, vector<16x256xbf16>, vector<16x256xf32> -> vector<16x256xf32>
    %cst_16 = arith.constant dense<0.000000e+00> : vector<16x256xf32>
    %17 = tpu.matmul %4, %14, %cst_16 {dimension_numbers = #tpu.dot_dimension_numbers<[1], [0], [0], [1], [0, 0, 1, 1], [], []>} : vector<16x16xbf16>, vector<16x256xbf16>, vector<16x256xf32> -> vector<16x256xf32>
    %cst_17 = arith.constant dense<0.000000e+00> : vector<16x256xf32>
    %18 = tpu.matmul %6, %13, %cst_17 {dimension_numbers = #tpu.dot_dimension_numbers<[1], [0], [0], [1], [0, 0, 1, 1], [], []>} : vector<16x16xbf16>, vector<16x256xbf16>, vector<16x256xf32> -> vector<16x256xf32>
    %19 = arith.subf %15, %16 : vector<16x256xf32>
    %20 = arith.addf %17, %18 : vector<16x256xf32>
    %21 = arith.truncf %19 : vector<16x256xf32> to vector<16x256xbf16>
    %22 = arith.truncf %20 : vector<16x256xf32> to vector<16x256xbf16>
    %cst_18 = arith.constant dense<0.000000e+00> : vector<16x256xf32>
    %23 = tpu.matmul %21, %8, %cst_18 {dimension_numbers = #tpu.dot_dimension_numbers<[1], [0], [0], [1], [0, 0, 1, 1], [], []>} : vector<16x256xbf16>, vector<256x256xbf16>, vector<16x256xf32> -> vector<16x256xf32>
    %cst_19 = arith.constant dense<0.000000e+00> : vector<16x256xf32>
    %24 = tpu.matmul %22, %10, %cst_19 {dimension_numbers = #tpu.dot_dimension_numbers<[1], [0], [0], [1], [0, 0, 1, 1], [], []>} : vector<16x256xbf16>, vector<256x256xbf16>, vector<16x256xf32> -> vector<16x256xf32>
    %cst_20 = arith.constant dense<0.000000e+00> : vector<16x256xf32>
    %25 = tpu.matmul %21, %10, %cst_20 {dimension_numbers = #tpu.dot_dimension_numbers<[1], [0], [0], [1], [0, 0, 1, 1], [], []>} : vector<16x256xbf16>, vector<256x256xbf16>, vector<16x256xf32> -> vector<16x256xf32>
    %cst_21 = arith.constant dense<0.000000e+00> : vector<16x256xf32>
    %26 = tpu.matmul %22, %8, %cst_21 {dimension_numbers = #tpu.dot_dimension_numbers<[1], [0], [0], [1], [0, 0, 1, 1], [], []>} : vector<16x256xbf16>, vector<256x256xbf16>, vector<16x256xf32> -> vector<16x256xf32>
    %27 = arith.subf %23, %24 : vector<16x256xf32>
    %28 = arith.addf %25, %26 : vector<16x256xf32>
    %c0_22 = arith.constant 0 : index
    %c0_23 = arith.constant 0 : index
    %c0_24 = arith.constant 0 : index
    %29 = vector.load %arg5[%c0_22, %c0_23, %c0_24] : memref<2x16x256xf32, #tpu.memory_space<vmem>>, vector<1x16x256xf32>
    %30 = vector.shape_cast %29 : vector<1x16x256xf32> to vector<16x256xf32>
    %c1_25 = arith.constant 1 : index
    %c0_26 = arith.constant 0 : index
    %c0_27 = arith.constant 0 : index
    %31 = vector.load %arg5[%c1_25, %c0_26, %c0_27] : memref<2x16x256xf32, #tpu.memory_space<vmem>>, vector<1x16x256xf32>
    %32 = vector.shape_cast %31 : vector<1x16x256xf32> to vector<16x256xf32>
    %33 = arith.mulf %27, %30 : vector<16x256xf32>
    %34 = arith.mulf %28, %32 : vector<16x256xf32>
    %35 = arith.subf %33, %34 : vector<16x256xf32>
    %36 = arith.mulf %27, %32 : vector<16x256xf32>
    %37 = arith.mulf %28, %30 : vector<16x256xf32>
    %38 = arith.addf %36, %37 : vector<16x256xf32>
    %39 = arith.truncf %35 : vector<16x256xf32> to vector<16x256xbf16>
    %40 = arith.truncf %38 : vector<16x256xf32> to vector<16x256xbf16>
    %cst_28 = arith.constant dense<0.000000e+00> : vector<16x256xf32>
    %41 = tpu.matmul %4, %39, %cst_28 {dimension_numbers = #tpu.dot_dimension_numbers<[1], [0], [0], [1], [0, 0, 1, 1], [], []>} : vector<16x16xbf16>, vector<16x256xbf16>, vector<16x256xf32> -> vector<16x256xf32>
    %cst_29 = arith.constant dense<0.000000e+00> : vector<16x256xf32>
    %42 = tpu.matmul %6, %40, %cst_29 {dimension_numbers = #tpu.dot_dimension_numbers<[1], [0], [0], [1], [0, 0, 1, 1], [], []>} : vector<16x16xbf16>, vector<16x256xbf16>, vector<16x256xf32> -> vector<16x256xf32>
    %cst_30 = arith.constant dense<0.000000e+00> : vector<16x256xf32>
    %43 = tpu.matmul %4, %40, %cst_30 {dimension_numbers = #tpu.dot_dimension_numbers<[1], [0], [0], [1], [0, 0, 1, 1], [], []>} : vector<16x16xbf16>, vector<16x256xbf16>, vector<16x256xf32> -> vector<16x256xf32>
    %cst_31 = arith.constant dense<0.000000e+00> : vector<16x256xf32>
    %44 = tpu.matmul %6, %39, %cst_31 {dimension_numbers = #tpu.dot_dimension_numbers<[1], [0], [0], [1], [0, 0, 1, 1], [], []>} : vector<16x16xbf16>, vector<16x256xbf16>, vector<16x256xf32> -> vector<16x256xf32>
    %45 = arith.addf %41, %42 : vector<16x256xf32>
    %46 = arith.subf %43, %44 : vector<16x256xf32>
    %47 = arith.truncf %45 : vector<16x256xf32> to vector<16x256xbf16>
    %48 = arith.truncf %46 : vector<16x256xf32> to vector<16x256xbf16>
    %cst_32 = arith.constant dense<0.000000e+00> : vector<16x256xf32>
    %49 = tpu.matmul %47, %8, %cst_32 {dimension_numbers = #tpu.dot_dimension_numbers<[1], [0], [0], [1], [0, 0, 1, 1], [], []>} : vector<16x256xbf16>, vector<256x256xbf16>, vector<16x256xf32> -> vector<16x256xf32>
    %cst_33 = arith.constant dense<0.000000e+00> : vector<16x256xf32>
    %50 = tpu.matmul %48, %10, %cst_33 {dimension_numbers = #tpu.dot_dimension_numbers<[1], [0], [0], [1], [0, 0, 1, 1], [], []>} : vector<16x256xbf16>, vector<256x256xbf16>, vector<16x256xf32> -> vector<16x256xf32>
    %cst_34 = arith.constant dense<0.000000e+00> : vector<16x256xf32>
    %51 = tpu.matmul %47, %10, %cst_34 {dimension_numbers = #tpu.dot_dimension_numbers<[1], [0], [0], [1], [0, 0, 1, 1], [], []>} : vector<16x256xbf16>, vector<256x256xbf16>, vector<16x256xf32> -> vector<16x256xf32>
    %cst_35 = arith.constant dense<0.000000e+00> : vector<16x256xf32>
    %52 = tpu.matmul %48, %8, %cst_35 {dimension_numbers = #tpu.dot_dimension_numbers<[1], [0], [0], [1], [0, 0, 1, 1], [], []>} : vector<16x256xbf16>, vector<256x256xbf16>, vector<16x256xf32> -> vector<16x256xf32>
    %53 = arith.addf %49, %50 : vector<16x256xf32>
    %54 = arith.subf %52, %51 : vector<16x256xf32>
    %c0_36 = arith.constant 0 : index
    %c0_37 = arith.constant 0 : index
    %c0_38 = arith.constant 0 : index
    %55 = vector.load %arg6[%c0_36, %c0_37, %c0_38] : memref<2x16x256xf32, #tpu.memory_space<vmem>>, vector<1x16x256xf32>
    %56 = vector.shape_cast %55 : vector<1x16x256xf32> to vector<16x256xf32>
    %c1_39 = arith.constant 1 : index
    %c0_40 = arith.constant 0 : index
    %c0_41 = arith.constant 0 : index
    %57 = vector.load %arg6[%c1_39, %c0_40, %c0_41] : memref<2x16x256xf32, #tpu.memory_space<vmem>>, vector<1x16x256xf32>
    %58 = vector.shape_cast %57 : vector<1x16x256xf32> to vector<16x256xf32>
    %59 = arith.mulf %53, %56 : vector<16x256xf32>
    %60 = arith.mulf %54, %58 : vector<16x256xf32>
    %61 = arith.subf %59, %60 : vector<16x256xf32>
    %62 = arith.mulf %53, %58 : vector<16x256xf32>
    %63 = arith.mulf %54, %56 : vector<16x256xf32>
    %64 = arith.addf %62, %63 : vector<16x256xf32>
    %c0_42 = arith.constant 0 : index
    %c0_43 = arith.constant 0 : index
    %65 = vector.load %arg11[%c0_42, %c0_43] : memref<16x256xf32, #tpu.memory_space<vmem>>, vector<16x256xf32>
    tpu.vector_store %arg11[%c0_42, %c0_43], %61 {strides = array<i32>} : memref<16x256xf32, #tpu.memory_space<vmem>>, vector<16x256xf32>,
    %c0_44 = arith.constant 0 : index
    %c0_45 = arith.constant 0 : index
    %66 = vector.load %arg12[%c0_44, %c0_45] : memref<16x256xf32, #tpu.memory_space<vmem>>, vector<16x256xf32>
    tpu.vector_store %arg12[%c0_44, %c0_45], %64 {strides = array<i32>} : memref<16x256xf32, #tpu.memory_space<vmem>>, vector<16x256xf32>,
    %67 = arith.index_cast %arg1 : i32 to index
    %68 = memref.load %arg7[%67] : memref<4xf32, #tpu.memory_space<smem>>
    %c0_46 = arith.constant 0 : index
    %c0_47 = arith.constant 0 : index
    %69 = vector.load %arg13[%c0_46, %c0_47] : memref<16x256xf32, #tpu.memory_space<vmem>>, vector<16x256xf32>
    %70 = vector.broadcast %68 : f32 to vector<16x256xf32>
    %71 = arith.mulf %61, %70 : vector<16x256xf32>
    %72 = arith.addf %69, %71 : vector<16x256xf32>
    %c0_48 = arith.constant 0 : index
    %c0_49 = arith.constant 0 : index
    %73 = vector.load %arg13[%c0_48, %c0_49] : memref<16x256xf32, #tpu.memory_space<vmem>>, vector<16x256xf32>
    tpu.vector_store %arg13[%c0_48, %c0_49], %72 {strides = array<i32>} : memref<16x256xf32, #tpu.memory_space<vmem>>, vector<16x256xf32>,
    %c0_50 = arith.constant 0 : index
    %c0_51 = arith.constant 0 : index
    %74 = vector.load %arg14[%c0_50, %c0_51] : memref<16x256xf32, #tpu.memory_space<vmem>>, vector<16x256xf32>
    %75 = vector.broadcast %68 : f32 to vector<16x256xf32>
    %76 = arith.mulf %64, %75 : vector<16x256xf32>
    %77 = arith.addf %74, %76 : vector<16x256xf32>
    %c0_52 = arith.constant 0 : index
    %c0_53 = arith.constant 0 : index
    %78 = vector.load %arg14[%c0_52, %c0_53] : memref<16x256xf32, #tpu.memory_space<vmem>>, vector<16x256xf32>
    tpu.vector_store %arg14[%c0_52, %c0_53], %77 {strides = array<i32>} : memref<16x256xf32, #tpu.memory_space<vmem>>, vector<16x256xf32>,
    %c3_i32 = arith.constant 3 : i32
    %79 = arith.cmpi eq, %arg1, %c3_i32 : i32
    %80 = arith.extui %79 : i1 to i32
    %c0_i32_54 = arith.constant 0 : i32
    %81 = arith.cmpi ne, %80, %c0_i32_54 : i32
    scf.if %81 {
      %c0_i32_55 = arith.constant 0 : i32
      %82 = tpu.memref_slice %arg17[%c0_i32_55] : memref<1x!tpu.dma_semaphore, #tpu.memory_space<semaphore_mem>> -> memref<1x!tpu.dma_semaphore, #tpu.memory_space<semaphore_mem>>
      %83 = tpu.memref_squeeze %82 : memref<1x!tpu.dma_semaphore, #tpu.memory_space<semaphore_mem>> -> memref<!tpu.dma_semaphore, #tpu.memory_space<semaphore_mem>>
      tpu.wait_dma2 semaphore(%83 : memref<!tpu.dma_semaphore, #tpu.memory_space<semaphore_mem>>) src(%arg8 : memref<256x128xbf16, #tpu.memory_space<any>>) dst(%arg16 : memref<256x128xbf16, #tpu.memory_space<vmem>>)
      %c0_56 = arith.constant 0 : index
      %c0_57 = arith.constant 0 : index
      %84 = vector.load %arg13[%c0_56, %c0_57] : memref<16x256xf32, #tpu.memory_space<vmem>>, vector<16x256xf32>
      %c0_58 = arith.constant 0 : index
      %c0_59 = arith.constant 0 : index
      %85 = vector.load %arg14[%c0_58, %c0_59] : memref<16x256xf32, #tpu.memory_space<vmem>>, vector<16x256xf32>
      %86 = arith.mulf %84, %84 : vector<16x256xf32>
      %87 = arith.mulf %85, %85 : vector<16x256xf32>
      %88 = arith.addf %86, %87 : vector<16x256xf32>
      %89 = math.sqrt %88 : vector<16x256xf32>
      %90 = vector.extract_strided_slice %89 {offsets = [0, 0], sizes = [16, 16], strides = [1, 1]} : vector<16x256xf32> to vector<16x16xf32>
      %c0_60 = arith.constant 0 : index
      %c0_61 = arith.constant 0 : index
      %91 = vector.load %arg15[%c0_60, %c0_61] : memref<256x16xf32, #tpu.memory_space<vmem>>, vector<16x16xf32>
      tpu.vector_store %arg15[%c0_60, %c0_61], %90 {strides = array<i32>} : memref<256x16xf32, #tpu.memory_space<vmem>>, vector<16x16xf32>,
      %92 = vector.extract_strided_slice %89 {offsets = [0, 16], sizes = [16, 16], strides = [1, 1]} : vector<16x256xf32> to vector<16x16xf32>
      %c16 = arith.constant 16 : index
      %c0_62 = arith.constant 0 : index
      %93 = vector.load %arg15[%c16, %c0_62] : memref<256x16xf32, #tpu.memory_space<vmem>>, vector<16x16xf32>
      tpu.vector_store %arg15[%c16, %c0_62], %92 {strides = array<i32>} : memref<256x16xf32, #tpu.memory_space<vmem>>, vector<16x16xf32>,
      %94 = vector.extract_strided_slice %89 {offsets = [0, 32], sizes = [16, 16], strides = [1, 1]} : vector<16x256xf32> to vector<16x16xf32>
      %c32 = arith.constant 32 : index
      %c0_63 = arith.constant 0 : index
      %95 = vector.load %arg15[%c32, %c0_63] : memref<256x16xf32, #tpu.memory_space<vmem>>, vector<16x16xf32>
      tpu.vector_store %arg15[%c32, %c0_63], %94 {strides = array<i32>} : memref<256x16xf32, #tpu.memory_space<vmem>>, vector<16x16xf32>,
      %96 = vector.extract_strided_slice %89 {offsets = [0, 48], sizes = [16, 16], strides = [1, 1]} : vector<16x256xf32> to vector<16x16xf32>
      %c48 = arith.constant 48 : index
      %c0_64 = arith.constant 0 : index
      %97 = vector.load %arg15[%c48, %c0_64] : memref<256x16xf32, #tpu.memory_space<vmem>>, vector<16x16xf32>
      tpu.vector_store %arg15[%c48, %c0_64], %96 {strides = array<i32>} : memref<256x16xf32, #tpu.memory_space<vmem>>, vector<16x16xf32>,
      %98 = vector.extract_strided_slice %89 {offsets = [0, 64], sizes = [16, 16], strides = [1, 1]} : vector<16x256xf32> to vector<16x16xf32>
      %c64 = arith.constant 64 : index
      %c0_65 = arith.constant 0 : index
      %99 = vector.load %arg15[%c64, %c0_65] : memref<256x16xf32, #tpu.memory_space<vmem>>, vector<16x16xf32>
      tpu.vector_store %arg15[%c64, %c0_65], %98 {strides = array<i32>} : memref<256x16xf32, #tpu.memory_space<vmem>>, vector<16x16xf32>,
      %100 = vector.extract_strided_slice %89 {offsets = [0, 80], sizes = [16, 16], strides = [1, 1]} : vector<16x256xf32> to vector<16x16xf32>
      %c80 = arith.constant 80 : index
      %c0_66 = arith.constant 0 : index
      %101 = vector.load %arg15[%c80, %c0_66] : memref<256x16xf32, #tpu.memory_space<vmem>>, vector<16x16xf32>
      tpu.vector_store %arg15[%c80, %c0_66], %100 {strides = array<i32>} : memref<256x16xf32, #tpu.memory_space<vmem>>, vector<16x16xf32>,
      %102 = vector.extract_strided_slice %89 {offsets = [0, 96], sizes = [16, 16], strides = [1, 1]} : vector<16x256xf32> to vector<16x16xf32>
      %c96 = arith.constant 96 : index
      %c0_67 = arith.constant 0 : index
      %103 = vector.load %arg15[%c96, %c0_67] : memref<256x16xf32, #tpu.memory_space<vmem>>, vector<16x16xf32>
      tpu.vector_store %arg15[%c96, %c0_67], %102 {strides = array<i32>} : memref<256x16xf32, #tpu.memory_space<vmem>>, vector<16x16xf32>,
      %104 = vector.extract_strided_slice %89 {offsets = [0, 112], sizes = [16, 16], strides = [1, 1]} : vector<16x256xf32> to vector<16x16xf32>
      %c112 = arith.constant 112 : index
      %c0_68 = arith.constant 0 : index
      %105 = vector.load %arg15[%c112, %c0_68] : memref<256x16xf32, #tpu.memory_space<vmem>>, vector<16x16xf32>
      tpu.vector_store %arg15[%c112, %c0_68], %104 {strides = array<i32>} : memref<256x16xf32, #tpu.memory_space<vmem>>, vector<16x16xf32>,
      %106 = vector.extract_strided_slice %89 {offsets = [0, 128], sizes = [16, 16], strides = [1, 1]} : vector<16x256xf32> to vector<16x16xf32>
      %c128 = arith.constant 128 : index
      %c0_69 = arith.constant 0 : index
      %107 = vector.load %arg15[%c128, %c0_69] : memref<256x16xf32, #tpu.memory_space<vmem>>, vector<16x16xf32>
      tpu.vector_store %arg15[%c128, %c0_69], %106 {strides = array<i32>} : memref<256x16xf32, #tpu.memory_space<vmem>>, vector<16x16xf32>,
      %108 = vector.extract_strided_slice %89 {offsets = [0, 144], sizes = [16, 16], strides = [1, 1]} : vector<16x256xf32> to vector<16x16xf32>
      %c144 = arith.constant 144 : index
      %c0_70 = arith.constant 0 : index
      %109 = vector.load %arg15[%c144, %c0_70] : memref<256x16xf32, #tpu.memory_space<vmem>>, vector<16x16xf32>
      tpu.vector_store %arg15[%c144, %c0_70], %108 {strides = array<i32>} : memref<256x16xf32, #tpu.memory_space<vmem>>, vector<16x16xf32>,
      %110 = vector.extract_strided_slice %89 {offsets = [0, 160], sizes = [16, 16], strides = [1, 1]} : vector<16x256xf32> to vector<16x16xf32>
      %c160 = arith.constant 160 : index
      %c0_71 = arith.constant 0 : index
      %111 = vector.load %arg15[%c160, %c0_71] : memref<256x16xf32, #tpu.memory_space<vmem>>, vector<16x16xf32>
      tpu.vector_store %arg15[%c160, %c0_71], %110 {strides = array<i32>} : memref<256x16xf32, #tpu.memory_space<vmem>>, vector<16x16xf32>,
      %112 = vector.extract_strided_slice %89 {offsets = [0, 176], sizes = [16, 16], strides = [1, 1]} : vector<16x256xf32> to vector<16x16xf32>
      %c176 = arith.constant 176 : index
      %c0_72 = arith.constant 0 : index
      %113 = vector.load %arg15[%c176, %c0_72] : memref<256x16xf32, #tpu.memory_space<vmem>>, vector<16x16xf32>
      tpu.vector_store %arg15[%c176, %c0_72], %112 {strides = array<i32>} : memref<256x16xf32, #tpu.memory_space<vmem>>, vector<16x16xf32>,
      %114 = vector.extract_strided_slice %89 {offsets = [0, 192], sizes = [16, 16], strides = [1, 1]} : vector<16x256xf32> to vector<16x16xf32>
      %c192 = arith.constant 192 : index
      %c0_73 = arith.constant 0 : index
      %115 = vector.load %arg15[%c192, %c0_73] : memref<256x16xf32, #tpu.memory_space<vmem>>, vector<16x16xf32>
      tpu.vector_store %arg15[%c192, %c0_73], %114 {strides = array<i32>} : memref<256x16xf32, #tpu.memory_space<vmem>>, vector<16x16xf32>,
      %116 = vector.extract_strided_slice %89 {offsets = [0, 208], sizes = [16, 16], strides = [1, 1]} : vector<16x256xf32> to vector<16x16xf32>
      %c208 = arith.constant 208 : index
      %c0_74 = arith.constant 0 : index
      %117 = vector.load %arg15[%c208, %c0_74] : memref<256x16xf32, #tpu.memory_space<vmem>>, vector<16x16xf32>
      tpu.vector_store %arg15[%c208, %c0_74], %116 {strides = array<i32>} : memref<256x16xf32, #tpu.memory_space<vmem>>, vector<16x16xf32>,
      %118 = vector.extract_strided_slice %89 {offsets = [0, 224], sizes = [16, 16], strides = [1, 1]} : vector<16x256xf32> to vector<16x16xf32>
      %c224 = arith.constant 224 : index
      %c0_75 = arith.constant 0 : index
      %119 = vector.load %arg15[%c224, %c0_75] : memref<256x16xf32, #tpu.memory_space<vmem>>, vector<16x16xf32>
      tpu.vector_store %arg15[%c224, %c0_75], %118 {strides = array<i32>} : memref<256x16xf32, #tpu.memory_space<vmem>>, vector<16x16xf32>,
      %120 = vector.extract_strided_slice %89 {offsets = [0, 240], sizes = [16, 16], strides = [1, 1]} : vector<16x256xf32> to vector<16x16xf32>
      %c240 = arith.constant 240 : index
      %c0_76 = arith.constant 0 : index
      %121 = vector.load %arg15[%c240, %c0_76] : memref<256x16xf32, #tpu.memory_space<vmem>>, vector<16x16xf32>
      tpu.vector_store %arg15[%c240, %c0_76], %120 {strides = array<i32>} : memref<256x16xf32, #tpu.memory_space<vmem>>, vector<16x16xf32>,
      %cst_77 = arith.constant 0.000000e+00 : f32
      %122 = vector.broadcast %cst_77 : f32 to vector<16x128xf32>
      %c0_78 = arith.constant 0 : index
      %c0_79 = arith.constant 0 : index
      %123 = tpu.strided_load %arg15[%c0_78, %c0_79] {strides = array<i32: 16, 1>} : memref<256x16xf32, #tpu.memory_space<vmem>>, vector<16x16xf32>
      %124 = arith.truncf %123 : vector<16x16xf32> to vector<16x16xbf16>
      %c0_80 = arith.constant 0 : index
      %c0_81 = arith.constant 0 : index
      %125 = vector.load %arg16[%c0_80, %c0_81] : memref<256x128xbf16, #tpu.memory_space<vmem>>, vector<16x128xbf16>
      %cst_82 = arith.constant dense<0.000000e+00> : vector<16x128xf32>
      %126 = tpu.matmul %124, %125, %cst_82 {dimension_numbers = #tpu.dot_dimension_numbers<[1], [0], [0], [1], [0, 0, 1, 1], [], []>} : vector<16x16xbf16>, vector<16x128xbf16>, vector<16x128xf32> -> vector<16x128xf32>
      %127 = arith.addf %122, %126 : vector<16x128xf32>
      %c1_83 = arith.constant 1 : index
      %c0_84 = arith.constant 0 : index
      %128 = tpu.strided_load %arg15[%c1_83, %c0_84] {strides = array<i32: 16, 1>} : memref<256x16xf32, #tpu.memory_space<vmem>>, vector<16x16xf32>
      %129 = arith.truncf %128 : vector<16x16xf32> to vector<16x16xbf16>
      %c16_85 = arith.constant 16 : index
      %c0_86 = arith.constant 0 : index
      %130 = vector.load %arg16[%c16_85, %c0_86] : memref<256x128xbf16, #tpu.memory_space<vmem>>, vector<16x128xbf16>
      %cst_87 = arith.constant dense<0.000000e+00> : vector<16x128xf32>
      %131 = tpu.matmul %129, %130, %cst_87 {dimension_numbers = #tpu.dot_dimension_numbers<[1], [0], [0], [1], [0, 0, 1, 1], [], []>} : vector<16x16xbf16>, vector<16x128xbf16>, vector<16x128xf32> -> vector<16x128xf32>
      %132 = arith.addf %127, %131 : vector<16x128xf32>
      %c2 = arith.constant 2 : index
      %c0_88 = arith.constant 0 : index
      %133 = tpu.strided_load %arg15[%c2, %c0_88] {strides = array<i32: 16, 1>} : memref<256x16xf32, #tpu.memory_space<vmem>>, vector<16x16xf32>
      %134 = arith.truncf %133 : vector<16x16xf32> to vector<16x16xbf16>
      %c32_89 = arith.constant 32 : index
      %c0_90 = arith.constant 0 : index
      %135 = vector.load %arg16[%c32_89, %c0_90] : memref<256x128xbf16, #tpu.memory_space<vmem>>, vector<16x128xbf16>
      %cst_91 = arith.constant dense<0.000000e+00> : vector<16x128xf32>
      %136 = tpu.matmul %134, %135, %cst_91 {dimension_numbers = #tpu.dot_dimension_numbers<[1], [0], [0], [1], [0, 0, 1, 1], [], []>} : vector<16x16xbf16>, vector<16x128xbf16>, vector<16x128xf32> -> vector<16x128xf32>
      %137 = arith.addf %132, %136 : vector<16x128xf32>
      %c3 = arith.constant 3 : index
      %c0_92 = arith.constant 0 : index
      %138 = tpu.strided_load %arg15[%c3, %c0_92] {strides = array<i32: 16, 1>} : memref<256x16xf32, #tpu.memory_space<vmem>>, vector<16x16xf32>
      %139 = arith.truncf %138 : vector<16x16xf32> to vector<16x16xbf16>
      %c48_93 = arith.constant 48 : index
      %c0_94 = arith.constant 0 : index
      %140 = vector.load %arg16[%c48_93, %c0_94] : memref<256x128xbf16, #tpu.memory_space<vmem>>, vector<16x128xbf16>
      %cst_95 = arith.constant dense<0.000000e+00> : vector<16x128xf32>
      %141 = tpu.matmul %139, %140, %cst_95 {dimension_numbers = #tpu.dot_dimension_numbers<[1], [0], [0], [1], [0, 0, 1, 1], [], []>} : vector<16x16xbf16>, vector<16x128xbf16>, vector<16x128xf32> -> vector<16x128xf32>
      %142 = arith.addf %137, %141 : vector<16x128xf32>
      %c4 = arith.constant 4 : index
      %c0_96 = arith.constant 0 : index
      %143 = tpu.strided_load %arg15[%c4, %c0_96] {strides = array<i32: 16, 1>} : memref<256x16xf32, #tpu.memory_space<vmem>>, vector<16x16xf32>
      %144 = arith.truncf %143 : vector<16x16xf32> to vector<16x16xbf16>
      %c64_97 = arith.constant 64 : index
      %c0_98 = arith.constant 0 : index
      %145 = vector.load %arg16[%c64_97, %c0_98] : memref<256x128xbf16, #tpu.memory_space<vmem>>, vector<16x128xbf16>
      %cst_99 = arith.constant dense<0.000000e+00> : vector<16x128xf32>
      %146 = tpu.matmul %144, %145, %cst_99 {dimension_numbers = #tpu.dot_dimension_numbers<[1], [0], [0], [1], [0, 0, 1, 1], [], []>} : vector<16x16xbf16>, vector<16x128xbf16>, vector<16x128xf32> -> vector<16x128xf32>
      %147 = arith.addf %142, %146 : vector<16x128xf32>
      %c5 = arith.constant 5 : index
      %c0_100 = arith.constant 0 : index
      %148 = tpu.strided_load %arg15[%c5, %c0_100] {strides = array<i32: 16, 1>} : memref<256x16xf32, #tpu.memory_space<vmem>>, vector<16x16xf32>
      %149 = arith.truncf %148 : vector<16x16xf32> to vector<16x16xbf16>
      %c80_101 = arith.constant 80 : index
      %c0_102 = arith.constant 0 : index
      %150 = vector.load %arg16[%c80_101, %c0_102] : memref<256x128xbf16, #tpu.memory_space<vmem>>, vector<16x128xbf16>
      %cst_103 = arith.constant dense<0.000000e+00> : vector<16x128xf32>
      %151 = tpu.matmul %149, %150, %cst_103 {dimension_numbers = #tpu.dot_dimension_numbers<[1], [0], [0], [1], [0, 0, 1, 1], [], []>} : vector<16x16xbf16>, vector<16x128xbf16>, vector<16x128xf32> -> vector<16x128xf32>
      %152 = arith.addf %147, %151 : vector<16x128xf32>
      %c6 = arith.constant 6 : index
      %c0_104 = arith.constant 0 : index
      %153 = tpu.strided_load %arg15[%c6, %c0_104] {strides = array<i32: 16, 1>} : memref<256x16xf32, #tpu.memory_space<vmem>>, vector<16x16xf32>
      %154 = arith.truncf %153 : vector<16x16xf32> to vector<16x16xbf16>
      %c96_105 = arith.constant 96 : index
      %c0_106 = arith.constant 0 : index
      %155 = vector.load %arg16[%c96_105, %c0_106] : memref<256x128xbf16, #tpu.memory_space<vmem>>, vector<16x128xbf16>
      %cst_107 = arith.constant dense<0.000000e+00> : vector<16x128xf32>
      %156 = tpu.matmul %154, %155, %cst_107 {dimension_numbers = #tpu.dot_dimension_numbers<[1], [0], [0], [1], [0, 0, 1, 1], [], []>} : vector<16x16xbf16>, vector<16x128xbf16>, vector<16x128xf32> -> vector<16x128xf32>
      %157 = arith.addf %152, %156 : vector<16x128xf32>
      %c7 = arith.constant 7 : index
      %c0_108 = arith.constant 0 : index
      %158 = tpu.strided_load %arg15[%c7, %c0_108] {strides = array<i32: 16, 1>} : memref<256x16xf32, #tpu.memory_space<vmem>>, vector<16x16xf32>
      %159 = arith.truncf %158 : vector<16x16xf32> to vector<16x16xbf16>
      %c112_109 = arith.constant 112 : index
      %c0_110 = arith.constant 0 : index
      %160 = vector.load %arg16[%c112_109, %c0_110] : memref<256x128xbf16, #tpu.memory_space<vmem>>, vector<16x128xbf16>
      %cst_111 = arith.constant dense<0.000000e+00> : vector<16x128xf32>
      %161 = tpu.matmul %159, %160, %cst_111 {dimension_numbers = #tpu.dot_dimension_numbers<[1], [0], [0], [1], [0, 0, 1, 1], [], []>} : vector<16x16xbf16>, vector<16x128xbf16>, vector<16x128xf32> -> vector<16x128xf32>
      %162 = arith.addf %157, %161 : vector<16x128xf32>
      %c8 = arith.constant 8 : index
      %c0_112 = arith.constant 0 : index
      %163 = tpu.strided_load %arg15[%c8, %c0_112] {strides = array<i32: 16, 1>} : memref<256x16xf32, #tpu.memory_space<vmem>>, vector<16x16xf32>
      %164 = arith.truncf %163 : vector<16x16xf32> to vector<16x16xbf16>
      %c128_113 = arith.constant 128 : index
      %c0_114 = arith.constant 0 : index
      %165 = vector.load %arg16[%c128_113, %c0_114] : memref<256x128xbf16, #tpu.memory_space<vmem>>, vector<16x128xbf16>
      %cst_115 = arith.constant dense<0.000000e+00> : vector<16x128xf32>
      %166 = tpu.matmul %164, %165, %cst_115 {dimension_numbers = #tpu.dot_dimension_numbers<[1], [0], [0], [1], [0, 0, 1, 1], [], []>} : vector<16x16xbf16>, vector<16x128xbf16>, vector<16x128xf32> -> vector<16x128xf32>
      %167 = arith.addf %162, %166 : vector<16x128xf32>
      %c9 = arith.constant 9 : index
      %c0_116 = arith.constant 0 : index
      %168 = tpu.strided_load %arg15[%c9, %c0_116] {strides = array<i32: 16, 1>} : memref<256x16xf32, #tpu.memory_space<vmem>>, vector<16x16xf32>
      %169 = arith.truncf %168 : vector<16x16xf32> to vector<16x16xbf16>
      %c144_117 = arith.constant 144 : index
      %c0_118 = arith.constant 0 : index
      %170 = vector.load %arg16[%c144_117, %c0_118] : memref<256x128xbf16, #tpu.memory_space<vmem>>, vector<16x128xbf16>
      %cst_119 = arith.constant dense<0.000000e+00> : vector<16x128xf32>
      %171 = tpu.matmul %169, %170, %cst_119 {dimension_numbers = #tpu.dot_dimension_numbers<[1], [0], [0], [1], [0, 0, 1, 1], [], []>} : vector<16x16xbf16>, vector<16x128xbf16>, vector<16x128xf32> -> vector<16x128xf32>
      %172 = arith.addf %167, %171 : vector<16x128xf32>
      %c10 = arith.constant 10 : index
      %c0_120 = arith.constant 0 : index
      %173 = tpu.strided_load %arg15[%c10, %c0_120] {strides = array<i32: 16, 1>} : memref<256x16xf32, #tpu.memory_space<vmem>>, vector<16x16xf32>
      %174 = arith.truncf %173 : vector<16x16xf32> to vector<16x16xbf16>
      %c160_121 = arith.constant 160 : index
      %c0_122 = arith.constant 0 : index
      %175 = vector.load %arg16[%c160_121, %c0_122] : memref<256x128xbf16, #tpu.memory_space<vmem>>, vector<16x128xbf16>
      %cst_123 = arith.constant dense<0.000000e+00> : vector<16x128xf32>
      %176 = tpu.matmul %174, %175, %cst_123 {dimension_numbers = #tpu.dot_dimension_numbers<[1], [0], [0], [1], [0, 0, 1, 1], [], []>} : vector<16x16xbf16>, vector<16x128xbf16>, vector<16x128xf32> -> vector<16x128xf32>
      %177 = arith.addf %172, %176 : vector<16x128xf32>
      %c11 = arith.constant 11 : index
      %c0_124 = arith.constant 0 : index
      %178 = tpu.strided_load %arg15[%c11, %c0_124] {strides = array<i32: 16, 1>} : memref<256x16xf32, #tpu.memory_space<vmem>>, vector<16x16xf32>
      %179 = arith.truncf %178 : vector<16x16xf32> to vector<16x16xbf16>
      %c176_125 = arith.constant 176 : index
      %c0_126 = arith.constant 0 : index
      %180 = vector.load %arg16[%c176_125, %c0_126] : memref<256x128xbf16, #tpu.memory_space<vmem>>, vector<16x128xbf16>
      %cst_127 = arith.constant dense<0.000000e+00> : vector<16x128xf32>
      %181 = tpu.matmul %179, %180, %cst_127 {dimension_numbers = #tpu.dot_dimension_numbers<[1], [0], [0], [1], [0, 0, 1, 1], [], []>} : vector<16x16xbf16>, vector<16x128xbf16>, vector<16x128xf32> -> vector<16x128xf32>
      %182 = arith.addf %177, %181 : vector<16x128xf32>
      %c12 = arith.constant 12 : index
      %c0_128 = arith.constant 0 : index
      %183 = tpu.strided_load %arg15[%c12, %c0_128] {strides = array<i32: 16, 1>} : memref<256x16xf32, #tpu.memory_space<vmem>>, vector<16x16xf32>
      %184 = arith.truncf %183 : vector<16x16xf32> to vector<16x16xbf16>
      %c192_129 = arith.constant 192 : index
      %c0_130 = arith.constant 0 : index
      %185 = vector.load %arg16[%c192_129, %c0_130] : memref<256x128xbf16, #tpu.memory_space<vmem>>, vector<16x128xbf16>
      %cst_131 = arith.constant dense<0.000000e+00> : vector<16x128xf32>
      %186 = tpu.matmul %184, %185, %cst_131 {dimension_numbers = #tpu.dot_dimension_numbers<[1], [0], [0], [1], [0, 0, 1, 1], [], []>} : vector<16x16xbf16>, vector<16x128xbf16>, vector<16x128xf32> -> vector<16x128xf32>
      %187 = arith.addf %182, %186 : vector<16x128xf32>
      %c13 = arith.constant 13 : index
      %c0_132 = arith.constant 0 : index
      %188 = tpu.strided_load %arg15[%c13, %c0_132] {strides = array<i32: 16, 1>} : memref<256x16xf32, #tpu.memory_space<vmem>>, vector<16x16xf32>
      %189 = arith.truncf %188 : vector<16x16xf32> to vector<16x16xbf16>
      %c208_133 = arith.constant 208 : index
      %c0_134 = arith.constant 0 : index
      %190 = vector.load %arg16[%c208_133, %c0_134] : memref<256x128xbf16, #tpu.memory_space<vmem>>, vector<16x128xbf16>
      %cst_135 = arith.constant dense<0.000000e+00> : vector<16x128xf32>
      %191 = tpu.matmul %189, %190, %cst_135 {dimension_numbers = #tpu.dot_dimension_numbers<[1], [0], [0], [1], [0, 0, 1, 1], [], []>} : vector<16x16xbf16>, vector<16x128xbf16>, vector<16x128xf32> -> vector<16x128xf32>
      %192 = arith.addf %187, %191 : vector<16x128xf32>
      %c14 = arith.constant 14 : index
      %c0_136 = arith.constant 0 : index
      %193 = tpu.strided_load %arg15[%c14, %c0_136] {strides = array<i32: 16, 1>} : memref<256x16xf32, #tpu.memory_space<vmem>>, vector<16x16xf32>
      %194 = arith.truncf %193 : vector<16x16xf32> to vector<16x16xbf16>
      %c224_137 = arith.constant 224 : index
      %c0_138 = arith.constant 0 : index
      %195 = vector.load %arg16[%c224_137, %c0_138] : memref<256x128xbf16, #tpu.memory_space<vmem>>, vector<16x128xbf16>
      %cst_139 = arith.constant dense<0.000000e+00> : vector<16x128xf32>
      %196 = tpu.matmul %194, %195, %cst_139 {dimension_numbers = #tpu.dot_dimension_numbers<[1], [0], [0], [1], [0, 0, 1, 1], [], []>} : vector<16x16xbf16>, vector<16x128xbf16>, vector<16x128xf32> -> vector<16x128xf32>
      %197 = arith.addf %192, %196 : vector<16x128xf32>
      %c15 = arith.constant 15 : index
      %c0_140 = arith.constant 0 : index
      %198 = tpu.strided_load %arg15[%c15, %c0_140] {strides = array<i32: 16, 1>} : memref<256x16xf32, #tpu.memory_space<vmem>>, vector<16x16xf32>
      %199 = arith.truncf %198 : vector<16x16xf32> to vector<16x16xbf16>
      %c240_141 = arith.constant 240 : index
      %c0_142 = arith.constant 0 : index
      %200 = vector.load %arg16[%c240_141, %c0_142] : memref<256x128xbf16, #tpu.memory_space<vmem>>, vector<16x128xbf16>
      %cst_143 = arith.constant dense<0.000000e+00> : vector<16x128xf32>
      %201 = tpu.matmul %199, %200, %cst_143 {dimension_numbers = #tpu.dot_dimension_numbers<[1], [0], [0], [1], [0, 0, 1, 1], [], []>} : vector<16x16xbf16>, vector<16x128xbf16>, vector<16x128xf32> -> vector<16x128xf32>
      %202 = arith.addf %197, %201 : vector<16x128xf32>
      %c0_144 = arith.constant 0 : index
      %c0_145 = arith.constant 0 : index
      %203 = vector.load %arg9[%c0_144, %c0_145] : memref<1x128xf32, #tpu.memory_space<vmem>>, vector<1x128xf32>
      %204 = vector.broadcast %203 : vector<1x128xf32> to vector<16x128xf32>
      %205 = arith.addf %202, %204 : vector<16x128xf32>
      %c0_146 = arith.constant 0 : index
      %c0_147 = arith.constant 0 : index
      %206 = vector.load %arg10[%c0_146, %c0_147] : memref<16x128xf32, #tpu.memory_space<vmem>>, vector<16x128xf32>
      tpu.vector_store %arg10[%c0_146, %c0_147], %205 {strides = array<i32>} : memref<16x128xf32, #tpu.memory_space<vmem>>, vector<16x128xf32>,
    } else {
    }
    return
  }
  func.func @transform_0(%arg0: i32, %arg1: i32) -> (i32, i32) {
    %c0_i32 = arith.constant 0 : i32
    %c0_i32_0 = arith.constant 0 : i32
    return %c0_i32, %arg0 : i32, i32
  }
  func.func @transform_1(%arg0: i32, %arg1: i32) -> (i32, i32, i32) {
    %c0_i32 = arith.constant 0 : i32
    %c0_i32_0 = arith.constant 0 : i32
    %c0_i32_1 = arith.constant 0 : i32
    %c0_i32_2 = arith.constant 0 : i32
    return %c0_i32, %c0_i32_0, %c0_i32_1 : i32, i32, i32
  }
  func.func @transform_2(%arg0: i32, %arg1: i32) -> (i32, i32, i32) {
    %c0_i32 = arith.constant 0 : i32
    %c0_i32_0 = arith.constant 0 : i32
    %c0_i32_1 = arith.constant 0 : i32
    %c0_i32_2 = arith.constant 0 : i32
    return %c0_i32, %c0_i32_0, %c0_i32_1 : i32, i32, i32
  }
  func.func @transform_3(%arg0: i32, %arg1: i32) -> (i32, i32, i32) {
    %c0_i32 = arith.constant 0 : i32
    %c0_i32_0 = arith.constant 0 : i32
    %c0_i32_1 = arith.constant 0 : i32
    %c0_i32_2 = arith.constant 0 : i32
    return %c0_i32, %c0_i32_0, %c0_i32_1 : i32, i32, i32
  }
  func.func @transform_4(%arg0: i32, %arg1: i32) -> (i32, i32, i32) {
    %c0_i32 = arith.constant 0 : i32
    %c0_i32_0 = arith.constant 0 : i32
    %c0_i32_1 = arith.constant 0 : i32
    return %arg1, %c0_i32, %c0_i32_0 : i32, i32, i32
  }
  func.func @transform_5(%arg0: i32, %arg1: i32) -> i32 {
    %c0_i32 = arith.constant 0 : i32
    %c0_i32_0 = arith.constant 0 : i32
    return %c0_i32 : i32
  }
  func.func @transform_7(%arg0: i32, %arg1: i32) -> (i32, i32) {
    %c0_i32 = arith.constant 0 : i32
    %c0_i32_0 = arith.constant 0 : i32
    %c0_i32_1 = arith.constant 0 : i32
    return %c0_i32, %c0_i32_0 : i32, i32
  }
  func.func @transform_8(%arg0: i32, %arg1: i32) -> (i32, i32) {
    %c0_i32 = arith.constant 0 : i32
    %c0_i32_0 = arith.constant 0 : i32
    return %arg0, %c0_i32 : i32, i32
  }
}

</mosaic_0001>

<bundles_post_ra>
// kernel: tile.23
= control target key start
LH: loop header
LB: loop body
LE: loop exit
PB: predicated region body
PF: predicated region fallthrough
CT: control target
= control target key end

     0   :  { %vm485_vm0 = vcmask 1043458   ;;  %s525_s6 = smov 3  ;;  %vm490_vm1 = vcmask 1045508   ;;  %vm495_vm2 = vcmask 1047558   ;;  %s528_s9 = smov 12  ;;  %vm4_vm3 = vcmask 1047556   ;;  %s12712_s0 = inlined_call_operand.vmem [shape: f32[8,16,16,16], index: 0, kind: input, shape index: {}]   ;;  %s12713_s1 = inlined_call_operand.vmem [shape: f32[8,16,256], index: 1, kind: output, shape index: {}]  }
   0x1   :  { %v5822_v0 = vld [vmem:[%s12712_s0 + $0x207] ss:$16 sm:%s525_s6]   ;;  %s533_s10 = smov 48  ;;  %s538_s15 = smov 192  ;;  %vm6_vm4 = vcmask 130048   ;;  %vm499_vm5 = vcmask 1048448  }
   0x2   :  { %v5823_v1 = vld [vmem:[%s12712_s0 + $0x207] ss:$16 sm:%s528_s9]   ;;  %s480_s16 = smov 3  ;;  %s483_s21 = smov 12  ;;  %vm1234_vm6 = vcmask 917248   ;;  %vm1969_vm7 = vcmask 786048  }
   0x3   :  { %v5824_v2 = vld [vmem:[%s12712_s0 + $0x207] ss:$16 sm:%s533_s10]   ;;  %v531_v3 = vsel %vm485_vm0, %v5823_v1, %v5822_v0  ;;  %s488_s22 = smov 48  ;;  %s493_s27 = smov 192  ;;  %vm2704_vm8 = vcmask 654848   ;;  %vm3439_vm9 = vcmask 523648  }
   0x4   :  { %v5825_v4 = vld [vmem:[%s12712_s0 + $0x207] ss:$16 sm:%s538_s15]   ;;  %v536_v6 = vsel %vm490_vm1, %v5824_v2, %v531_v3  ;;  %s548_s28 = smov 3  ;;  %s551_s4 = smov 12  ;;  %vm4174_vm10 = vcmask 392448   ;;  %vm4909_vm11 = vcmask 261248  }
   0x5   :  { %v5813_v5 = vld [vmem:[%s12712_s0 + $0x7] ss:$16 sm:%s480_s16]   ;;  %v541_v9 = vsel %vm495_vm2, %v5825_v4, %v536_v6  ;;  %s556_s5 = smov 48  ;;  %s6933_s6 = smov 112  }
   0x6   :  { %v5814_v7 = vld [vmem:[%s12712_s0 + $0x7] ss:$16 sm:%s483_s21]   ;;  %542 = vrot.lane.b32.xlu1 %v541_v9, %s6933_s6  ;;  %s561_s9 = smov 192  ;;  %s502_s10 = smov 3 }
   0x7   :  { %v5815_v8 = vld [vmem:[%s12712_s0 + $0x7] ss:$16 sm:%s488_s22]   ;;  %v486_v10 = vsel %vm485_vm0, %v5814_v7, %v5813_v5  ;;  %s505_s15 = smov 12  ;;  %s510_s16 = smov 48 }
   0x8   :  { %v5816_v11 = vld [vmem:[%s12712_s0 + $0x7] ss:$16 sm:%s493_s27]   ;;  %v491_v13 = vsel %vm490_vm1, %v5815_v8, %v486_v10  ;;  %s515_s19 = smov 192  ;;  %s594_s20 = smov 3 }
   0x9   :  { %v5827_v12 = vld [vmem:[%s12712_s0 + $0x307] ss:$16 sm:%s548_s28]   ;;  %v496_v15 = vsel %vm495_vm2, %v5816_v11, %v491_v13  ;;  %s597_s25 = smov 12  ;;  %s602_s26 = smov 48 }
   0xa   :  { %v5828_v14 = vld [vmem:[%s12712_s0 + $0x307] ss:$16 sm:%s551_s4]   ;;  %497 = vrot.lane.b32.xlu0 %v496_v15, %s6933_s6  ;;  %s607_s29 = smov 192  ;;  %s571_s30 = smov 3 }
   0xb   :  { %v554_v16 = vsel %vm485_vm0, %v5828_v14, %v5827_v12  ;;  %v5829_v17 = vld [vmem:[%s12712_s0 + $0x307] ss:$16 sm:%s556_s5]   ;;  %s574_s7 = smov 12  ;;  %s579_s8 = smov 48 }
   0xc   :  { %v5830_v18 = vld [vmem:[%s12712_s0 + $0x307] ss:$16 sm:%s561_s9]   ;;  %v559_v19 = vsel %vm490_vm1, %v5829_v17, %v554_v16  ;;  %s584_s13 = smov 192  ;;  %s643_s17 = smov 12 }
   0xd   :  { %v5817_v20 = vld [vmem:[%s12712_s0 + $0x107] ss:$16 sm:%s502_s10]   ;;  %v564_v21 = vsel %vm495_vm2, %v5830_v18, %v559_v19  ;;  %s648_s22 = smov 48  ;;  %s653_s23 = smov 192 }
   0xe   :  { %v5818_v22 = vld [vmem:[%s12712_s0 + $0x107] ss:$16 sm:%s505_s15]   ;;  %565 = vrot.lane.b32.xlu1 %v564_v21, %s6933_s6  ;;  %s620_s2 = smov 12  ;;  %s625_s3 = smov 48 }
   0xf   :  { %v5819_v23 = vld [vmem:[%s12712_s0 + $0x107] ss:$16 sm:%s510_s16]   ;;  %v508_v24 = vsel %vm485_vm0, %v5818_v22, %v5817_v20  ;;  %s640_s16 = smov 3  ;;  %s630_s9 = smov 192 }
  0x10   :  { %v5820_v25 = vld [vmem:[%s12712_s0 + $0x107] ss:$16 sm:%s515_s19]   ;;  %v513_v26 = vsel %vm490_vm1, %v5819_v23, %v508_v24  ;;  %s686_s12 = smov 3  ;;  %s694_s18 = smov 48 }
  0x11   :  { %v5837_v27 = vld [vmem:[%s12712_s0 + $0x507] ss:$16 sm:%s594_s20]   ;;  %v518_v29 = vsel %vm495_vm2, %v5820_v25, %v513_v26  ;;  %s699_s19 = smov 192  ;;  %v5857_v55 = vld [vmem:[%s12712_s0 + $0x10f] ss:$16 sm:%s686_s12]   ;;  %s666_s27 = smov 12 }
  0x12   :  { %v5838_v28 = vld [vmem:[%s12712_s0 + $0x507] ss:$16 sm:%s597_s25]   ;;  %519 = vrot.lane.b32.xlu0 %v518_v29, %s6933_s6  ;;  %s671_s28 = smov 48  ;;  %s676_s4 = smov 192 }
  0x13   :  { %v600_v30 = vsel %vm485_vm0, %v5838_v28, %v5837_v27  ;;  %v5839_v31 = vld [vmem:[%s12712_s0 + $0x507] ss:$16 sm:%s602_s26]   ;;  %s617_s26 = smov 3  ;;  %v5859_v59 = vld [vmem:[%s12712_s0 + $0x10f] ss:$16 sm:%s694_s18]   ;;  %s740_s14 = smov 48 }
  0x14   :  { %v5840_v32 = vld [vmem:[%s12712_s0 + $0x507] ss:$16 sm:%s607_s29]   ;;  %v605_v33 = vsel %vm490_vm1, %v5839_v31, %v600_v30  ;;  %v5860_v60 = vld [vmem:[%s12712_s0 + $0x10f] ss:$16 sm:%s699_s19]   ;;  %s745_s15 = smov 192  ;;  %s709_s18 = smov 3 }
  0x15   :  { %v5832_v34 = vld [vmem:[%s12712_s0 + $0x407] ss:$16 sm:%s571_s30]   ;;  %v610_v35 = vsel %vm495_vm2, %v5840_v32, %v605_v33  ;;  %v5853_v0 = vld [vmem:[%s12712_s0 + $0xf] ss:$16 sm:%s666_s27]   ;;  %s717_s24 = smov 48  ;;  %s722_s29 = smov 192 }
  0x16   :  { %v5833_v36 = vld [vmem:[%s12712_s0 + $0x407] ss:$16 sm:%s574_s7]   ;;  %611 = vrot.lane.b32.xlu1 %v610_v35, %s6933_s6  ;;  %s786_s10 = smov 48  ;;  %s791_s11 = smov 192 }
  0x17   :  { %v5834_v37 = vld [vmem:[%s12712_s0 + $0x407] ss:$16 sm:%s579_s8]   ;;  %v577_v38 = vsel %vm485_vm0, %v5833_v36, %v5832_v34  ;;  %s732_s8 = smov 3  ;;  %v5854_v1 = vld [vmem:[%s12712_s0 + $0xf] ss:$16 sm:%s671_s28]   ;;  %s758_s19 = smov 12 }
  0x18   :  { %v5835_v39 = vld [vmem:[%s12712_s0 + $0x407] ss:$16 sm:%s584_s13]   ;;  %v582_v40 = vsel %vm490_vm1, %v5834_v37, %v577_v38  ;;  %s689_s13 = smov 12  ;;  %v5855_v3 = vld [vmem:[%s12712_s0 + $0xf] ss:$16 sm:%s676_s4]   ;;  %s781_s4 = smov 12 }
  0x19   :  { %v5847_v41 = vld [vmem:[%s12712_s0 + $0x707] ss:$16 sm:%s640_s16]   ;;  %v587_v43 = vsel %vm495_vm2, %v5835_v39, %v582_v40  ;;  %v5858_v56 = vld [vmem:[%s12712_s0 + $0x10f] ss:$16 sm:%s689_s13]   ;;  %s763_s20 = smov 48  ;;  %s768_s25 = smov 192 }
  0x1a   :  { %v5848_v42 = vld [vmem:[%s12712_s0 + $0x707] ss:$16 sm:%s643_s17]   ;;  %588 = vrot.lane.b32.xlu0 %v587_v43, %s6933_s6  ;;  %v692_v58 = vsel %vm485_vm0, %v5858_v56, %v5857_v55  ;;  %s824_s28 = smov 3  ;;  %s832_s5 = smov 48 }
  0x1b   :  { %v646_v44 = vsel %vm485_vm0, %v5848_v42, %v5847_v41  ;;  %v5849_v45 = vld [vmem:[%s12712_s0 + $0x707] ss:$16 sm:%s648_s22]   ;;  %s663_s22 = smov 3  ;;  %v697_v61 = vsel %vm490_vm1, %v5859_v59, %v692_v58  ;;  %v5867_v5 = vld [vmem:[%s12712_s0 + $0x30f] ss:$16 sm:%s732_s8]   ;;  %s837_s7 = smov 192 }
  0x1c   :  { %v5850_v46 = vld [vmem:[%s12712_s0 + $0x707] ss:$16 sm:%s653_s23]   ;;  %v651_v47 = vsel %vm490_vm1, %v5849_v45, %v646_v44  ;;  %v5852_v62 = vld [vmem:[%s12712_s0 + $0xf] ss:$16 sm:%s663_s22]   ;;  %v702_v63 = vsel %vm495_vm2, %v5860_v60, %v697_v61  ;;  %s712_s23 = smov 12  ;;  %s809_s16 = smov 48 }
  0x1d   :  { %v5842_v48 = vld [vmem:[%s12712_s0 + $0x607] ss:$16 sm:%s617_s26]   ;;  %v656_v49 = vsel %vm495_vm2, %v5850_v46, %v651_v47  ;;  %v669_v2 = vsel %vm485_vm0, %v5853_v0, %v5852_v62  ;;  %v5869_v9 = vld [vmem:[%s12712_s0 + $0x30f] ss:$16 sm:%s740_s14]   ;;  %s755_s14 = smov 3  ;;  %s814_s21 = smov 192 }
  0x1e   :  { %v5843_v50 = vld [vmem:[%s12712_s0 + $0x607] ss:$16 sm:%s620_s2]   ;;  %657 = vrot.lane.b32.xlu1 %v656_v49, %s6933_s6  ;;  %v674_v4 = vsel %vm490_vm1, %v5854_v1, %v669_v2  ;;  %s878_s30 = smov 48  ;;  %s883_s2 = smov 192 }
  0x1f   :  { %v5844_v51 = vld [vmem:[%s12712_s0 + $0x607] ss:$16 sm:%s625_s3]   ;;  %v623_v52 = vsel %vm485_vm0, %v5843_v50, %v5842_v48  ;;  %v679_v7 = vsel %vm495_vm2, %v5855_v3, %v674_v4  ;;  %v5870_v10 = vld [vmem:[%s12712_s0 + $0x30f] ss:$16 sm:%s745_s15]   ;;  %s778_s3 = smov 3  ;;  %s804_s15 = smov 12 }
  0x20   :  { %v5845_v53 = vld [vmem:[%s12712_s0 + $0x607] ss:$16 sm:%s630_s9]   ;;  %v628_v54 = vsel %vm490_vm1, %v5844_v51, %v623_v52  ;;  %s735_s9 = smov 12  ;;  %v5862_v12 = vld [vmem:[%s12712_s0 + $0x20f] ss:$16 sm:%s709_s18]   ;;  %s855_s12 = smov 48 }
  0x21   :  { %v633_v57 = vsel %vm495_vm2, %v5845_v53, %v628_v54  ;;  %v5868_v6 = vld [vmem:[%s12712_s0 + $0x30f] ss:$16 sm:%s735_s9]   ;;  %v5899_v51 = vld [vmem:[%s12712_s0 + $0x187] ss:$16 sm:%s878_s30]   ;;  %s860_s17 = smov 192  ;;  %s924_s26 = smov 48 }
  0x22   :  { %634 = vrot.lane.b32.xlu0 %v633_v57, %s6933_s6  ;;  %703 = vrot.lane.b32.xlu1 %v702_v63, %s6933_s6  ;;  %v738_v8 = vsel %vm485_vm0, %v5868_v6, %v5867_v5  ;;  %v5863_v14 = vld [vmem:[%s12712_s0 + $0x20f] ss:$16 sm:%s712_s23]   ;;  %s929_s27 = smov 192  ;;  %s893_s30 = smov 3 }
  0x23   :  { %v743_v11 = vsel %vm490_vm1, %v5869_v9, %v738_v8  ;;  %v5864_v15 = vld [vmem:[%s12712_s0 + $0x20f] ss:$16 sm:%s717_s24]   ;;  %v715_v16 = vsel %vm485_vm0, %v5863_v14, %v5862_v12  ;;  %s870_s24 = smov 3  ;;  %v5900_v52 = vld [vmem:[%s12712_s0 + $0x187] ss:$16 sm:%s883_s2]   ;;  %s901_s8 = smov 48 }
  0x24   :  { %v748_v13 = vsel %vm495_vm2, %v5870_v10, %v743_v11  ;;  %v5865_v17 = vld [vmem:[%s12712_s0 + $0x20f] ss:$16 sm:%s722_s29]   ;;  %v720_v18 = vsel %vm490_vm1, %v5864_v15, %v715_v16  ;;  %s827_s29 = smov 12  ;;  %v5897_v47 = vld [vmem:[%s12712_s0 + $0x187] ss:$16 sm:%s870_s24]   ;;  %s906_s13 = smov 192 }
  0x25   :  { %v5877_v19 = vld [vmem:[%s12712_s0 + $0x50f] ss:$16 sm:%s778_s3]   ;;  %v725_v21 = vsel %vm495_vm2, %v5865_v17, %v720_v18  ;;  %v5894_v57 = vld [vmem:[%s12712_s0 + $0x87] ss:$16 sm:%s855_s12]   ;;  %s970_s22 = smov 48  ;;  %s975_s23 = smov 192 }
  0x26   :  { %680 = vrot.lane.b32.xlu0 %v679_v7, %s6933_s6  ;;  %749 = vrot.lane.b32.xlu1 %v748_v13, %s6933_s6  ;;  %v5878_v20 = vld [vmem:[%s12712_s0 + $0x50f] ss:$16 sm:%s781_s4]   ;;  %s942_s2 = smov 12  ;;  %s947_s3 = smov 48 }
  0x27   :  { %v784_v22 = vsel %vm485_vm0, %v5878_v20, %v5877_v19  ;;  %v5879_v23 = vld [vmem:[%s12712_s0 + $0x50f] ss:$16 sm:%s786_s10]   ;;  %s801_s10 = smov 3  ;;  %v5895_v59 = vld [vmem:[%s12712_s0 + $0x87] ss:$16 sm:%s860_s17]   ;;  %s965_s17 = smov 12 }
  0x28   :  { %v5880_v24 = vld [vmem:[%s12712_s0 + $0x50f] ss:$16 sm:%s791_s11]   ;;  %v789_v25 = vsel %vm490_vm1, %v5879_v23, %v784_v22  ;;  %s850_s11 = smov 12  ;;  %v5909_v1 = vld [vmem:[%s12712_s0 + $0x387] ss:$16 sm:%s924_s26]   ;;  %s939_s26 = smov 3 }
  0x29   :  { %v5872_v26 = vld [vmem:[%s12712_s0 + $0x40f] ss:$16 sm:%s755_s14]   ;;  %v794_v27 = vsel %vm495_vm2, %v5880_v24, %v789_v25  ;;  %v5893_v56 = vld [vmem:[%s12712_s0 + $0x87] ss:$16 sm:%s850_s11]   ;;  %s952_s9 = smov 192  ;;  %s1008_s12 = smov 3 }
  0x2a   :  { %726 = vrot.lane.b32.xlu0 %v725_v21, %s6933_s6  ;;  %v5873_v28 = vld [vmem:[%s12712_s0 + $0x40f] ss:$16 sm:%s758_s19]   ;;  %795 = vrot.lane.b32.xlu1 %v794_v27, %s6933_s6  ;;  %s1016_s18 = smov 48  ;;  %s1021_s19 = smov 192 }
  0x2b   :  { %v5874_v29 = vld [vmem:[%s12712_s0 + $0x40f] ss:$16 sm:%s763_s20]   ;;  %v761_v30 = vsel %vm485_vm0, %v5873_v28, %v5872_v26  ;;  %s916_s20 = smov 3  ;;  %v5910_v2 = vld [vmem:[%s12712_s0 + $0x387] ss:$16 sm:%s929_s27]   ;;  %s988_s27 = smov 12 }
  0x2c   :  { %v5875_v31 = vld [vmem:[%s12712_s0 + $0x40f] ss:$16 sm:%s768_s25]   ;;  %v766_v32 = vsel %vm490_vm1, %v5874_v29, %v761_v30  ;;  %s873_s25 = smov 12  ;;  %v5907_v61 = vld [vmem:[%s12712_s0 + $0x387] ss:$16 sm:%s916_s20]   ;;  %s998_s4 = smov 192 }
  0x2d   :  { %v5887_v33 = vld [vmem:[%s12712_s0 + $0x70f] ss:$16 sm:%s824_s28]   ;;  %v771_v35 = vsel %vm495_vm2, %v5875_v31, %v766_v32  ;;  %v5898_v48 = vld [vmem:[%s12712_s0 + $0x187] ss:$16 sm:%s873_s25]   ;;  %s993_s28 = smov 48  ;;  %s1062_s14 = smov 48 }
  0x2e   :  { %v5888_v34 = vld [vmem:[%s12712_s0 + $0x70f] ss:$16 sm:%s827_s29]   ;;  %772 = vrot.lane.b32.xlu0 %v771_v35, %s6933_s6  ;;  %v876_v50 = vsel %vm485_vm0, %v5898_v48, %v5897_v47  ;;  %s1039_s24 = smov 48  ;;  %s1044_s29 = smov 192 }
  0x2f   :  { %v830_v36 = vsel %vm485_vm0, %v5888_v34, %v5887_v33  ;;  %v5889_v37 = vld [vmem:[%s12712_s0 + $0x70f] ss:$16 sm:%s832_s5]   ;;  %s847_s5 = smov 3  ;;  %v881_v53 = vsel %vm490_vm1, %v5899_v51, %v876_v50  ;;  %v5902_v4 = vld [vmem:[%s12712_s0 + $0x287] ss:$16 sm:%s893_s30]   ;;  %s1113_s11 = smov 192 }
  0x30   :  { %v5890_v38 = vld [vmem:[%s12712_s0 + $0x70f] ss:$16 sm:%s837_s7]   ;;  %v835_v39 = vsel %vm490_vm1, %v5889_v37, %v830_v36  ;;  %v5892_v54 = vld [vmem:[%s12712_s0 + $0x87] ss:$16 sm:%s847_s5]   ;;  %v886_v55 = vsel %vm495_vm2, %v5900_v52, %v881_v53  ;;  %s896_s7 = smov 12  ;;  %s1085_s20 = smov 48 }
  0x31   :  { %v5882_v40 = vld [vmem:[%s12712_s0 + $0x60f] ss:$16 sm:%s801_s10]   ;;  %v840_v41 = vsel %vm495_vm2, %v5890_v38, %v835_v39  ;;  %v853_v58 = vsel %vm485_vm0, %v5893_v56, %v5892_v54  ;;  %v5903_v6 = vld [vmem:[%s12712_s0 + $0x287] ss:$16 sm:%s896_s7]   ;;  %s1108_s10 = smov 48  ;;  %s1090_s25 = smov 192 }
  0x32   :  { %v5883_v42 = vld [vmem:[%s12712_s0 + $0x60f] ss:$16 sm:%s804_s15]   ;;  %841 = vrot.lane.b32.xlu1 %v840_v41, %s6933_s6  ;;  %v858_v60 = vsel %vm490_vm1, %v5894_v57, %v853_v58  ;;  %v899_v8 = vsel %vm485_vm0, %v5903_v6, %v5902_v4  ;;  %s1067_s15 = smov 192  ;;  %s1154_s5 = smov 48 }
  0x33   :  { %v5884_v43 = vld [vmem:[%s12712_s0 + $0x60f] ss:$16 sm:%s809_s16]   ;;  %v807_v44 = vsel %vm485_vm0, %v5883_v42, %v5882_v40  ;;  %v863_v63 = vsel %vm495_vm2, %v5895_v59, %v858_v60  ;;  %s962_s16 = smov 3  ;;  %v5904_v7 = vld [vmem:[%s12712_s0 + $0x287] ss:$16 sm:%s901_s8]   ;;  %s1054_s8 = smov 3 }
  0x34   :  { %v5885_v45 = vld [vmem:[%s12712_s0 + $0x60f] ss:$16 sm:%s814_s21]   ;;  %v812_v46 = vsel %vm490_vm1, %v5884_v43, %v807_v44  ;;  %s919_s21 = smov 12  ;;  %v5905_v9 = vld [vmem:[%s12712_s0 + $0x287] ss:$16 sm:%s906_s13]   ;;  %v904_v10 = vsel %vm490_vm1, %v5904_v7, %v899_v8  ;;  %s1011_s13 = smov 12 }
  0x35   :  { %v817_v49 = vsel %vm495_vm2, %v5885_v45, %v812_v46  ;;  %v5908_v62 = vld [vmem:[%s12712_s0 + $0x387] ss:$16 sm:%s919_s21]   ;;  %v909_v13 = vsel %vm495_vm2, %v5905_v9, %v904_v10  ;;  %v5937_v39 = vld [vmem:[%s12712_s0 + $0x18f] ss:$16 sm:%s1054_s8]   ;;  %s1159_s7 = smov 192  ;;  %s1136_s21 = smov 192 }
  0x36   :  { %818 = vrot.lane.b32.xlu0 %v817_v49, %s6933_s6  ;;  %887 = vrot.lane.b32.xlu1 %v886_v55, %s6933_s6  ;;  %v922_v0 = vsel %vm485_vm0, %v5908_v62, %v5907_v61  ;;  %v5917_v11 = vld [vmem:[%s12712_s0 + $0x587] ss:$16 sm:%s962_s16]   ;;  %s1131_s16 = smov 48  ;;  %s1200_s30 = smov 48 }
  0x37   :  { %v927_v3 = vsel %vm490_vm1, %v5909_v1, %v922_v0  ;;  %v5918_v12 = vld [vmem:[%s12712_s0 + $0x587] ss:$16 sm:%s965_s17]   ;;  %v5939_v43 = vld [vmem:[%s12712_s0 + $0x18f] ss:$16 sm:%s1062_s14]   ;;  %s1077_s14 = smov 3  ;;  %s1182_s17 = smov 192 }
  0x38   :  { %v932_v5 = vsel %vm495_vm2, %v5910_v2, %v927_v3  ;;  %v968_v14 = vsel %vm485_vm0, %v5918_v12, %v5917_v11  ;;  %v5919_v15 = vld [vmem:[%s12712_s0 + $0x587] ss:$16 sm:%s970_s22]   ;;  %s985_s22 = smov 3  ;;  %v5940_v44 = vld [vmem:[%s12712_s0 + $0x18f] ss:$16 sm:%s1067_s15]   ;;  %s1126_s15 = smov 12 }
  0x39   :  { %v5920_v16 = vld [vmem:[%s12712_s0 + $0x587] ss:$16 sm:%s975_s23]   ;;  %v973_v17 = vsel %vm490_vm1, %v5919_v15, %v968_v14  ;;  %s1034_s23 = smov 12  ;;  %v5934_v49 = vld [vmem:[%s12712_s0 + $0x8f] ss:$16 sm:%s1039_s24]   ;;  %s1192_s24 = smov 3 }
  0x3a   :  { %864 = vrot.lane.b32.xlu0 %v863_v63, %s6933_s6  ;;  %933 = vrot.lane.b32.xlu1 %v932_v5, %s6933_s6  ;;  %v5912_v18 = vld [vmem:[%s12712_s0 + $0x487] ss:$16 sm:%s939_s26]   ;;  %v978_v19 = vsel %vm495_vm2, %v5920_v16, %v973_v17  ;;  %s1245_s26 = smov 48  ;;  %s1223_s8 = smov 48 }
  0x3b   :  { %v5913_v20 = vld [vmem:[%s12712_s0 + $0x487] ss:$16 sm:%s942_s2]   ;;  %v5933_v48 = vld [vmem:[%s12712_s0 + $0x8f] ss:$16 sm:%s1034_s23]   ;;  %s1205_s2 = smov 192  ;;  %s6934_s23 = smov 96  }
  0x3c   :  { %v5914_v21 = vld [vmem:[%s12712_s0 + $0x487] ss:$16 sm:%s947_s3]   ;;  %v945_v22 = vsel %vm485_vm0, %v5913_v20, %v5912_v18  ;;  %s1100_s3 = smov 3  ;;  %v5935_v51 = vld [vmem:[%s12712_s0 + $0x8f] ss:$16 sm:%s1044_s29]   ;;  %s1149_s29 = smov 12 }
  0x3d   :  { %v5915_v23 = vld [vmem:[%s12712_s0 + $0x487] ss:$16 sm:%s952_s9]   ;;  %v950_v24 = vsel %vm490_vm1, %v5914_v21, %v945_v22  ;;  %s1057_s9 = smov 12  ;;  %v5947_v53 = vld [vmem:[%s12712_s0 + $0x38f] ss:$16 sm:%s1100_s3]   ;;  %s1268_s3 = smov 48 }
  0x3e   :  { %910 = vrot.lane.b32.xlu0 %v909_v13, %s6933_s6  ;;  %979 = vrot.lane.b32.xlu1 %v978_v19, %s6933_s6  ;;  %v5927_v25 = vld [vmem:[%s12712_s0 + $0x787] ss:$16 sm:%s1008_s12]   ;;  %v955_v27 = vsel %vm495_vm2, %v5915_v23, %v950_v24  ;;  %s1177_s12 = smov 48 }
  0x3f   :  { %v5928_v26 = vld [vmem:[%s12712_s0 + $0x787] ss:$16 sm:%s1011_s13]   ;;  %v5938_v40 = vld [vmem:[%s12712_s0 + $0x18f] ss:$16 sm:%s1057_s9]   ;;  %s1228_s13 = smov 192  ;;  %s1273_s9 = smov 192 }
  0x40   :  { %v1014_v28 = vsel %vm485_vm0, %v5928_v26, %v5927_v25  ;;  %v5929_v29 = vld [vmem:[%s12712_s0 + $0x787] ss:$16 sm:%s1016_s18]   ;;  %s1031_s18 = smov 3  ;;  %v1060_v42 = vsel %vm485_vm0, %v5938_v40, %v5937_v39  ;;  %v5949_v57 = vld [vmem:[%s12712_s0 + $0x38f] ss:$16 sm:%s1108_s10]   ;;  %s1123_s10 = smov 3 }
  0x41   :  { %v5930_v30 = vld [vmem:[%s12712_s0 + $0x787] ss:$16 sm:%s1021_s19]   ;;  %v1019_v31 = vsel %vm490_vm1, %v5929_v29, %v1014_v28  ;;  %v1065_v45 = vsel %vm490_vm1, %v5939_v43, %v1060_v42  ;;  %v5932_v46 = vld [vmem:[%s12712_s0 + $0x8f] ss:$16 sm:%s1031_s18]   ;;  %s1080_s19 = smov 12  ;;  %s1342_s18 = smov 192 }
  0x42   :  { %956 = vrot.lane.b32.xlu0 %v955_v27, %s6933_s6  ;;  %v5922_v32 = vld [vmem:[%s12712_s0 + $0x687] ss:$16 sm:%s985_s22]   ;;  %v1024_v33 = vsel %vm495_vm2, %v5930_v30, %v1019_v31  ;;  %v1070_v47 = vsel %vm495_vm2, %v5940_v44, %v1065_v45  ;;  %v1037_v50 = vsel %vm485_vm0, %v5933_v48, %v5932_v46  ;;  %s1296_s22 = smov 192 }
  0x43   :  { %v5923_v34 = vld [vmem:[%s12712_s0 + $0x687] ss:$16 sm:%s988_s27]   ;;  %1025 = vrot.lane.b32.xlu1 %v1024_v33, %s6933_s6  ;;  %v1042_v52 = vsel %vm490_vm1, %v5934_v49, %v1037_v50  ;;  %s1250_s27 = smov 192 }
  0x44   :  { %v5924_v35 = vld [vmem:[%s12712_s0 + $0x687] ss:$16 sm:%s993_s28]   ;;  %v991_v36 = vsel %vm485_vm0, %v5923_v34, %v5922_v32  ;;  %v1047_v55 = vsel %vm495_vm2, %v5935_v51, %v1042_v52  ;;  %v5950_v58 = vld [vmem:[%s12712_s0 + $0x38f] ss:$16 sm:%s1113_s11]   ;;  %s1146_s28 = smov 3  ;;  %s1172_s11 = smov 12 }
  0x45   :  { %v5925_v37 = vld [vmem:[%s12712_s0 + $0x687] ss:$16 sm:%s998_s4]   ;;  %v996_v38 = vsel %vm490_vm1, %v5924_v35, %v991_v36  ;;  %s1103_s4 = smov 12  ;;  %v5942_v60 = vld [vmem:[%s12712_s0 + $0x28f] ss:$16 sm:%s1077_s14]   ;;  %s1388_s14 = smov 192 }
  0x46   :  { %v1001_v41 = vsel %vm495_vm2, %v5925_v37, %v996_v38  ;;  %v5948_v54 = vld [vmem:[%s12712_s0 + $0x38f] ss:$16 sm:%s1103_s4]   ;;  %v5978_v35 = vld [vmem:[%s12712_s0 + $0x106] ss:$16 sm:%s1245_s26]   ;;  %s1260_s26 = smov 3  ;;  %s1319_s4 = smov 192 }
  0x47   :  { %1002 = vrot.lane.b32.xlu0 %v1001_v41, %s6933_s6  ;;  %1071 = vrot.lane.b32.xlu1 %v1070_v47, %s6933_s6  ;;  %v1106_v56 = vsel %vm485_vm0, %v5948_v54, %v5947_v53  ;;  %v5943_v62 = vld [vmem:[%s12712_s0 + $0x28f] ss:$16 sm:%s1080_s19]   ;;  %s1406_s19 = smov 48 }
  0x48   :  { %v1111_v59 = vsel %vm490_vm1, %v5949_v57, %v1106_v56  ;;  %v5944_v63 = vld [vmem:[%s12712_s0 + $0x28f] ss:$16 sm:%s1085_s20]   ;;  %v1083_v0 = vsel %vm485_vm0, %v5943_v62, %v5942_v60  ;;  %s1237_s20 = smov 3  ;;  %v5979_v36 = vld [vmem:[%s12712_s0 + $0x106] ss:$16 sm:%s1250_s27]   ;;  %s1309_s27 = smov 12 }
  0x49   :  { %v1116_v61 = vsel %vm495_vm2, %v5950_v58, %v1111_v59  ;;  %v5945_v1 = vld [vmem:[%s12712_s0 + $0x28f] ss:$16 sm:%s1090_s25]   ;;  %v1088_v2 = vsel %vm490_vm1, %v5944_v63, %v1083_v0  ;;  %s1195_s25 = smov 12  ;;  %v5976_v31 = vld [vmem:[%s12712_s0 + $0x106] ss:$16 sm:%s1237_s20]   ;;  %s1457_s20 = smov 192 }
  0x4a   :  { %v5957_v3 = vld [vmem:[%s12712_s0 + $0x58f] ss:$16 sm:%s1146_s28]   ;;  %v1093_v5 = vsel %vm495_vm2, %v5945_v1, %v1088_v2  ;;  %v5974_v41 = vld [vmem:[%s12712_s0 + $0x6] ss:$16 sm:%s1223_s8]   ;;  %s1314_s28 = smov 48  ;;  %s1375_s8 = smov 3 }
  0x4b   :  { %1048 = vrot.lane.b32.xlu0 %v1047_v55, %s6933_s6  ;;  %1117 = vrot.lane.b32.xlu1 %v1116_v61, %s6933_s6  ;;  %v5958_v4 = vld [vmem:[%s12712_s0 + $0x58f] ss:$16 sm:%s1149_s29]   ;;  %s1365_s29 = smov 192 }
  0x4c   :  { %v1152_v6 = vsel %vm485_vm0, %v5958_v4, %v5957_v3  ;;  %v5959_v7 = vld [vmem:[%s12712_s0 + $0x58f] ss:$16 sm:%s1154_s5]   ;;  %s1169_s5 = smov 3  ;;  %v5975_v43 = vld [vmem:[%s12712_s0 + $0x6] ss:$16 sm:%s1228_s13]   ;;  %s1332_s13 = smov 12 }
  0x4d   :  { %v5960_v8 = vld [vmem:[%s12712_s0 + $0x58f] ss:$16 sm:%s1159_s7]   ;;  %v1157_v9 = vsel %vm490_vm1, %v5959_v7, %v1152_v6  ;;  %s1218_s7 = smov 12  ;;  %v5989_v50 = vld [vmem:[%s12712_s0 + $0x306] ss:$16 sm:%s1296_s22]   ;;  %s1355_s22 = smov 12 }
  0x4e   :  { %v5952_v10 = vld [vmem:[%s12712_s0 + $0x48f] ss:$16 sm:%s1123_s10]   ;;  %v1162_v11 = vsel %vm495_vm2, %v5960_v8, %v1157_v9  ;;  %v5973_v40 = vld [vmem:[%s12712_s0 + $0x6] ss:$16 sm:%s1218_s7]   ;;  %s1429_s10 = smov 48  ;;  %s1480_s7 = smov 192 }
  0x4f   :  { %1094 = vrot.lane.b32.xlu0 %v1093_v5, %s6933_s6  ;;  %v5953_v12 = vld [vmem:[%s12712_s0 + $0x48f] ss:$16 sm:%s1126_s15]   ;;  %1163 = vrot.lane.b32.xlu1 %v1162_v11, %s6933_s6  ;;  %s1283_s15 = smov 3 }
  0x50   :  { %v5954_v13 = vld [vmem:[%s12712_s0 + $0x48f] ss:$16 sm:%s1131_s16]   ;;  %v1129_v14 = vsel %vm485_vm0, %v5953_v12, %v5952_v10  ;;  %s1286_s16 = smov 12  ;;  %v5986_v45 = vld [vmem:[%s12712_s0 + $0x306] ss:$16 sm:%s1283_s15]   ;;  %s1452_s15 = smov 48 }
  0x51   :  { %v5955_v15 = vld [vmem:[%s12712_s0 + $0x48f] ss:$16 sm:%s1136_s21]   ;;  %v1134_v16 = vsel %vm490_vm1, %v5954_v13, %v1129_v14  ;;  %s1240_s21 = smov 12  ;;  %v5987_v46 = vld [vmem:[%s12712_s0 + $0x306] ss:$16 sm:%s1286_s16]   ;;  %s1503_s16 = smov 192 }
  0x52   :  { %v5967_v17 = vld [vmem:[%s12712_s0 + $0x78f] ss:$16 sm:%s1192_s24]   ;;  %v1139_v19 = vsel %vm495_vm2, %v5955_v15, %v1134_v16  ;;  %v5977_v32 = vld [vmem:[%s12712_s0 + $0x106] ss:$16 sm:%s1240_s21]   ;;  %s1291_s21 = smov 48  ;;  %v1289_v48 = vsel %vm485_vm0, %v5987_v46, %v5986_v45  ;;  %s1360_s24 = smov 48 }
  0x53   :  { %v5968_v18 = vld [vmem:[%s12712_s0 + $0x78f] ss:$16 sm:%s1195_s25]   ;;  %1140 = vrot.lane.b32.xlu0 %v1139_v19, %s6933_s6  ;;  %v1243_v34 = vsel %vm485_vm0, %v5977_v32, %v5976_v31  ;;  %s1411_s25 = smov 192 }
  0x54   :  { %v1198_v20 = vsel %vm485_vm0, %v5968_v18, %v5967_v17  ;;  %v5969_v21 = vld [vmem:[%s12712_s0 + $0x78f] ss:$16 sm:%s1200_s30]   ;;  %s1215_s30 = smov 3  ;;  %v1248_v37 = vsel %vm490_vm1, %v5978_v35, %v1243_v34  ;;  %v5988_v49 = vld [vmem:[%s12712_s0 + $0x306] ss:$16 sm:%s1291_s21]   ;;  %s1306_s21 = smov 3 }
  0x55   :  { %v5970_v22 = vld [vmem:[%s12712_s0 + $0x78f] ss:$16 sm:%s1205_s2]   ;;  %v1203_v23 = vsel %vm490_vm1, %v5969_v21, %v1198_v20  ;;  %v5972_v38 = vld [vmem:[%s12712_s0 + $0x6] ss:$16 sm:%s1215_s30]   ;;  %v1253_v39 = vsel %vm495_vm2, %v5979_v36, %v1248_v37  ;;  %s1263_s2 = smov 12  ;;  %v1294_v51 = vsel %vm490_vm1, %v5988_v49, %v1289_v48  ;;  %s1521_s30 = smov 48 }
  0x56   :  { %v5962_v24 = vld [vmem:[%s12712_s0 + $0x68f] ss:$16 sm:%s1169_s5]   ;;  %v1208_v25 = vsel %vm495_vm2, %v5970_v22, %v1203_v23  ;;  %v1221_v42 = vsel %vm485_vm0, %v5973_v40, %v5972_v38  ;;  %v5981_v52 = vld [vmem:[%s12712_s0 + $0x206] ss:$16 sm:%s1260_s26]   ;;  %v1299_v53 = vsel %vm495_vm2, %v5989_v50, %v1294_v51  ;;  %s1475_s5 = smov 48  ;;  %s1567_s26 = smov 48 }
  0x57   :  { %v5963_v26 = vld [vmem:[%s12712_s0 + $0x68f] ss:$16 sm:%s1172_s11]   ;;  %1209 = vrot.lane.b32.xlu1 %v1208_v25, %s6933_s6  ;;  %v1226_v44 = vsel %vm490_vm1, %v5974_v41, %v1221_v42  ;;  %s1434_s11 = smov 192 }
  0x58   :  { %v5964_v27 = vld [vmem:[%s12712_s0 + $0x68f] ss:$16 sm:%s1177_s12]   ;;  %v1175_v28 = vsel %vm485_vm0, %v5963_v26, %v5962_v24  ;;  %v1231_v47 = vsel %vm495_vm2, %v5975_v43, %v1226_v44  ;;  %s1329_s12 = smov 3  ;;  %v5982_v54 = vld [vmem:[%s12712_s0 + $0x206] ss:$16 sm:%s1263_s2]   ;;  %s1526_s2 = smov 192 }
  0x59   :  { %v5965_v29 = vld [vmem:[%s12712_s0 + $0x68f] ss:$16 sm:%s1182_s17]   ;;  %v1180_v30 = vsel %vm490_vm1, %v5964_v27, %v1175_v28  ;;  %v5983_v55 = vld [vmem:[%s12712_s0 + $0x206] ss:$16 sm:%s1268_s3]   ;;  %s1337_s17 = smov 48  ;;  %v1266_v56 = vsel %vm485_vm0, %v5982_v54, %v5981_v52  ;;  %s1421_s3 = smov 3 }
  0x5a   :  { %v1185_v33 = vsel %vm495_vm2, %v5965_v29, %v1180_v30  ;;  %v5984_v57 = vld [vmem:[%s12712_s0 + $0x206] ss:$16 sm:%s1273_s9]   ;;  %v1271_v58 = vsel %vm490_vm1, %v5983_v55, %v1266_v56  ;;  %s1378_s9 = smov 12  ;;  %v6016_v23 = vld [vmem:[%s12712_s0 + $0x10e] ss:$16 sm:%s1421_s3]   ;;  %s1590_s3 = smov 48 }
  0x5b   :  { %1186 = vrot.lane.b32.xlu0 %v1185_v33, %s6933_s6  ;;  %1254 = vrot.lane.b32.xlu1 %v1253_v39, %s6934_s23  ;;  %v5996_v59 = vld [vmem:[%s12712_s0 + $0x506] ss:$16 sm:%s1329_s12]   ;;  %v1276_v61 = vsel %vm495_vm2, %v5984_v57, %v1271_v58  ;;  %s1383_s6 = smov 48  ;;  %s1498_s12 = smov 48 }
  0x5c   :  { %v5997_v60 = vld [vmem:[%s12712_s0 + $0x506] ss:$16 sm:%s1332_s13]   ;;  %v6018_v27 = vld [vmem:[%s12712_s0 + $0x10e] ss:$16 sm:%s1429_s10]   ;;  %s1444_s10 = smov 3  ;;  %s1549_s13 = smov 192 }
  0x5d   :  { %v1335_v62 = vsel %vm485_vm0, %v5997_v60, %v5996_v59  ;;  %v5998_v63 = vld [vmem:[%s12712_s0 + $0x506] ss:$16 sm:%s1337_s17]   ;;  %s1352_s17 = smov 3  ;;  %v6019_v28 = vld [vmem:[%s12712_s0 + $0x10e] ss:$16 sm:%s1434_s11]   ;;  %s1493_s11 = smov 12 }
  0x5e   :  { %v5999_v0 = vld [vmem:[%s12712_s0 + $0x506] ss:$16 sm:%s1342_s18]   ;;  %v1340_v1 = vsel %vm490_vm1, %v5998_v63, %v1335_v62  ;;  %s1401_s18 = smov 12  ;;  %v6013_v33 = vld [vmem:[%s12712_s0 + $0xe] ss:$16 sm:%s1406_s19]   ;;  %s1559_s19 = smov 3 }
  0x5f   :  { %1232 = vrot.lane.b32.xlu0 %v1231_v47, %s6934_s23  ;;  %1300 = vrot.lane.b32.xlu1 %v1299_v53, %s6934_s23  ;;  %v5991_v2 = vld [vmem:[%s12712_s0 + $0x406] ss:$16 sm:%s1306_s21]   ;;  %v1345_v3 = vsel %vm495_vm2, %v5999_v0, %v1340_v1  ;;  %s1613_s21 = smov 48 }
  0x60   :  { %v5992_v4 = vld [vmem:[%s12712_s0 + $0x406] ss:$16 sm:%s1309_s27]   ;;  %v6012_v32 = vld [vmem:[%s12712_s0 + $0xe] ss:$16 sm:%s1401_s18]   ;;  %s1572_s27 = smov 192  ;;  %s1664_s18 = smov 192 }
  0x61   :  { %v5993_v5 = vld [vmem:[%s12712_s0 + $0x406] ss:$16 sm:%s1314_s28]   ;;  %v1312_v6 = vsel %vm485_vm0, %v5992_v4, %v5991_v2  ;;  %s1467_s28 = smov 3  ;;  %v6014_v35 = vld [vmem:[%s12712_s0 + $0xe] ss:$16 sm:%s1411_s25]   ;;  %s1516_s25 = smov 12 }
  0x62   :  { %v5994_v7 = vld [vmem:[%s12712_s0 + $0x406] ss:$16 sm:%s1319_s4]   ;;  %v1317_v8 = vsel %vm490_vm1, %v5993_v5, %v1312_v6  ;;  %s1424_s4 = smov 12  ;;  %v6026_v37 = vld [vmem:[%s12712_s0 + $0x30e] ss:$16 sm:%s1467_s28]   ;;  %s1636_s28 = smov 48 }
  0x63   :  { %1277 = vrot.lane.b32.xlu0 %v1276_v61, %s6934_s23  ;;  %1346 = vrot.lane.b32.xlu1 %v1345_v3, %s6934_s23  ;;  %v6006_v9 = vld [vmem:[%s12712_s0 + $0x706] ss:$16 sm:%s1375_s8]   ;;  %v1322_v11 = vsel %vm495_vm2, %v5994_v7, %v1317_v8  ;;  %s1544_s8 = smov 48 }
  0x64   :  { %v6007_v10 = vld [vmem:[%s12712_s0 + $0x706] ss:$16 sm:%s1378_s9]   ;;  %v6017_v24 = vld [vmem:[%s12712_s0 + $0x10e] ss:$16 sm:%s1424_s4]   ;;  %s1595_s9 = smov 192  ;;  %s1641_s4 = smov 192 }
  0x65   :  { %v1381_v12 = vsel %vm485_vm0, %v6007_v10, %v6006_v9  ;;  %v6008_v13 = vld [vmem:[%s12712_s0 + $0x706] ss:$16 sm:%s1383_s6]   ;;  %s1398_s6 = smov 3  ;;  %v1427_v26 = vsel %vm485_vm0, %v6017_v24, %v6016_v23  ;;  %v6028_v41 = vld [vmem:[%s12712_s0 + $0x30e] ss:$16 sm:%s1475_s5]   ;;  %s1490_s5 = smov 3 }
  0x66   :  { %v6009_v14 = vld [vmem:[%s12712_s0 + $0x706] ss:$16 sm:%s1388_s14]   ;;  %v1386_v15 = vsel %vm490_vm1, %v6008_v13, %v1381_v12  ;;  %v1432_v29 = vsel %vm490_vm1, %v6018_v27, %v1427_v26  ;;  %v6011_v30 = vld [vmem:[%s12712_s0 + $0xe] ss:$16 sm:%s1398_s6]   ;;  %s1447_s14 = smov 12  ;;  %s1705_s6 = smov 48 }
  0x67   :  { %1323 = vrot.lane.b32.xlu0 %v1322_v11, %s6934_s23  ;;  %v6001_v16 = vld [vmem:[%s12712_s0 + $0x606] ss:$16 sm:%s1352_s17]   ;;  %v1391_v17 = vsel %vm495_vm2, %v6009_v14, %v1386_v15  ;;  %v1437_v31 = vsel %vm495_vm2, %v6019_v28, %v1432_v29  ;;  %v1404_v34 = vsel %vm485_vm0, %v6012_v32, %v6011_v30  ;;  %s1659_s17 = smov 48 }
  0x68   :  { %v6002_v18 = vld [vmem:[%s12712_s0 + $0x606] ss:$16 sm:%s1355_s22]   ;;  %1392 = vrot.lane.b32.xlu1 %v1391_v17, %s6934_s23  ;;  %v1409_v36 = vsel %vm490_vm1, %v6013_v33, %v1404_v34  ;;  %s1618_s22 = smov 192 }
  0x69   :  { %v6003_v19 = vld [vmem:[%s12712_s0 + $0x606] ss:$16 sm:%s1360_s24]   ;;  %v1358_v20 = vsel %vm485_vm0, %v6002_v18, %v6001_v16  ;;  %v1414_v39 = vsel %vm495_vm2, %v6014_v35, %v1409_v36  ;;  %v6029_v42 = vld [vmem:[%s12712_s0 + $0x30e] ss:$16 sm:%s1480_s7]   ;;  %s1513_s24 = smov 3  ;;  %s1539_s7 = smov 12 }
  0x6a   :  { %v6004_v21 = vld [vmem:[%s12712_s0 + $0x606] ss:$16 sm:%s1365_s29]   ;;  %v1363_v22 = vsel %vm490_vm1, %v6003_v19, %v1358_v20  ;;  %s1470_s29 = smov 12  ;;  %v6021_v44 = vld [vmem:[%s12712_s0 + $0x20e] ss:$16 sm:%s1444_s10]   ;;  %s1751_s10 = smov 48 }
  0x6b   :  { %v1368_v25 = vsel %vm495_vm2, %v6004_v21, %v1363_v22  ;;  %v6027_v38 = vld [vmem:[%s12712_s0 + $0x30e] ss:$16 sm:%s1470_s29]   ;;  %v6058_v20 = vld [vmem:[%s12712_s0 + $0x186] ss:$16 sm:%s1613_s21]   ;;  %s1628_s21 = smov 3  ;;  %s1687_s29 = smov 192 }
  0x6c   :  { %1369 = vrot.lane.b32.xlu0 %v1368_v25, %s6934_s23  ;;  %1438 = vrot.lane.b32.xlu1 %v1437_v31, %s6934_s23  ;;  %v1473_v40 = vsel %vm485_vm0, %v6027_v38, %v6026_v37  ;;  %v6022_v46 = vld [vmem:[%s12712_s0 + $0x20e] ss:$16 sm:%s1447_s14]   ;;  %s1710_s14 = smov 192 }
  0x6d   :  { %v1478_v43 = vsel %vm490_vm1, %v6028_v41, %v1473_v40  ;;  %v6023_v47 = vld [vmem:[%s12712_s0 + $0x20e] ss:$16 sm:%s1452_s15]   ;;  %v1450_v48 = vsel %vm485_vm0, %v6022_v46, %v6021_v44  ;;  %s1605_s15 = smov 3  ;;  %v6059_v21 = vld [vmem:[%s12712_s0 + $0x186] ss:$16 sm:%s1618_s22]   ;;  %s1677_s22 = smov 12 }
  0x6e   :  { %v1483_v45 = vsel %vm495_vm2, %v6029_v42, %v1478_v43  ;;  %v6024_v49 = vld [vmem:[%s12712_s0 + $0x20e] ss:$16 sm:%s1457_s20]   ;;  %v1455_v50 = vsel %vm490_vm1, %v6023_v47, %v1450_v48  ;;  %s1562_s20 = smov 12  ;;  %v6056_v16 = vld [vmem:[%s12712_s0 + $0x186] ss:$16 sm:%s1605_s15]   ;;  %s1774_s15 = smov 48 }
  0x6f   :  { %v6036_v51 = vld [vmem:[%s12712_s0 + $0x50e] ss:$16 sm:%s1513_s24]   ;;  %v1460_v53 = vsel %vm495_vm2, %v6024_v49, %v1455_v50  ;;  %v6053_v27 = vld [vmem:[%s12712_s0 + $0x86] ss:$16 sm:%s1590_s3]   ;;  %s1682_s24 = smov 48  ;;  %s1743_s3 = smov 3 }
  0x70   :  { %1415 = vrot.lane.b32.xlu0 %v1414_v39, %s6934_s23  ;;  %1484 = vrot.lane.b32.xlu1 %v1483_v45, %s6934_s23  ;;  %v6037_v52 = vld [vmem:[%s12712_s0 + $0x50e] ss:$16 sm:%s1516_s25]   ;;  %s1733_s25 = smov 192 }
  0x71   :  { %v1519_v54 = vsel %vm485_vm0, %v6037_v52, %v6036_v51  ;;  %v6038_v55 = vld [vmem:[%s12712_s0 + $0x50e] ss:$16 sm:%s1521_s30]   ;;  %s1536_s30 = smov 3  ;;  %v6054_v30 = vld [vmem:[%s12712_s0 + $0x86] ss:$16 sm:%s1595_s9]   ;;  %s1700_s9 = smov 12 }
  0x72   :  { %v6039_v56 = vld [vmem:[%s12712_s0 + $0x50e] ss:$16 sm:%s1526_s2]   ;;  %v1524_v57 = vsel %vm490_vm1, %v6038_v55, %v1519_v54  ;;  %s1585_s2 = smov 12  ;;  %v6068_v36 = vld [vmem:[%s12712_s0 + $0x386] ss:$16 sm:%s1659_s17]   ;;  %s1674_s17 = smov 3 }
  0x73   :  { %v6031_v58 = vld [vmem:[%s12712_s0 + $0x40e] ss:$16 sm:%s1490_s5]   ;;  %v1529_v59 = vsel %vm495_vm2, %v6039_v56, %v1524_v57  ;;  %v6052_v26 = vld [vmem:[%s12712_s0 + $0x86] ss:$16 sm:%s1585_s2]   ;;  %s1797_s5 = smov 48  ;;  %s1848_s2 = smov 192 }
  0x74   :  { %1461 = vrot.lane.b32.xlu0 %v1460_v53, %s6934_s23  ;;  %v6032_v60 = vld [vmem:[%s12712_s0 + $0x40e] ss:$16 sm:%s1493_s11]   ;;  %1530 = vrot.lane.b32.xlu1 %v1529_v59, %s6934_s23  ;;  %s1756_s11 = smov 192 }
  0x75   :  { %v6033_v61 = vld [vmem:[%s12712_s0 + $0x40e] ss:$16 sm:%s1498_s12]   ;;  %v1496_v62 = vsel %vm485_vm0, %v6032_v60, %v6031_v58  ;;  %s1651_s12 = smov 3  ;;  %v6069_v37 = vld [vmem:[%s12712_s0 + $0x386] ss:$16 sm:%s1664_s18]   ;;  %s1723_s18 = smov 12 }
  0x76   :  { %v6034_v63 = vld [vmem:[%s12712_s0 + $0x40e] ss:$16 sm:%s1503_s16]   ;;  %v1501_v0 = vsel %vm490_vm1, %v6033_v61, %v1496_v62  ;;  %s1608_s16 = smov 12  ;;  %v6066_v32 = vld [vmem:[%s12712_s0 + $0x386] ss:$16 sm:%s1651_s12]   ;;  %s1820_s12 = smov 48 }
  0x77   :  { %v6046_v1 = vld [vmem:[%s12712_s0 + $0x70e] ss:$16 sm:%s1559_s19]   ;;  %v1506_v3 = vsel %vm495_vm2, %v6034_v63, %v1501_v0  ;;  %v6057_v17 = vld [vmem:[%s12712_s0 + $0x186] ss:$16 sm:%s1608_s16]   ;;  %s1728_s19 = smov 48  ;;  %s1825_s16 = smov 192 }
  0x78   :  { %v6047_v2 = vld [vmem:[%s12712_s0 + $0x70e] ss:$16 sm:%s1562_s20]   ;;  %1507 = vrot.lane.b32.xlu0 %v1506_v3, %s6934_s23  ;;  %v7715_v14 = vpop.permute.xlu1 %542   ;;  %v1611_v19 = vsel %vm485_vm0, %v6057_v17, %v6056_v16  ;;  %s1779_s20 = smov 192 }
  0x79   :  { %v1565_v4 = vsel %vm485_vm0, %v6047_v2, %v6046_v1  ;;  %v6048_v5 = vld [vmem:[%s12712_s0 + $0x70e] ss:$16 sm:%s1567_s26]   ;;  %s1582_s26 = smov 3  ;;  %v1616_v23 = vsel %vm490_vm1, %v6058_v20, %v1611_v19  ;;  %v6061_v40 = vld [vmem:[%s12712_s0 + $0x286] ss:$16 sm:%s1628_s21]   ;;  %s1935_s21 = smov 48 }
  0x7a   :  { %v6049_v6 = vld [vmem:[%s12712_s0 + $0x70e] ss:$16 sm:%s1572_s27]   ;;  %v1570_v7 = vsel %vm490_vm1, %v6048_v5, %v1565_v4  ;;  %v6051_v24 = vld [vmem:[%s12712_s0 + $0x86] ss:$16 sm:%s1582_s26]   ;;  %v1621_v25 = vsel %vm495_vm2, %v6059_v21, %v1616_v23  ;;  %s1631_s27 = smov 12  ;;  %s1889_s26 = smov 48 }
  0x7b   :  { %v6041_v8 = vld [vmem:[%s12712_s0 + $0x60e] ss:$16 sm:%s1536_s30]   ;;  %v1575_v9 = vsel %vm495_vm2, %v6049_v6, %v1570_v7  ;;  %v1588_v29 = vsel %vm485_vm0, %v6052_v26, %v6051_v24  ;;  %v6062_v42 = vld [vmem:[%s12712_s0 + $0x286] ss:$16 sm:%s1631_s27]   ;;  %s1843_s30 = smov 48  ;;  %s1894_s27 = smov 192 }
  0x7c   :  { %v6042_v10 = vld [vmem:[%s12712_s0 + $0x60e] ss:$16 sm:%s1539_s7]   ;;  %1576 = vrot.lane.b32.xlu1 %v1575_v9, %s6934_s23  ;;  %v7732_v22 = vpop.permute.xlu0 %497   ;;  %v1593_v31 = vsel %vm490_vm1, %v6053_v27, %v1588_v29  ;;  %v1634_v45 = vsel %vm485_vm0, %v6062_v42, %v6061_v40  ;;  %s1802_s7 = smov 192 }
  0x7d   :  { %v6043_v11 = vld [vmem:[%s12712_s0 + $0x60e] ss:$16 sm:%s1544_s8]   ;;  %v1542_v12 = vsel %vm485_vm0, %v6042_v10, %v6041_v8  ;;  %v1598_v34 = vsel %vm495_vm2, %v6054_v30, %v1593_v31  ;;  %s1697_s8 = smov 3  ;;  %v6063_v43 = vld [vmem:[%s12712_s0 + $0x286] ss:$16 sm:%s1636_s28]   ;;  %s1789_s28 = smov 3 }
  0x7e   :  { %v6044_v13 = vld [vmem:[%s12712_s0 + $0x60e] ss:$16 sm:%s1549_s13]   ;;  %v1547_v15 = vsel %vm490_vm1, %v6043_v11, %v1542_v12  ;;  %s1654_s13 = smov 12  ;;  %v6064_v46 = vld [vmem:[%s12712_s0 + $0x286] ss:$16 sm:%s1641_s4]   ;;  %v1639_v47 = vsel %vm490_vm1, %v6063_v43, %v1634_v45  ;;  %s1746_s4 = smov 12 }
  0x7f   :  { %v1552_v18 = vsel %vm495_vm2, %v6044_v13, %v1547_v15  ;;  %v6067_v33 = vld [vmem:[%s12712_s0 + $0x386] ss:$16 sm:%s1654_s13]   ;;  %v1644_v50 = vsel %vm495_vm2, %v6064_v46, %v1639_v47  ;;  %v6096_v17 = vld [vmem:[%s12712_s0 + $0x18e] ss:$16 sm:%s1789_s28]   ;;  %s1871_s13 = smov 192  ;;  %s1958_s28 = smov 48 }
  0x80   :  { %1553 = vrot.lane.b32.xlu0 %v1552_v18, %s6934_s23  ;;  %v7746_v28 = vpop.permute.xlu1 %565   ;;  %1622 = vrot.lane.b32.xlu1 %v1621_v25, %s6934_s23  ;;  %v1657_v35 = vsel %vm485_vm0, %v6067_v33, %v6066_v32  ;;  %v6076_v48 = vld [vmem:[%s12712_s0 + $0x586] ss:$16 sm:%s1697_s8]   ;;  %s1866_s8 = smov 48 }
  0x81   :  { %v1662_v39 = vsel %vm490_vm1, %v6068_v36, %v1657_v35  ;;  %v6077_v49 = vld [vmem:[%s12712_s0 + $0x586] ss:$16 sm:%s1700_s9]   ;;  %v6098_v21 = vld [vmem:[%s12712_s0 + $0x18e] ss:$16 sm:%s1797_s5]   ;;  %s1812_s5 = smov 3  ;;  %s1917_s9 = smov 192 }
  0x82   :  { %v1667_v41 = vsel %vm495_vm2, %v6069_v37, %v1662_v39  ;;  %v1703_v51 = vsel %vm485_vm0, %v6077_v49, %v6076_v48  ;;  %v6078_v52 = vld [vmem:[%s12712_s0 + $0x586] ss:$16 sm:%s1705_s6]   ;;  %s1720_s6 = smov 3  ;;  %v6099_v23 = vld [vmem:[%s12712_s0 + $0x18e] ss:$16 sm:%s1802_s7]   ;;  %s1861_s7 = smov 12 }
  0x83   :  { %v6079_v53 = vld [vmem:[%s12712_s0 + $0x586] ss:$16 sm:%s1710_s14]   ;;  %v1708_v55 = vsel %vm490_vm1, %v6078_v52, %v1703_v51  ;;  %s1769_s14 = smov 12  ;;  %v6093_v30 = vld [vmem:[%s12712_s0 + $0x8e] ss:$16 sm:%s1774_s15]   ;;  %s1927_s15 = smov 3 }
  0x84   :  { %v7768_v38 = vpop.permute.xlu0 %519   ;;  %1599 = vrot.lane.b32.xlu0 %v1598_v34, %s6934_s23  ;;  %1668 = vrot.lane.b32.xlu1 %v1667_v41, %s6934_s23  ;;  %v6071_v56 = vld [vmem:[%s12712_s0 + $0x486] ss:$16 sm:%s1674_s17]   ;;  %v1713_v57 = vsel %vm495_vm2, %v6079_v53, %v1708_v55  ;;  %s1980_s17 = smov 48 }
  0x85   :  { %v6072_v58 = vld [vmem:[%s12712_s0 + $0x486] ss:$16 sm:%s1677_s22]   ;;  %v6092_v29 = vld [vmem:[%s12712_s0 + $0x8e] ss:$16 sm:%s1769_s14]   ;;  %s1940_s22 = smov 192  ;;  %s6935_s14 = smov 80  }
  0x86   :  { %v6073_v59 = vld [vmem:[%s12712_s0 + $0x486] ss:$16 sm:%s1682_s24]   ;;  %v1680_v61 = vsel %vm485_vm0, %v6072_v58, %v6071_v56  ;;  %s1835_s24 = smov 3  ;;  %v6094_v33 = vld [vmem:[%s12712_s0 + $0x8e] ss:$16 sm:%s1779_s20]   ;;  %s1884_s20 = smov 12 }
  0x87   :  { %v6074_v62 = vld [vmem:[%s12712_s0 + $0x486] ss:$16 sm:%s1687_s29]   ;;  %v1685_v63 = vsel %vm490_vm1, %v6073_v59, %v1680_v61  ;;  %s1792_s29 = smov 12  ;;  %v6106_v35 = vld [vmem:[%s12712_s0 + $0x38e] ss:$16 sm:%s1835_s24]   ;;  %s2003_s24 = smov 48 }
  0x88   :  { %v7782_v44 = vpop.permute.xlu1 %611   ;;  %1645 = vrot.lane.b32.xlu0 %v1644_v50, %s6934_s23  ;;  %1714 = vrot.lane.b32.xlu1 %v1713_v57, %s6934_s23  ;;  %v6086_v0 = vld [vmem:[%s12712_s0 + $0x786] ss:$16 sm:%s1743_s3]   ;;  %v1690_v2 = vsel %vm495_vm2, %v6074_v62, %v1685_v63  ;;  %s1912_s3 = smov 48 }
  0x89   :  { %v6087_v1 = vld [vmem:[%s12712_s0 + $0x786] ss:$16 sm:%s1746_s4]   ;;  %v6097_v18 = vld [vmem:[%s12712_s0 + $0x18e] ss:$16 sm:%s1792_s29]   ;;  %s1963_s4 = smov 192  ;;  %s2008_s29 = smov 192 }
  0x8a   :  { %v1749_v3 = vsel %vm485_vm0, %v6087_v1, %v6086_v0  ;;  %v6088_v4 = vld [vmem:[%s12712_s0 + $0x786] ss:$16 sm:%s1751_s10]   ;;  %s1766_s10 = smov 3  ;;  %v1795_v20 = vsel %vm485_vm0, %v6097_v18, %v6096_v17  ;;  %v6108_v40 = vld [vmem:[%s12712_s0 + $0x38e] ss:$16 sm:%s1843_s30]   ;;  %s1858_s30 = smov 3 }
  0x8b   :  { %v6089_v5 = vld [vmem:[%s12712_s0 + $0x786] ss:$16 sm:%s1756_s11]   ;;  %v1754_v7 = vsel %vm490_vm1, %v6088_v4, %v1749_v3  ;;  %v1800_v25 = vsel %vm490_vm1, %v6098_v21, %v1795_v20  ;;  %v6091_v26 = vld [vmem:[%s12712_s0 + $0x8e] ss:$16 sm:%s1766_s10]   ;;  %s1815_s11 = smov 12  ;;  %s2077_s10 = smov 192 }
  0x8c   :  { %v7804_v54 = vpop.permute.xlu0 %588   ;;  %1691 = vrot.lane.b32.xlu0 %v1690_v2, %s6934_s23  ;;  %v6081_v8 = vld [vmem:[%s12712_s0 + $0x686] ss:$16 sm:%s1720_s6]   ;;  %v1759_v9 = vsel %vm495_vm2, %v6089_v5, %v1754_v7  ;;  %v1805_v27 = vsel %vm495_vm2, %v6099_v23, %v1800_v25  ;;  %v1772_v32 = vsel %vm485_vm0, %v6092_v29, %v6091_v26  ;;  %s2031_s6 = smov 192 }
  0x8d   :  { %v6082_v10 = vld [vmem:[%s12712_s0 + $0x686] ss:$16 sm:%s1723_s18]   ;;  %1760 = vrot.lane.b32.xlu1 %v1759_v9, %s6934_s23  ;;  %v1777_v34 = vsel %vm490_vm1, %v6093_v30, %v1772_v32  ;;  %s1985_s18 = smov 192 }
  0x8e   :  { %v6083_v11 = vld [vmem:[%s12712_s0 + $0x686] ss:$16 sm:%s1728_s19]   ;;  %v1726_v13 = vsel %vm485_vm0, %v6082_v10, %v6081_v8  ;;  %v1782_v37 = vsel %vm495_vm2, %v6094_v33, %v1777_v34  ;;  %v6109_v41 = vld [vmem:[%s12712_s0 + $0x38e] ss:$16 sm:%s1848_s2]   ;;  %s1881_s19 = smov 3  ;;  %s1907_s2 = smov 12 }
  0x8f   :  { %v6084_v15 = vld [vmem:[%s12712_s0 + $0x686] ss:$16 sm:%s1733_s25]   ;;  %v1731_v16 = vsel %vm490_vm1, %v6083_v11, %v1726_v13  ;;  %s1838_s25 = smov 12  ;;  %v6101_v45 = vld [vmem:[%s12712_s0 + $0x28e] ss:$16 sm:%s1812_s5]   ;;  %s2123_s5 = smov 192 }
  0x90   :  { %v7818_v60 = vpop.permute.xlu1 %657   ;;  %v1736_v19 = vsel %vm495_vm2, %v6084_v15, %v1731_v16  ;;  %v6107_v36 = vld [vmem:[%s12712_s0 + $0x38e] ss:$16 sm:%s1838_s25]   ;;  %v6137_v34 = vld [vmem:[%s12712_s0 + $0x105] ss:$16 sm:%s1980_s17]   ;;  %s1995_s17 = smov 3  ;;  %s2054_s25 = smov 192 }
  0x91   :  { %1737 = vrot.lane.b32.xlu0 %v1736_v19, %s6934_s23  ;;  %1806 = vrot.lane.b32.xlu1 %v1805_v27, %s6934_s23  ;;  %v1841_v39 = vsel %vm485_vm0, %v6107_v36, %v6106_v35  ;;  %v6102_v47 = vld [vmem:[%s12712_s0 + $0x28e] ss:$16 sm:%s1815_s11]   ;;  %s8385_s11 = smov 12 }
  0x92   :  { %v1846_v43 = vsel %vm490_vm1, %v6108_v40, %v1841_v39  ;;  %v6103_v48 = vld [vmem:[%s12712_s0 + $0x28e] ss:$16 sm:%s1820_s12]   ;;  %v1818_v50 = vsel %vm485_vm0, %v6102_v47, %v6101_v45  ;;  %s1972_s12 = smov 3  ;;  %v6138_v35 = vld [vmem:[%s12712_s0 + $0x105] ss:$16 sm:%s1985_s18]   ;;  %s2044_s18 = smov 12 }
  0x93   :  { %v1851_v46 = vsel %vm495_vm2, %v6109_v41, %v1846_v43  ;;  %v6104_v51 = vld [vmem:[%s12712_s0 + $0x28e] ss:$16 sm:%s1825_s16]   ;;  %v1823_v52 = vsel %vm490_vm1, %v6103_v48, %v1818_v50  ;;  %s1930_s16 = smov 12  ;;  %v6135_v29 = vld [vmem:[%s12712_s0 + $0x105] ss:$16 sm:%s1972_s12]   ;;  %s8266_s12 = smov 48 }
  0x94   :  { %v7840_v6 = vpop.permute.xlu0 %634   ;;  %v7854_v12 = vpop.permute.xlu1 %703   ;;  %v6116_v53 = vld [vmem:[%s12712_s0 + $0x58e] ss:$16 sm:%s1881_s19]   ;;  %v1828_v56 = vsel %vm495_vm2, %v6104_v51, %v1823_v52  ;;  %v6133_v43 = vld [vmem:[%s12712_s0 + $0x5] ss:$16 sm:%s1958_s28]   ;;  %s2049_s19 = smov 48  ;;  %s2110_s28 = smov 3 }
  0x95   :  { %1783 = vrot.lane.b32.xlu0 %v1782_v37, %s6934_s23  ;;  %1852 = vrot.lane.b32.xlu1 %v1851_v46, %s6934_s23  ;;  %v6117_v55 = vld [vmem:[%s12712_s0 + $0x58e] ss:$16 sm:%s1884_s20]   ;;  %s2215_s20 = smov 192 }
  0x96   :  { %v1887_v57 = vsel %vm485_vm0, %v6117_v55, %v6116_v53  ;;  %v6118_v58 = vld [vmem:[%s12712_s0 + $0x58e] ss:$16 sm:%s1889_s26]   ;;  %s1904_s26 = smov 3  ;;  %v6134_v47 = vld [vmem:[%s12712_s0 + $0x5] ss:$16 sm:%s1963_s4]   ;;  %s2067_s4 = smov 12 }
  0x97   :  { %v6119_v59 = vld [vmem:[%s12712_s0 + $0x58e] ss:$16 sm:%s1894_s27]   ;;  %v1892_v62 = vsel %vm490_vm1, %v6118_v58, %v1887_v57  ;;  %s1953_s27 = smov 12 }
  0x98   :  { %v7876_v24 = vpop.permute.xlu0 %680   ;;  %v7890_v31 = vpop.permute.xlu1 %749   ;;  %v6111_v63 = vld [vmem:[%s12712_s0 + $0x48e] ss:$16 sm:%s1858_s30]   ;;  %v1897_v0 = vsel %vm495_vm2, %v6119_v59, %v1892_v62  ;;  %v6132_v41 = vld [vmem:[%s12712_s0 + $0x5] ss:$16 sm:%s1953_s27]   ;;  %s2169_s27 = smov 192  ;;  %s8307_s30 = smov 192 }
  0x99   :  { %1829 = vrot.lane.b32.xlu0 %v1828_v56, %s6934_s23  ;;  %v6112_v1 = vld [vmem:[%s12712_s0 + $0x48e] ss:$16 sm:%s1861_s7]   ;;  %1898 = vrot.lane.b32.xlu1 %v1897_v0, %s6934_s23  ;;  %s2018_s7 = smov 3 }
  0x9a   :  { %v6113_v2 = vld [vmem:[%s12712_s0 + $0x48e] ss:$16 sm:%s1866_s8]   ;;  %v1864_v4 = vsel %vm485_vm0, %v6112_v1, %v6111_v63  ;;  %s2021_s8 = smov 12  ;;  %v6145_v50 = vld [vmem:[%s12712_s0 + $0x305] ss:$16 sm:%s2018_s7]   ;;  %s2141_s7 = smov 48 }
  0x9b   :  { %v6114_v5 = vld [vmem:[%s12712_s0 + $0x48e] ss:$16 sm:%s1871_s13]   ;;  %v1869_v7 = vsel %vm490_vm1, %v6113_v2, %v1864_v4  ;;  %s1975_s13 = smov 12  ;;  %v6146_v51 = vld [vmem:[%s12712_s0 + $0x305] ss:$16 sm:%s2021_s8]   ;;  %s8149_s8 = smov 192 }
  0x9c   :  { %v7912_v42 = vpop.permute.xlu0 %726   ;;  %v7926_v49 = vpop.permute.xlu1 %795   ;;  %v6126_v8 = vld [vmem:[%s12712_s0 + $0x78e] ss:$16 sm:%s1927_s15]   ;;  %v1874_v10 = vsel %vm495_vm2, %v6114_v5, %v1869_v7  ;;  %v6136_v30 = vld [vmem:[%s12712_s0 + $0x105] ss:$16 sm:%s1975_s13]   ;;  %s2026_s13 = smov 48  ;;  %v2024_v53 = vsel %vm485_vm0, %v6146_v51, %v6145_v50  ;;  %s2095_s15 = smov 48 }
  0x9d   :  { %v6127_v9 = vld [vmem:[%s12712_s0 + $0x78e] ss:$16 sm:%s1930_s16]   ;;  %1875 = vrot.lane.b32.xlu0 %v1874_v10, %s6934_s23  ;;  %v1978_v33 = vsel %vm485_vm0, %v6136_v30, %v6135_v29  ;;  %s2100_s16 = smov 192 }
  0x9e   :  { %v1933_v11 = vsel %vm485_vm0, %v6127_v9, %v6126_v8  ;;  %v6128_v13 = vld [vmem:[%s12712_s0 + $0x78e] ss:$16 sm:%s1935_s21]   ;;  %s1950_s21 = smov 3  ;;  %v1983_v37 = vsel %vm490_vm1, %v6137_v34, %v1978_v33  ;;  %v6147_v55 = vld [vmem:[%s12712_s0 + $0x305] ss:$16 sm:%s2026_s13]   ;;  %s2041_s13 = smov 3 }
  0x9f   :  { %v6129_v15 = vld [vmem:[%s12712_s0 + $0x78e] ss:$16 sm:%s1940_s22]   ;;  %v1938_v17 = vsel %vm490_vm1, %v6128_v13, %v1933_v11  ;;  %v6131_v39 = vld [vmem:[%s12712_s0 + $0x5] ss:$16 sm:%s1950_s21]   ;;  %v1988_v40 = vsel %vm495_vm2, %v6138_v35, %v1983_v37  ;;  %s1998_s22 = smov 12  ;;  %v2029_v58 = vsel %vm490_vm1, %v6147_v55, %v2024_v53  ;;  %s2156_s21 = smov 3 }
  0xa0   :  { %v7948_v61 = vpop.permute.xlu0 %772   ;;  %v6121_v18 = vld [vmem:[%s12712_s0 + $0x68e] ss:$16 sm:%s1904_s26]   ;;  %v1943_v19 = vsel %vm495_vm2, %v6129_v15, %v1938_v17  ;;  %v1956_v46 = vsel %vm485_vm0, %v6132_v41, %v6131_v39  ;;  %v6148_v56 = vld [vmem:[%s12712_s0 + $0x305] ss:$16 sm:%s2031_s6]   ;;  %s2164_s26 = smov 48  ;;  %s2205_s6 = smov 12 }
  0xa1   :  { %v6122_v20 = vld [vmem:[%s12712_s0 + $0x68e] ss:$16 sm:%s1907_s2]   ;;  %1944 = vrot.lane.b32.xlu1 %v1943_v19, %s6934_s23  ;;  %v1961_v48 = vsel %vm490_vm1, %v6133_v43, %v1956_v46  ;;  %v2034_v62 = vsel %vm495_vm2, %v6148_v56, %v2029_v58  ;;  %s8185_s2 = smov 12 }
  0xa2   :  { %v6123_v21 = vld [vmem:[%s12712_s0 + $0x68e] ss:$16 sm:%s1912_s3]   ;;  %v1910_v25 = vsel %vm485_vm0, %v6122_v20, %v6121_v18  ;;  %v1966_v52 = vsel %vm495_vm2, %v6134_v47, %v1961_v48  ;;  %v6140_v59 = vld [vmem:[%s12712_s0 + $0x205] ss:$16 sm:%s1995_s17]   ;;  %s2064_s3 = smov 3  ;;  %s8565_s17 = smov 12 }
  0xa3   :  { %v6124_v26 = vld [vmem:[%s12712_s0 + $0x68e] ss:$16 sm:%s1917_s9]   ;;  %v1915_v27 = vsel %vm490_vm1, %v6123_v21, %v1910_v25  ;;  %v6141_v63 = vld [vmem:[%s12712_s0 + $0x205] ss:$16 sm:%s1998_s22]   ;;  %s2072_s9 = smov 48  ;;  %s2159_s22 = smov 12 }
  0xa4   :  { %v7962_v3 = vpop.permute.xlu1 %841   ;;  %v1920_v32 = vsel %vm495_vm2, %v6124_v26, %v1915_v27  ;;  %v6142_v0 = vld [vmem:[%s12712_s0 + $0x205] ss:$16 sm:%s2003_s24]   ;;  %v2001_v2 = vsel %vm485_vm0, %v6141_v63, %v6140_v59  ;;  %v6175_v53 = vld [vmem:[%s12712_s0 + $0x10d] ss:$16 sm:%s2156_s21]   ;;  %s8173_s24 = smov 3  ;;  %s8803_s21 = smov 48 }
  0xa5   :  { %1921 = vrot.lane.b32.xlu0 %v1920_v32, %s6934_s23  ;;  %1989 = vrot.lane.b32.xlu1 %v1988_v40, %s6935_s14  ;;  %v6143_v4 = vld [vmem:[%s12712_s0 + $0x205] ss:$16 sm:%s2008_s29]   ;;  %v2006_v5 = vsel %vm490_vm1, %v6142_v0, %v2001_v2  ;;  %s2113_s29 = smov 12  ;;  %s2118_s23 = smov 48 }
  0xa6   :  { %v6155_v7 = vld [vmem:[%s12712_s0 + $0x505] ss:$16 sm:%s2064_s3]   ;;  %v2011_v9 = vsel %vm495_vm2, %v6143_v4, %v2006_v5  ;;  %s2133_s3 = smov 3  ;;  %v6176_v55 = vld [vmem:[%s12712_s0 + $0x10d] ss:$16 sm:%s2159_s22]   ;;  %s8746_s22 = smov 12 }
  0xa7   :  { %v6156_v8 = vld [vmem:[%s12712_s0 + $0x505] ss:$16 sm:%s2067_s4]   ;;  %s2136_s4 = smov 12  ;;  %v2162_v58 = vsel %vm485_vm0, %v6176_v55, %v6175_v53  ;;  %v6177_v59 = vld [vmem:[%s12712_s0 + $0x10d] ss:$16 sm:%s2164_s26]   ;;  %s8292_s26 = smov 12 }
  0xa8   :  { %v7984_v16 = vpop.permute.xlu0 %818   ;;  %v7998_v23 = vpop.permute.xlu1 %887   ;;  %v2070_v10 = vsel %vm485_vm0, %v6156_v8, %v6155_v7  ;;  %v6157_v11 = vld [vmem:[%s12712_s0 + $0x505] ss:$16 sm:%s2072_s9]   ;;  %s2087_s9 = smov 3  ;;  %v2167_v0 = vsel %vm490_vm1, %v6177_v59, %v2162_v58  ;;  %v6170_v2 = vld [vmem:[%s12712_s0 + $0xd] ss:$16 sm:%s2133_s3]   ;;  %s8187_s3 = smov 48 }
  0xa9   :  { %1967 = vrot.lane.b32.xlu0 %v1966_v52, %s6935_s14  ;;  %2035 = vrot.lane.b32.xlu1 %v2034_v62, %s6935_s14  ;;  %v6158_v13 = vld [vmem:[%s12712_s0 + $0x505] ss:$16 sm:%s2077_s10]   ;;  %v2075_v17 = vsel %vm490_vm1, %v6157_v11, %v2070_v10  ;;  %s2090_s10 = smov 12 }
  0xaa   :  { %v6150_v18 = vld [vmem:[%s12712_s0 + $0x405] ss:$16 sm:%s2041_s13]   ;;  %v2080_v19 = vsel %vm495_vm2, %v6158_v13, %v2075_v17  ;;  %s2202_s13 = smov 3  ;;  %v6178_v62 = vld [vmem:[%s12712_s0 + $0x10d] ss:$16 sm:%s2169_s27]   ;;  %s8761_s27 = smov 192 }
  0xab   :  { %v6151_v20 = vld [vmem:[%s12712_s0 + $0x405] ss:$16 sm:%s2044_s18]   ;;  %v5645_v4 = vld [vmem:[%s12712_s0 + $0x100] ss:$8 sm:$0xf]   ;;  %v2172_v5 = vsel %vm495_vm2, %v6178_v62, %v2167_v0  ;;  %s8400_s18 = smov 192 }
  0xac   :  { %v8020_v36 = vpop.permute.xlu0 %864   ;;  %v8034_v45 = vpop.permute.xlu1 %933   ;;  %v6152_v21 = vld [vmem:[%s12712_s0 + $0x405] ss:$16 sm:%s2049_s19]   ;;  %v2047_v26 = vsel %vm485_vm0, %v6151_v20, %v6150_v18  ;;  %s2210_s19 = smov 48  ;;  %v6171_v7 = vld [vmem:[%s12712_s0 + $0xd] ss:$16 sm:%s2136_s4]   ;;  %s8535_s4 = smov 48 }
  0xad   :  { %2012 = vrot.lane.b32.xlu0 %v2011_v9, %s6935_s14  ;;  %2081 = vrot.lane.b32.xlu1 %v2080_v19, %s6935_s14  ;;  %v6153_v27 = vld [vmem:[%s12712_s0 + $0x405] ss:$16 sm:%s2054_s25]   ;;  %v2052_v29 = vsel %vm490_vm1, %v6152_v21, %v2047_v26  ;;  %v2139_v10 = vsel %vm485_vm0, %v6171_v7, %v6170_v2  ;;  %s8580_s25 = smov 192 }
  0xae   :  { %v6165_v30 = vld [vmem:[%s12712_s0 + $0x705] ss:$16 sm:%s2110_s28]   ;;  %v2057_v33 = vsel %vm495_vm2, %v6153_v27, %v2052_v29  ;;  %v6172_v8 = vld [vmem:[%s12712_s0 + $0xd] ss:$16 sm:%s2141_s7]   ;;  %s8470_s28 = smov 12  ;;  %s8715_s7 = smov 48 }
  0xaf   :  { %v6166_v32 = vld [vmem:[%s12712_s0 + $0x705] ss:$16 sm:%s2113_s29]   ;;  %v6173_v11 = vld [vmem:[%s12712_s0 + $0xd] ss:$16 sm:%s8149_s8]   ;;  %v2144_v17 = vsel %vm490_vm1, %v6172_v8, %v2139_v10  ;;  %s8359_s29 = smov 48  ;;  %s8663_s8 = smov 192 }
  0xb0   :  { %v8056_v57 = vpop.permute.xlu0 %910   ;;  %v8070_v1 = vpop.permute.xlu1 %979   ;;  %v2116_v34 = vsel %vm485_vm0, %v6166_v32, %v6165_v30  ;;  %v6167_v35 = vld [vmem:[%s12712_s0 + $0x705] ss:$16 sm:%s2118_s23]   ;;  %v5646_v13 = vld [vmem:[%s12712_s0 + $0x100] ss:$8 sm:$0xf0]   ;;  %v2149_v21 = vsel %vm495_vm2, %v6173_v11, %v2144_v17  ;;  %s8485_s23 = smov 192 }
  0xb1   :  { %v6168_v37 = vld [vmem:[%s12712_s0 + $0x705] ss:$16 sm:%s2123_s5]   ;;  %2058 = vrot.lane.b32.xlu0 %v2057_v33, %s6935_s14  ;;  %v2121_v40 = vsel %vm490_vm1, %v6167_v35, %v2116_v34  ;;  %s8197_s5 = smov 192  ;;  %v64_v20 = vsel %vm4_vm3, %v5646_v13, %v5645_v4  ;;  %v5651_v34 = vld [vmem:[%s12712_s0 + $0x140] ss:$8 sm:$0xf]  }
  0xb2   :  { %v6160_v41 = vld [vmem:[%s12712_s0 + $0x605] ss:$16 sm:%s2087_s9]   ;;  %v2126_v43 = vsel %vm495_vm2, %v6168_v37, %v2121_v40  ;;  %v6185_v18 = vld [vmem:[%s12712_s0 + $0x30d] ss:$16 sm:%s2202_s13]   ;;  %s8209_s13 = smov 3  ;;  %s9731_s9 = smov 12 }
  0xb3   :  { %v6161_v46 = vld [vmem:[%s12712_s0 + $0x605] ss:$16 sm:%s2090_s10]   ;;  %2127 = vrot.lane.b32.xlu1 %v2126_v43, %s6935_s14  ;;  %5647 = vst.msk [vmem:[%s12713_s1 + $0x20] ss:$8 sm:$0x3] %vm6_vm4, %v64_v20   ;;  %s8948_s10 = smov 192 }
  0xb4   :  { %v8092_v15 = vpop.permute.xlu0 %956   ;;  %v6162_v47 = vld [vmem:[%s12712_s0 + $0x605] ss:$16 sm:%s2095_s15]   ;;  %v2093_v50 = vsel %vm485_vm0, %v6161_v46, %v6160_v41  ;;  %v6186_v19 = vld [vmem:[%s12712_s0 + $0x30d] ss:$16 sm:%s2205_s6]   ;;  %s8211_s6 = smov 12  ;;  %s9168_s15 = smov 12 }
  0xb5   :  { %v8106_v25 = vpop.permute.xlu1 %1025   ;;  %v6163_v51 = vld [vmem:[%s12712_s0 + $0x605] ss:$16 sm:%s2100_s16]   ;;  %v2098_v52 = vsel %vm490_vm1, %v6162_v47, %v2093_v50  ;;  %v2208_v26 = vsel %vm485_vm0, %v6186_v19, %v6185_v18  ;;  %v6187_v27 = vld [vmem:[%s12712_s0 + $0x30d] ss:$16 sm:%s2210_s19]   ;;  %s8222_s19 = smov 48  ;;  %s8900_s16 = smov 48 }
  0xb6   :  { %v2103_v56 = vsel %vm495_vm2, %v6163_v51, %v2098_v52  ;;  %v6188_v29 = vld [vmem:[%s12712_s0 + $0x30d] ss:$16 sm:%s2215_s20]   ;;  %s8224_s20 = smov 192  ;;  %5648 = vst.msk [vmem:[%s12713_s1 + $0x11] ss:$8 sm:$0xc] %vm6_vm4, %v64_v20   ;;  %v2213_v32 = vsel %vm490_vm1, %v6187_v27, %v2208_v26 }
  0xb7   :  { %2104 = vrot.lane.b32.xlu0 %v2103_v56, %s6935_s14  ;;  %2173 = vrot.lane.b32.xlu1 %v2172_v5, %s6935_s14  ;;  %5649 = vst.msk [vmem:[%s12713_s1 + $0x2] ss:$8 sm:$0x30] %vm6_vm4, %v64_v20   ;;  %5650 = vst.msk [vmem:[%s12713_s1 - $0xd] ss:$8 sm:$0xc0] %vm6_vm4, %v64_v20   ;;  %v2218_v35 = vsel %vm495_vm2, %v6188_v29, %v2213_v32 }
  0xb8   :  { %v6180_v33 = vld [vmem:[%s12712_s0 + $0x20d] ss:$16 sm:%s8173_s24]   ;;  %s8250_s24 = smov 3  ;;  %v5652_v47 = vld [vmem:[%s12712_s0 + $0x140] ss:$8 sm:$0xf0]  }
  0xb9   :  { %v8128_v39 = vpop.permute.xlu0 %1002   ;;  %v8142_v48 = vpop.permute.xlu1 %1071   ;;  %v6181_v37 = vld [vmem:[%s12712_s0 + $0x20d] ss:$16 sm:%s8185_s2]   ;;  %v79_v53 = vsel %vm4_vm3, %v5652_v47, %v5651_v34  ;;  %v3_v11 = vld [vmem:[%s12712_s0] ss:$8 sm:$0xf0]   ;;  %s8442_s2 = smov 48 }
  0xba   :  { %v6182_v40 = vld [vmem:[%s12712_s0 + $0x20d] ss:$16 sm:%s8187_s3]   ;;  %s8264_s3 = smov 12  ;;  %v2185_v43 = vsel %vm485_vm0, %v6181_v37, %v6180_v33  ;;  %5653 = vst.msk [vmem:[%s12713_s1 + $0x24] ss:$8 sm:$0x3] %vm6_vm4, %v79_v53  }
  0xbb   :  { %2150 = vrot.lane.b32.xlu0 %v2149_v21, %s6935_s14  ;;  %2219 = vrot.lane.b32.xlu1 %v2218_v35, %s6935_s14  ;;  %v6183_v46 = vld [vmem:[%s12712_s0 + $0x20d] ss:$16 sm:%s8197_s5]   ;;  %s8276_s5 = smov 192  ;;  %v2190_v50 = vsel %vm490_vm1, %v6182_v40, %v2185_v43 }
  0xbc   :  { %v6195_v51 = vld [vmem:[%s12712_s0 + $0x50d] ss:$16 sm:%s8209_s13]   ;;  %v2195_v55 = vsel %vm495_vm2, %v6183_v46, %v2190_v50  ;;  %5654 = vst.msk [vmem:[%s12713_s1 + $0x15] ss:$8 sm:$0xc] %vm6_vm4, %v79_v53   ;;  %s9086_s13 = smov 48 }
  0xbd   :  { %v8166_v63 = vpop.permute.xlu0 %1048   ;;  %v8189_v9 = vpop.permute.xlu1 %1117   ;;  %v6196_v52 = vld [vmem:[%s12712_s0 + $0x50d] ss:$16 sm:%s8211_s6]   ;;  %s8290_s6 = smov 3  ;;  %5655 = vst.msk [vmem:[%s12713_s1 + $0x6] ss:$8 sm:$0x30] %vm6_vm4, %v79_v53  }
  0xbe   :  { %v2254_v56 = vsel %vm485_vm0, %v6196_v52, %v6195_v51  ;;  %v6197_v58 = vld [vmem:[%s12712_s0 + $0x50d] ss:$16 sm:%s8222_s19]   ;;  %5656 = vst.msk [vmem:[%s12713_s1 - $0x9] ss:$8 sm:$0xc0] %vm6_vm4, %v79_v53   ;;  %s8648_s19 = smov 12 }
  0xbf   :  { %v6198_v59 = vld [vmem:[%s12712_s0 + $0x50d] ss:$16 sm:%s8224_s20]   ;;  %s8305_s20 = smov 48  ;;  %2196 = vrot.lane.b32.xlu0 %v2195_v55, %s6935_s14  ;;  %v2259_v0 = vsel %vm490_vm1, %v6197_v58, %v2254_v56  ;;  %5821 = vst.msk [vmem:[%s12713_s1 + $0x20] sm:$0xff] %vm499_vm5, %v7768_v38  }
  0xc0   :  { %v6190_v2 = vld [vmem:[%s12712_s0 + $0x40d] ss:$16 sm:%s8250_s24]   ;;  %s8333_s24 = smov 3  ;;  %5861 = vst.msk [vmem:[%s12713_s1 + $0x28] sm:$0xff] %vm499_vm5, %v7854_v12   ;;  %v2264_v12 = vsel %vm495_vm2, %v6198_v59, %v2259_v0 }
  0xc1   :  { %v8226_v30 = vpop.permute.xlu0 %1094   ;;  %v8268_v41 = vpop.permute.xlu1 %1163   ;;  %v2_v38 = vld [vmem:[%s12712_s0] ss:$8 sm:$0xf]   ;;  %v6191_v4 = vld [vmem:[%s12712_s0 + $0x40d] ss:$16 sm:%s8264_s3]   ;;  %2265 = vrot.lane.b32.xlu1 %v2264_v12, %s6935_s14  ;;  %s9664_s3 = smov 3 }
  0xc2   :  { %v6192_v5 = vld [vmem:[%s12712_s0 + $0x40d] ss:$16 sm:%s8266_s12]   ;;  %s8357_s12 = smov 12  ;;  %v2231_v8 = vsel %vm485_vm0, %v6191_v4, %v6190_v2  ;;  %v5_v19 = vsel %vm4_vm3, %v3_v11, %v2_v38  ;;  %v5627_v34 = vld [vmem:[%s12712_s0 + $0x40] ss:$8 sm:$0xf]  }
  0xc3   :  { %v6193_v10 = vld [vmem:[%s12712_s0 + $0x40d] ss:$16 sm:%s8276_s5]   ;;  %s8369_s5 = smov 192  ;;  %v2236_v13 = vsel %vm490_vm1, %v6192_v5, %v2231_v8  ;;  %7 = vst.msk [vmem:[%s12713_s1] ss:$8 sm:$0x3] %vm6_vm4, %v5_v19  }
  0xc4   :  { %v6205_v17 = vld [vmem:[%s12712_s0 + $0x70d] ss:$16 sm:%s8290_s6]   ;;  %v2241_v20 = vsel %vm495_vm2, %v6193_v10, %v2236_v13  ;;  %5624 = vst.msk [vmem:[%s12713_s1 - $0xf] ss:$8 sm:$0xc] %vm6_vm4, %v5_v19   ;;  %s8846_s6 = smov 192 }
  0xc5   :  { %v8309_v62 = vpop.permute.xlu0 %1140   ;;  %v6206_v18 = vld [vmem:[%s12712_s0 + $0x70d] ss:$16 sm:%s8292_s26]   ;;  %s8383_s26 = smov 3  ;;  %5625 = vst.msk [vmem:[%s12713_s1 - $0x1e] ss:$8 sm:$0x30] %vm6_vm4, %v5_v19   ;;  %2242 = vrot.lane.b32.xlu0 %v2241_v20, %s6935_s14 }
  0xc6   :  { %v2300_v21 = vsel %vm485_vm0, %v6206_v18, %v6205_v17  ;;  %v6207_v26 = vld [vmem:[%s12712_s0 + $0x70d] ss:$16 sm:%s8305_s20]   ;;  %5626 = vst.msk [vmem:[%s12713_s1 - $0x2d] ss:$8 sm:$0xc0] %vm6_vm4, %v5_v19   ;;  %s8622_s20 = smov 48 }
  0xc7   :  { %v6208_v27 = vld [vmem:[%s12712_s0 + $0x70d] ss:$16 sm:%s8307_s30]   ;;  %s8398_s30 = smov 48  ;;  %v2305_v32 = vsel %vm490_vm1, %v6207_v26, %v2300_v21  ;;  %v5628_v50 = vld [vmem:[%s12712_s0 + $0x40] ss:$8 sm:$0xf0]  }
  0xc8   :  { %v6200_v33 = vld [vmem:[%s12712_s0 + $0x60d] ss:$16 sm:%s8333_s24]   ;;  %s8426_s24 = smov 3  ;;  %v2310_v35 = vsel %vm495_vm2, %v6208_v27, %v2305_v32  ;;  %v6215_v52 = vld [vmem:[%s12712_s0 + $0x185] ss:$16 sm:%s8383_s26]   ;;  %v19_v55 = vsel %vm4_vm3, %v5628_v50, %v5627_v34  ;;  %s6936_s26 = smov 64  }
  0xc9   :  { %v8361_v7 = vpop.permute.xlu1 %1209   ;;  %v6201_v37 = vld [vmem:[%s12712_s0 + $0x60d] ss:$16 sm:%s8357_s12]   ;;  %2311 = vrot.lane.b32.xlu1 %v2310_v35, %s6935_s14  ;;  %5629 = vst.msk [vmem:[%s12713_s1 + $0x4] ss:$8 sm:$0x3] %vm6_vm4, %v19_v55   ;;  %s9323_s12 = smov 3 }
  0xca   :  { %v6202_v40 = vld [vmem:[%s12712_s0 + $0x60d] ss:$16 sm:%s8359_s29]   ;;  %s8440_s29 = smov 12  ;;  %v2277_v46 = vsel %vm485_vm0, %v6201_v37, %v6200_v33  ;;  %v6216_v53 = vld [vmem:[%s12712_s0 + $0x185] ss:$16 sm:%s8385_s11]   ;;  %s8468_s11 = smov 3 }
  0xcb   :  { %v6203_v47 = vld [vmem:[%s12712_s0 + $0x60d] ss:$16 sm:%s8369_s5]   ;;  %s8450_s5 = smov 192  ;;  %v2282_v51 = vsel %vm490_vm1, %v6202_v40, %v2277_v46  ;;  %v2346_v58 = vsel %vm485_vm0, %v6216_v53, %v6215_v52  ;;  %v6217_v59 = vld [vmem:[%s12712_s0 + $0x185] ss:$16 sm:%s8398_s30]   ;;  %s8933_s30 = smov 12 }
  0xcc   :  { %v2287_v56 = vsel %vm495_vm2, %v6203_v47, %v2282_v51  ;;  %v6218_v0 = vld [vmem:[%s12712_s0 + $0x185] ss:$16 sm:%s8400_s18]   ;;  %s8483_s18 = smov 48  ;;  %5630 = vst.msk [vmem:[%s12713_s1 - $0xb] ss:$8 sm:$0xc] %vm6_vm4, %v19_v55   ;;  %v2351_v38 = vsel %vm490_vm1, %v6217_v59, %v2346_v58 }
  0xcd   :  { %v8402_v29 = vpop.permute.xlu0 %1186   ;;  %v1255_v43 = vpop.permute.xlu1 %1254   ;;  %5631 = vst.msk [vmem:[%s12713_s1 - $0x1a] ss:$8 sm:$0x30] %vm6_vm4, %v19_v55   ;;  %5632 = vst.msk [vmem:[%s12713_s1 - $0x29] ss:$8 sm:$0xc0] %vm6_vm4, %v19_v55   ;;  %2288 = vrot.lane.b32.xlu0 %v2287_v56, %s6935_s14 }
  0xce   :  { %5980 = vst.msk [vmem:[%s12713_s1 + $0x20] sm:$0xff] %vm1234_vm6, %v1255_v43   ;;  %v6210_v12 = vld [vmem:[%s12712_s0 + $0x85] ss:$16 sm:%s8426_s24]   ;;  %s8509_s24 = smov 3 }
  0xcf   :  { %500 = vst.msk [vmem:[%s12713_s1] sm:$0xff] %vm499_vm5, %v7732_v22   ;;  %5856 = vst.msk [vmem:[%s12713_s1 + $0x8] sm:$0xff] %vm499_vm5, %v7876_v24   ;;  %v5693_v22 = vld [vmem:[%s12712_s0 + $0x300] ss:$8 sm:$0xf]   ;;  %v2356_v24 = vsel %vm495_vm2, %v6218_v0, %v2351_v38 }
  0xd0   :  { %v6211_v4 = vld [vmem:[%s12712_s0 + $0x85] ss:$16 sm:%s8440_s29]   ;;  %2357 = vrot.lane.b32.xlu1 %v2356_v24, %s6935_s14  ;;  %v5694_v13 = vld [vmem:[%s12712_s0 + $0x300] ss:$8 sm:$0xf0]   ;;  %s9103_s29 = smov 192 }
  0xd1   :  { %v1233_v2 = vpop.permute.xlu0 %1232   ;;  %v6212_v5 = vld [vmem:[%s12712_s0 + $0x85] ss:$16 sm:%s8442_s2]   ;;  %s8533_s2 = smov 12  ;;  %v8541_v8 = vpop.permute.xlu1 %1300   ;;  %v2323_v10 = vsel %vm485_vm0, %v6211_v4, %v6210_v12  ;;  %v184_v20 = vsel %vm4_vm3, %v5694_v13, %v5693_v22  ;;  %v5699_v37 = vld [vmem:[%s12712_s0 + $0x340] ss:$8 sm:$0xf]  }
  0xd2   :  { %1235 = vst.msk [vmem:[%s12713_s1] sm:$0xff] %vm1234_vm6, %v1233_v2   ;;  %v6213_v11 = vld [vmem:[%s12712_s0 + $0x85] ss:$16 sm:%s8450_s5]   ;;  %s8549_s5 = smov 192  ;;  %v2328_v17 = vsel %vm490_vm1, %v6212_v5, %v2323_v10 }
  0xd3   :  { %v6225_v18 = vld [vmem:[%s12712_s0 + $0x385] ss:$16 sm:%s8468_s11]   ;;  %v2333_v21 = vsel %vm495_vm2, %v6213_v11, %v2328_v17  ;;  %5695 = vst.msk [vmem:[%s12713_s1 + $0x60] ss:$8 sm:$0x3] %vm6_vm4, %v184_v20   ;;  %s9017_s11 = smov 12 }
  0xd4   :  { %v6226_v19 = vld [vmem:[%s12712_s0 + $0x385] ss:$16 sm:%s8470_s28]   ;;  %s8563_s28 = smov 3  ;;  %5696 = vst.msk [vmem:[%s12713_s1 + $0x51] ss:$8 sm:$0xc] %vm6_vm4, %v184_v20   ;;  %2334 = vrot.lane.b32.xlu0 %v2333_v21, %s6935_s14 }
  0xd5   :  { %v2392_v26 = vsel %vm485_vm0, %v6226_v19, %v6225_v18  ;;  %v6227_v27 = vld [vmem:[%s12712_s0 + $0x385] ss:$16 sm:%s8483_s18]   ;;  %5697 = vst.msk [vmem:[%s12713_s1 + $0x42] ss:$8 sm:$0x30] %vm6_vm4, %v184_v20   ;;  %v8598_v33 = vpop.permute.xlu0 %1277   ;;  %v8624_v47 = vpop.permute.xlu1 %1346   ;;  %s2779_s18 = smov 12 }
  0xd6   :  { %v6228_v32 = vld [vmem:[%s12712_s0 + $0x385] ss:$16 sm:%s8485_s23]   ;;  %s8578_s23 = smov 48  ;;  %5698 = vst.msk [vmem:[%s12713_s1 + $0x33] ss:$8 sm:$0xc0] %vm6_vm4, %v184_v20   ;;  %v2397_v34 = vsel %vm490_vm1, %v6227_v27, %v2392_v26 }
  0xd7   :  { %v6220_v35 = vld [vmem:[%s12712_s0 + $0x285] ss:$16 sm:%s8509_s24]   ;;  %s8606_s24 = smov 3  ;;  %v2402_v40 = vsel %vm495_vm2, %v6228_v32, %v2397_v34  ;;  %v5700_v52 = vld [vmem:[%s12712_s0 + $0x340] ss:$8 sm:$0xf0]  }
  0xd8   :  { %v6221_v43 = vld [vmem:[%s12712_s0 + $0x285] ss:$16 sm:%s8533_s2]   ;;  %2403 = vrot.lane.b32.xlu1 %v2402_v40, %s6935_s14  ;;  %v199_v58 = vsel %vm4_vm3, %v5700_v52, %v5699_v37  ;;  %v5670_v13 = vld [vmem:[%s12712_s0 + $0x200] ss:$8 sm:$0xf0]   ;;  %s9068_s2 = smov 3 }
  0xd9   :  { %v6222_v46 = vld [vmem:[%s12712_s0 + $0x285] ss:$16 sm:%s8535_s4]   ;;  %s8620_s4 = smov 12  ;;  %v2369_v50 = vsel %vm485_vm0, %v6221_v43, %v6220_v35  ;;  %5701 = vst.msk [vmem:[%s12713_s1 + $0x64] ss:$8 sm:$0x3] %vm6_vm4, %v199_v58   ;;  %v8681_v12 = vpop.permute.xlu0 %1323  }
  0xda   :  { %v6223_v51 = vld [vmem:[%s12712_s0 + $0x285] ss:$16 sm:%s8549_s5]   ;;  %s8632_s5 = smov 192  ;;  %v2374_v53 = vsel %vm490_vm1, %v6222_v46, %v2369_v50  ;;  %5702 = vst.msk [vmem:[%s12713_s1 + $0x55] ss:$8 sm:$0xc] %vm6_vm4, %v199_v58  }
  0xdb   :  { %v6235_v55 = vld [vmem:[%s12712_s0 + $0x585] ss:$16 sm:%s8563_s28]   ;;  %v2379_v59 = vsel %vm495_vm2, %v6223_v51, %v2374_v53  ;;  %5703 = vst.msk [vmem:[%s12713_s1 + $0x46] ss:$8 sm:$0x30] %vm6_vm4, %v199_v58   ;;  %s9605_s28 = smov 48 }
  0xdc   :  { %v6236_v56 = vld [vmem:[%s12712_s0 + $0x585] ss:$16 sm:%s8565_s17]   ;;  %s8646_s17 = smov 3  ;;  %5704 = vst.msk [vmem:[%s12713_s1 + $0x37] ss:$8 sm:$0xc0] %vm6_vm4, %v199_v58   ;;  %2380 = vrot.lane.b32.xlu0 %v2379_v59, %s6935_s14 }
  0xdd   :  { %v2438_v0 = vsel %vm485_vm0, %v6236_v56, %v6235_v55  ;;  %v6237_v2 = vld [vmem:[%s12712_s0 + $0x585] ss:$16 sm:%s8578_s23]   ;;  %5831 = vst.msk [vmem:[%s12713_s1 + $0x60] sm:$0xff] %vm499_vm5, %v7746_v28   ;;  %5871 = vst.msk [vmem:[%s12713_s1 + $0x68] sm:$0xff] %vm499_vm5, %v7890_v31   ;;  %s8831_s23 = smov 12 }
  0xde   :  { %v6238_v38 = vld [vmem:[%s12712_s0 + $0x585] ss:$16 sm:%s8580_s25]   ;;  %s8661_s25 = smov 48  ;;  %v2443_v22 = vsel %vm490_vm1, %v6237_v2, %v2438_v0  ;;  %v5669_v28 = vld [vmem:[%s12712_s0 + $0x200] ss:$8 sm:$0xf]   ;;  %v8779_v34 = vpop.permute.xlu0 %1369  }
  0xdf   :  { %v6230_v24 = vld [vmem:[%s12712_s0 + $0x485] ss:$16 sm:%s8606_s24]   ;;  %s8689_s24 = smov 3  ;;  %v2448_v31 = vsel %vm495_vm2, %v6238_v38, %v2443_v22  ;;  %5990 = vst.msk [vmem:[%s12713_s1 + $0x60] sm:$0xff] %vm1234_vm6, %v8541_v8   ;;  %v8722_v8 = vpop.permute.xlu1 %1392   ;;  %v124_v20 = vsel %vm4_vm3, %v5670_v13, %v5669_v28 }
  0xe0   :  { %v6231_v4 = vld [vmem:[%s12712_s0 + $0x485] ss:$16 sm:%s8620_s4]   ;;  %2449 = vrot.lane.b32.xlu1 %v2448_v31, %s6935_s14  ;;  %5671 = vst.msk [vmem:[%s12713_s1 + $0x40] ss:$8 sm:$0x3] %vm6_vm4, %v124_v20   ;;  %s8992_s4 = smov 48 }
  0xe1   :  { %v6232_v5 = vld [vmem:[%s12712_s0 + $0x485] ss:$16 sm:%s8622_s20]   ;;  %s8713_s20 = smov 12  ;;  %v2415_v10 = vsel %vm485_vm0, %v6231_v4, %v6230_v24  ;;  %5672 = vst.msk [vmem:[%s12713_s1 + $0x31] ss:$8 sm:$0xc] %vm6_vm4, %v124_v20  }
  0xe2   :  { %v6233_v11 = vld [vmem:[%s12712_s0 + $0x485] ss:$16 sm:%s8632_s5]   ;;  %s8730_s5 = smov 192  ;;  %v2420_v17 = vsel %vm490_vm1, %v6232_v5, %v2415_v10  ;;  %5673 = vst.msk [vmem:[%s12713_s1 + $0x22] ss:$8 sm:$0x30] %vm6_vm4, %v124_v20   ;;  %v1416_v28 = vpop.permute.xlu0 %1415  }
  0xe3   :  { %v6245_v18 = vld [vmem:[%s12712_s0 + $0x785] ss:$16 sm:%s8646_s17]   ;;  %v2425_v21 = vsel %vm495_vm2, %v6233_v11, %v2420_v17  ;;  %5674 = vst.msk [vmem:[%s12713_s1 + $0x13] ss:$8 sm:$0xc0] %vm6_vm4, %v124_v20   ;;  %v1439_v51 = vpop.permute.xlu1 %1438   ;;  %s3065_s17 = smov 192 }
  0xe4   :  { %v6246_v19 = vld [vmem:[%s12712_s0 + $0x785] ss:$16 sm:%s8648_s19]   ;;  %s8744_s19 = smov 3  ;;  %2426 = vrot.lane.b32.xlu0 %v2425_v21, %s6935_s14  ;;  %v5675_v40 = vld [vmem:[%s12712_s0 + $0x240] ss:$8 sm:$0xf]  }
  0xe5   :  { %v2484_v26 = vsel %vm485_vm0, %v6246_v19, %v6245_v18  ;;  %v6247_v27 = vld [vmem:[%s12712_s0 + $0x785] ss:$16 sm:%s8661_s25]   ;;  %v5676_v55 = vld [vmem:[%s12712_s0 + $0x240] ss:$8 sm:$0xf0]   ;;  %6020 = vst.msk [vmem:[%s12713_s1 + $0x28] sm:$0xff] %vm1234_vm6, %v1439_v51  }
  0xe6   :  { %v6248_v32 = vld [vmem:[%s12712_s0 + $0x785] ss:$16 sm:%s8663_s8]   ;;  %s8759_s8 = smov 48  ;;  %v2489_v35 = vsel %vm490_vm1, %v6247_v27, %v2484_v26  ;;  %v6255_v58 = vld [vmem:[%s12712_s0 + $0x18d] ss:$16 sm:%s8744_s19]   ;;  %v139_v0 = vsel %vm4_vm3, %v5676_v55, %v5675_v40  ;;  %s9047_s19 = smov 192 }
  0xe7   :  { %v6240_v37 = vld [vmem:[%s12712_s0 + $0x685] ss:$16 sm:%s8689_s24]   ;;  %s8787_s24 = smov 3  ;;  %v2494_v43 = vsel %vm495_vm2, %v6248_v32, %v2489_v35  ;;  %v6256_v59 = vld [vmem:[%s12712_s0 + $0x18d] ss:$16 sm:%s8746_s22]   ;;  %s8829_s22 = smov 3 }
  0xe8   :  { %v6241_v46 = vld [vmem:[%s12712_s0 + $0x685] ss:$16 sm:%s8713_s20]   ;;  %2495 = vrot.lane.b32.xlu1 %v2494_v43, %s6935_s14  ;;  %v2530_v38 = vsel %vm485_vm0, %v6256_v59, %v6255_v58  ;;  %5677 = vst.msk [vmem:[%s12713_s1 + $0x44] ss:$8 sm:$0x3] %vm6_vm4, %v139_v0   ;;  %s9448_s25 = smov 48 }
  0xe9   :  { %v6242_v50 = vld [vmem:[%s12712_s0 + $0x685] ss:$16 sm:%s8715_s7]   ;;  %s8801_s7 = smov 12  ;;  %v2461_v52 = vsel %vm485_vm0, %v6241_v46, %v6240_v37  ;;  %v6257_v22 = vld [vmem:[%s12712_s0 + $0x18d] ss:$16 sm:%s8759_s8]   ;;  %v1462_v37 = vpop.permute.xlu0 %1461   ;;  %s9790_s8 = smov 48 }
  0xea   :  { %v6243_v53 = vld [vmem:[%s12712_s0 + $0x685] ss:$16 sm:%s8730_s5]   ;;  %s8811_s5 = smov 192  ;;  %v2466_v56 = vsel %vm490_vm1, %v6242_v50, %v2461_v52  ;;  %v6258_v24 = vld [vmem:[%s12712_s0 + $0x18d] ss:$16 sm:%s8761_s27]   ;;  %s8844_s27 = smov 48  ;;  %v2535_v31 = vsel %vm490_vm1, %v6257_v22, %v2530_v38 }
  0xeb   :  { %v2471_v2 = vsel %vm495_vm2, %v6243_v53, %v2466_v56  ;;  %5678 = vst.msk [vmem:[%s12713_s1 + $0x35] ss:$8 sm:$0xc] %vm6_vm4, %v139_v0   ;;  %5679 = vst.msk [vmem:[%s12713_s1 + $0x26] ss:$8 sm:$0x30] %vm6_vm4, %v139_v0  }
  0xec   :  { %5680 = vst.msk [vmem:[%s12713_s1 + $0x17] ss:$8 sm:$0xc0] %vm6_vm4, %v139_v0   ;;  %2472 = vrot.lane.b32.xlu0 %v2471_v2, %s6935_s14  ;;  %v6250_v4 = vld [vmem:[%s12712_s0 + $0x8d] ss:$16 sm:%s8787_s24]   ;;  %s8870_s24 = smov 3 }
  0xed   :  { %5826 = vst.msk [vmem:[%s12713_s1 + $0x40] sm:$0xff] %vm499_vm5, %v7715_v14   ;;  %5866 = vst.msk [vmem:[%s12713_s1 + $0x48] sm:$0xff] %vm499_vm5, %v7912_v42   ;;  %v5741_v14 = vld [vmem:[%s12712_s0 + $0x500] ss:$8 sm:$0xf]   ;;  %v2540_v42 = vsel %vm495_vm2, %v6258_v24, %v2535_v31  ;;  %s9903_s20 = smov 12 }
  0xee   :  { %6015 = vst.msk [vmem:[%s12713_s1 + $0x8] sm:$0xff] %vm1234_vm6, %v1416_v28   ;;  %v6251_v5 = vld [vmem:[%s12712_s0 + $0x8d] ss:$16 sm:%s8801_s7]   ;;  %5985 = vst.msk [vmem:[%s12713_s1 + $0x40] sm:$0xff] %vm1234_vm6, %v8598_v33   ;;  %v1485_v33 = vpop.permute.xlu1 %1484   ;;  %s9746_s7 = smov 48 }
  0xef   :  { %v6252_v10 = vld [vmem:[%s12712_s0 + $0x8d] ss:$16 sm:%s8803_s21]   ;;  %s8898_s21 = smov 12  ;;  %2541 = vrot.lane.b32.xlu1 %v2540_v42, %s6935_s14  ;;  %v2507_v11 = vsel %vm485_vm0, %v6251_v5, %v6250_v4  ;;  %v5742_v17 = vld [vmem:[%s12712_s0 + $0x500] ss:$8 sm:$0xf0]   ;;  %v1508_v4 = vpop.permute.xlu0 %1507  }
  0xf0   :  { %v6253_v13 = vld [vmem:[%s12712_s0 + $0x8d] ss:$16 sm:%s8811_s5]   ;;  %s8913_s5 = smov 192  ;;  %6030 = vst.msk [vmem:[%s12713_s1 + $0x68] sm:$0xff] %vm1234_vm6, %v1485_v33   ;;  %v2512_v18 = vsel %vm490_vm1, %v6252_v10, %v2507_v11  ;;  %v304_v21 = vsel %vm4_vm3, %v5742_v17, %v5741_v14  ;;  %6025 = vst.msk [vmem:[%s12713_s1 + $0x48] sm:$0xff] %vm1234_vm6, %v1462_v37  }
  0xf1   :  { %v6265_v19 = vld [vmem:[%s12712_s0 + $0x38d] ss:$16 sm:%s8829_s22]   ;;  %v2517_v26 = vsel %vm495_vm2, %v6253_v13, %v2512_v18  ;;  %5743 = vst.msk [vmem:[%s12713_s1 + $0xa0] ss:$8 sm:$0x3] %vm6_vm4, %v304_v21   ;;  %s9211_s22 = smov 12 }
  0xf2   :  { %v6266_v20 = vld [vmem:[%s12712_s0 + $0x38d] ss:$16 sm:%s8831_s23]   ;;  %s8931_s23 = smov 3  ;;  %5744 = vst.msk [vmem:[%s12713_s1 + $0x91] ss:$8 sm:$0xc] %vm6_vm4, %v304_v21   ;;  %2518 = vrot.lane.b32.xlu0 %v2517_v26, %s6935_s14  ;;  %v1531_v53 = vpop.permute.xlu1 %1530  }
  0xf3   :  { %v2576_v27 = vsel %vm485_vm0, %v6266_v20, %v6265_v19  ;;  %v6267_v32 = vld [vmem:[%s12712_s0 + $0x38d] ss:$16 sm:%s8844_s27]   ;;  %5745 = vst.msk [vmem:[%s12713_s1 + $0x82] ss:$8 sm:$0x30] %vm6_vm4, %v304_v21   ;;  %s9788_s27 = smov 12 }
  0xf4   :  { %v6268_v35 = vld [vmem:[%s12712_s0 + $0x38d] ss:$16 sm:%s8846_s6]   ;;  %s8946_s6 = smov 48  ;;  %5746 = vst.msk [vmem:[%s12713_s1 + $0x73] ss:$8 sm:$0xc0] %vm6_vm4, %v304_v21   ;;  %v2581_v40 = vsel %vm490_vm1, %v6267_v32, %v2576_v27 }
  0xf5   :  { %v6260_v43 = vld [vmem:[%s12712_s0 + $0x28d] ss:$16 sm:%s8870_s24]   ;;  %s8972_s24 = smov 3  ;;  %v5747_v46 = vld [vmem:[%s12712_s0 + $0x540] ss:$8 sm:$0xf]   ;;  %v2586_v50 = vsel %vm495_vm2, %v6268_v35, %v2581_v40  ;;  %v9141_v35 = vpop.permute.xlu0 %1553  }
  0xf6   :  { %v6261_v51 = vld [vmem:[%s12712_s0 + $0x28d] ss:$16 sm:%s8898_s21]   ;;  %2587 = vrot.lane.b32.xlu1 %v2586_v50, %s6935_s14  ;;  %v5748_v58 = vld [vmem:[%s12712_s0 + $0x540] ss:$8 sm:$0xf0]   ;;  %s9045_s21 = smov 48 }
  0xf7   :  { %v6262_v52 = vld [vmem:[%s12712_s0 + $0x28d] ss:$16 sm:%s8900_s16]   ;;  %s8990_s16 = smov 12  ;;  %v2553_v55 = vsel %vm485_vm0, %v6261_v51, %v6260_v43  ;;  %v319_v38 = vsel %vm4_vm3, %v5748_v58, %v5747_v46  ;;  %v5718_v13 = vld [vmem:[%s12712_s0 + $0x400] ss:$8 sm:$0xf0]  }
  0xf8   :  { %v6263_v56 = vld [vmem:[%s12712_s0 + $0x28d] ss:$16 sm:%s8913_s5]   ;;  %s9000_s5 = smov 192  ;;  %v2558_v59 = vsel %vm490_vm1, %v6262_v52, %v2553_v55  ;;  %5749 = vst.msk [vmem:[%s12713_s1 + $0xa4] ss:$8 sm:$0x3] %vm6_vm4, %v319_v38  }
  0xf9   :  { %v6275_v0 = vld [vmem:[%s12712_s0 + $0x58d] ss:$16 sm:%s8931_s23]   ;;  %v2563_v22 = vsel %vm495_vm2, %v6263_v56, %v2558_v59  ;;  %5750 = vst.msk [vmem:[%s12713_s1 + $0x95] ss:$8 sm:$0xc] %vm6_vm4, %v319_v38   ;;  %s2730_s23 = smov 3 }
  0xfa   :  { %v6276_v2 = vld [vmem:[%s12712_s0 + $0x58d] ss:$16 sm:%s8933_s30]   ;;  %s9015_s30 = smov 3  ;;  %5751 = vst.msk [vmem:[%s12713_s1 + $0x86] ss:$8 sm:$0x30] %vm6_vm4, %v319_v38   ;;  %2564 = vrot.lane.b32.xlu0 %v2563_v22, %s6935_s14 }
  0xfb   :  { %v2622_v24 = vsel %vm485_vm0, %v6276_v2, %v6275_v0  ;;  %v6277_v28 = vld [vmem:[%s12712_s0 + $0x58d] ss:$16 sm:%s8946_s6]   ;;  %5752 = vst.msk [vmem:[%s12713_s1 + $0x77] ss:$8 sm:$0xc0] %vm6_vm4, %v319_v38   ;;  %v9236_v38 = vpop.permute.xlu0 %1599   ;;  %s9435_s6 = smov 3 }
  0xfc   :  { %v6278_v31 = vld [vmem:[%s12712_s0 + $0x58d] ss:$16 sm:%s8948_s10]   ;;  %v2627_v14 = vsel %vm490_vm1, %v6277_v28, %v2622_v24  ;;  %5841 = vst.msk [vmem:[%s12713_s1 + $0xa0] sm:$0xff] %vm499_vm5, %v7782_v44   ;;  %5881 = vst.msk [vmem:[%s12713_s1 + $0xa8] sm:$0xff] %vm499_vm5, %v7926_v49   ;;  %s9084_s10 = smov 12 }
  0xfd   :  { %v6270_v42 = vld [vmem:[%s12712_s0 + $0x48d] ss:$16 sm:%s8972_s24]   ;;  %v5717_v44 = vld [vmem:[%s12712_s0 + $0x400] ss:$8 sm:$0xf]   ;;  %v2632_v49 = vsel %vm495_vm2, %v6278_v31, %v2627_v14  ;;  %6000 = vst.msk [vmem:[%s12713_s1 + $0xa0] sm:$0xff] %vm1234_vm6, %v8624_v47   ;;  %v9092_v47 = vpop.permute.xlu1 %1576  }
  0xfe   :  { %v6271_v5 = vld [vmem:[%s12712_s0 + $0x48d] ss:$16 sm:%s8990_s16]   ;;  %6040 = vst.msk [vmem:[%s12713_s1 + $0xa8] sm:$0xff] %vm1234_vm6, %v1531_v53   ;;  %2633 = vrot.lane.b32.xlu1 %v2632_v49, %s6935_s14  ;;  %v244_v18 = vsel %vm4_vm3, %v5718_v13, %v5717_v44  ;;  %s9418_s24 = smov 12  ;;  %s2812_s16 = smov 192 }
  0xff   :  { %v6272_v10 = vld [vmem:[%s12712_s0 + $0x48d] ss:$16 sm:%s8992_s4]   ;;  %v2599_v33 = vsel %vm485_vm0, %v6271_v5, %v6270_v42  ;;  %v5723_v19 = vld [vmem:[%s12712_s0 + $0x440] ss:$8 sm:$0xf]   ;;  %s9759_s4 = smov 3 }
 0x100   :  { %v6273_v11 = vld [vmem:[%s12712_s0 + $0x48d] ss:$16 sm:%s9000_s5]   ;;  %v2604_v17 = vsel %vm490_vm1, %v6272_v10, %v2599_v33  ;;  %v5724_v20 = vld [vmem:[%s12712_s0 + $0x440] ss:$8 sm:$0xf0]   ;;  %v9379_v33 = vpop.permute.xlu0 %1645   ;;  %s3180_s5 = smov 192 }
 0x101   :  { %v2609_v21 = vsel %vm495_vm2, %v6273_v11, %v2604_v17  ;;  %5719 = vst.msk [vmem:[%s12713_s1 + $0x80] ss:$8 sm:$0x3] %vm6_vm4, %v244_v18   ;;  %5720 = vst.msk [vmem:[%s12713_s1 + $0x71] ss:$8 sm:$0xc] %vm6_vm4, %v244_v18   ;;  %v259_v26 = vsel %vm4_vm3, %v5724_v20, %v5723_v19  ;;  %v9193_v50 = vpop.permute.xlu1 %1622  }
 0x102   :  { %5721 = vst.msk [vmem:[%s12713_s1 + $0x62] ss:$8 sm:$0x30] %vm6_vm4, %v244_v18   ;;  %5722 = vst.msk [vmem:[%s12713_s1 + $0x53] ss:$8 sm:$0xc0] %vm6_vm4, %v244_v18   ;;  %2610 = vrot.lane.b32.xlu0 %v2609_v21, %s6935_s14 }
 0x103   :  { %v6285_v27 = vld [vmem:[%s12712_s0 + $0x78d] ss:$16 sm:%s9015_s30]   ;;  %5725 = vst.msk [vmem:[%s12713_s1 + $0x84] ss:$8 sm:$0x3] %vm6_vm4, %v259_v26   ;;  %s9191_s30 = smov 192 }
 0x104   :  { %v6286_v32 = vld [vmem:[%s12712_s0 + $0x78d] ss:$16 sm:%s9017_s11]   ;;  %s9139_s11 = smov 3  ;;  %5726 = vst.msk [vmem:[%s12713_s1 + $0x75] ss:$8 sm:$0xc] %vm6_vm4, %v259_v26  }
 0x105   :  { %5727 = vst.msk [vmem:[%s12713_s1 + $0x66] ss:$8 sm:$0x30] %vm6_vm4, %v259_v26   ;;  %5728 = vst.msk [vmem:[%s12713_s1 + $0x57] ss:$8 sm:$0xc0] %vm6_vm4, %v259_v26   ;;  %v2668_v37 = vsel %vm485_vm0, %v6286_v32, %v6285_v27  ;;  %v9286_v44 = vpop.permute.xlu1 %1668  }
 0x106   :  { %v6287_v40 = vld [vmem:[%s12712_s0 + $0x78d] ss:$16 sm:%s9045_s21]   ;;  %v5789_v43 = vld [vmem:[%s12712_s0 + $0x700] ss:$8 sm:$0xf]   ;;  %5836 = vst.msk [vmem:[%s12713_s1 + $0x80] sm:$0xff] %vm499_vm5, %v7804_v54  }
 0x107   :  { %5876 = vst.msk [vmem:[%s12713_s1 + $0x88] sm:$0xff] %vm499_vm5, %v7948_v61   ;;  %v2673_v54 = vsel %vm490_vm1, %v6287_v40, %v2668_v37  ;;  %v6288_v61 = vld [vmem:[%s12712_s0 + $0x78d] ss:$16 sm:%s9047_s19]   ;;  %v5790_v56 = vld [vmem:[%s12712_s0 + $0x700] ss:$8 sm:$0xf0]  }
 0x108   :  { %v6280_v46 = vld [vmem:[%s12712_s0 + $0x68d] ss:$16 sm:%s9068_s2]   ;;  %s9189_s2 = smov 48  ;;  %5995 = vst.msk [vmem:[%s12713_s1 + $0x80] sm:$0xff] %vm1234_vm6, %v8681_v12   ;;  %v2678_v12 = vsel %vm495_vm2, %v6288_v61, %v2673_v54  ;;  %6035 = vst.msk [vmem:[%s12713_s1 + $0x88] sm:$0xff] %vm1234_vm6, %v1508_v4   ;;  %s9226_s21 = smov 48  ;;  %v424_v59 = vsel %vm4_vm3, %v5790_v56, %v5789_v43 }
 0x109   :  { %v6281_v51 = vld [vmem:[%s12712_s0 + $0x68d] ss:$16 sm:%s9084_s10]   ;;  %2679 = vrot.lane.b32.xlu1 %v2678_v12, %s6935_s14  ;;  %v5795_v0 = vld [vmem:[%s12712_s0 + $0x740] ss:$8 sm:$0xf]   ;;  %s2761_s10 = smov 48  ;;  %v9409_v21 = vpop.permute.xlu1 %1714   ;;  %v9438_v12 = vpop.permute.xlu0 %1691  }
 0x10a   :  { %v6282_v52 = vld [vmem:[%s12712_s0 + $0x68d] ss:$16 sm:%s9086_s13]   ;;  %s9209_s13 = smov 3  ;;  %v2645_v53 = vsel %vm485_vm0, %v6281_v51, %v6280_v46  ;;  %v5796_v2 = vld [vmem:[%s12712_s0 + $0x740] ss:$8 sm:$0xf0]  }
 0x10b   :  { %v6283_v55 = vld [vmem:[%s12712_s0 + $0x68d] ss:$16 sm:%s9103_s29]   ;;  %v2650_v58 = vsel %vm490_vm1, %v6282_v52, %v2645_v53  ;;  %5791 = vst.msk [vmem:[%s12713_s1 + $0xe0] ss:$8 sm:$0x3] %vm6_vm4, %v424_v59   ;;  %v439_v24 = vsel %vm4_vm3, %v5796_v2, %v5795_v0  ;;  %s2738_s19 = smov 48 }
 0x10c   :  { %v2655_v22 = vsel %vm495_vm2, %v6283_v55, %v2650_v58  ;;  %5792 = vst.msk [vmem:[%s12713_s1 + $0xd1] ss:$8 sm:$0xc] %vm6_vm4, %v424_v59   ;;  %5793 = vst.msk [vmem:[%s12713_s1 + $0xc2] ss:$8 sm:$0x30] %vm6_vm4, %v424_v59  }
 0x10d   :  { %5794 = vst.msk [vmem:[%s12713_s1 + $0xb3] ss:$8 sm:$0xc0] %vm6_vm4, %v424_v59   ;;  %v5765_v28 = vld [vmem:[%s12712_s0 + $0x600] ss:$8 sm:$0xf]   ;;  %2656 = vrot.lane.b32.xlu0 %v2655_v22, %s6935_s14  ;;  %v9474_v0 = vpop.permute.xlu1 %1760  }
 0x10e   :  { %v5766_v31 = vld [vmem:[%s12712_s0 + $0x600] ss:$8 sm:$0xf0]   ;;  %5797 = vst.msk [vmem:[%s12713_s1 + $0xe4] ss:$8 sm:$0x3] %vm6_vm4, %v439_v24  }
 0x10f   :  { %5798 = vst.msk [vmem:[%s12713_s1 + $0xd5] ss:$8 sm:$0xc] %vm6_vm4, %v439_v24   ;;  %5799 = vst.msk [vmem:[%s12713_s1 + $0xc6] ss:$8 sm:$0x30] %vm6_vm4, %v439_v24   ;;  %v364_v4 = vsel %vm4_vm3, %v5766_v31, %v5765_v28 }
 0x110   :  { %5800 = vst.msk [vmem:[%s12713_s1 + $0xb7] ss:$8 sm:$0xc0] %vm6_vm4, %v439_v24   ;;  %v5771_v14 = vld [vmem:[%s12712_s0 + $0x640] ss:$8 sm:$0xf]  }
 0x111   :  { %v5772_v42 = vld [vmem:[%s12712_s0 + $0x640] ss:$8 sm:$0xf0]   ;;  %5851 = vst.msk [vmem:[%s12713_s1 + $0xe0] sm:$0xff] %vm499_vm5, %v7818_v60   ;;  %5891 = vst.msk [vmem:[%s12713_s1 + $0xe8] sm:$0xff] %vm499_vm5, %v7962_v3   ;;  %s2807_s29 = smov 48 }
 0x112   :  { %5767 = vst.msk [vmem:[%s12713_s1 + $0xc0] ss:$8 sm:$0x3] %vm6_vm4, %v364_v4   ;;  %5768 = vst.msk [vmem:[%s12713_s1 + $0xb1] ss:$8 sm:$0xc] %vm6_vm4, %v364_v4   ;;  %v379_v60 = vsel %vm4_vm3, %v5772_v42, %v5771_v14 }
 0x113   :  { %5769 = vst.msk [vmem:[%s12713_s1 + $0xa2] ss:$8 sm:$0x30] %vm6_vm4, %v364_v4   ;;  %5770 = vst.msk [vmem:[%s12713_s1 + $0x93] ss:$8 sm:$0xc0] %vm6_vm4, %v364_v4  }
 0x114   :  { %v6294_v3 = vld [vmem:[%s12712_s0 + $0x104] ss:$16 sm:%s9139_s11]   ;;  %6010 = vst.msk [vmem:[%s12713_s1 + $0xe0] sm:$0xff] %vm1234_vm6, %v8722_v8   ;;  %6050 = vst.msk [vmem:[%s12713_s1 + $0xe8] sm:$0xff] %vm1234_vm6, %v9092_v47   ;;  %s2825_s14 = smov 12  ;;  %s3101_s11 = smov 12 }
 0x115   :  { %v6295_v49 = vld [vmem:[%s12712_s0 + $0x104] ss:$16 sm:%s9168_s15]   ;;  %s2698_s15 = smov 192  ;;  %5773 = vst.msk [vmem:[%s12713_s1 + $0xc4] ss:$8 sm:$0x3] %vm6_vm4, %v379_v60  }
 0x116   :  { %5774 = vst.msk [vmem:[%s12713_s1 + $0xb5] ss:$8 sm:$0xc] %vm6_vm4, %v379_v60   ;;  %5775 = vst.msk [vmem:[%s12713_s1 + $0xa6] ss:$8 sm:$0x30] %vm6_vm4, %v379_v60   ;;  %v2713_v8 = vsel %vm485_vm0, %v6295_v49, %v6294_v3  ;;  %v9509_v49 = vpop.permute.xlu0 %1737  }
 0x117   :  { %5776 = vst.msk [vmem:[%s12713_s1 + $0x97] ss:$8 sm:$0xc0] %vm6_vm4, %v379_v60   ;;  %v6296_v5 = vld [vmem:[%s12712_s0 + $0x104] ss:$16 sm:%s9189_s2]   ;;  %s3777_s2 = smov 192 }
 0x118   :  { %v6297_v10 = vld [vmem:[%s12712_s0 + $0x104] ss:$16 sm:%s9191_s30]   ;;  %s2756_s30 = smov 12  ;;  %5846 = vst.msk [vmem:[%s12713_s1 + $0xc0] sm:$0xff] %vm499_vm5, %v7840_v6   ;;  %5886 = vst.msk [vmem:[%s12713_s1 + $0xc8] sm:$0xff] %vm499_vm5, %v7984_v16   ;;  %v2718_v6 = vsel %vm490_vm1, %v6296_v5, %v2713_v8 }
 0x119   :  { %v6290_v16 = vld [vmem:[%s12712_s0 + $0x4] ss:$16 sm:%s9209_s13]   ;;  %6005 = vst.msk [vmem:[%s12713_s1 + $0xc0] sm:$0xff] %vm1234_vm6, %v8779_v34   ;;  %v2723_v34 = vsel %vm495_vm2, %v6297_v10, %v2718_v6  ;;  %6045 = vst.msk [vmem:[%s12713_s1 + $0xc8] sm:$0xff] %vm1234_vm6, %v9141_v35   ;;  %s10098_s13 = smov 12 }
 0x11a   :  { %v6291_v47 = vld [vmem:[%s12712_s0 + $0x4] ss:$16 sm:%s9211_s22]   ;;  %s2766_s22 = smov 192  ;;  %2724 = vrot.lane.b32.xlu1 %v2723_v34, %s6936_s26  ;;  %v5657_v20 = vld [vmem:[%s12712_s0 + $0x180] ss:$8 sm:$0xf]  }
 0x11b   :  { %v2691_v11 = vsel %vm485_vm0, %v6291_v47, %v6290_v16  ;;  %v6292_v13 = vld [vmem:[%s12712_s0 + $0x4] ss:$16 sm:%s9226_s21]   ;;  %v5658_v40 = vld [vmem:[%s12712_s0 + $0x180] ss:$8 sm:$0xf0]   ;;  %s9593_s21 = smov 3 }
 0x11c   :  { %v6293_v17 = vld [vmem:[%s12712_s0 + $0x4] ss:$16 sm:%s2698_s15]   ;;  %s2733_s15 = smov 12  ;;  %v2696_v18 = vsel %vm490_vm1, %v6292_v13, %v2691_v11  ;;  %v94_v46 = vsel %vm4_vm3, %v5658_v40, %v5657_v20  ;;  %v5663_v59 = vld [vmem:[%s12712_s0 + $0x1c0] ss:$8 sm:$0xf]  }
 0x11d   :  { %v6304_v19 = vld [vmem:[%s12712_s0 + $0x304] ss:$16 sm:%s9323_s12]   ;;  %s2743_s12 = smov 192  ;;  %v2701_v26 = vsel %vm495_vm2, %v6293_v17, %v2696_v18  ;;  %5659 = vst.msk [vmem:[%s12713_s1 + $0x30] ss:$8 sm:$0x3] %vm6_vm4, %v94_v46  }
 0x11e   :  { %v6305_v27 = vld [vmem:[%s12712_s0 + $0x304] ss:$16 sm:%s2756_s30]   ;;  %2702 = vrot.lane.b32.xlu0 %v2701_v26, %s6936_s26  ;;  %5660 = vst.msk [vmem:[%s12713_s1 + $0x21] ss:$8 sm:$0xc] %vm6_vm4, %v94_v46   ;;  %s9520_s30 = smov 48 }
 0x11f   :  { %v6306_v32 = vld [vmem:[%s12712_s0 + $0x304] ss:$16 sm:%s2761_s10]   ;;  %s2799_s10 = smov 3  ;;  %v2759_v35 = vsel %vm485_vm0, %v6305_v27, %v6304_v19  ;;  %5661 = vst.msk [vmem:[%s12713_s1 + $0x12] ss:$8 sm:$0x30] %vm6_vm4, %v94_v46  }
 0x120   :  { %v6307_v37 = vld [vmem:[%s12712_s0 + $0x304] ss:$16 sm:%s2766_s22]   ;;  %v2764_v43 = vsel %vm490_vm1, %v6306_v32, %v2759_v35  ;;  %5662 = vst.msk [vmem:[%s12713_s1 + $0x3] ss:$8 sm:$0xc0] %vm6_vm4, %v94_v46   ;;  %v1784_v32 = vpop.permute.xlu0 %1783   ;;  %s3111_s22 = smov 192 }
 0x121   :  { %v6299_v54 = vld [vmem:[%s12712_s0 + $0x204] ss:$16 sm:%s2730_s23]   ;;  %v2769_v51 = vsel %vm495_vm2, %v6307_v37, %v2764_v43  ;;  %s9484_s23 = smov 12  ;;  %v5664_v4 = vld [vmem:[%s12712_s0 + $0x1c0] ss:$8 sm:$0xf0]  }
 0x122   :  { %v6300_v61 = vld [vmem:[%s12712_s0 + $0x204] ss:$16 sm:%s2733_s15]   ;;  %2770 = vrot.lane.b32.xlu1 %v2769_v51, %s6936_s26  ;;  %v109_v3 = vsel %vm4_vm3, %v5664_v4, %v5663_v59  ;;  %v5634_v18 = vld [vmem:[%s12712_s0 + $0x80] ss:$8 sm:$0xf0]   ;;  %s3019_s15 = smov 192 }
 0x123   :  { %v2736_v52 = vsel %vm485_vm0, %v6300_v61, %v6299_v54  ;;  %v6301_v53 = vld [vmem:[%s12712_s0 + $0x204] ss:$16 sm:%s2738_s19]   ;;  %5665 = vst.msk [vmem:[%s12713_s1 + $0x34] ss:$8 sm:$0x3] %vm6_vm4, %v109_v3   ;;  %s3772_s19 = smov 48 }
 0x124   :  { %v6302_v55 = vld [vmem:[%s12712_s0 + $0x204] ss:$16 sm:%s2743_s12]   ;;  %v2741_v56 = vsel %vm490_vm1, %v6301_v53, %v2736_v52  ;;  %s9506_s12 = smov 3  ;;  %5666 = vst.msk [vmem:[%s12713_s1 + $0x25] ss:$8 sm:$0xc] %vm6_vm4, %v109_v3  }
 0x125   :  { %v6314_v58 = vld [vmem:[%s12712_s0 + $0x504] ss:$16 sm:%s2799_s10]   ;;  %s2789_s10 = smov 192  ;;  %v2746_v2 = vsel %vm495_vm2, %v6302_v55, %v2741_v56  ;;  %5667 = vst.msk [vmem:[%s12713_s1 + $0x16] ss:$8 sm:$0x30] %vm6_vm4, %v109_v3  }
 0x126   :  { %v6315_v22 = vld [vmem:[%s12712_s0 + $0x504] ss:$16 sm:%s9418_s24]   ;;  %2747 = vrot.lane.b32.xlu0 %v2746_v2, %s6936_s26  ;;  %5668 = vst.msk [vmem:[%s12713_s1 + $0x7] ss:$8 sm:$0xc0] %vm6_vm4, %v109_v3   ;;  %s2917_s24 = smov 12 }
 0x127   :  { %v6316_v24 = vld [vmem:[%s12712_s0 + $0x504] ss:$16 sm:%s2807_s29]   ;;  %s2845_s29 = smov 3  ;;  %v2805_v28 = vsel %vm485_vm0, %v6315_v22, %v6314_v58  ;;  %5901 = vst.msk [vmem:[%s12713_s1 + $0x30] sm:$0xff] %vm499_vm5, %v7998_v23   ;;  %5941 = vst.msk [vmem:[%s12713_s1 + $0x38] sm:$0xff] %vm499_vm5, %v8142_v48   ;;  %v1807_v48 = vpop.permute.xlu1 %1806  }
 0x128   :  { %v6317_v31 = vld [vmem:[%s12712_s0 + $0x504] ss:$16 sm:%s2812_s16]   ;;  %s9491_s16 = smov 48  ;;  %v2810_v14 = vsel %vm490_vm1, %v6316_v24, %v2805_v28  ;;  %v5633_v23 = vld [vmem:[%s12712_s0 + $0x80] ss:$8 sm:$0xf]  }
 0x129   :  { %v6309_v42 = vld [vmem:[%s12712_s0 + $0x404] ss:$16 sm:%s9435_s6]   ;;  %v2815_v8 = vsel %vm495_vm2, %v6317_v31, %v2810_v14  ;;  %6060 = vst.msk [vmem:[%s12713_s1 + $0x30] sm:$0xff] %vm1234_vm6, %v9193_v50   ;;  %6100 = vst.msk [vmem:[%s12713_s1 + $0x38] sm:$0xff] %vm1234_vm6, %v1807_v48   ;;  %v34_v27 = vsel %vm4_vm3, %v5634_v18, %v5633_v23  ;;  %v9666_v31 = vpop.permute.xlu0 %1829  }
 0x12a   :  { %v6310_v60 = vld [vmem:[%s12712_s0 + $0x404] ss:$16 sm:%s2779_s18]   ;;  %s9504_s18 = smov 192  ;;  %2816 = vrot.lane.b32.xlu1 %v2815_v8, %s6936_s26  ;;  %5635 = vst.msk [vmem:[%s12713_s1 + $0x10] ss:$8 sm:$0x3] %vm6_vm4, %v34_v27  }
 0x12b   :  { %v2782_v5 = vsel %vm485_vm0, %v6310_v60, %v6309_v42  ;;  %v6311_v10 = vld [vmem:[%s12712_s0 + $0x404] ss:$16 sm:%s9448_s25]   ;;  %s9565_s25 = smov 12  ;;  %5636 = vst.msk [vmem:[%s12713_s1 + $0x1] ss:$8 sm:$0xc] %vm6_vm4, %v34_v27   ;;  %v9631_v51 = vpop.permute.xlu1 %1852  }
 0x12c   :  { %v6312_v6 = vld [vmem:[%s12712_s0 + $0x404] ss:$16 sm:%s2789_s10]   ;;  %v2787_v16 = vsel %vm490_vm1, %v6311_v10, %v2782_v5  ;;  %5637 = vst.msk [vmem:[%s12713_s1 - $0xe] ss:$8 sm:$0x30] %vm6_vm4, %v34_v27   ;;  %s9949_s10 = smov 12 }
 0x12d   :  { %v6324_v47 = vld [vmem:[%s12712_s0 + $0x704] ss:$16 sm:%s2845_s29]   ;;  %s2835_s29 = smov 192  ;;  %v2792_v34 = vsel %vm495_vm2, %v6312_v6, %v2787_v16  ;;  %5638 = vst.msk [vmem:[%s12713_s1 - $0x1d] ss:$8 sm:$0xc0] %vm6_vm4, %v34_v27  }
 0x12e   :  { %v6325_v11 = vld [vmem:[%s12712_s0 + $0x704] ss:$16 sm:%s9484_s23]   ;;  %2793 = vrot.lane.b32.xlu0 %v2792_v34, %s6936_s26  ;;  %v5639_v46 = vld [vmem:[%s12712_s0 + $0xc0] ss:$8 sm:$0xf]   ;;  %s3685_s23 = smov 192 }
 0x12f   :  { %v6326_v13 = vld [vmem:[%s12712_s0 + $0x704] ss:$16 sm:%s9491_s16]   ;;  %s2891_s16 = smov 3  ;;  %v2851_v50 = vsel %vm485_vm0, %v6325_v11, %v6324_v47  ;;  %v6335_v53 = vld [vmem:[%s12712_s0 + $0x10c] ss:$16 sm:%s9565_s25]   ;;  %s9693_s25 = smov 48  ;;  %v9713_v8 = vpop.permute.xlu1 %1898  }
 0x130   :  { %v6327_v17 = vld [vmem:[%s12712_s0 + $0x704] ss:$16 sm:%s9504_s18]   ;;  %s2899_s18 = smov 48  ;;  %v2856_v19 = vsel %vm490_vm1, %v6326_v13, %v2851_v50  ;;  %v6334_v61 = vld [vmem:[%s12712_s0 + $0x10c] ss:$16 sm:%s2891_s16]   ;;  %s2881_s16 = smov 192  ;;  %v9761_v13 = vpop.permute.xlu0 %1875  }
 0x131   :  { %v6319_v20 = vld [vmem:[%s12712_s0 + $0x604] ss:$16 sm:%s9506_s12]   ;;  %v2861_v35 = vsel %vm495_vm2, %v6327_v17, %v2856_v19  ;;  %v6336_v55 = vld [vmem:[%s12712_s0 + $0x10c] ss:$16 sm:%s2899_s18]   ;;  %s2937_s18 = smov 3  ;;  %s9641_s12 = smov 12  ;;  %v2897_v56 = vsel %vm485_vm0, %v6335_v53, %v6334_v61 }
 0x132   :  { %v6320_v26 = vld [vmem:[%s12712_s0 + $0x604] ss:$16 sm:%s2825_s14]   ;;  %s2904_s14 = smov 192  ;;  %2862 = vrot.lane.b32.xlu1 %v2861_v35, %s6936_s26  ;;  %v5640_v59 = vld [vmem:[%s12712_s0 + $0xc0] ss:$8 sm:$0xf0]   ;;  %v2902_v2 = vsel %vm490_vm1, %v6336_v55, %v2897_v56 }
 0x133   :  { %v2828_v37 = vsel %vm485_vm0, %v6320_v26, %v6319_v20  ;;  %v6321_v40 = vld [vmem:[%s12712_s0 + $0x604] ss:$16 sm:%s9520_s30]   ;;  %v6337_v58 = vld [vmem:[%s12712_s0 + $0x10c] ss:$16 sm:%s2904_s14]   ;;  %s9651_s30 = smov 48  ;;  %v49_v28 = vsel %vm4_vm3, %v5640_v59, %v5639_v46  ;;  %s3167_s14 = smov 3 }
 0x134   :  { %v6322_v43 = vld [vmem:[%s12712_s0 + $0x604] ss:$16 sm:%s2835_s29]   ;;  %s2871_s29 = smov 12  ;;  %v2833_v54 = vsel %vm490_vm1, %v6321_v40, %v2828_v37  ;;  %v6329_v22 = vld [vmem:[%s12712_s0 + $0xc] ss:$16 sm:%s9593_s21]   ;;  %v2907_v4 = vsel %vm495_vm2, %v6337_v58, %v2902_v2  ;;  %v9869_v53 = vpop.permute.xlu0 %1921   ;;  %s9931_s21 = smov 192 }
 0x135   :  { %v2838_v52 = vsel %vm495_vm2, %v6322_v43, %v2833_v54  ;;  %v6330_v24 = vld [vmem:[%s12712_s0 + $0xc] ss:$16 sm:%s2871_s29]   ;;  %s9662_s29 = smov 192  ;;  %5641 = vst.msk [vmem:[%s12713_s1 + $0x14] ss:$8 sm:$0x3] %vm6_vm4, %v49_v28  }
 0x136   :  { %2839 = vrot.lane.b32.xlu0 %v2838_v52, %s6936_s26  ;;  %v2874_v14 = vsel %vm485_vm0, %v6330_v24, %v6329_v22  ;;  %v6331_v42 = vld [vmem:[%s12712_s0 + $0xc] ss:$16 sm:%s9605_s28]   ;;  %5642 = vst.msk [vmem:[%s12713_s1 + $0x5] ss:$8 sm:$0xc] %vm6_vm4, %v49_v28   ;;  %s10143_s28 = smov 12 }
 0x137   :  { %v6332_v60 = vld [vmem:[%s12712_s0 + $0xc] ss:$16 sm:%s2881_s16]   ;;  %5643 = vst.msk [vmem:[%s12713_s1 - $0xa] ss:$8 sm:$0x30] %vm6_vm4, %v49_v28   ;;  %2908 = vrot.lane.b32.xlu1 %v2907_v4, %s6936_s26  ;;  %v2879_v3 = vsel %vm490_vm1, %v6331_v42, %v2874_v14  ;;  %s4030_s16 = smov 192 }
 0x138   :  { %5644 = vst.msk [vmem:[%s12713_s1 - $0x19] ss:$8 sm:$0xc0] %vm6_vm4, %v49_v28   ;;  %v2884_v5 = vsel %vm495_vm2, %v6332_v60, %v2879_v3  ;;  %v6346_v10 = vld [vmem:[%s12712_s0 + $0x30c] ss:$16 sm:%s9651_s30]   ;;  %s9729_s30 = smov 3  ;;  %v1968_v3 = vpop.permute.xlu0 %1967  }
 0x139   :  { %5896 = vst.msk [vmem:[%s12713_s1 + $0x10] sm:$0xff] %vm499_vm5, %v8020_v36   ;;  %5936 = vst.msk [vmem:[%s12713_s1 + $0x18] sm:$0xff] %vm499_vm5, %v8166_v63   ;;  %v6344_v36 = vld [vmem:[%s12712_s0 + $0x30c] ss:$16 sm:%s2937_s18]   ;;  %s2927_s18 = smov 192 }
 0x13a   :  { %v5705_v63 = vld [vmem:[%s12712_s0 + $0x380] ss:$8 sm:$0xf]   ;;  %6055 = vst.msk [vmem:[%s12713_s1 + $0x10] sm:$0xff] %vm1234_vm6, %v9236_v38   ;;  %v6345_v38 = vld [vmem:[%s12712_s0 + $0x30c] ss:$16 sm:%s9641_s12]  }
 0x13b   :  { %6095 = vst.msk [vmem:[%s12713_s1 + $0x18] sm:$0xff] %vm1234_vm6, %v1784_v32   ;;  %2885 = vrot.lane.b32.xlu0 %v2884_v5, %s6936_s26  ;;  %v2943_v6 = vsel %vm485_vm0, %v6345_v38, %v6344_v36  ;;  %v6347_v16 = vld [vmem:[%s12712_s0 + $0x30c] ss:$16 sm:%s9662_s29]   ;;  %v9800_v32 = vpop.permute.xlu1 %1944   ;;  %s3698_s12 = smov 12  ;;  %s3708_s29 = smov 192 }
 0x13c   :  { %v5706_v47 = vld [vmem:[%s12712_s0 + $0x380] ss:$8 sm:$0xf0]   ;;  %v2948_v23 = vsel %vm490_vm1, %v6346_v10, %v2943_v6  ;;  %v6339_v48 = vld [vmem:[%s12712_s0 + $0x20c] ss:$16 sm:%s9664_s3]   ;;  %1970 = vst.msk [vmem:[%s12713_s1] sm:$0xff] %vm1969_vm7, %v1968_v3  }
 0x13d   :  { %v6340_v34 = vld [vmem:[%s12712_s0 + $0x20c] ss:$16 sm:%s2917_s24]   ;;  %v214_v11 = vsel %vm4_vm3, %v5706_v47, %v5705_v63  ;;  %s9757_s24 = smov 192  ;;  %v2953_v50 = vsel %vm495_vm2, %v6347_v16, %v2948_v23  ;;  %v5711_v26 = vld [vmem:[%s12712_s0 + $0x3c0] ss:$8 sm:$0xf]  }
 0x13e   :  { %v2920_v17 = vsel %vm485_vm0, %v6340_v34, %v6339_v48  ;;  %v6341_v18 = vld [vmem:[%s12712_s0 + $0x20c] ss:$16 sm:%s9693_s25]   ;;  %5707 = vst.msk [vmem:[%s12713_s1 + $0x70] ss:$8 sm:$0x3] %vm6_vm4, %v214_v11   ;;  %2954 = vrot.lane.b32.xlu1 %v2953_v50, %s6936_s26  ;;  %v2013_v34 = vpop.permute.xlu0 %2012   ;;  %s3129_s25 = smov 48 }
 0x13f   :  { %v6342_v19 = vld [vmem:[%s12712_s0 + $0x20c] ss:$16 sm:%s2927_s18]   ;;  %5708 = vst.msk [vmem:[%s12713_s1 + $0x61] ss:$8 sm:$0xc] %vm6_vm4, %v214_v11   ;;  %v2925_v20 = vsel %vm490_vm1, %v6341_v18, %v2920_v17  ;;  %v1990_v58 = vpop.permute.xlu1 %1989   ;;  %s10126_s18 = smov 192 }
 0x140   :  { %5709 = vst.msk [vmem:[%s12713_s1 + $0x52] ss:$8 sm:$0x30] %vm6_vm4, %v214_v11   ;;  %5710 = vst.msk [vmem:[%s12713_s1 + $0x43] ss:$8 sm:$0xc0] %vm6_vm4, %v214_v11   ;;  %v2930_v35 = vsel %vm495_vm2, %v6342_v19, %v2925_v20 }
 0x141   :  { %v5712_v27 = vld [vmem:[%s12712_s0 + $0x3c0] ss:$8 sm:$0xf0]   ;;  %2931 = vrot.lane.b32.xlu0 %v2930_v35, %s6936_s26  ;;  %v6355_v52 = vld [vmem:[%s12712_s0 + $0x50c] ss:$16 sm:%s9731_s9]   ;;  %s2973_s9 = smov 192 }
 0x142   :  { %v229_v37 = vsel %vm4_vm3, %v5712_v27, %v5711_v26  ;;  %v5681_v40 = vld [vmem:[%s12712_s0 + $0x280] ss:$8 sm:$0xf]   ;;  %v6356_v55 = vld [vmem:[%s12712_s0 + $0x50c] ss:$16 sm:%s9746_s7]   ;;  %6139 = vst.msk [vmem:[%s12713_s1 + $0x20] sm:$0xff] %vm1969_vm7, %v1990_v58  }
 0x143   :  { %v5682_v43 = vld [vmem:[%s12712_s0 + $0x280] ss:$8 sm:$0xf0]   ;;  %5713 = vst.msk [vmem:[%s12713_s1 + $0x74] ss:$8 sm:$0x3] %vm6_vm4, %v229_v37   ;;  %v2036_v16 = vpop.permute.xlu1 %2035  }
 0x144   :  { %5714 = vst.msk [vmem:[%s12713_s1 + $0x65] ss:$8 sm:$0xc] %vm6_vm4, %v229_v37   ;;  %5715 = vst.msk [vmem:[%s12713_s1 + $0x56] ss:$8 sm:$0x30] %vm6_vm4, %v229_v37   ;;  %v154_v54 = vsel %vm4_vm3, %v5682_v43, %v5681_v40 }
 0x145   :  { %5716 = vst.msk [vmem:[%s12713_s1 + $0x47] ss:$8 sm:$0xc0] %vm6_vm4, %v229_v37   ;;  %v5687_v61 = vld [vmem:[%s12712_s0 + $0x2c0] ss:$8 sm:$0xf]  }
 0x146   :  { %v5688_v46 = vld [vmem:[%s12712_s0 + $0x2c0] ss:$8 sm:$0xf0]   ;;  %5911 = vst.msk [vmem:[%s12713_s1 + $0x70] sm:$0xff] %vm499_vm5, %v8034_v45   ;;  %5951 = vst.msk [vmem:[%s12713_s1 + $0x78] sm:$0xff] %vm499_vm5, %v8189_v9   ;;  %s3106_s7 = smov 48 }
 0x147   :  { %5683 = vst.msk [vmem:[%s12713_s1 + $0x50] ss:$8 sm:$0x3] %vm6_vm4, %v154_v54   ;;  %5684 = vst.msk [vmem:[%s12713_s1 + $0x41] ss:$8 sm:$0xc] %vm6_vm4, %v154_v54   ;;  %v169_v45 = vsel %vm4_vm3, %v5688_v46, %v5687_v61  ;;  %v2082_v20 = vpop.permute.xlu1 %2081  }
 0x148   :  { %5685 = vst.msk [vmem:[%s12713_s1 + $0x32] ss:$8 sm:$0x30] %vm6_vm4, %v154_v54   ;;  %5686 = vst.msk [vmem:[%s12713_s1 + $0x23] ss:$8 sm:$0xc0] %vm6_vm4, %v154_v54  }
 0x149   :  { %v6354_v9 = vld [vmem:[%s12712_s0 + $0x50c] ss:$16 sm:%s9729_s30]   ;;  %6070 = vst.msk [vmem:[%s12713_s1 + $0x70] sm:$0xff] %vm1234_vm6, %v9286_v44   ;;  %6110 = vst.msk [vmem:[%s12713_s1 + $0x78] sm:$0xff] %vm1234_vm6, %v9631_v51   ;;  %s3170_s30 = smov 12  ;;  %s4180_s3 = smov 12 }
 0x14a   :  { %5689 = vst.msk [vmem:[%s12713_s1 + $0x54] ss:$8 sm:$0x3] %vm6_vm4, %v169_v45   ;;  %5690 = vst.msk [vmem:[%s12713_s1 + $0x45] ss:$8 sm:$0xc] %vm6_vm4, %v169_v45   ;;  %v2989_v44 = vsel %vm485_vm0, %v6355_v52, %v6354_v9  ;;  %v2059_v9 = vpop.permute.xlu0 %2058  }
 0x14b   :  { %5691 = vst.msk [vmem:[%s12713_s1 + $0x36] ss:$8 sm:$0x30] %vm6_vm4, %v169_v45   ;;  %5692 = vst.msk [vmem:[%s12713_s1 + $0x27] ss:$8 sm:$0xc0] %vm6_vm4, %v169_v45  }
 0x14c   :  { %v6357_v56 = vld [vmem:[%s12712_s0 + $0x50c] ss:$16 sm:%s9757_s24]   ;;  %s9901_s24 = smov 3  ;;  %5906 = vst.msk [vmem:[%s12713_s1 + $0x50] sm:$0xff] %vm499_vm5, %v8056_v57   ;;  %5946 = vst.msk [vmem:[%s12713_s1 + $0x58] sm:$0xff] %vm499_vm5, %v8226_v30   ;;  %v2994_v57 = vsel %vm490_vm1, %v6356_v55, %v2989_v44 }
 0x14d   :  { %v6349_v30 = vld [vmem:[%s12712_s0 + $0x40c] ss:$16 sm:%s9759_s4]   ;;  %6065 = vst.msk [vmem:[%s12713_s1 + $0x50] sm:$0xff] %vm1234_vm6, %v9379_v33   ;;  %v2999_v33 = vsel %vm495_vm2, %v6357_v56, %v2994_v57  ;;  %6105 = vst.msk [vmem:[%s12713_s1 + $0x58] sm:$0xff] %vm1234_vm6, %v9666_v31   ;;  %s3175_s4 = smov 48 }
 0x14e   :  { %v6350_v51 = vld [vmem:[%s12712_s0 + $0x40c] ss:$16 sm:%s9788_s27]   ;;  %s9929_s27 = smov 48  ;;  %3000 = vrot.lane.b32.xlu1 %v2999_v33, %s6936_s26  ;;  %v5753_v28 = vld [vmem:[%s12712_s0 + $0x580] ss:$8 sm:$0xf]   ;;  %v2105_v33 = vpop.permute.xlu0 %2104  }
 0x14f   :  { %v2966_v59 = vsel %vm485_vm0, %v6350_v51, %v6349_v30  ;;  %v6351_v2 = vld [vmem:[%s12712_s0 + $0x40c] ss:$16 sm:%s9790_s8]   ;;  %v5754_v31 = vld [vmem:[%s12712_s0 + $0x580] ss:$8 sm:$0xf0]   ;;  %6149 = vst.msk [vmem:[%s12713_s1 + $0x60] sm:$0xff] %vm1969_vm7, %v2036_v16  }
 0x150   :  { %v6352_v22 = vld [vmem:[%s12712_s0 + $0x40c] ss:$16 sm:%s2973_s9]   ;;  %s9947_s9 = smov 3  ;;  %v2971_v24 = vsel %vm490_vm1, %v6351_v2, %v2966_v59  ;;  %v334_v14 = vsel %vm4_vm3, %v5754_v31, %v5753_v28  ;;  %v5759_v42 = vld [vmem:[%s12712_s0 + $0x5c0] ss:$8 sm:$0xf]  }
 0x151   :  { %v2976_v4 = vsel %vm495_vm2, %v6352_v22, %v2971_v24  ;;  %v5760_v60 = vld [vmem:[%s12712_s0 + $0x5c0] ss:$8 sm:$0xf0]   ;;  %5755 = vst.msk [vmem:[%s12713_s1 + $0xb0] ss:$8 sm:$0x3] %vm6_vm4, %v334_v14  }
 0x152   :  { %2977 = vrot.lane.b32.xlu0 %v2976_v4, %s6936_s26  ;;  %5756 = vst.msk [vmem:[%s12713_s1 + $0xa1] ss:$8 sm:$0xc] %vm6_vm4, %v334_v14   ;;  %5757 = vst.msk [vmem:[%s12713_s1 + $0x92] ss:$8 sm:$0x30] %vm6_vm4, %v334_v14   ;;  %v349_v36 = vsel %vm4_vm3, %v5760_v60, %v5759_v42 }
 0x153   :  { %5758 = vst.msk [vmem:[%s12713_s1 + $0x83] ss:$8 sm:$0xc0] %vm6_vm4, %v334_v14   ;;  %v5729_v63 = vld [vmem:[%s12712_s0 + $0x480] ss:$8 sm:$0xf]  }
 0x154   :  { %v5730_v5 = vld [vmem:[%s12712_s0 + $0x480] ss:$8 sm:$0xf0]   ;;  %5761 = vst.msk [vmem:[%s12713_s1 + $0xb4] ss:$8 sm:$0x3] %vm6_vm4, %v349_v36  }
 0x155   :  { %5762 = vst.msk [vmem:[%s12713_s1 + $0xa5] ss:$8 sm:$0xc] %vm6_vm4, %v349_v36   ;;  %5763 = vst.msk [vmem:[%s12713_s1 + $0x96] ss:$8 sm:$0x30] %vm6_vm4, %v349_v36   ;;  %v274_v38 = vsel %vm4_vm3, %v5730_v5, %v5729_v63 }
 0x156   :  { %5764 = vst.msk [vmem:[%s12713_s1 + $0x87] ss:$8 sm:$0xc0] %vm6_vm4, %v349_v36   ;;  %v5735_v10 = vld [vmem:[%s12712_s0 + $0x4c0] ss:$8 sm:$0xf]  }
 0x157   :  { %v5736_v6 = vld [vmem:[%s12712_s0 + $0x4c0] ss:$8 sm:$0xf0]   ;;  %5921 = vst.msk [vmem:[%s12713_s1 + $0xb0] sm:$0xff] %vm499_vm5, %v8070_v1   ;;  %5961 = vst.msk [vmem:[%s12713_s1 + $0xb8] sm:$0xff] %vm499_vm5, %v8268_v41   ;;  %s3695_s8 = smov 3 }
 0x158   :  { %5731 = vst.msk [vmem:[%s12713_s1 + $0x90] ss:$8 sm:$0x3] %vm6_vm4, %v274_v38   ;;  %5732 = vst.msk [vmem:[%s12713_s1 + $0x81] ss:$8 sm:$0xc] %vm6_vm4, %v274_v38   ;;  %v289_v1 = vsel %vm4_vm3, %v5736_v6, %v5735_v10  ;;  %v2151_v10 = vpop.permute.xlu0 %2150  }
 0x159   :  { %5733 = vst.msk [vmem:[%s12713_s1 + $0x72] ss:$8 sm:$0x30] %vm6_vm4, %v274_v38   ;;  %5734 = vst.msk [vmem:[%s12713_s1 + $0x63] ss:$8 sm:$0xc0] %vm6_vm4, %v274_v38  }
 0x15a   :  { %v6364_v41 = vld [vmem:[%s12712_s0 + $0x70c] ss:$16 sm:%s9901_s24]   ;;  %6080 = vst.msk [vmem:[%s12713_s1 + $0xb0] sm:$0xff] %vm1234_vm6, %v9409_v21   ;;  %6120 = vst.msk [vmem:[%s12713_s1 + $0xb8] sm:$0xff] %vm1234_vm6, %v9713_v8   ;;  %s4135_s24 = smov 12 }
 0x15b   :  { %v6365_v47 = vld [vmem:[%s12712_s0 + $0x70c] ss:$16 sm:%s9903_s20]   ;;  %s3014_s20 = smov 48  ;;  %5737 = vst.msk [vmem:[%s12713_s1 + $0x94] ss:$8 sm:$0x3] %vm6_vm4, %v289_v1  }
 0x15c   :  { %5738 = vst.msk [vmem:[%s12713_s1 + $0x85] ss:$8 sm:$0xc] %vm6_vm4, %v289_v1   ;;  %5739 = vst.msk [vmem:[%s12713_s1 + $0x76] ss:$8 sm:$0x30] %vm6_vm4, %v289_v1   ;;  %v3035_v21 = vsel %vm485_vm0, %v6365_v47, %v6364_v41 }
 0x15d   :  { %5740 = vst.msk [vmem:[%s12713_s1 + $0x67] ss:$8 sm:$0xc0] %vm6_vm4, %v289_v1   ;;  %v6366_v23 = vld [vmem:[%s12712_s0 + $0x70c] ss:$16 sm:%s9929_s27]   ;;  %s3703_s27 = smov 48 }
 0x15e   :  { %v6367_v48 = vld [vmem:[%s12712_s0 + $0x70c] ss:$16 sm:%s9931_s21]   ;;  %s10096_s21 = smov 3  ;;  %5916 = vst.msk [vmem:[%s12713_s1 + $0x90] sm:$0xff] %vm499_vm5, %v8092_v15   ;;  %5956 = vst.msk [vmem:[%s12713_s1 + $0x98] sm:$0xff] %vm499_vm5, %v8309_v62   ;;  %v3040_v15 = vsel %vm490_vm1, %v6366_v23, %v3035_v21 }
 0x15f   :  { %v6359_v62 = vld [vmem:[%s12712_s0 + $0x60c] ss:$16 sm:%s9947_s9]   ;;  %6075 = vst.msk [vmem:[%s12713_s1 + $0x90] sm:$0xff] %vm1234_vm6, %v9438_v12   ;;  %v3045_v12 = vsel %vm495_vm2, %v6367_v48, %v3040_v15  ;;  %6115 = vst.msk [vmem:[%s12713_s1 + $0x98] sm:$0xff] %vm1234_vm6, %v9761_v13   ;;  %s3491_s9 = smov 12 }
 0x160   :  { %v6360_v8 = vld [vmem:[%s12712_s0 + $0x60c] ss:$16 sm:%s9949_s10]   ;;  %s10124_s10 = smov 48  ;;  %6144 = vst.msk [vmem:[%s12713_s1 + $0x40] sm:$0xff] %vm1969_vm7, %v2013_v34   ;;  %3046 = vrot.lane.b32.xlu1 %v3045_v12, %s6936_s26 }
 0x161   :  { %v3012_v11 = vsel %vm485_vm0, %v6360_v8, %v6359_v62  ;;  %v6361_v50 = vld [vmem:[%s12712_s0 + $0x60c] ss:$16 sm:%s3014_s20]   ;;  %v5801_v18 = vld [vmem:[%s12712_s0 + $0x780] ss:$8 sm:$0xf]   ;;  %6159 = vst.msk [vmem:[%s12713_s1 + $0xa0] sm:$0xff] %vm1969_vm7, %v2082_v20  }
 0x162   :  { %v6362_v17 = vld [vmem:[%s12712_s0 + $0x60c] ss:$16 sm:%s3019_s15]   ;;  %s10141_s15 = smov 3  ;;  %v3017_v13 = vsel %vm490_vm1, %v6361_v50, %v3012_v11  ;;  %v5802_v19 = vld [vmem:[%s12712_s0 + $0x780] ss:$8 sm:$0xf0]  }
 0x163   :  { %v3022_v26 = vsel %vm495_vm2, %v6362_v17, %v3017_v13  ;;  %v454_v27 = vsel %vm4_vm3, %v5802_v19, %v5801_v18  ;;  %v5807_v35 = vld [vmem:[%s12712_s0 + $0x7c0] ss:$8 sm:$0xf]   ;;  %v6375_v52 = vld [vmem:[%s12712_s0 + $0x184] ss:$16 sm:%s10098_s13]   ;;  %s3060_s13 = smov 48  ;;  %v2197_v17 = vpop.permute.xlu0 %2196  }
 0x164   :  { %v5808_v37 = vld [vmem:[%s12712_s0 + $0x7c0] ss:$8 sm:$0xf0]   ;;  %3023 = vrot.lane.b32.xlu0 %v3022_v26, %s6936_s26  ;;  %5803 = vst.msk [vmem:[%s12713_s1 + $0xf0] ss:$8 sm:$0x3] %vm6_vm4, %v454_v27  }
 0x165   :  { %5804 = vst.msk [vmem:[%s12713_s1 + $0xe1] ss:$8 sm:$0xc] %vm6_vm4, %v454_v27   ;;  %5805 = vst.msk [vmem:[%s12713_s1 + $0xd2] ss:$8 sm:$0x30] %vm6_vm4, %v454_v27   ;;  %v469_v40 = vsel %vm4_vm3, %v5808_v37, %v5807_v35 }
 0x166   :  { %5806 = vst.msk [vmem:[%s12713_s1 + $0xc3] ss:$8 sm:$0xc0] %vm6_vm4, %v454_v27   ;;  %v5777_v43 = vld [vmem:[%s12712_s0 + $0x680] ss:$8 sm:$0xf]  }
 0x167   :  { %v5778_v54 = vld [vmem:[%s12712_s0 + $0x680] ss:$8 sm:$0xf0]   ;;  %5809 = vst.msk [vmem:[%s12713_s1 + $0xf4] ss:$8 sm:$0x3] %vm6_vm4, %v469_v40  }
 0x168   :  { %5810 = vst.msk [vmem:[%s12713_s1 + $0xe5] ss:$8 sm:$0xc] %vm6_vm4, %v469_v40   ;;  %5811 = vst.msk [vmem:[%s12713_s1 + $0xd6] ss:$8 sm:$0x30] %vm6_vm4, %v469_v40   ;;  %v394_v61 = vsel %vm4_vm3, %v5778_v54, %v5777_v43 }
 0x169   :  { %5812 = vst.msk [vmem:[%s12713_s1 + $0xc7] ss:$8 sm:$0xc0] %vm6_vm4, %v469_v40   ;;  %v5783_v46 = vld [vmem:[%s12712_s0 + $0x6c0] ss:$8 sm:$0xf]  }
 0x16a   :  { %v5784_v45 = vld [vmem:[%s12712_s0 + $0x6c0] ss:$8 sm:$0xf0]   ;;  %5931 = vst.msk [vmem:[%s12713_s1 + $0xf0] sm:$0xff] %vm499_vm5, %v8106_v25   ;;  %5971 = vst.msk [vmem:[%s12713_s1 + $0xf8] sm:$0xff] %vm499_vm5, %v8361_v7   ;;  %s3501_s20 = smov 192 }
 0x16b   :  { %5779 = vst.msk [vmem:[%s12713_s1 + $0xd0] ss:$8 sm:$0x3] %vm6_vm4, %v394_v61   ;;  %5780 = vst.msk [vmem:[%s12713_s1 + $0xc1] ss:$8 sm:$0xc] %vm6_vm4, %v394_v61   ;;  %v409_v25 = vsel %vm4_vm3, %v5784_v45, %v5783_v46 }
 0x16c   :  { %5781 = vst.msk [vmem:[%s12713_s1 + $0xb2] ss:$8 sm:$0x30] %vm6_vm4, %v394_v61   ;;  %5782 = vst.msk [vmem:[%s12713_s1 + $0xa3] ss:$8 sm:$0xc0] %vm6_vm4, %v394_v61  }
 0x16d   :  { %v6374_v7 = vld [vmem:[%s12712_s0 + $0x184] ss:$16 sm:%s10096_s21]   ;;  %6154 = vst.msk [vmem:[%s12713_s1 + $0x80] sm:$0xff] %vm1969_vm7, %v2059_v9   ;;  %6164 = vst.msk [vmem:[%s12713_s1 + $0xc0] sm:$0xff] %vm1969_vm7, %v2105_v33   ;;  %s3764_s21 = smov 3 }
 0x16e   :  { %6090 = vst.msk [vmem:[%s12713_s1 + $0xf0] sm:$0xff] %vm1234_vm6, %v9474_v0   ;;  %v3081_v0 = vsel %vm485_vm0, %v6375_v52, %v6374_v7  ;;  %v6376_v44 = vld [vmem:[%s12712_s0 + $0x184] ss:$16 sm:%s10124_s10]   ;;  %6130 = vst.msk [vmem:[%s12713_s1 + $0xf8] sm:$0xff] %vm1234_vm6, %v9800_v32   ;;  %v2128_v32 = vpop.permute.xlu1 %2127   ;;  %s3098_s10 = smov 3 }
 0x16f   :  { %5785 = vst.msk [vmem:[%s12713_s1 + $0xd4] ss:$8 sm:$0x3] %vm6_vm4, %v409_v25   ;;  %5786 = vst.msk [vmem:[%s12713_s1 + $0xc5] ss:$8 sm:$0xc] %vm6_vm4, %v409_v25  }
 0x170   :  { %5787 = vst.msk [vmem:[%s12713_s1 + $0xb6] ss:$8 sm:$0x30] %vm6_vm4, %v409_v25   ;;  %5788 = vst.msk [vmem:[%s12713_s1 + $0xa7] ss:$8 sm:$0xc0] %vm6_vm4, %v409_v25   ;;  %v2243_v25 = vpop.permute.xlu0 %2242  }
 0x171   :  { %v6377_v55 = vld [vmem:[%s12712_s0 + $0x184] ss:$16 sm:%s10126_s18]   ;;  %s3121_s18 = smov 3  ;;  %5926 = vst.msk [vmem:[%s12713_s1 + $0xd0] sm:$0xff] %vm499_vm5, %v8128_v39   ;;  %5966 = vst.msk [vmem:[%s12713_s1 + $0xd8] sm:$0xff] %vm499_vm5, %v8402_v29   ;;  %v3086_v39 = vsel %vm490_vm1, %v6376_v44, %v3081_v0 }
 0x172   :  { %v6369_v29 = vld [vmem:[%s12712_s0 + $0x84] ss:$16 sm:%s10141_s15]   ;;  %6169 = vst.msk [vmem:[%s12713_s1 + $0xe0] sm:$0xff] %vm1969_vm7, %v2128_v32   ;;  %v2174_v31 = vpop.permute.xlu1 %2173   ;;  %6174 = vst.msk [vmem:[%s12713_s1 + $0x8] sm:$0xff] %vm1969_vm7, %v2151_v10   ;;  %s3488_s15 = smov 3 }
 0x173   :  { %v6370_v56 = vld [vmem:[%s12712_s0 + $0x84] ss:$16 sm:%s10143_s28]   ;;  %s3124_s28 = smov 12  ;;  %6085 = vst.msk [vmem:[%s12713_s1 + $0xd0] sm:$0xff] %vm1234_vm6, %v9509_v49   ;;  %v3091_v49 = vsel %vm495_vm2, %v6377_v55, %v3086_v39  ;;  %6125 = vst.msk [vmem:[%s12713_s1 + $0xd8] sm:$0xff] %vm1234_vm6, %v9869_v53  }
 0x174   :  { %v3058_v57 = vsel %vm485_vm0, %v6370_v56, %v6369_v29  ;;  %v6371_v30 = vld [vmem:[%s12712_s0 + $0x84] ss:$16 sm:%s3060_s13]   ;;  %3092 = vrot.lane.b32.xlu1 %v3091_v49, %s6936_s26  ;;  %6179 = vst.msk [vmem:[%s12713_s1 + $0x28] sm:$0xff] %vm1969_vm7, %v2174_v31   ;;  %v2289_v33 = vpop.permute.xlu0 %2288   ;;  %s4063_s13 = smov 3 }
 0x175   :  { %v6372_v51 = vld [vmem:[%s12712_s0 + $0x84] ss:$16 sm:%s3065_s17]   ;;  %s3134_s17 = smov 192  ;;  %v3063_v53 = vsel %vm490_vm1, %v6371_v30, %v3058_v57  ;;  %6184 = vst.msk [vmem:[%s12713_s1 + $0x48] sm:$0xff] %vm1969_vm7, %v2197_v17   ;;  %6194 = vst.msk [vmem:[%s12713_s1 + $0x88] sm:$0xff] %vm1969_vm7, %v2243_v25  }
 0x176   :  { %v6384_v58 = vld [vmem:[%s12712_s0 + $0x384] ss:$16 sm:%s3121_s18]   ;;  %v3068_v59 = vsel %vm495_vm2, %v6372_v51, %v3063_v53  ;;  %v2220_v21 = vpop.permute.xlu1 %2219   ;;  %6204 = vst.msk [vmem:[%s12713_s1 + $0xc8] sm:$0xff] %vm1969_vm7, %v2289_v33   ;;  %s4025_s18 = smov 48 }
 0x177   :  { %v6385_v2 = vld [vmem:[%s12712_s0 + $0x384] ss:$16 sm:%s3124_s28]   ;;  %3069 = vrot.lane.b32.xlu0 %v3068_v59, %s6936_s26  ;;  %6189 = vst.msk [vmem:[%s12713_s1 + $0x68] sm:$0xff] %vm1969_vm7, %v2220_v21   ;;  %s4048_s28 = smov 48 }
 0x178   :  { %v6386_v22 = vld [vmem:[%s12712_s0 + $0x384] ss:$16 sm:%s3129_s25]   ;;  %v3127_v24 = vsel %vm485_vm0, %v6385_v2, %v6384_v58  ;;  %v2335_v10 = vpop.permute.xlu0 %2334   ;;  %s3767_s25 = smov 12 }
 0x179   :  { %v6387_v28 = vld [vmem:[%s12712_s0 + $0x384] ss:$16 sm:%s3134_s17]   ;;  %v3132_v4 = vsel %vm490_vm1, %v6386_v22, %v3127_v24  ;;  %6214 = vst.msk [vmem:[%s12713_s1 + $0x10] sm:$0xff] %vm1969_vm7, %v2335_v10   ;;  %s4017_s17 = smov 3 }
 0x17a   :  { %v6379_v14 = vld [vmem:[%s12712_s0 + $0x284] ss:$16 sm:%s3098_s10]   ;;  %v3137_v60 = vsel %vm495_vm2, %v6387_v28, %v3132_v4  ;;  %s3144_s10 = smov 3  ;;  %v2266_v27 = vpop.permute.xlu1 %2265  }
 0x17b   :  { %v6380_v42 = vld [vmem:[%s12712_s0 + $0x284] ss:$16 sm:%s3101_s11]   ;;  %3138 = vrot.lane.b32.xlu1 %v3137_v60, %s6936_s26  ;;  %s3147_s11 = smov 12  ;;  %6199 = vst.msk [vmem:[%s12713_s1 + $0xa8] sm:$0xff] %vm1969_vm7, %v2266_v27  }
 0x17c   :  { %v3104_v3 = vsel %vm485_vm0, %v6380_v42, %v6379_v14  ;;  %v6381_v36 = vld [vmem:[%s12712_s0 + $0x284] ss:$16 sm:%s3106_s7]   ;;  %s3152_s7 = smov 48  ;;  %v2381_v17 = vpop.permute.xlu0 %2380  }
 0x17d   :  { %v6382_v63 = vld [vmem:[%s12712_s0 + $0x284] ss:$16 sm:%s3111_s22]   ;;  %v3109_v5 = vsel %vm490_vm1, %v6381_v36, %v3104_v3  ;;  %s3157_s22 = smov 192  ;;  %6224 = vst.msk [vmem:[%s12713_s1 + $0x50] sm:$0xff] %vm1969_vm7, %v2381_v17  }
 0x17e   :  { %v6394_v38 = vld [vmem:[%s12712_s0 + $0x584] ss:$16 sm:%s3167_s14]   ;;  %v3114_v6 = vsel %vm495_vm2, %v6382_v63, %v3109_v5  ;;  %s3213_s14 = smov 3  ;;  %v2312_v32 = vpop.permute.xlu1 %2311  }
 0x17f   :  { %v6395_v16 = vld [vmem:[%s12712_s0 + $0x584] ss:$16 sm:%s3170_s30]   ;;  %3115 = vrot.lane.b32.xlu0 %v3114_v6, %s6936_s26  ;;  %s3216_s30 = smov 12  ;;  %6209 = vst.msk [vmem:[%s12713_s1 + $0xe8] sm:$0xff] %vm1969_vm7, %v2312_v32  }
 0x180   :  { %v6396_v1 = vld [vmem:[%s12712_s0 + $0x584] ss:$16 sm:%s3175_s4]   ;;  %v3173_v41 = vsel %vm485_vm0, %v6395_v16, %v6394_v38  ;;  %s3221_s4 = smov 48  ;;  %v2427_v25 = vpop.permute.xlu0 %2426  }
 0x181   :  { %v6397_v47 = vld [vmem:[%s12712_s0 + $0x584] ss:$16 sm:%s3180_s5]   ;;  %v3178_v23 = vsel %vm490_vm1, %v6396_v1, %v3173_v41  ;;  %s3226_s5 = smov 192  ;;  %6234 = vst.msk [vmem:[%s12713_s1 + $0x90] sm:$0xff] %vm1969_vm7, %v2427_v25  }
 0x182   :  { %v6389_v48 = vld [vmem:[%s12712_s0 + $0x484] ss:$16 sm:%s3144_s10]   ;;  %v3183_v62 = vsel %vm495_vm2, %v6397_v47, %v3178_v23  ;;  %s3190_s10 = smov 3  ;;  %v2358_v31 = vpop.permute.xlu1 %2357  }
 0x183   :  { %v6390_v15 = vld [vmem:[%s12712_s0 + $0x484] ss:$16 sm:%s3147_s11]   ;;  %3184 = vrot.lane.b32.xlu1 %v3183_v62, %s6936_s26  ;;  %s3193_s11 = smov 12  ;;  %6219 = vst.msk [vmem:[%s12713_s1 + $0x30] sm:$0xff] %vm1969_vm7, %v2358_v31  }
 0x184   :  { %v3150_v8 = vsel %vm485_vm0, %v6390_v15, %v6389_v48  ;;  %v6391_v34 = vld [vmem:[%s12712_s0 + $0x484] ss:$16 sm:%s3152_s7]   ;;  %s3198_s7 = smov 48  ;;  %v2473_v33 = vpop.permute.xlu0 %2472  }
 0x185   :  { %v6392_v12 = vld [vmem:[%s12712_s0 + $0x484] ss:$16 sm:%s3157_s22]   ;;  %v3155_v11 = vsel %vm490_vm1, %v6391_v34, %v3150_v8  ;;  %s3203_s22 = smov 192  ;;  %6244 = vst.msk [vmem:[%s12713_s1 + $0xd0] sm:$0xff] %vm1969_vm7, %v2473_v33  }
 0x186   :  { %v6404_v50 = vld [vmem:[%s12712_s0 + $0x784] ss:$16 sm:%s3213_s14]   ;;  %v3160_v13 = vsel %vm495_vm2, %v6392_v12, %v3155_v11  ;;  %s3259_s14 = smov 3  ;;  %v2404_v21 = vpop.permute.xlu1 %2403  }
 0x187   :  { %v6405_v18 = vld [vmem:[%s12712_s0 + $0x784] ss:$16 sm:%s3216_s30]   ;;  %3161 = vrot.lane.b32.xlu0 %v3160_v13, %s6936_s26  ;;  %s3262_s30 = smov 12  ;;  %6229 = vst.msk [vmem:[%s12713_s1 + $0x70] sm:$0xff] %vm1969_vm7, %v2404_v21  }
 0x188   :  { %v6406_v19 = vld [vmem:[%s12712_s0 + $0x784] ss:$16 sm:%s3221_s4]   ;;  %v3219_v20 = vsel %vm485_vm0, %v6405_v18, %v6404_v50  ;;  %s3267_s4 = smov 48  ;;  %v6414_v9 = vld [vmem:[%s12712_s0 + $0x18c] ss:$16 sm:%s3259_s14]   ;;  %s3305_s14 = smov 3  ;;  %v2519_v10 = vpop.permute.xlu0 %2518  }
 0x189   :  { %v6407_v26 = vld [vmem:[%s12712_s0 + $0x784] ss:$16 sm:%s3226_s5]   ;;  %v3224_v35 = vsel %vm490_vm1, %v6406_v19, %v3219_v20  ;;  %s3272_s5 = smov 192  ;;  %v6415_v52 = vld [vmem:[%s12712_s0 + $0x18c] ss:$16 sm:%s3262_s30]   ;;  %s3308_s30 = smov 12 }
 0x18a   :  { %v6399_v37 = vld [vmem:[%s12712_s0 + $0x684] ss:$16 sm:%s3190_s10]   ;;  %v3229_v43 = vsel %vm495_vm2, %v6407_v26, %v3224_v35  ;;  %s3236_s10 = smov 3  ;;  %v6416_v0 = vld [vmem:[%s12712_s0 + $0x18c] ss:$16 sm:%s3267_s4]   ;;  %v3265_v44 = vsel %vm485_vm0, %v6415_v52, %v6414_v9  ;;  %s3313_s4 = smov 48  ;;  %v2450_v27 = vpop.permute.xlu1 %2449  }
 0x18b   :  { %v6400_v40 = vld [vmem:[%s12712_s0 + $0x684] ss:$16 sm:%s3193_s11]   ;;  %3230 = vrot.lane.b32.xlu1 %v3229_v43, %s6936_s26  ;;  %s3239_s11 = smov 12  ;;  %v3270_v39 = vsel %vm490_vm1, %v6416_v0, %v3265_v44  ;;  %6239 = vst.msk [vmem:[%s12713_s1 + $0xb0] sm:$0xff] %vm1969_vm7, %v2450_v27  }
 0x18c   :  { %v3196_v54 = vsel %vm485_vm0, %v6400_v40, %v6399_v37  ;;  %v6401_v61 = vld [vmem:[%s12712_s0 + $0x684] ss:$16 sm:%s3198_s7]   ;;  %s3244_s7 = smov 48  ;;  %v6417_v55 = vld [vmem:[%s12712_s0 + $0x18c] ss:$16 sm:%s3272_s5]   ;;  %s3318_s5 = smov 192  ;;  %v2565_v17 = vpop.permute.xlu0 %2564  }
 0x18d   :  { %v6402_v46 = vld [vmem:[%s12712_s0 + $0x684] ss:$16 sm:%s3203_s22]   ;;  %v3201_v45 = vsel %vm490_vm1, %v6401_v61, %v3196_v54  ;;  %s3249_s22 = smov 192  ;;  %v6409_v29 = vld [vmem:[%s12712_s0 + $0x8c] ss:$16 sm:%s3236_s10]   ;;  %v3275_v49 = vsel %vm495_vm2, %v6417_v55, %v3270_v39  ;;  %s3282_s10 = smov 3 }
 0x18e   :  { %v3206_v7 = vsel %vm495_vm2, %v6402_v46, %v3201_v45  ;;  %v6410_v56 = vld [vmem:[%s12712_s0 + $0x8c] ss:$16 sm:%s3239_s11]   ;;  %s3285_s11 = smov 12  ;;  %v2496_v32 = vpop.permute.xlu1 %2495   ;;  %6254 = vst.msk [vmem:[%s12713_s1 + $0x18] sm:$0xff] %vm1969_vm7, %v2519_v10   ;;  %6264 = vst.msk [vmem:[%s12713_s1 + $0x58] sm:$0xff] %vm1969_vm7, %v2565_v17  }
 0x18f   :  { %3207 = vrot.lane.b32.xlu0 %v3206_v7, %s6936_s26  ;;  %v3242_v57 = vsel %vm485_vm0, %v6410_v56, %v6409_v29  ;;  %v6411_v30 = vld [vmem:[%s12712_s0 + $0x8c] ss:$16 sm:%s3244_s7]   ;;  %3276 = vrot.lane.b32.xlu1 %v3275_v49, %s6936_s26  ;;  %s3290_s7 = smov 48 }
 0x190   :  { %v6412_v51 = vld [vmem:[%s12712_s0 + $0x8c] ss:$16 sm:%s3249_s22]   ;;  %v3247_v53 = vsel %vm490_vm1, %v6411_v30, %v3242_v57  ;;  %s3295_s22 = smov 192  ;;  %6249 = vst.msk [vmem:[%s12713_s1 + $0xf0] sm:$0xff] %vm1969_vm7, %v2496_v32   ;;  %v2611_v25 = vpop.permute.xlu0 %2610  }
 0x191   :  { %v6424_v58 = vld [vmem:[%s12712_s0 + $0x38c] ss:$16 sm:%s3305_s14]   ;;  %v3252_v59 = vsel %vm495_vm2, %v6412_v51, %v3247_v53  ;;  %s3351_s14 = smov 3  ;;  %6274 = vst.msk [vmem:[%s12713_s1 + $0x98] sm:$0xff] %vm1969_vm7, %v2611_v25  }
 0x192   :  { %v6425_v2 = vld [vmem:[%s12712_s0 + $0x38c] ss:$16 sm:%s3308_s30]   ;;  %s3354_s30 = smov 12  ;;  %v2542_v31 = vpop.permute.xlu1 %2541   ;;  %v6524_v17 = vld [vmem:[%s12712_s0 + $0x70b] ss:$16 sm:%s3767_s25]   ;;  %s3813_s25 = smov 12 }
 0x193   :  { %v6426_v22 = vld [vmem:[%s12712_s0 + $0x38c] ss:$16 sm:%s3313_s4]   ;;  %3253 = vrot.lane.b32.xlu0 %v3252_v59, %s6936_s26  ;;  %v3311_v24 = vsel %vm485_vm0, %v6425_v2, %v6424_v58  ;;  %s3359_s4 = smov 48  ;;  %6259 = vst.msk [vmem:[%s12713_s1 + $0x38] sm:$0xff] %vm1969_vm7, %v2542_v31  }
 0x194   :  { %v6427_v28 = vld [vmem:[%s12712_s0 + $0x38c] ss:$16 sm:%s3318_s5]   ;;  %v3316_v4 = vsel %vm490_vm1, %v6426_v22, %v3311_v24  ;;  %s3364_s5 = smov 192  ;;  %v6463_v58 = vld [vmem:[%s12712_s0 + $0x303] ss:$16 sm:%s3488_s15]   ;;  %s3534_s15 = smov 3 }
 0x195   :  { %v6419_v14 = vld [vmem:[%s12712_s0 + $0x28c] ss:$16 sm:%s3282_s10]   ;;  %v3321_v60 = vsel %vm495_vm2, %v6427_v28, %v3316_v4  ;;  %s3328_s10 = smov 3  ;;  %v6464_v2 = vld [vmem:[%s12712_s0 + $0x303] ss:$16 sm:%s3491_s9]   ;;  %s3537_s9 = smov 12 }
 0x196   :  { %v6420_v42 = vld [vmem:[%s12712_s0 + $0x28c] ss:$16 sm:%s3285_s11]   ;;  %3322 = vrot.lane.b32.xlu1 %v3321_v60, %s6936_s26  ;;  %s3331_s11 = smov 12  ;;  %v3494_v24 = vsel %vm485_vm0, %v6464_v2, %v6463_v58  ;;  %v2588_v21 = vpop.permute.xlu1 %2587  }
 0x197   :  { %v3288_v3 = vsel %vm485_vm0, %v6420_v42, %v6419_v14  ;;  %v6421_v36 = vld [vmem:[%s12712_s0 + $0x28c] ss:$16 sm:%s3290_s7]   ;;  %s3336_s7 = smov 48  ;;  %v6466_v28 = vld [vmem:[%s12712_s0 + $0x303] ss:$16 sm:%s3501_s20]   ;;  %s3547_s20 = smov 192 }
 0x198   :  { %v6422_v63 = vld [vmem:[%s12712_s0 + $0x28c] ss:$16 sm:%s3295_s22]   ;;  %v3293_v5 = vsel %vm490_vm1, %v6421_v36, %v3288_v3  ;;  %s3341_s22 = smov 192  ;;  %6269 = vst.msk [vmem:[%s12713_s1 + $0x78] sm:$0xff] %vm1969_vm7, %v2588_v21  }
 0x199   :  { %v6434_v38 = vld [vmem:[%s12712_s0 + $0x58c] ss:$16 sm:%s3351_s14]   ;;  %v3298_v6 = vsel %vm495_vm2, %v6422_v63, %v3293_v5  ;;  %s3397_s14 = smov 3  ;;  %v6508_v21 = vld [vmem:[%s12712_s0 + $0x40b] ss:$16 sm:%s3695_s8]   ;;  %s3741_s8 = smov 3 }
 0x19a   :  { %v6435_v16 = vld [vmem:[%s12712_s0 + $0x58c] ss:$16 sm:%s3354_s30]   ;;  %3299 = vrot.lane.b32.xlu0 %v3298_v6, %s6936_s26  ;;  %s3400_s30 = smov 12  ;;  %v2634_v27 = vpop.permute.xlu1 %2633  }
 0x19b   :  { %v6436_v1 = vld [vmem:[%s12712_s0 + $0x58c] ss:$16 sm:%s3359_s4]   ;;  %v3357_v41 = vsel %vm485_vm0, %v6435_v16, %v6434_v38  ;;  %s3405_s4 = smov 48  ;;  %v6473_v38 = vld [vmem:[%s12712_s0 + $0x503] ss:$16 sm:%s3534_s15]   ;;  %s3580_s15 = smov 3 }
 0x19c   :  { %v6437_v47 = vld [vmem:[%s12712_s0 + $0x58c] ss:$16 sm:%s3364_s5]   ;;  %v3362_v23 = vsel %vm490_vm1, %v6436_v1, %v3357_v41  ;;  %s3410_s5 = smov 192  ;;  %v6474_v16 = vld [vmem:[%s12712_s0 + $0x503] ss:$16 sm:%s3537_s9]   ;;  %s3583_s9 = smov 12 }
 0x19d   :  { %v6429_v48 = vld [vmem:[%s12712_s0 + $0x48c] ss:$16 sm:%s3328_s10]   ;;  %v3367_v62 = vsel %vm495_vm2, %v6437_v47, %v3362_v23  ;;  %s3374_s10 = smov 3  ;;  %v3540_v41 = vsel %vm485_vm0, %v6474_v16, %v6473_v38  ;;  %v6476_v47 = vld [vmem:[%s12712_s0 + $0x503] ss:$16 sm:%s3547_s20]   ;;  %s3593_s20 = smov 192 }
 0x19e   :  { %v6430_v15 = vld [vmem:[%s12712_s0 + $0x48c] ss:$16 sm:%s3331_s11]   ;;  %3368 = vrot.lane.b32.xlu1 %v3367_v62, %s6936_s26  ;;  %s3377_s11 = smov 12  ;;  %6279 = vst.msk [vmem:[%s12713_s1 + $0xb8] sm:$0xff] %vm1969_vm7, %v2634_v27  }
 0x19f   :  { %v3334_v8 = vsel %vm485_vm0, %v6430_v15, %v6429_v48  ;;  %v6431_v34 = vld [vmem:[%s12712_s0 + $0x48c] ss:$16 sm:%s3336_s7]   ;;  %s3382_s7 = smov 48  ;;  %v6518_v27 = vld [vmem:[%s12712_s0 + $0x60b] ss:$16 sm:%s3741_s8]   ;;  %s3787_s8 = smov 3 }
 0x1a0   :  { %v6432_v12 = vld [vmem:[%s12712_s0 + $0x48c] ss:$16 sm:%s3341_s22]   ;;  %v3339_v11 = vsel %vm490_vm1, %v6431_v34, %v3334_v8  ;;  %s3387_s22 = smov 192  ;;  %v6534_v25 = vld [vmem:[%s12712_s0 + $0x183] ss:$16 sm:%s3813_s25]   ;;  %s3859_s25 = smov 12 }
 0x1a1   :  { %v6444_v50 = vld [vmem:[%s12712_s0 + $0x78c] ss:$16 sm:%s3397_s14]   ;;  %v3344_v13 = vsel %vm495_vm2, %v6432_v12, %v3339_v11  ;;  %s3442_s14 = smov 3 }
 0x1a2   :  { %v6445_v18 = vld [vmem:[%s12712_s0 + $0x78c] ss:$16 sm:%s3400_s30]   ;;  %3345 = vrot.lane.b32.xlu0 %v3344_v13, %s6936_s26  ;;  %s3445_s30 = smov 12 }
 0x1a3   :  { %v6446_v19 = vld [vmem:[%s12712_s0 + $0x78c] ss:$16 sm:%s3405_s4]   ;;  %v3403_v20 = vsel %vm485_vm0, %v6445_v18, %v6444_v50  ;;  %s3450_s4 = smov 48  ;;  %v6453_v9 = vld [vmem:[%s12712_s0 + $0x103] ss:$16 sm:%s3442_s14]   ;;  %s4043_s14 = smov 12 }
 0x1a4   :  { %v6447_v26 = vld [vmem:[%s12712_s0 + $0x78c] ss:$16 sm:%s3410_s5]   ;;  %v3408_v35 = vsel %vm490_vm1, %v6446_v19, %v3403_v20  ;;  %s3455_s5 = smov 192  ;;  %v6454_v52 = vld [vmem:[%s12712_s0 + $0x103] ss:$16 sm:%s3445_s30]   ;;  %s3496_s30 = smov 48 }
 0x1a5   :  { %v6439_v37 = vld [vmem:[%s12712_s0 + $0x68c] ss:$16 sm:%s3374_s10]   ;;  %v3413_v43 = vsel %vm495_vm2, %v6447_v26, %v3408_v35  ;;  %s3420_s10 = smov 3  ;;  %v6455_v0 = vld [vmem:[%s12712_s0 + $0x103] ss:$16 sm:%s3450_s4]   ;;  %v3448_v44 = vsel %vm485_vm0, %v6454_v52, %v6453_v9  ;;  %s4053_s4 = smov 192 }
 0x1a6   :  { %v6440_v40 = vld [vmem:[%s12712_s0 + $0x68c] ss:$16 sm:%s3377_s11]   ;;  %3414 = vrot.lane.b32.xlu1 %v3413_v43, %s6936_s26  ;;  %s3423_s11 = smov 12  ;;  %v3453_v39 = vsel %vm490_vm1, %v6455_v0, %v3448_v44 }
 0x1a7   :  { %v3380_v54 = vsel %vm485_vm0, %v6440_v40, %v6439_v37  ;;  %v6441_v61 = vld [vmem:[%s12712_s0 + $0x68c] ss:$16 sm:%s3382_s7]   ;;  %s3428_s7 = smov 48  ;;  %v6456_v55 = vld [vmem:[%s12712_s0 + $0x103] ss:$16 sm:%s3455_s5]   ;;  %s6937_s5 = smov 48  }
 0x1a8   :  { %v6442_v46 = vld [vmem:[%s12712_s0 + $0x68c] ss:$16 sm:%s3387_s22]   ;;  %v3385_v45 = vsel %vm490_vm1, %v6441_v61, %v3380_v54  ;;  %s3433_s22 = smov 192  ;;  %v6449_v29 = vld [vmem:[%s12712_s0 + $0x3] ss:$16 sm:%s3420_s10]   ;;  %v3458_v49 = vsel %vm495_vm2, %v6456_v55, %v3453_v39  ;;  %s3465_s10 = smov 3 }
 0x1a9   :  { %v3390_v7 = vsel %vm495_vm2, %v6442_v46, %v3385_v45  ;;  %v6450_v56 = vld [vmem:[%s12712_s0 + $0x3] ss:$16 sm:%s3423_s11]   ;;  %s3468_s11 = smov 12 }
 0x1aa   :  { %3391 = vrot.lane.b32.xlu0 %v3390_v7, %s6936_s26  ;;  %v3426_v57 = vsel %vm485_vm0, %v6450_v56, %v6449_v29  ;;  %v6451_v30 = vld [vmem:[%s12712_s0 + $0x3] ss:$16 sm:%s3428_s7]   ;;  %3459 = vrot.lane.b32.xlu1 %v3458_v49, %s6937_s5  ;;  %s3473_s7 = smov 48  ;;  %v2680_v56 = vpop.permute.xlu1 %2679   ;;  %s3718_s26 = smov 3 }
 0x1ab   :  { %v6452_v51 = vld [vmem:[%s12712_s0 + $0x3] ss:$16 sm:%s3433_s22]   ;;  %v3431_v53 = vsel %vm490_vm1, %v6451_v30, %v3426_v57  ;;  %s3478_s22 = smov 192  ;;  %6289 = vst.msk [vmem:[%s12713_s1 + $0xf8] sm:$0xff] %vm1969_vm7, %v2680_v56  }
 0x1ac   :  { %v3436_v59 = vsel %vm495_vm2, %v6452_v51, %v3431_v53  ;;  %v6465_v22 = vld [vmem:[%s12712_s0 + $0x303] ss:$16 sm:%s3496_s30]   ;;  %s3542_s30 = smov 48 }
 0x1ad   :  { %v3499_v4 = vsel %vm490_vm1, %v6465_v22, %v3494_v24  ;;  %v6458_v14 = vld [vmem:[%s12712_s0 + $0x203] ss:$16 sm:%s3465_s10]   ;;  %s3511_s10 = smov 3  ;;  %v2657_v22 = vpop.permute.xlu0 %2656  }
 0x1ae   :  { %3437 = vrot.lane.b32.xlu0 %v3436_v59, %s6937_s5  ;;  %v6459_v42 = vld [vmem:[%s12712_s0 + $0x203] ss:$16 sm:%s3468_s11]   ;;  %v3504_v60 = vsel %vm495_vm2, %v6466_v28, %v3499_v4  ;;  %s3514_s11 = smov 12  ;;  %6284 = vst.msk [vmem:[%s12713_s1 + $0xd8] sm:$0xff] %vm1969_vm7, %v2657_v22   ;;  %v2725_v16 = vpop.permute.xlu1 %2724  }
 0x1af   :  { %v3471_v3 = vsel %vm485_vm0, %v6459_v42, %v6458_v14  ;;  %v6460_v36 = vld [vmem:[%s12712_s0 + $0x203] ss:$16 sm:%s3473_s7]   ;;  %3505 = vrot.lane.b32.xlu1 %v3504_v60, %s6937_s5  ;;  %s3519_s7 = smov 48  ;;  %6298 = vst.msk [vmem:[%s12713_s1 + $0x20] sm:$0xff] %vm2704_vm8, %v2725_v16  }
 0x1b0   :  { %v6461_v63 = vld [vmem:[%s12712_s0 + $0x203] ss:$16 sm:%s3478_s22]   ;;  %v3476_v5 = vsel %vm490_vm1, %v6460_v36, %v3471_v3  ;;  %s3524_s22 = smov 192  ;;  %v6506_v28 = vld [vmem:[%s12712_s0 + $0x30b] ss:$16 sm:%s3685_s23]   ;;  %s3731_s23 = smov 192 }
 0x1b1   :  { %v3481_v6 = vsel %vm495_vm2, %v6461_v63, %v3476_v5  ;;  %v6475_v1 = vld [vmem:[%s12712_s0 + $0x503] ss:$16 sm:%s3542_s30]   ;;  %s3588_s30 = smov 48  ;;  %v6513_v5 = vld [vmem:[%s12712_s0 + $0x50b] ss:$16 sm:%s3718_s26]   ;;  %s4185_s26 = smov 48 }
 0x1b2   :  { %3482 = vrot.lane.b32.xlu0 %v3481_v6, %s6937_s5  ;;  %v3545_v23 = vsel %vm490_vm1, %v6475_v1, %v3540_v41  ;;  %v6468_v48 = vld [vmem:[%s12712_s0 + $0x403] ss:$16 sm:%s3511_s10]   ;;  %s3557_s10 = smov 3 }
 0x1b3   :  { %v6469_v15 = vld [vmem:[%s12712_s0 + $0x403] ss:$16 sm:%s3514_s11]   ;;  %v3550_v62 = vsel %vm495_vm2, %v6476_v47, %v3545_v23  ;;  %s3560_s11 = smov 12  ;;  %v6516_v41 = vld [vmem:[%s12712_s0 + $0x50b] ss:$16 sm:%s3731_s23]   ;;  %s4066_s23 = smov 12 }
 0x1b4   :  { %v3517_v8 = vsel %vm485_vm0, %v6469_v15, %v6468_v48  ;;  %v6470_v34 = vld [vmem:[%s12712_s0 + $0x403] ss:$16 sm:%s3519_s7]   ;;  %3551 = vrot.lane.b32.xlu1 %v3550_v62, %s6937_s5  ;;  %s3565_s7 = smov 48  ;;  %v2703_v48 = vpop.permute.xlu0 %2702  }
 0x1b5   :  { %v6471_v12 = vld [vmem:[%s12712_s0 + $0x403] ss:$16 sm:%s3524_s22]   ;;  %v3522_v11 = vsel %vm490_vm1, %v6470_v34, %v3517_v8  ;;  %s3570_s22 = smov 192  ;;  %v6509_v23 = vld [vmem:[%s12712_s0 + $0x40b] ss:$16 sm:%s3698_s12]   ;;  %s3744_s12 = smov 12 }
 0x1b6   :  { %v6483_v50 = vld [vmem:[%s12712_s0 + $0x703] ss:$16 sm:%s3580_s15]   ;;  %v3527_v13 = vsel %vm495_vm2, %v6471_v12, %v3522_v11  ;;  %s3626_s15 = smov 3  ;;  %v3701_v62 = vsel %vm485_vm0, %v6509_v23, %v6508_v21  ;;  %v6510_v8 = vld [vmem:[%s12712_s0 + $0x40b] ss:$16 sm:%s3703_s27]   ;;  %s3749_s27 = smov 48 }
 0x1b7   :  { %v6484_v18 = vld [vmem:[%s12712_s0 + $0x703] ss:$16 sm:%s3583_s9]   ;;  %3528 = vrot.lane.b32.xlu0 %v3527_v13, %s6937_s5  ;;  %s3629_s9 = smov 12  ;;  %2705 = vst.msk [vmem:[%s12713_s1] sm:$0xff] %vm2704_vm8, %v2703_v48   ;;  %v3706_v12 = vsel %vm490_vm1, %v6510_v8, %v3701_v62 }
 0x1b8   :  { %v6485_v19 = vld [vmem:[%s12712_s0 + $0x703] ss:$16 sm:%s3588_s30]   ;;  %v3586_v20 = vsel %vm485_vm0, %v6484_v18, %v6483_v50  ;;  %s3634_s30 = smov 48  ;;  %v6493_v9 = vld [vmem:[%s12712_s0 + $0x10b] ss:$16 sm:%s3626_s15]   ;;  %s3672_s15 = smov 3  ;;  %v2771_v18 = vpop.permute.xlu1 %2770  }
 0x1b9   :  { %v6486_v26 = vld [vmem:[%s12712_s0 + $0x703] ss:$16 sm:%s3593_s20]   ;;  %v3591_v35 = vsel %vm490_vm1, %v6485_v19, %v3586_v20  ;;  %s3639_s20 = smov 192  ;;  %v6494_v52 = vld [vmem:[%s12712_s0 + $0x10b] ss:$16 sm:%s3629_s9]   ;;  %s3675_s9 = smov 12 }
 0x1ba   :  { %v6478_v37 = vld [vmem:[%s12712_s0 + $0x603] ss:$16 sm:%s3557_s10]   ;;  %v3596_v43 = vsel %vm495_vm2, %v6486_v26, %v3591_v35  ;;  %s3603_s10 = smov 3  ;;  %v6495_v0 = vld [vmem:[%s12712_s0 + $0x10b] ss:$16 sm:%s3634_s30]   ;;  %v3632_v44 = vsel %vm485_vm0, %v6494_v52, %v6493_v9  ;;  %s3680_s30 = smov 48 }
 0x1bb   :  { %v6479_v40 = vld [vmem:[%s12712_s0 + $0x603] ss:$16 sm:%s3560_s11]   ;;  %3597 = vrot.lane.b32.xlu1 %v3596_v43, %s6937_s5  ;;  %s3606_s11 = smov 12  ;;  %v3637_v32 = vsel %vm490_vm1, %v6495_v0, %v3632_v44  ;;  %6308 = vst.msk [vmem:[%s12713_s1 + $0x60] sm:$0xff] %vm2704_vm8, %v2771_v18  }
 0x1bc   :  { %v3563_v54 = vsel %vm485_vm0, %v6479_v40, %v6478_v37  ;;  %v6480_v61 = vld [vmem:[%s12712_s0 + $0x603] ss:$16 sm:%s3565_s7]   ;;  %s3611_s7 = smov 48  ;;  %v6496_v55 = vld [vmem:[%s12712_s0 + $0x10b] ss:$16 sm:%s3639_s20]   ;;  %v2748_v37 = vpop.permute.xlu0 %2747   ;;  %v2817_v52 = vpop.permute.xlu1 %2816   ;;  %s4020_s20 = smov 12 }
 0x1bd   :  { %v6481_v46 = vld [vmem:[%s12712_s0 + $0x603] ss:$16 sm:%s3570_s22]   ;;  %v3568_v45 = vsel %vm490_vm1, %v6480_v61, %v3563_v54  ;;  %s3616_s22 = smov 192  ;;  %v6488_v39 = vld [vmem:[%s12712_s0 + $0xb] ss:$16 sm:%s3603_s10]   ;;  %v3642_v49 = vsel %vm495_vm2, %v6496_v55, %v3637_v32  ;;  %s3649_s10 = smov 3 }
 0x1be   :  { %v3573_v7 = vsel %vm495_vm2, %v6481_v46, %v3568_v45  ;;  %v6489_v29 = vld [vmem:[%s12712_s0 + $0xb] ss:$16 sm:%s3606_s11]   ;;  %s3652_s11 = smov 12  ;;  %6303 = vst.msk [vmem:[%s12713_s1 + $0x40] sm:$0xff] %vm2704_vm8, %v2748_v37   ;;  %6318 = vst.msk [vmem:[%s12713_s1 + $0xa0] sm:$0xff] %vm2704_vm8, %v2817_v52  }
 0x1bf   :  { %3574 = vrot.lane.b32.xlu0 %v3573_v7, %s6937_s5  ;;  %v3609_v57 = vsel %vm485_vm0, %v6489_v29, %v6488_v39  ;;  %v6490_v30 = vld [vmem:[%s12712_s0 + $0xb] ss:$16 sm:%s3611_s7]   ;;  %3643 = vrot.lane.b32.xlu1 %v3642_v49, %s6937_s5  ;;  %s3657_s7 = smov 48 }
 0x1c0   :  { %v6491_v51 = vld [vmem:[%s12712_s0 + $0xb] ss:$16 sm:%s3616_s22]   ;;  %v3614_v53 = vsel %vm490_vm1, %v6490_v30, %v3609_v57  ;;  %s3662_s22 = smov 192  ;;  %v6528_v32 = vld [vmem:[%s12712_s0 + $0x83] ss:$16 sm:%s3787_s8]   ;;  %v2794_v29 = vpop.permute.xlu0 %2793   ;;  %s3833_s8 = smov 3 }
 0x1c1   :  { %v6503_v58 = vld [vmem:[%s12712_s0 + $0x30b] ss:$16 sm:%s3672_s15]   ;;  %v3619_v33 = vsel %vm495_vm2, %v6491_v51, %v3614_v53  ;;  %6313 = vst.msk [vmem:[%s12713_s1 + $0x80] sm:$0xff] %vm2704_vm8, %v2794_v29   ;;  %s4140_s15 = smov 48 }
 0x1c2   :  { %v6504_v59 = vld [vmem:[%s12712_s0 + $0x30b] ss:$16 sm:%s3675_s9]   ;;  %s3721_s9 = smov 12 }
 0x1c3   :  { %v6505_v2 = vld [vmem:[%s12712_s0 + $0x30b] ss:$16 sm:%s3680_s30]   ;;  %3620 = vrot.lane.b32.xlu0 %v3619_v33, %s6937_s5  ;;  %v3678_v24 = vsel %vm485_vm0, %v6504_v59, %v6503_v58  ;;  %s3726_s30 = smov 48 }
 0x1c4   :  { %v3683_v31 = vsel %vm490_vm1, %v6505_v2, %v3678_v24  ;;  %v6498_v4 = vld [vmem:[%s12712_s0 + $0x20b] ss:$16 sm:%s3649_s10]   ;;  %v6544_v33 = vld [vmem:[%s12712_s0 + $0x383] ss:$16 sm:%s3859_s25]   ;;  %v2863_v2 = vpop.permute.xlu1 %2862   ;;  %s3905_s25 = smov 12  ;;  %s4071_s10 = smov 48 }
 0x1c5   :  { %v6499_v14 = vld [vmem:[%s12712_s0 + $0x20b] ss:$16 sm:%s3652_s11]   ;;  %v3688_v42 = vsel %vm495_vm2, %v6506_v28, %v3683_v31  ;;  %6328 = vst.msk [vmem:[%s12713_s1 + $0xe0] sm:$0xff] %vm2704_vm8, %v2863_v2   ;;  %s4076_s11 = smov 192 }
 0x1c6   :  { %v3655_v60 = vsel %vm485_vm0, %v6499_v14, %v6498_v4  ;;  %v6500_v3 = vld [vmem:[%s12712_s0 + $0x20b] ss:$16 sm:%s3657_s7]   ;;  %3689 = vrot.lane.b32.xlu1 %v3688_v42, %s6937_s5  ;;  %v2840_v14 = vpop.permute.xlu0 %2839  }
 0x1c7   :  { %v6501_v36 = vld [vmem:[%s12712_s0 + $0x20b] ss:$16 sm:%s3662_s22]   ;;  %v3660_v63 = vsel %vm490_vm1, %v6500_v3, %v3655_v60  ;;  %v6538_v31 = vld [vmem:[%s12712_s0 + $0x283] ss:$16 sm:%s3833_s8]   ;;  %s3879_s8 = smov 3  ;;  %s4961_s22 = smov 12 }
 0x1c8   :  { %v3665_v38 = vsel %vm495_vm2, %v6501_v36, %v3660_v63  ;;  %v6514_v10 = vld [vmem:[%s12712_s0 + $0x50b] ss:$16 sm:%s3721_s9]   ;;  %6323 = vst.msk [vmem:[%s12713_s1 + $0xc0] sm:$0xff] %vm2704_vm8, %v2840_v14   ;;  %v2909_v16 = vpop.permute.xlu1 %2908   ;;  %s4145_s9 = smov 192 }
 0x1c9   :  { %v6515_v6 = vld [vmem:[%s12712_s0 + $0x50b] ss:$16 sm:%s3726_s30]   ;;  %3666 = vrot.lane.b32.xlu0 %v3665_v38, %s6937_s5  ;;  %v3724_v1 = vsel %vm485_vm0, %v6514_v10, %v6513_v5  ;;  %6338 = vst.msk [vmem:[%s12713_s1 + $0x28] sm:$0xff] %vm2704_vm8, %v2909_v16   ;;  %s4155_s30 = smov 3 }
 0x1ca   :  { %v3729_v47 = vsel %vm490_vm1, %v6515_v6, %v3724_v1  ;;  %v6511_v34 = vld [vmem:[%s12712_s0 + $0x40b] ss:$16 sm:%s3708_s29]   ;;  %s3754_s29 = smov 192  ;;  %v6554_v10 = vld [vmem:[%s12712_s0 + $0x583] ss:$16 sm:%s3905_s25]   ;;  %s3951_s25 = smov 12  ;;  %v2886_v48 = vpop.permute.xlu0 %2885  }
 0x1cb   :  { %v3734_v15 = vsel %vm495_vm2, %v6516_v41, %v3729_v47  ;;  %v6523_v11 = vld [vmem:[%s12712_s0 + $0x70b] ss:$16 sm:%s3764_s21]   ;;  %v3711_v50 = vsel %vm495_vm2, %v6511_v34, %v3706_v12  ;;  %s3810_s21 = smov 3  ;;  %v6548_v21 = vld [vmem:[%s12712_s0 + $0x483] ss:$16 sm:%s3879_s8]   ;;  %s3925_s8 = smov 3 }
 0x1cc   :  { %3735 = vrot.lane.b32.xlu1 %v3734_v15, %s6937_s5  ;;  %v6525_v13 = vld [vmem:[%s12712_s0 + $0x70b] ss:$16 sm:%s3772_s19]   ;;  %v3770_v19 = vsel %vm485_vm0, %v6524_v17, %v6523_v11  ;;  %s3818_s19 = smov 48  ;;  %6333 = vst.msk [vmem:[%s12713_s1 + $0x8] sm:$0xff] %vm2704_vm8, %v2886_v48   ;;  %v2955_v18 = vpop.permute.xlu1 %2954  }
 0x1cd   :  { %3712 = vrot.lane.b32.xlu0 %v3711_v50, %s6937_s5  ;;  %v6526_v20 = vld [vmem:[%s12712_s0 + $0x70b] ss:$16 sm:%s3777_s2]   ;;  %v3775_v26 = vsel %vm490_vm1, %v6525_v13, %v3770_v19  ;;  %s3823_s2 = smov 192  ;;  %6348 = vst.msk [vmem:[%s12713_s1 + $0x68] sm:$0xff] %vm2704_vm8, %v2955_v18  }
 0x1ce   :  { %v6519_v35 = vld [vmem:[%s12712_s0 + $0x60b] ss:$16 sm:%s3744_s12]   ;;  %v3780_v40 = vsel %vm495_vm2, %v6526_v20, %v3775_v26  ;;  %v6533_v45 = vld [vmem:[%s12712_s0 + $0x183] ss:$16 sm:%s3810_s21]   ;;  %s3790_s12 = smov 12  ;;  %s3856_s21 = smov 3  ;;  %v2932_v37 = vpop.permute.xlu0 %2931  }
 0x1cf   :  { %v3747_v43 = vsel %vm485_vm0, %v6519_v35, %v6518_v27  ;;  %v6520_v54 = vld [vmem:[%s12712_s0 + $0x60b] ss:$16 sm:%s3749_s27]   ;;  %v6535_v7 = vld [vmem:[%s12712_s0 + $0x183] ss:$16 sm:%s3818_s19]   ;;  %s3795_s27 = smov 48  ;;  %v3816_v0 = vsel %vm485_vm0, %v6534_v25, %v6533_v45  ;;  %s3864_s19 = smov 48 }
 0x1d0   :  { %v6521_v61 = vld [vmem:[%s12712_s0 + $0x60b] ss:$16 sm:%s3754_s29]   ;;  %3781 = vrot.lane.b32.xlu1 %v3780_v40, %s6937_s5  ;;  %v3752_v46 = vsel %vm490_vm1, %v6520_v54, %v3747_v43  ;;  %s3800_s29 = smov 192  ;;  %v3821_v55 = vsel %vm490_vm1, %v6535_v7, %v3816_v0  ;;  %6343 = vst.msk [vmem:[%s12713_s1 + $0x48] sm:$0xff] %vm2704_vm8, %v2932_v37  }
 0x1d1   :  { %v3757_v9 = vsel %vm495_vm2, %v6521_v61, %v3752_v46  ;;  %v6536_v44 = vld [vmem:[%s12712_s0 + $0x183] ss:$16 sm:%s3823_s2]   ;;  %s3869_s2 = smov 192 }
 0x1d2   :  { %3758 = vrot.lane.b32.xlu0 %v3757_v9, %s6937_s5  ;;  %v6529_v39 = vld [vmem:[%s12712_s0 + $0x83] ss:$16 sm:%s3790_s12]   ;;  %v3826_v56 = vsel %vm495_vm2, %v6536_v44, %v3821_v55  ;;  %s3836_s12 = smov 12 }
 0x1d3   :  { %v3793_v49 = vsel %vm485_vm0, %v6529_v39, %v6528_v32  ;;  %v6530_v57 = vld [vmem:[%s12712_s0 + $0x83] ss:$16 sm:%s3795_s27]   ;;  %s3841_s27 = smov 48  ;;  %v3001_v39 = vpop.permute.xlu1 %3000  }
 0x1d4   :  { %v6531_v30 = vld [vmem:[%s12712_s0 + $0x83] ss:$16 sm:%s3800_s29]   ;;  %3827 = vrot.lane.b32.xlu1 %v3826_v56, %s6937_s5  ;;  %v3798_v51 = vsel %vm490_vm1, %v6530_v57, %v3793_v49  ;;  %s3846_s29 = smov 192  ;;  %6358 = vst.msk [vmem:[%s12713_s1 + $0xa8] sm:$0xff] %vm2704_vm8, %v3001_v39  }
 0x1d5   :  { %v6543_v53 = vld [vmem:[%s12712_s0 + $0x383] ss:$16 sm:%s3856_s21]   ;;  %v3803_v58 = vsel %vm495_vm2, %v6531_v30, %v3798_v51  ;;  %s3902_s21 = smov 3 }
 0x1d6   :  { %v6545_v59 = vld [vmem:[%s12712_s0 + $0x383] ss:$16 sm:%s3864_s19]   ;;  %3804 = vrot.lane.b32.xlu0 %v3803_v58, %s6937_s5  ;;  %v3862_v22 = vsel %vm485_vm0, %v6544_v33, %v6543_v53  ;;  %s3910_s19 = smov 48  ;;  %v2978_v53 = vpop.permute.xlu0 %2977  }
 0x1d7   :  { %v6546_v24 = vld [vmem:[%s12712_s0 + $0x383] ss:$16 sm:%s3869_s2]   ;;  %v3867_v28 = vsel %vm490_vm1, %v6545_v59, %v3862_v22  ;;  %s3915_s2 = smov 192  ;;  %v6584_v33 = vld [vmem:[%s12712_s0 + $0x38b] ss:$16 sm:%s4043_s14]   ;;  %s4089_s14 = smov 12 }
 0x1d8   :  { %v6539_v4 = vld [vmem:[%s12712_s0 + $0x283] ss:$16 sm:%s3836_s12]   ;;  %v3872_v42 = vsel %vm495_vm2, %v6546_v24, %v3867_v28  ;;  %s3882_s12 = smov 12  ;;  %v6585_v59 = vld [vmem:[%s12712_s0 + $0x38b] ss:$16 sm:%s4048_s28]   ;;  %s4094_s28 = smov 48 }
 0x1d9   :  { %v3839_v60 = vsel %vm485_vm0, %v6539_v4, %v6538_v31  ;;  %v6540_v3 = vld [vmem:[%s12712_s0 + $0x283] ss:$16 sm:%s3841_s27]   ;;  %3873 = vrot.lane.b32.xlu1 %v3872_v42, %s6937_s5  ;;  %s3887_s27 = smov 48  ;;  %6353 = vst.msk [vmem:[%s12713_s1 + $0x88] sm:$0xff] %vm2704_vm8, %v2978_v53  }
 0x1da   :  { %v6541_v36 = vld [vmem:[%s12712_s0 + $0x283] ss:$16 sm:%s3846_s29]   ;;  %v3844_v63 = vsel %vm490_vm1, %v6540_v3, %v3839_v60  ;;  %s3892_s29 = smov 192  ;;  %v6586_v22 = vld [vmem:[%s12712_s0 + $0x38b] ss:$16 sm:%s4053_s4]   ;;  %s4099_s4 = smov 192 }
 0x1db   :  { %v6553_v5 = vld [vmem:[%s12712_s0 + $0x583] ss:$16 sm:%s3902_s21]   ;;  %v3849_v38 = vsel %vm495_vm2, %v6541_v36, %v3844_v63  ;;  %s3948_s21 = smov 3  ;;  %v6578_v28 = vld [vmem:[%s12712_s0 + $0x28b] ss:$16 sm:%s4017_s17]  }
 0x1dc   :  { %v6555_v6 = vld [vmem:[%s12712_s0 + $0x583] ss:$16 sm:%s3910_s19]   ;;  %3850 = vrot.lane.b32.xlu0 %v3849_v38, %s6937_s5  ;;  %v3908_v1 = vsel %vm485_vm0, %v6554_v10, %v6553_v5  ;;  %s3956_s19 = smov 48  ;;  %v3047_v10 = vpop.permute.xlu1 %3046  }
 0x1dd   :  { %v6556_v41 = vld [vmem:[%s12712_s0 + $0x583] ss:$16 sm:%s3915_s2]   ;;  %v3913_v47 = vsel %vm490_vm1, %v6555_v6, %v3908_v1  ;;  %s3961_s2 = smov 192  ;;  %v6579_v31 = vld [vmem:[%s12712_s0 + $0x28b] ss:$16 sm:%s4020_s20]  }
 0x1de   :  { %v6549_v23 = vld [vmem:[%s12712_s0 + $0x483] ss:$16 sm:%s3882_s12]   ;;  %v3918_v15 = vsel %vm495_vm2, %v6556_v41, %v3913_v47  ;;  %s3928_s12 = smov 12  ;;  %v4023_v14 = vsel %vm485_vm0, %v6579_v31, %v6578_v28  ;;  %v6580_v42 = vld [vmem:[%s12712_s0 + $0x28b] ss:$16 sm:%s4025_s18]  }
 0x1df   :  { %v3885_v62 = vsel %vm485_vm0, %v6549_v23, %v6548_v21  ;;  %v6550_v8 = vld [vmem:[%s12712_s0 + $0x483] ss:$16 sm:%s3887_s27]   ;;  %3919 = vrot.lane.b32.xlu1 %v3918_v15, %s6937_s5  ;;  %s3933_s27 = smov 48  ;;  %v4028_v3 = vsel %vm490_vm1, %v6580_v42, %v4023_v14  ;;  %6368 = vst.msk [vmem:[%s12713_s1 + $0xe8] sm:$0xff] %vm2704_vm8, %v3047_v10   ;;  %v3024_v21 = vpop.permute.xlu0 %3023  }
 0x1e0   :  { %v6551_v34 = vld [vmem:[%s12712_s0 + $0x483] ss:$16 sm:%s3892_s29]   ;;  %v3890_v12 = vsel %vm490_vm1, %v6550_v8, %v3885_v62  ;;  %s3938_s29 = smov 192  ;;  %v6581_v60 = vld [vmem:[%s12712_s0 + $0x28b] ss:$16 sm:%s4030_s16]  }
 0x1e1   :  { %v6563_v11 = vld [vmem:[%s12712_s0 + $0x783] ss:$16 sm:%s3948_s21]   ;;  %v3895_v50 = vsel %vm495_vm2, %v6551_v34, %v3890_v12  ;;  %s3994_s21 = smov 3  ;;  %v4033_v63 = vsel %vm495_vm2, %v6581_v60, %v4028_v3  ;;  %v6594_v5 = vld [vmem:[%s12712_s0 + $0x58b] ss:$16 sm:%s4089_s14]   ;;  %s4971_s14 = smov 192 }
 0x1e2   :  { %v6564_v17 = vld [vmem:[%s12712_s0 + $0x783] ss:$16 sm:%s3951_s25]   ;;  %3896 = vrot.lane.b32.xlu0 %v3895_v50, %s6937_s5  ;;  %s3997_s25 = smov 12  ;;  %6363 = vst.msk [vmem:[%s12713_s1 + $0xc8] sm:$0xff] %vm2704_vm8, %v3024_v21  }
 0x1e3   :  { %v6565_v13 = vld [vmem:[%s12712_s0 + $0x783] ss:$16 sm:%s3956_s19]   ;;  %v3954_v19 = vsel %vm485_vm0, %v6564_v17, %v6563_v11  ;;  %s4002_s19 = smov 48  ;;  %v6573_v45 = vld [vmem:[%s12712_s0 + $0x18b] ss:$16 sm:%s3994_s21]   ;;  %s4040_s21 = smov 3 }
 0x1e4   :  { %v6566_v20 = vld [vmem:[%s12712_s0 + $0x783] ss:$16 sm:%s3961_s2]   ;;  %v3959_v26 = vsel %vm490_vm1, %v6565_v13, %v3954_v19  ;;  %s4007_s2 = smov 192  ;;  %v6574_v25 = vld [vmem:[%s12712_s0 + $0x18b] ss:$16 sm:%s3997_s25]   ;;  %s4190_s25 = smov 192 }
 0x1e5   :  { %v6558_v27 = vld [vmem:[%s12712_s0 + $0x683] ss:$16 sm:%s3925_s8]   ;;  %v3964_v40 = vsel %vm495_vm2, %v6566_v20, %v3959_v26  ;;  %s3971_s8 = smov 3  ;;  %v6575_v7 = vld [vmem:[%s12712_s0 + $0x18b] ss:$16 sm:%s4002_s19]   ;;  %v4000_v52 = vsel %vm485_vm0, %v6574_v25, %v6573_v45 }
 0x1e6   :  { %v6559_v35 = vld [vmem:[%s12712_s0 + $0x683] ss:$16 sm:%s3928_s12]   ;;  %3965 = vrot.lane.b32.xlu1 %v3964_v40, %s6937_s5  ;;  %s3974_s12 = smov 12  ;;  %v4005_v44 = vsel %vm490_vm1, %v6575_v7, %v4000_v52  ;;  %v3093_v40 = vpop.permute.xlu1 %3092  }
 0x1e7   :  { %v3931_v43 = vsel %vm485_vm0, %v6559_v35, %v6558_v27  ;;  %v6560_v54 = vld [vmem:[%s12712_s0 + $0x683] ss:$16 sm:%s3933_s27]   ;;  %s3979_s27 = smov 48  ;;  %v6576_v0 = vld [vmem:[%s12712_s0 + $0x18b] ss:$16 sm:%s4007_s2]  }
 0x1e8   :  { %v6561_v61 = vld [vmem:[%s12712_s0 + $0x683] ss:$16 sm:%s3938_s29]   ;;  %v3936_v46 = vsel %vm490_vm1, %v6560_v54, %v3931_v43  ;;  %s3984_s29 = smov 192  ;;  %v6568_v55 = vld [vmem:[%s12712_s0 + $0x8b] ss:$16 sm:%s3971_s8]   ;;  %v4010_v29 = vsel %vm495_vm2, %v6576_v0, %v4005_v44  ;;  %s4163_s8 = smov 48 }
 0x1e9   :  { %v3941_v9 = vsel %vm495_vm2, %v6561_v61, %v3936_v46  ;;  %v6569_v32 = vld [vmem:[%s12712_s0 + $0x8b] ss:$16 sm:%s3974_s12]   ;;  %6378 = vst.msk [vmem:[%s12713_s1 + $0x30] sm:$0xff] %vm2704_vm8, %v3093_v40   ;;  %s4168_s12 = smov 192 }
 0x1ea   :  { %3942 = vrot.lane.b32.xlu0 %v3941_v9, %s6937_s5  ;;  %v3977_v56 = vsel %vm485_vm0, %v6569_v32, %v6568_v55  ;;  %v6570_v49 = vld [vmem:[%s12712_s0 + $0x8b] ss:$16 sm:%s3979_s27]   ;;  %4011 = vrot.lane.b32.xlu1 %v4010_v29, %s6937_s5  ;;  %s4132_s27 = smov 3  ;;  %v3070_v9 = vpop.permute.xlu0 %3069  }
 0x1eb   :  { %v6571_v57 = vld [vmem:[%s12712_s0 + $0x8b] ss:$16 sm:%s3984_s29]   ;;  %v3982_v30 = vsel %vm490_vm1, %v6570_v49, %v3977_v56  ;;  %v6613_v46 = vld [vmem:[%s12712_s0 + $0x102] ss:$16 sm:%s4180_s3]   ;;  %s4231_s3 = smov 48 }
 0x1ec   :  { %v6583_v51 = vld [vmem:[%s12712_s0 + $0x38b] ss:$16 sm:%s4040_s21]   ;;  %v3987_v58 = vsel %vm495_vm2, %v6571_v57, %v3982_v30  ;;  %s4086_s21 = smov 3  ;;  %v6614_v45 = vld [vmem:[%s12712_s0 + $0x102] ss:$16 sm:%s4185_s26]  }
 0x1ed   :  { %v4046_v2 = vsel %vm485_vm0, %v6584_v33, %v6583_v51  ;;  %v6593_v36 = vld [vmem:[%s12712_s0 + $0x58b] ss:$16 sm:%s4086_s21]   ;;  %v6615_v7 = vld [vmem:[%s12712_s0 + $0x102] ss:$16 sm:%s4190_s25]   ;;  %s4226_s21 = smov 12  ;;  %v3139_v56 = vpop.permute.xlu1 %3138   ;;  %s6938_s25 = smov 32  }
 0x1ee   :  { %3988 = vrot.lane.b32.xlu0 %v3987_v58, %s6937_s5  ;;  %v4051_v24 = vsel %vm490_vm1, %v6585_v59, %v4046_v2  ;;  %v6595_v38 = vld [vmem:[%s12712_s0 + $0x58b] ss:$16 sm:%s4094_s28]   ;;  %v4092_v6 = vsel %vm485_vm0, %v6594_v5, %v6593_v36  ;;  %6373 = vst.msk [vmem:[%s12713_s1 + $0x10] sm:$0xff] %vm2704_vm8, %v3070_v9   ;;  %s4236_s28 = smov 192 }
 0x1ef   :  { %v4056_v4 = vsel %vm495_vm2, %v6586_v22, %v4051_v24  ;;  %v6596_v16 = vld [vmem:[%s12712_s0 + $0x58b] ss:$16 sm:%s4099_s4]   ;;  %v4097_v1 = vsel %vm490_vm1, %v6595_v38, %v4092_v6  ;;  %s4158_s4 = smov 12  ;;  %v6608_v0 = vld [vmem:[%s12712_s0 + $0x2] ss:$16 sm:%s4155_s30]   ;;  %s4200_s30 = smov 3 }
 0x1f0   :  { %4057 = vrot.lane.b32.xlu1 %v4056_v4, %s6937_s5  ;;  %v6588_v41 = vld [vmem:[%s12712_s0 + $0x48b] ss:$16 sm:%s4063_s13]   ;;  %v4102_v23 = vsel %vm495_vm2, %v6596_v16, %v4097_v1  ;;  %s4109_s13 = smov 3  ;;  %6388 = vst.msk [vmem:[%s12713_s1 + $0x70] sm:$0xff] %vm2704_vm8, %v3139_v56  }
 0x1f1   :  { %v6589_v47 = vld [vmem:[%s12712_s0 + $0x48b] ss:$16 sm:%s4066_s23]   ;;  %s4112_s23 = smov 12  ;;  %v6609_v44 = vld [vmem:[%s12712_s0 + $0x2] ss:$16 sm:%s4158_s4]   ;;  %s4203_s4 = smov 12  ;;  %v3116_v58 = vpop.permute.xlu0 %3115  }
 0x1f2   :  { %4034 = vrot.lane.b32.xlu0 %v4033_v63, %s6937_s5  ;;  %v4069_v48 = vsel %vm485_vm0, %v6589_v47, %v6588_v41  ;;  %v6590_v15 = vld [vmem:[%s12712_s0 + $0x48b] ss:$16 sm:%s4071_s10]   ;;  %s4117_s10 = smov 48  ;;  %v4161_v32 = vsel %vm485_vm0, %v6609_v44, %v6608_v0  ;;  %6383 = vst.msk [vmem:[%s12713_s1 + $0x50] sm:$0xff] %vm2704_vm8, %v3116_v58  }
 0x1f3   :  { %v6591_v62 = vld [vmem:[%s12712_s0 + $0x48b] ss:$16 sm:%s4076_s11]   ;;  %v4074_v8 = vsel %vm490_vm1, %v6590_v15, %v4069_v48  ;;  %s4122_s11 = smov 192  ;;  %v6610_v39 = vld [vmem:[%s12712_s0 + $0x2] ss:$16 sm:%s4163_s8]   ;;  %s4208_s8 = smov 48 }
 0x1f4   :  { %4103 = vrot.lane.b32.xlu1 %v4102_v23, %s6937_s5  ;;  %v6603_v34 = vld [vmem:[%s12712_s0 + $0x78b] ss:$16 sm:%s4132_s27]   ;;  %v4079_v12 = vsel %vm495_vm2, %v6591_v62, %v4074_v8  ;;  %s4177_s27 = smov 3  ;;  %v4166_v49 = vsel %vm490_vm1, %v6610_v39, %v4161_v32 }
 0x1f5   :  { %v6604_v11 = vld [vmem:[%s12712_s0 + $0x78b] ss:$16 sm:%s4135_s24]   ;;  %v6612_v54 = vld [vmem:[%s12712_s0 + $0x102] ss:$16 sm:%s4177_s27]   ;;  %v3185_v42 = vpop.permute.xlu1 %3184  }
 0x1f6   :  { %v6605_v50 = vld [vmem:[%s12712_s0 + $0x78b] ss:$16 sm:%s4140_s15]   ;;  %4080 = vrot.lane.b32.xlu0 %v4079_v12, %s6937_s5  ;;  %v4138_v17 = vsel %vm485_vm0, %v6604_v11, %v6603_v34  ;;  %v4183_v25 = vsel %vm485_vm0, %v6613_v46, %v6612_v54  ;;  %6398 = vst.msk [vmem:[%s12713_s1 + $0xb0] sm:$0xff] %vm2704_vm8, %v3185_v42  }
 0x1f7   :  { %v6606_v13 = vld [vmem:[%s12712_s0 + $0x78b] ss:$16 sm:%s4145_s9]   ;;  %v4143_v18 = vsel %vm490_vm1, %v6605_v50, %v4138_v17  ;;  %v4188_v52 = vsel %vm490_vm1, %v6614_v45, %v4183_v25  ;;  %v6611_v29 = vld [vmem:[%s12712_s0 + $0x2] ss:$16 sm:%s4168_s12]   ;;  %s4213_s12 = smov 192 }
 0x1f8   :  { %v6598_v19 = vld [vmem:[%s12712_s0 + $0x68b] ss:$16 sm:%s4109_s13]   ;;  %v4148_v26 = vsel %vm495_vm2, %v6606_v13, %v4143_v18  ;;  %v4193_v55 = vsel %vm495_vm2, %v6615_v7, %v4188_v52  ;;  %v4171_v30 = vsel %vm495_vm2, %v6611_v29, %v4166_v49  ;;  %v6623_v51 = vld [vmem:[%s12712_s0 + $0x302] ss:$16 sm:%s4226_s21]   ;;  %s4272_s21 = smov 12 }
 0x1f9   :  { %v6599_v20 = vld [vmem:[%s12712_s0 + $0x68b] ss:$16 sm:%s4112_s23]   ;;  %4149 = vrot.lane.b32.xlu1 %v4148_v26, %s6937_s5  ;;  %v3162_v38 = vpop.permute.xlu0 %3161  }
 0x1fa   :  { %v4115_v27 = vsel %vm485_vm0, %v6599_v20, %v6598_v19  ;;  %v6600_v35 = vld [vmem:[%s12712_s0 + $0x68b] ss:$16 sm:%s4117_s10]   ;;  %v6624_v53 = vld [vmem:[%s12712_s0 + $0x302] ss:$16 sm:%s4231_s3]   ;;  %s4277_s3 = smov 48  ;;  %s4958_s10 = smov 3 }
 0x1fb   :  { %v6601_v37 = vld [vmem:[%s12712_s0 + $0x68b] ss:$16 sm:%s4122_s11]   ;;  %v4120_v43 = vsel %vm490_vm1, %v6600_v35, %v4115_v27  ;;  %s4223_s11 = smov 3  ;;  %v6625_v59 = vld [vmem:[%s12712_s0 + $0x302] ss:$16 sm:%s4236_s28]   ;;  %s4282_s28 = smov 192 }
 0x1fc   :  { %v4125_v61 = vsel %vm495_vm2, %v6601_v37, %v4120_v43  ;;  %v6622_v57 = vld [vmem:[%s12712_s0 + $0x302] ss:$16 sm:%s4223_s11]   ;;  %s4269_s11 = smov 3  ;;  %6393 = vst.msk [vmem:[%s12713_s1 + $0x90] sm:$0xff] %vm2704_vm8, %v3162_v38  }
 0x1fd   :  { %4126 = vrot.lane.b32.xlu0 %v4125_v61, %s6937_s5  ;;  %4194 = vrot.lane.b32.xlu1 %v4193_v55, %s6938_s25  ;;  %v4229_v33 = vsel %vm485_vm0, %v6623_v51, %v6622_v57  ;;  %v6617_v22 = vld [vmem:[%s12712_s0 + $0x202] ss:$16 sm:%s4200_s30]   ;;  %s4246_s30 = smov 3  ;;  %v3231_v15 = vpop.permute.xlu1 %3230  }
 0x1fe   :  { %v4234_v2 = vsel %vm490_vm1, %v6624_v53, %v4229_v33  ;;  %v6618_v24 = vld [vmem:[%s12712_s0 + $0x202] ss:$16 sm:%s4203_s4]   ;;  %s4249_s4 = smov 12  ;;  %6408 = vst.msk [vmem:[%s12713_s1 + $0xf0] sm:$0xff] %vm2704_vm8, %v3231_v15  }
 0x1ff   :  { %v4239_v28 = vsel %vm495_vm2, %v6625_v59, %v4234_v2  ;;  %v4206_v31 = vsel %vm485_vm0, %v6618_v24, %v6617_v22  ;;  %v6619_v4 = vld [vmem:[%s12712_s0 + $0x202] ss:$16 sm:%s4208_s8]   ;;  %s4254_s8 = smov 48 }
 0x200   :  { %v6620_v14 = vld [vmem:[%s12712_s0 + $0x202] ss:$16 sm:%s4213_s12]   ;;  %v4211_v60 = vsel %vm490_vm1, %v6619_v4, %v4206_v31  ;;  %s4259_s12 = smov 192 }
 0x201   :  { %4172 = vrot.lane.b32.xlu0 %v4171_v30, %s6938_s25  ;;  %4240 = vrot.lane.b32.xlu1 %v4239_v28, %s6938_s25  ;;  %v6632_v3 = vld [vmem:[%s12712_s0 + $0x502] ss:$16 sm:%s4269_s11]   ;;  %v4216_v36 = vsel %vm495_vm2, %v6620_v14, %v4211_v60  ;;  %s4315_s11 = smov 3  ;;  %v3208_v50 = vpop.permute.xlu0 %3207   ;;  %v3277_v40 = vpop.permute.xlu1 %3276  }
 0x202   :  { %v6633_v63 = vld [vmem:[%s12712_s0 + $0x502] ss:$16 sm:%s4272_s21]   ;;  %s4318_s21 = smov 12  ;;  %6403 = vst.msk [vmem:[%s12713_s1 + $0xd0] sm:$0xff] %vm2704_vm8, %v3208_v50   ;;  %6418 = vst.msk [vmem:[%s12713_s1 + $0x38] sm:$0xff] %vm2704_vm8, %v3277_v40  }
 0x203   :  { %v6634_v5 = vld [vmem:[%s12712_s0 + $0x502] ss:$16 sm:%s4277_s3]   ;;  %v4275_v10 = vsel %vm485_vm0, %v6633_v63, %v6632_v3  ;;  %s4323_s3 = smov 48 }
 0x204   :  { %v6635_v6 = vld [vmem:[%s12712_s0 + $0x502] ss:$16 sm:%s4282_s28]   ;;  %v4280_v16 = vsel %vm490_vm1, %v6634_v5, %v4275_v10  ;;  %s4328_s28 = smov 192 }
 0x205   :  { %4217 = vrot.lane.b32.xlu0 %v4216_v36, %s6938_s25  ;;  %v6627_v1 = vld [vmem:[%s12712_s0 + $0x402] ss:$16 sm:%s4246_s30]   ;;  %v4285_v47 = vsel %vm495_vm2, %v6635_v6, %v4280_v16  ;;  %s4292_s30 = smov 3  ;;  %v3254_v9 = vpop.permute.xlu0 %3253  }
 0x206   :  { %v6628_v41 = vld [vmem:[%s12712_s0 + $0x402] ss:$16 sm:%s4249_s4]   ;;  %4286 = vrot.lane.b32.xlu1 %v4285_v47, %s6938_s25  ;;  %s4295_s4 = smov 12  ;;  %6413 = vst.msk [vmem:[%s12713_s1 + $0x18] sm:$0xff] %vm2704_vm8, %v3254_v9  }
 0x207   :  { %v4252_v21 = vsel %vm485_vm0, %v6628_v41, %v6627_v1  ;;  %v6629_v23 = vld [vmem:[%s12712_s0 + $0x402] ss:$16 sm:%s4254_s8]   ;;  %s4300_s8 = smov 48 }
 0x208   :  { %v6630_v48 = vld [vmem:[%s12712_s0 + $0x402] ss:$16 sm:%s4259_s12]   ;;  %v4257_v62 = vsel %vm490_vm1, %v6629_v23, %v4252_v21  ;;  %s4305_s12 = smov 192  ;;  %v3323_v56 = vpop.permute.xlu1 %3322  }
 0x209   :  { %v6642_v8 = vld [vmem:[%s12712_s0 + $0x702] ss:$16 sm:%s4315_s11]   ;;  %v4262_v34 = vsel %vm495_vm2, %v6630_v48, %v4257_v62  ;;  %s4361_s11 = smov 3  ;;  %6428 = vst.msk [vmem:[%s12713_s1 + $0x78] sm:$0xff] %vm2704_vm8, %v3323_v56  }
 0x20a   :  { %v6643_v12 = vld [vmem:[%s12712_s0 + $0x702] ss:$16 sm:%s4318_s21]   ;;  %4263 = vrot.lane.b32.xlu0 %v4262_v34, %s6938_s25  ;;  %s4364_s21 = smov 12 }
 0x20b   :  { %v6644_v11 = vld [vmem:[%s12712_s0 + $0x702] ss:$16 sm:%s4323_s3]   ;;  %v4321_v17 = vsel %vm485_vm0, %v6643_v12, %v6642_v8  ;;  %s4369_s3 = smov 48  ;;  %v6652_v54 = vld [vmem:[%s12712_s0 + $0x10a] ss:$16 sm:%s4361_s11]   ;;  %s4407_s11 = smov 3 }
 0x20c   :  { %v6645_v13 = vld [vmem:[%s12712_s0 + $0x702] ss:$16 sm:%s4328_s28]   ;;  %v4326_v18 = vsel %vm490_vm1, %v6644_v11, %v4321_v17  ;;  %s4374_s28 = smov 192  ;;  %v6653_v46 = vld [vmem:[%s12712_s0 + $0x10a] ss:$16 sm:%s4364_s21]   ;;  %s4410_s21 = smov 12  ;;  %v3300_v58 = vpop.permute.xlu0 %3299  }
 0x20d   :  { %v6637_v19 = vld [vmem:[%s12712_s0 + $0x602] ss:$16 sm:%s4292_s30]   ;;  %v4331_v26 = vsel %vm495_vm2, %v6645_v13, %v4326_v18  ;;  %s4338_s30 = smov 3  ;;  %v6654_v45 = vld [vmem:[%s12712_s0 + $0x10a] ss:$16 sm:%s4369_s3]   ;;  %v4367_v25 = vsel %vm485_vm0, %v6653_v46, %v6652_v54  ;;  %s4415_s3 = smov 48 }
 0x20e   :  { %v6638_v20 = vld [vmem:[%s12712_s0 + $0x602] ss:$16 sm:%s4295_s4]   ;;  %4332 = vrot.lane.b32.xlu1 %v4331_v26, %s6938_s25  ;;  %s4341_s4 = smov 12  ;;  %v4372_v52 = vsel %vm490_vm1, %v6654_v45, %v4367_v25  ;;  %6423 = vst.msk [vmem:[%s12713_s1 + $0x58] sm:$0xff] %vm2704_vm8, %v3300_v58  }
 0x20f   :  { %v4298_v27 = vsel %vm485_vm0, %v6638_v20, %v6637_v19  ;;  %v6639_v35 = vld [vmem:[%s12712_s0 + $0x602] ss:$16 sm:%s4300_s8]   ;;  %s4346_s8 = smov 48  ;;  %v6655_v7 = vld [vmem:[%s12712_s0 + $0x10a] ss:$16 sm:%s4374_s28]   ;;  %s4420_s28 = smov 192 }
 0x210   :  { %v6640_v37 = vld [vmem:[%s12712_s0 + $0x602] ss:$16 sm:%s4305_s12]   ;;  %v4303_v43 = vsel %vm490_vm1, %v6639_v35, %v4298_v27  ;;  %s4351_s12 = smov 192  ;;  %v6647_v0 = vld [vmem:[%s12712_s0 + $0xa] ss:$16 sm:%s4338_s30]   ;;  %v4377_v55 = vsel %vm495_vm2, %v6655_v7, %v4372_v52  ;;  %s4384_s30 = smov 3  ;;  %v3369_v42 = vpop.permute.xlu1 %3368  }
 0x211   :  { %v4308_v61 = vsel %vm495_vm2, %v6640_v37, %v4303_v43  ;;  %v6648_v44 = vld [vmem:[%s12712_s0 + $0xa] ss:$16 sm:%s4341_s4]   ;;  %s4387_s4 = smov 12  ;;  %6438 = vst.msk [vmem:[%s12713_s1 + $0xb8] sm:$0xff] %vm2704_vm8, %v3369_v42  }
 0x212   :  { %4309 = vrot.lane.b32.xlu0 %v4308_v61, %s6938_s25  ;;  %v4344_v32 = vsel %vm485_vm0, %v6648_v44, %v6647_v0  ;;  %v6649_v39 = vld [vmem:[%s12712_s0 + $0xa] ss:$16 sm:%s4346_s8]   ;;  %4378 = vrot.lane.b32.xlu1 %v4377_v55, %s6938_s25  ;;  %s4392_s8 = smov 48 }
 0x213   :  { %v6650_v29 = vld [vmem:[%s12712_s0 + $0xa] ss:$16 sm:%s4351_s12]   ;;  %v4349_v49 = vsel %vm490_vm1, %v6649_v39, %v4344_v32  ;;  %s4397_s12 = smov 192 }
 0x214   :  { %v6662_v57 = vld [vmem:[%s12712_s0 + $0x30a] ss:$16 sm:%s4407_s11]   ;;  %v4354_v30 = vsel %vm495_vm2, %v6650_v29, %v4349_v49  ;;  %s4453_s11 = smov 3  ;;  %v3346_v38 = vpop.permute.xlu0 %3345  }
 0x215   :  { %v6663_v51 = vld [vmem:[%s12712_s0 + $0x30a] ss:$16 sm:%s4410_s21]   ;;  %s4456_s21 = smov 12  ;;  %6433 = vst.msk [vmem:[%s12713_s1 + $0x98] sm:$0xff] %vm2704_vm8, %v3346_v38  }
 0x216   :  { %v6664_v53 = vld [vmem:[%s12712_s0 + $0x30a] ss:$16 sm:%s4415_s3]   ;;  %4355 = vrot.lane.b32.xlu0 %v4354_v30, %s6938_s25  ;;  %v4413_v33 = vsel %vm485_vm0, %v6663_v51, %v6662_v57  ;;  %s4461_s3 = smov 48 }
 0x217   :  { %v6665_v59 = vld [vmem:[%s12712_s0 + $0x30a] ss:$16 sm:%s4420_s28]   ;;  %v4418_v2 = vsel %vm490_vm1, %v6664_v53, %v4413_v33  ;;  %s4466_s28 = smov 192 }
 0x218   :  { %v6657_v22 = vld [vmem:[%s12712_s0 + $0x20a] ss:$16 sm:%s4384_s30]   ;;  %v4423_v28 = vsel %vm495_vm2, %v6665_v59, %v4418_v2  ;;  %s4430_s30 = smov 3  ;;  %v3415_v15 = vpop.permute.xlu1 %3414  }
 0x219   :  { %v6658_v24 = vld [vmem:[%s12712_s0 + $0x20a] ss:$16 sm:%s4387_s4]   ;;  %4424 = vrot.lane.b32.xlu1 %v4423_v28, %s6938_s25  ;;  %s4433_s4 = smov 12  ;;  %6448 = vst.msk [vmem:[%s12713_s1 + $0xf8] sm:$0xff] %vm2704_vm8, %v3415_v15  }
 0x21a   :  { %v4390_v31 = vsel %vm485_vm0, %v6658_v24, %v6657_v22  ;;  %v6659_v4 = vld [vmem:[%s12712_s0 + $0x20a] ss:$16 sm:%s4392_s8]   ;;  %s4438_s8 = smov 48 }
 0x21b   :  { %v6660_v14 = vld [vmem:[%s12712_s0 + $0x20a] ss:$16 sm:%s4397_s12]   ;;  %v4395_v60 = vsel %vm490_vm1, %v6659_v4, %v4390_v31  ;;  %s4443_s12 = smov 192 }
 0x21c   :  { %v6672_v3 = vld [vmem:[%s12712_s0 + $0x50a] ss:$16 sm:%s4453_s11]   ;;  %v4400_v36 = vsel %vm495_vm2, %v6660_v14, %v4395_v60  ;;  %s4499_s11 = smov 3  ;;  %v3392_v50 = vpop.permute.xlu0 %3391   ;;  %v3460_v40 = vpop.permute.xlu1 %3459  }
 0x21d   :  { %v6673_v63 = vld [vmem:[%s12712_s0 + $0x50a] ss:$16 sm:%s4456_s21]   ;;  %4401 = vrot.lane.b32.xlu0 %v4400_v36, %s6938_s25  ;;  %s4502_s21 = smov 12  ;;  %6443 = vst.msk [vmem:[%s12713_s1 + $0xd8] sm:$0xff] %vm2704_vm8, %v3392_v50  }
 0x21e   :  { %v6674_v5 = vld [vmem:[%s12712_s0 + $0x50a] ss:$16 sm:%s4461_s3]   ;;  %v4459_v10 = vsel %vm485_vm0, %v6673_v63, %v6672_v3  ;;  %s4507_s3 = smov 48  ;;  %6457 = vst.msk [vmem:[%s12713_s1 + $0x20] sm:$0xff] %vm3439_vm9, %v3460_v40  }
 0x21f   :  { %v6675_v6 = vld [vmem:[%s12712_s0 + $0x50a] ss:$16 sm:%s4466_s28]   ;;  %v4464_v16 = vsel %vm490_vm1, %v6674_v5, %v4459_v10  ;;  %s4512_s28 = smov 192 }
 0x220   :  { %v6667_v1 = vld [vmem:[%s12712_s0 + $0x40a] ss:$16 sm:%s4430_s30]   ;;  %v4469_v47 = vsel %vm495_vm2, %v6675_v6, %v4464_v16  ;;  %s4476_s30 = smov 3  ;;  %v3438_v9 = vpop.permute.xlu0 %3437  }
 0x221   :  { %v6668_v41 = vld [vmem:[%s12712_s0 + $0x40a] ss:$16 sm:%s4433_s4]   ;;  %4470 = vrot.lane.b32.xlu1 %v4469_v47, %s6938_s25  ;;  %s4479_s4 = smov 12  ;;  %3440 = vst.msk [vmem:[%s12713_s1] sm:$0xff] %vm3439_vm9, %v3438_v9   ;;  %v3506_v56 = vpop.permute.xlu1 %3505  }
 0x222   :  { %v4436_v21 = vsel %vm485_vm0, %v6668_v41, %v6667_v1  ;;  %v6669_v23 = vld [vmem:[%s12712_s0 + $0x40a] ss:$16 sm:%s4438_s8]   ;;  %s4484_s8 = smov 48  ;;  %6467 = vst.msk [vmem:[%s12713_s1 + $0x60] sm:$0xff] %vm3439_vm9, %v3506_v56  }
 0x223   :  { %v6670_v48 = vld [vmem:[%s12712_s0 + $0x40a] ss:$16 sm:%s4443_s12]   ;;  %v4441_v62 = vsel %vm490_vm1, %v6669_v23, %v4436_v21  ;;  %s4489_s12 = smov 192 }
 0x224   :  { %v6682_v8 = vld [vmem:[%s12712_s0 + $0x70a] ss:$16 sm:%s4499_s11]   ;;  %v4446_v34 = vsel %vm495_vm2, %v6670_v48, %v4441_v62  ;;  %s4545_s11 = smov 3  ;;  %v3483_v58 = vpop.permute.xlu0 %3482  }
 0x225   :  { %v6683_v12 = vld [vmem:[%s12712_s0 + $0x70a] ss:$16 sm:%s4502_s21]   ;;  %4447 = vrot.lane.b32.xlu0 %v4446_v34, %s6938_s25  ;;  %s4548_s21 = smov 12  ;;  %6462 = vst.msk [vmem:[%s12713_s1 + $0x40] sm:$0xff] %vm3439_vm9, %v3483_v58  }
 0x226   :  { %v6684_v11 = vld [vmem:[%s12712_s0 + $0x70a] ss:$16 sm:%s4507_s3]   ;;  %v4505_v17 = vsel %vm485_vm0, %v6683_v12, %v6682_v8  ;;  %s4553_s3 = smov 48  ;;  %v6692_v54 = vld [vmem:[%s12712_s0 + $0x182] ss:$16 sm:%s4545_s11]   ;;  %s4591_s11 = smov 3  ;;  %v3552_v42 = vpop.permute.xlu1 %3551  }
 0x227   :  { %v6685_v13 = vld [vmem:[%s12712_s0 + $0x70a] ss:$16 sm:%s4512_s28]   ;;  %v4510_v18 = vsel %vm490_vm1, %v6684_v11, %v4505_v17  ;;  %s4558_s28 = smov 192  ;;  %v6693_v46 = vld [vmem:[%s12712_s0 + $0x182] ss:$16 sm:%s4548_s21]   ;;  %s4594_s21 = smov 12 }
 0x228   :  { %v6677_v19 = vld [vmem:[%s12712_s0 + $0x60a] ss:$16 sm:%s4476_s30]   ;;  %v4515_v26 = vsel %vm495_vm2, %v6685_v13, %v4510_v18  ;;  %s4522_s30 = smov 3  ;;  %v6694_v45 = vld [vmem:[%s12712_s0 + $0x182] ss:$16 sm:%s4553_s3]   ;;  %v4551_v25 = vsel %vm485_vm0, %v6693_v46, %v6692_v54  ;;  %s4599_s3 = smov 48 }
 0x229   :  { %v6678_v20 = vld [vmem:[%s12712_s0 + $0x60a] ss:$16 sm:%s4479_s4]   ;;  %4516 = vrot.lane.b32.xlu1 %v4515_v26, %s6938_s25  ;;  %s4525_s4 = smov 12  ;;  %v4556_v52 = vsel %vm490_vm1, %v6694_v45, %v4551_v25  ;;  %6477 = vst.msk [vmem:[%s12713_s1 + $0xa0] sm:$0xff] %vm3439_vm9, %v3552_v42   ;;  %v3529_v38 = vpop.permute.xlu0 %3528  }
 0x22a   :  { %v4482_v27 = vsel %vm485_vm0, %v6678_v20, %v6677_v19  ;;  %v6679_v35 = vld [vmem:[%s12712_s0 + $0x60a] ss:$16 sm:%s4484_s8]   ;;  %s4530_s8 = smov 48  ;;  %v6695_v7 = vld [vmem:[%s12712_s0 + $0x182] ss:$16 sm:%s4558_s28]   ;;  %s4604_s28 = smov 192 }
 0x22b   :  { %v6680_v37 = vld [vmem:[%s12712_s0 + $0x60a] ss:$16 sm:%s4489_s12]   ;;  %v4487_v43 = vsel %vm490_vm1, %v6679_v35, %v4482_v27  ;;  %s4535_s12 = smov 192  ;;  %v6687_v0 = vld [vmem:[%s12712_s0 + $0x82] ss:$16 sm:%s4522_s30]   ;;  %v4561_v55 = vsel %vm495_vm2, %v6695_v7, %v4556_v52  ;;  %s4568_s30 = smov 3 }
 0x22c   :  { %v4492_v61 = vsel %vm495_vm2, %v6680_v37, %v4487_v43  ;;  %v6688_v44 = vld [vmem:[%s12712_s0 + $0x82] ss:$16 sm:%s4525_s4]   ;;  %s4571_s4 = smov 12  ;;  %6472 = vst.msk [vmem:[%s12713_s1 + $0x80] sm:$0xff] %vm3439_vm9, %v3529_v38  }
 0x22d   :  { %4493 = vrot.lane.b32.xlu0 %v4492_v61, %s6938_s25  ;;  %v4528_v32 = vsel %vm485_vm0, %v6688_v44, %v6687_v0  ;;  %v6689_v39 = vld [vmem:[%s12712_s0 + $0x82] ss:$16 sm:%s4530_s8]   ;;  %4562 = vrot.lane.b32.xlu1 %v4561_v55, %s6938_s25  ;;  %s4576_s8 = smov 48  ;;  %v3598_v15 = vpop.permute.xlu1 %3597  }
 0x22e   :  { %v6690_v29 = vld [vmem:[%s12712_s0 + $0x82] ss:$16 sm:%s4535_s12]   ;;  %v4533_v49 = vsel %vm490_vm1, %v6689_v39, %v4528_v32  ;;  %s4581_s12 = smov 192  ;;  %6487 = vst.msk [vmem:[%s12713_s1 + $0xe0] sm:$0xff] %vm3439_vm9, %v3598_v15  }
 0x22f   :  { %v6702_v57 = vld [vmem:[%s12712_s0 + $0x382] ss:$16 sm:%s4591_s11]   ;;  %v4538_v30 = vsel %vm495_vm2, %v6690_v29, %v4533_v49  ;;  %s4637_s11 = smov 3 }
 0x230   :  { %v6703_v51 = vld [vmem:[%s12712_s0 + $0x382] ss:$16 sm:%s4594_s21]   ;;  %s4640_s21 = smov 12 }
 0x231   :  { %v6704_v53 = vld [vmem:[%s12712_s0 + $0x382] ss:$16 sm:%s4599_s3]   ;;  %4539 = vrot.lane.b32.xlu0 %v4538_v30, %s6938_s25  ;;  %v4597_v33 = vsel %vm485_vm0, %v6703_v51, %v6702_v57  ;;  %s4645_s3 = smov 48  ;;  %v3575_v50 = vpop.permute.xlu0 %3574   ;;  %v3644_v40 = vpop.permute.xlu1 %3643  }
 0x232   :  { %v6705_v59 = vld [vmem:[%s12712_s0 + $0x382] ss:$16 sm:%s4604_s28]   ;;  %v4602_v2 = vsel %vm490_vm1, %v6704_v53, %v4597_v33  ;;  %s4650_s28 = smov 192  ;;  %6482 = vst.msk [vmem:[%s12713_s1 + $0xc0] sm:$0xff] %vm3439_vm9, %v3575_v50   ;;  %6497 = vst.msk [vmem:[%s12713_s1 + $0x28] sm:$0xff] %vm3439_vm9, %v3644_v40  }
 0x233   :  { %v6697_v22 = vld [vmem:[%s12712_s0 + $0x282] ss:$16 sm:%s4568_s30]   ;;  %v4607_v28 = vsel %vm495_vm2, %v6705_v59, %v4602_v2  ;;  %s4614_s30 = smov 3 }
 0x234   :  { %v6698_v24 = vld [vmem:[%s12712_s0 + $0x282] ss:$16 sm:%s4571_s4]   ;;  %4608 = vrot.lane.b32.xlu1 %v4607_v28, %s6938_s25  ;;  %s4617_s4 = smov 12 }
 0x235   :  { %v4574_v31 = vsel %vm485_vm0, %v6698_v24, %v6697_v22  ;;  %v6699_v4 = vld [vmem:[%s12712_s0 + $0x282] ss:$16 sm:%s4576_s8]   ;;  %s4622_s8 = smov 48  ;;  %v3621_v9 = vpop.permute.xlu0 %3620  }
 0x236   :  { %v6700_v14 = vld [vmem:[%s12712_s0 + $0x282] ss:$16 sm:%s4581_s12]   ;;  %v4579_v60 = vsel %vm490_vm1, %v6699_v4, %v4574_v31  ;;  %s4627_s12 = smov 192  ;;  %6492 = vst.msk [vmem:[%s12713_s1 + $0x8] sm:$0xff] %vm3439_vm9, %v3621_v9  }
 0x237   :  { %v6712_v3 = vld [vmem:[%s12712_s0 + $0x582] ss:$16 sm:%s4637_s11]   ;;  %v4584_v36 = vsel %vm495_vm2, %v6700_v14, %v4579_v60  ;;  %s4683_s11 = smov 3 }
 0x238   :  { %v6713_v63 = vld [vmem:[%s12712_s0 + $0x582] ss:$16 sm:%s4640_s21]   ;;  %4585 = vrot.lane.b32.xlu0 %v4584_v36, %s6938_s25  ;;  %s4686_s21 = smov 12  ;;  %v3690_v56 = vpop.permute.xlu1 %3689  }
 0x239   :  { %v6714_v5 = vld [vmem:[%s12712_s0 + $0x582] ss:$16 sm:%s4645_s3]   ;;  %v4643_v10 = vsel %vm485_vm0, %v6713_v63, %v6712_v3  ;;  %s4691_s3 = smov 48  ;;  %6507 = vst.msk [vmem:[%s12713_s1 + $0x68] sm:$0xff] %vm3439_vm9, %v3690_v56  }
 0x23a   :  { %v6715_v6 = vld [vmem:[%s12712_s0 + $0x582] ss:$16 sm:%s4650_s28]   ;;  %v4648_v16 = vsel %vm490_vm1, %v6714_v5, %v4643_v10  ;;  %s4696_s28 = smov 192 }
 0x23b   :  { %v6707_v1 = vld [vmem:[%s12712_s0 + $0x482] ss:$16 sm:%s4614_s30]   ;;  %v4653_v47 = vsel %vm495_vm2, %v6715_v6, %v4648_v16  ;;  %s4660_s30 = smov 3  ;;  %v3667_v58 = vpop.permute.xlu0 %3666  }
 0x23c   :  { %v6708_v41 = vld [vmem:[%s12712_s0 + $0x482] ss:$16 sm:%s4617_s4]   ;;  %4654 = vrot.lane.b32.xlu1 %v4653_v47, %s6938_s25  ;;  %s4663_s4 = smov 12  ;;  %6502 = vst.msk [vmem:[%s12713_s1 + $0x48] sm:$0xff] %vm3439_vm9, %v3667_v58  }
 0x23d   :  { %v4620_v21 = vsel %vm485_vm0, %v6708_v41, %v6707_v1  ;;  %v6709_v23 = vld [vmem:[%s12712_s0 + $0x482] ss:$16 sm:%s4622_s8]   ;;  %s4668_s8 = smov 48 }
 0x23e   :  { %v6710_v48 = vld [vmem:[%s12712_s0 + $0x482] ss:$16 sm:%s4627_s12]   ;;  %v4625_v62 = vsel %vm490_vm1, %v6709_v23, %v4620_v21  ;;  %s4673_s12 = smov 192  ;;  %v3736_v42 = vpop.permute.xlu1 %3735  }
 0x23f   :  { %v6722_v8 = vld [vmem:[%s12712_s0 + $0x782] ss:$16 sm:%s4683_s11]   ;;  %v4630_v34 = vsel %vm495_vm2, %v6710_v48, %v4625_v62  ;;  %s4729_s11 = smov 3  ;;  %6517 = vst.msk [vmem:[%s12713_s1 + $0xa8] sm:$0xff] %vm3439_vm9, %v3736_v42   ;;  %v3713_v38 = vpop.permute.xlu0 %3712  }
 0x240   :  { %v6723_v12 = vld [vmem:[%s12712_s0 + $0x782] ss:$16 sm:%s4686_s21]   ;;  %4631 = vrot.lane.b32.xlu0 %v4630_v34, %s6938_s25  ;;  %s4732_s21 = smov 12  ;;  %6512 = vst.msk [vmem:[%s12713_s1 + $0x88] sm:$0xff] %vm3439_vm9, %v3713_v38  }
 0x241   :  { %v6724_v11 = vld [vmem:[%s12712_s0 + $0x782] ss:$16 sm:%s4691_s3]   ;;  %v4689_v17 = vsel %vm485_vm0, %v6723_v12, %v6722_v8  ;;  %s4737_s3 = smov 48  ;;  %v6732_v54 = vld [vmem:[%s12712_s0 + $0x18a] ss:$16 sm:%s4729_s11]   ;;  %s4775_s11 = smov 3 }
 0x242   :  { %v6725_v13 = vld [vmem:[%s12712_s0 + $0x782] ss:$16 sm:%s4696_s28]   ;;  %v4694_v18 = vsel %vm490_vm1, %v6724_v11, %v4689_v17  ;;  %s4742_s28 = smov 192  ;;  %v6733_v46 = vld [vmem:[%s12712_s0 + $0x18a] ss:$16 sm:%s4732_s21]   ;;  %s4778_s21 = smov 12  ;;  %v3782_v15 = vpop.permute.xlu1 %3781  }
 0x243   :  { %v6717_v19 = vld [vmem:[%s12712_s0 + $0x682] ss:$16 sm:%s4660_s30]   ;;  %v4699_v26 = vsel %vm495_vm2, %v6725_v13, %v4694_v18  ;;  %s4706_s30 = smov 3  ;;  %v6734_v45 = vld [vmem:[%s12712_s0 + $0x18a] ss:$16 sm:%s4737_s3]   ;;  %v4735_v25 = vsel %vm485_vm0, %v6733_v46, %v6732_v54  ;;  %s4783_s3 = smov 48 }
 0x244   :  { %v6718_v20 = vld [vmem:[%s12712_s0 + $0x682] ss:$16 sm:%s4663_s4]   ;;  %4700 = vrot.lane.b32.xlu1 %v4699_v26, %s6938_s25  ;;  %s4709_s4 = smov 12  ;;  %v4740_v52 = vsel %vm490_vm1, %v6734_v45, %v4735_v25  ;;  %6527 = vst.msk [vmem:[%s12713_s1 + $0xe8] sm:$0xff] %vm3439_vm9, %v3782_v15   ;;  %v3759_v50 = vpop.permute.xlu0 %3758  }
 0x245   :  { %v4666_v27 = vsel %vm485_vm0, %v6718_v20, %v6717_v19  ;;  %v6719_v35 = vld [vmem:[%s12712_s0 + $0x682] ss:$16 sm:%s4668_s8]   ;;  %s4714_s8 = smov 48  ;;  %v6735_v7 = vld [vmem:[%s12712_s0 + $0x18a] ss:$16 sm:%s4742_s28]   ;;  %s4788_s28 = smov 192 }
 0x246   :  { %v6720_v37 = vld [vmem:[%s12712_s0 + $0x682] ss:$16 sm:%s4673_s12]   ;;  %v4671_v43 = vsel %vm490_vm1, %v6719_v35, %v4666_v27  ;;  %s4719_s12 = smov 192  ;;  %v6727_v0 = vld [vmem:[%s12712_s0 + $0x8a] ss:$16 sm:%s4706_s30]   ;;  %v4745_v55 = vsel %vm495_vm2, %v6735_v7, %v4740_v52  ;;  %s4752_s30 = smov 3  ;;  %v3828_v40 = vpop.permute.xlu1 %3827  }
 0x247   :  { %v4676_v61 = vsel %vm495_vm2, %v6720_v37, %v4671_v43  ;;  %v6728_v44 = vld [vmem:[%s12712_s0 + $0x8a] ss:$16 sm:%s4709_s4]   ;;  %s4755_s4 = smov 12  ;;  %6522 = vst.msk [vmem:[%s12713_s1 + $0xc8] sm:$0xff] %vm3439_vm9, %v3759_v50   ;;  %6537 = vst.msk [vmem:[%s12713_s1 + $0x30] sm:$0xff] %vm3439_vm9, %v3828_v40  }
 0x248   :  { %4677 = vrot.lane.b32.xlu0 %v4676_v61, %s6938_s25  ;;  %v4712_v32 = vsel %vm485_vm0, %v6728_v44, %v6727_v0  ;;  %v6729_v39 = vld [vmem:[%s12712_s0 + $0x8a] ss:$16 sm:%s4714_s8]   ;;  %4746 = vrot.lane.b32.xlu1 %v4745_v55, %s6938_s25  ;;  %s4760_s8 = smov 48  ;;  %v3805_v9 = vpop.permute.xlu0 %3804  }
 0x249   :  { %v6730_v29 = vld [vmem:[%s12712_s0 + $0x8a] ss:$16 sm:%s4719_s12]   ;;  %v4717_v49 = vsel %vm490_vm1, %v6729_v39, %v4712_v32  ;;  %s4765_s12 = smov 192  ;;  %6532 = vst.msk [vmem:[%s12713_s1 + $0x10] sm:$0xff] %vm3439_vm9, %v3805_v9  }
 0x24a   :  { %v6742_v57 = vld [vmem:[%s12712_s0 + $0x38a] ss:$16 sm:%s4775_s11]   ;;  %v4722_v30 = vsel %vm495_vm2, %v6730_v29, %v4717_v49  ;;  %s4821_s11 = smov 3 }
 0x24b   :  { %v6743_v51 = vld [vmem:[%s12712_s0 + $0x38a] ss:$16 sm:%s4778_s21]   ;;  %s4824_s21 = smov 12  ;;  %v3874_v56 = vpop.permute.xlu1 %3873  }
 0x24c   :  { %v6744_v53 = vld [vmem:[%s12712_s0 + $0x38a] ss:$16 sm:%s4783_s3]   ;;  %4723 = vrot.lane.b32.xlu0 %v4722_v30, %s6938_s25  ;;  %v4781_v33 = vsel %vm485_vm0, %v6743_v51, %v6742_v57  ;;  %s4829_s3 = smov 48  ;;  %6547 = vst.msk [vmem:[%s12713_s1 + $0x70] sm:$0xff] %vm3439_vm9, %v3874_v56  }
 0x24d   :  { %v6745_v59 = vld [vmem:[%s12712_s0 + $0x38a] ss:$16 sm:%s4788_s28]   ;;  %v4786_v2 = vsel %vm490_vm1, %v6744_v53, %v4781_v33  ;;  %s4834_s28 = smov 192  ;;  %v6781_v57 = vld [vmem:[%s12712_s0 + $0x301] ss:$16 sm:%s4958_s10]   ;;  %s5004_s10 = smov 3 }
 0x24e   :  { %v6737_v22 = vld [vmem:[%s12712_s0 + $0x28a] ss:$16 sm:%s4752_s30]   ;;  %v4791_v28 = vsel %vm495_vm2, %v6745_v59, %v4786_v2  ;;  %s4798_s30 = smov 3  ;;  %v6782_v51 = vld [vmem:[%s12712_s0 + $0x301] ss:$16 sm:%s4961_s22]   ;;  %v3851_v58 = vpop.permute.xlu0 %3850   ;;  %s5007_s22 = smov 12 }
 0x24f   :  { %v6738_v24 = vld [vmem:[%s12712_s0 + $0x28a] ss:$16 sm:%s4755_s4]   ;;  %4792 = vrot.lane.b32.xlu1 %v4791_v28, %s6938_s25  ;;  %s4801_s4 = smov 12  ;;  %v4964_v33 = vsel %vm485_vm0, %v6782_v51, %v6781_v57  ;;  %6542 = vst.msk [vmem:[%s12713_s1 + $0x50] sm:$0xff] %vm3439_vm9, %v3851_v58  }
 0x250   :  { %v4758_v31 = vsel %vm485_vm0, %v6738_v24, %v6737_v22  ;;  %v6739_v4 = vld [vmem:[%s12712_s0 + $0x28a] ss:$16 sm:%s4760_s8]   ;;  %s4806_s8 = smov 48  ;;  %v6784_v59 = vld [vmem:[%s12712_s0 + $0x301] ss:$16 sm:%s4971_s14]   ;;  %s5017_s14 = smov 192 }
 0x251   :  { %v6740_v14 = vld [vmem:[%s12712_s0 + $0x28a] ss:$16 sm:%s4765_s12]   ;;  %v4763_v60 = vsel %vm490_vm1, %v6739_v4, %v4758_v31  ;;  %s4811_s12 = smov 192  ;;  %v3920_v42 = vpop.permute.xlu1 %3919  }
 0x252   :  { %v6752_v3 = vld [vmem:[%s12712_s0 + $0x58a] ss:$16 sm:%s4821_s11]   ;;  %v4768_v36 = vsel %vm495_vm2, %v6740_v14, %v4763_v60  ;;  %s4867_s11 = smov 3  ;;  %6557 = vst.msk [vmem:[%s12713_s1 + $0xb0] sm:$0xff] %vm3439_vm9, %v3920_v42  }
 0x253   :  { %v6753_v63 = vld [vmem:[%s12712_s0 + $0x58a] ss:$16 sm:%s4824_s21]   ;;  %4769 = vrot.lane.b32.xlu0 %v4768_v36, %s6938_s25  ;;  %s4870_s21 = smov 12 }
 0x254   :  { %v6754_v5 = vld [vmem:[%s12712_s0 + $0x58a] ss:$16 sm:%s4829_s3]   ;;  %v4827_v10 = vsel %vm485_vm0, %v6753_v63, %v6752_v3  ;;  %s4875_s3 = smov 48  ;;  %v6791_v3 = vld [vmem:[%s12712_s0 + $0x501] ss:$16 sm:%s5004_s10]   ;;  %v3897_v38 = vpop.permute.xlu0 %3896   ;;  %s5050_s10 = smov 3 }
 0x255   :  { %v6755_v6 = vld [vmem:[%s12712_s0 + $0x58a] ss:$16 sm:%s4834_s28]   ;;  %v4832_v16 = vsel %vm490_vm1, %v6754_v5, %v4827_v10  ;;  %s4880_s28 = smov 192  ;;  %v6792_v63 = vld [vmem:[%s12712_s0 + $0x501] ss:$16 sm:%s5007_s22]   ;;  %s5053_s22 = smov 12 }
 0x256   :  { %v6747_v1 = vld [vmem:[%s12712_s0 + $0x48a] ss:$16 sm:%s4798_s30]   ;;  %v4837_v47 = vsel %vm495_vm2, %v6755_v6, %v4832_v16  ;;  %s4844_s30 = smov 3  ;;  %v5010_v10 = vsel %vm485_vm0, %v6792_v63, %v6791_v3  ;;  %v6794_v6 = vld [vmem:[%s12712_s0 + $0x501] ss:$16 sm:%s5017_s14]   ;;  %s5063_s14 = smov 192 }
 0x257   :  { %v6748_v41 = vld [vmem:[%s12712_s0 + $0x48a] ss:$16 sm:%s4801_s4]   ;;  %4838 = vrot.lane.b32.xlu1 %v4837_v47, %s6938_s25  ;;  %s4847_s4 = smov 12  ;;  %6552 = vst.msk [vmem:[%s12713_s1 + $0x90] sm:$0xff] %vm3439_vm9, %v3897_v38  }
 0x258   :  { %v4804_v21 = vsel %vm485_vm0, %v6748_v41, %v6747_v1  ;;  %v6749_v23 = vld [vmem:[%s12712_s0 + $0x48a] ss:$16 sm:%s4806_s8]   ;;  %s4852_s8 = smov 48  ;;  %v3966_v15 = vpop.permute.xlu1 %3965  }
 0x259   :  { %v6750_v48 = vld [vmem:[%s12712_s0 + $0x48a] ss:$16 sm:%s4811_s12]   ;;  %v4809_v62 = vsel %vm490_vm1, %v6749_v23, %v4804_v21  ;;  %s4857_s12 = smov 192  ;;  %6567 = vst.msk [vmem:[%s12713_s1 + $0xf0] sm:$0xff] %vm3439_vm9, %v3966_v15  }
 0x25a   :  { %v6762_v8 = vld [vmem:[%s12712_s0 + $0x78a] ss:$16 sm:%s4867_s11]   ;;  %v4814_v34 = vsel %vm495_vm2, %v6750_v48, %v4809_v62  ;;  %s4912_s11 = smov 3 }
 0x25b   :  { %v6763_v12 = vld [vmem:[%s12712_s0 + $0x78a] ss:$16 sm:%s4870_s21]   ;;  %4815 = vrot.lane.b32.xlu0 %v4814_v34, %s6938_s25  ;;  %s4915_s21 = smov 12 }
 0x25c   :  { %v6764_v11 = vld [vmem:[%s12712_s0 + $0x78a] ss:$16 sm:%s4875_s3]   ;;  %v4873_v17 = vsel %vm485_vm0, %v6763_v12, %v6762_v8  ;;  %s4920_s3 = smov 48  ;;  %v6771_v54 = vld [vmem:[%s12712_s0 + $0x101] ss:$16 sm:%s4912_s11]   ;;  %v3943_v50 = vpop.permute.xlu0 %3942   ;;  %v4012_v40 = vpop.permute.xlu1 %4011  }
 0x25d   :  { %v6765_v13 = vld [vmem:[%s12712_s0 + $0x78a] ss:$16 sm:%s4880_s28]   ;;  %v4878_v18 = vsel %vm490_vm1, %v6764_v11, %v4873_v17  ;;  %s4925_s28 = smov 192  ;;  %v6772_v46 = vld [vmem:[%s12712_s0 + $0x101] ss:$16 sm:%s4915_s21]   ;;  %s4966_s21 = smov 48 }
 0x25e   :  { %v6757_v19 = vld [vmem:[%s12712_s0 + $0x68a] ss:$16 sm:%s4844_s30]   ;;  %v4883_v26 = vsel %vm495_vm2, %v6765_v13, %v4878_v18  ;;  %s4890_s30 = smov 3  ;;  %v6773_v45 = vld [vmem:[%s12712_s0 + $0x101] ss:$16 sm:%s4920_s3]   ;;  %v4918_v25 = vsel %vm485_vm0, %v6772_v46, %v6771_v54 }
 0x25f   :  { %v6758_v20 = vld [vmem:[%s12712_s0 + $0x68a] ss:$16 sm:%s4847_s4]   ;;  %4884 = vrot.lane.b32.xlu1 %v4883_v26, %s6938_s25  ;;  %s4893_s4 = smov 12  ;;  %v4923_v52 = vsel %vm490_vm1, %v6773_v45, %v4918_v25  ;;  %6562 = vst.msk [vmem:[%s12713_s1 + $0xd0] sm:$0xff] %vm3439_vm9, %v3943_v50  }
 0x260   :  { %v4850_v27 = vsel %vm485_vm0, %v6758_v20, %v6757_v19  ;;  %v6759_v35 = vld [vmem:[%s12712_s0 + $0x68a] ss:$16 sm:%s4852_s8]   ;;  %s4898_s8 = smov 48  ;;  %v6774_v7 = vld [vmem:[%s12712_s0 + $0x101] ss:$16 sm:%s4925_s28]   ;;  %s6939_s28 = smov 16   ;;  %v3989_v9 = vpop.permute.xlu0 %3988  }
 0x261   :  { %v6760_v37 = vld [vmem:[%s12712_s0 + $0x68a] ss:$16 sm:%s4857_s12]   ;;  %v4855_v43 = vsel %vm490_vm1, %v6759_v35, %v4850_v27  ;;  %s4903_s12 = smov 192  ;;  %v6767_v0 = vld [vmem:[%s12712_s0 + $0x1] ss:$16 sm:%s4890_s30]   ;;  %v4928_v55 = vsel %vm495_vm2, %v6774_v7, %v4923_v52  ;;  %s4935_s30 = smov 3 }
 0x262   :  { %v4860_v61 = vsel %vm495_vm2, %v6760_v37, %v4855_v43  ;;  %v6768_v44 = vld [vmem:[%s12712_s0 + $0x1] ss:$16 sm:%s4893_s4]   ;;  %s4938_s4 = smov 12  ;;  %6577 = vst.msk [vmem:[%s12713_s1 + $0x38] sm:$0xff] %vm3439_vm9, %v4012_v40   ;;  %6572 = vst.msk [vmem:[%s12713_s1 + $0x18] sm:$0xff] %vm3439_vm9, %v3989_v9   ;;  %v4058_v56 = vpop.permute.xlu1 %4057  }
 0x263   :  { %4861 = vrot.lane.b32.xlu0 %v4860_v61, %s6938_s25  ;;  %v4896_v32 = vsel %vm485_vm0, %v6768_v44, %v6767_v0  ;;  %v6769_v39 = vld [vmem:[%s12712_s0 + $0x1] ss:$16 sm:%s4898_s8]   ;;  %4929 = vrot.lane.b32.xlu1 %v4928_v55, %s6939_s28  ;;  %s4943_s8 = smov 48 }
 0x264   :  { %v6770_v29 = vld [vmem:[%s12712_s0 + $0x1] ss:$16 sm:%s4903_s12]   ;;  %v4901_v49 = vsel %vm490_vm1, %v6769_v39, %v4896_v32  ;;  %s4948_s12 = smov 192  ;;  %6587 = vst.msk [vmem:[%s12713_s1 + $0x78] sm:$0xff] %vm3439_vm9, %v4058_v56   ;;  %v4035_v58 = vpop.permute.xlu0 %4034  }
 0x265   :  { %v4906_v30 = vsel %vm495_vm2, %v6770_v29, %v4901_v49  ;;  %v6783_v53 = vld [vmem:[%s12712_s0 + $0x301] ss:$16 sm:%s4966_s21]   ;;  %s5012_s21 = smov 48  ;;  %6582 = vst.msk [vmem:[%s12713_s1 + $0x58] sm:$0xff] %vm3439_vm9, %v4035_v58  }
 0x266   :  { %v4969_v2 = vsel %vm490_vm1, %v6783_v53, %v4964_v33  ;;  %v6776_v22 = vld [vmem:[%s12712_s0 + $0x201] ss:$16 sm:%s4935_s30]   ;;  %s4981_s30 = smov 3  ;;  %v4104_v42 = vpop.permute.xlu1 %4103  }
 0x267   :  { %4907 = vrot.lane.b32.xlu0 %v4906_v30, %s6939_s28  ;;  %v6777_v24 = vld [vmem:[%s12712_s0 + $0x201] ss:$16 sm:%s4938_s4]   ;;  %v4974_v28 = vsel %vm495_vm2, %v6784_v59, %v4969_v2  ;;  %s4984_s4 = smov 12  ;;  %6597 = vst.msk [vmem:[%s12713_s1 + $0xb8] sm:$0xff] %vm3439_vm9, %v4104_v42  }
 0x268   :  { %v4941_v31 = vsel %vm485_vm0, %v6777_v24, %v6776_v22  ;;  %v6778_v4 = vld [vmem:[%s12712_s0 + $0x201] ss:$16 sm:%s4943_s8]   ;;  %4975 = vrot.lane.b32.xlu1 %v4974_v28, %s6939_s28  ;;  %s4989_s8 = smov 48  ;;  %v4081_v38 = vpop.permute.xlu0 %4080  }
 0x269   :  { %v6779_v14 = vld [vmem:[%s12712_s0 + $0x201] ss:$16 sm:%s4948_s12]   ;;  %v4946_v60 = vsel %vm490_vm1, %v6778_v4, %v4941_v31  ;;  %s4994_s12 = smov 192  ;;  %6592 = vst.msk [vmem:[%s12713_s1 + $0x98] sm:$0xff] %vm3439_vm9, %v4081_v38  }
 0x26a   :  { %v4951_v36 = vsel %vm495_vm2, %v6779_v14, %v4946_v60  ;;  %v6793_v5 = vld [vmem:[%s12712_s0 + $0x501] ss:$16 sm:%s5012_s21]   ;;  %s5058_s21 = smov 48 }
 0x26b   :  { %4952 = vrot.lane.b32.xlu0 %v4951_v36, %s6939_s28  ;;  %v5015_v16 = vsel %vm490_vm1, %v6793_v5, %v5010_v10  ;;  %v6786_v1 = vld [vmem:[%s12712_s0 + $0x401] ss:$16 sm:%s4981_s30]   ;;  %s5027_s30 = smov 3  ;;  %v4150_v15 = vpop.permute.xlu1 %4149  }
 0x26c   :  { %v6787_v41 = vld [vmem:[%s12712_s0 + $0x401] ss:$16 sm:%s4984_s4]   ;;  %v5020_v47 = vsel %vm495_vm2, %v6794_v6, %v5015_v16  ;;  %s5030_s4 = smov 12  ;;  %6607 = vst.msk [vmem:[%s12713_s1 + $0xf8] sm:$0xff] %vm3439_vm9, %v4150_v15  }
 0x26d   :  { %v4987_v21 = vsel %vm485_vm0, %v6787_v41, %v6786_v1  ;;  %v6788_v23 = vld [vmem:[%s12712_s0 + $0x401] ss:$16 sm:%s4989_s8]   ;;  %5021 = vrot.lane.b32.xlu1 %v5020_v47, %s6939_s28  ;;  %s5035_s8 = smov 48 }
 0x26e   :  { %v6789_v48 = vld [vmem:[%s12712_s0 + $0x401] ss:$16 sm:%s4994_s12]   ;;  %v4992_v62 = vsel %vm490_vm1, %v6788_v23, %v4987_v21  ;;  %s5040_s12 = smov 192 }
 0x26f   :  { %v6801_v8 = vld [vmem:[%s12712_s0 + $0x701] ss:$16 sm:%s5050_s10]   ;;  %v4997_v34 = vsel %vm495_vm2, %v6789_v48, %v4992_v62  ;;  %s5096_s10 = smov 3  ;;  %v4127_v50 = vpop.permute.xlu0 %4126   ;;  %v4195_v40 = vpop.permute.xlu1 %4194  }
 0x270   :  { %v6802_v12 = vld [vmem:[%s12712_s0 + $0x701] ss:$16 sm:%s5053_s22]   ;;  %4998 = vrot.lane.b32.xlu0 %v4997_v34, %s6939_s28  ;;  %s5099_s22 = smov 12  ;;  %6602 = vst.msk [vmem:[%s12713_s1 + $0xd8] sm:$0xff] %vm3439_vm9, %v4127_v50  }
 0x271   :  { %v6803_v11 = vld [vmem:[%s12712_s0 + $0x701] ss:$16 sm:%s5058_s21]   ;;  %v5056_v17 = vsel %vm485_vm0, %v6802_v12, %v6801_v8  ;;  %s5104_s21 = smov 48  ;;  %v6811_v54 = vld [vmem:[%s12712_s0 + $0x109] ss:$16 sm:%s5096_s10]   ;;  %s5142_s10 = smov 3 }
 0x272   :  { %v6804_v13 = vld [vmem:[%s12712_s0 + $0x701] ss:$16 sm:%s5063_s14]   ;;  %v5061_v18 = vsel %vm490_vm1, %v6803_v11, %v5056_v17  ;;  %s5109_s14 = smov 192  ;;  %v6812_v46 = vld [vmem:[%s12712_s0 + $0x109] ss:$16 sm:%s5099_s22]   ;;  %s5145_s22 = smov 12 }
 0x273   :  { %v6796_v19 = vld [vmem:[%s12712_s0 + $0x601] ss:$16 sm:%s5027_s30]   ;;  %v5066_v26 = vsel %vm495_vm2, %v6804_v13, %v5061_v18  ;;  %s5073_s30 = smov 3  ;;  %v6813_v45 = vld [vmem:[%s12712_s0 + $0x109] ss:$16 sm:%s5104_s21]   ;;  %v5102_v25 = vsel %vm485_vm0, %v6812_v46, %v6811_v54  ;;  %s5150_s21 = smov 48  ;;  %v4173_v9 = vpop.permute.xlu0 %4172   ;;  %v4241_v56 = vpop.permute.xlu1 %4240  }
 0x274   :  { %v6797_v20 = vld [vmem:[%s12712_s0 + $0x601] ss:$16 sm:%s5030_s4]   ;;  %5067 = vrot.lane.b32.xlu1 %v5066_v26, %s6939_s28  ;;  %s5076_s4 = smov 12  ;;  %v5107_v52 = vsel %vm490_vm1, %v6813_v45, %v5102_v25  ;;  %6616 = vst.msk [vmem:[%s12713_s1 + $0x20] sm:$0xff] %vm4174_vm10, %v4195_v40  }
 0x275   :  { %v5033_v27 = vsel %vm485_vm0, %v6797_v20, %v6796_v19  ;;  %v6798_v35 = vld [vmem:[%s12712_s0 + $0x601] ss:$16 sm:%s5035_s8]   ;;  %s5081_s8 = smov 48  ;;  %v6814_v7 = vld [vmem:[%s12712_s0 + $0x109] ss:$16 sm:%s5109_s14]   ;;  %s5155_s14 = smov 192 }
 0x276   :  { %v6799_v37 = vld [vmem:[%s12712_s0 + $0x601] ss:$16 sm:%s5040_s12]   ;;  %v5038_v43 = vsel %vm490_vm1, %v6798_v35, %v5033_v27  ;;  %s5086_s12 = smov 192  ;;  %v6806_v0 = vld [vmem:[%s12712_s0 + $0x9] ss:$16 sm:%s5073_s30]   ;;  %v5112_v55 = vsel %vm495_vm2, %v6814_v7, %v5107_v52  ;;  %s5119_s30 = smov 3 }
 0x277   :  { %v5043_v61 = vsel %vm495_vm2, %v6799_v37, %v5038_v43  ;;  %v6807_v44 = vld [vmem:[%s12712_s0 + $0x9] ss:$16 sm:%s5076_s4]   ;;  %s5122_s4 = smov 12  ;;  %4175 = vst.msk [vmem:[%s12713_s1] sm:$0xff] %vm4174_vm10, %v4173_v9   ;;  %6626 = vst.msk [vmem:[%s12713_s1 + $0x60] sm:$0xff] %vm4174_vm10, %v4241_v56   ;;  %v4218_v58 = vpop.permute.xlu0 %4217  }
 0x278   :  { %5044 = vrot.lane.b32.xlu0 %v5043_v61, %s6939_s28  ;;  %v5079_v32 = vsel %vm485_vm0, %v6807_v44, %v6806_v0  ;;  %v6808_v39 = vld [vmem:[%s12712_s0 + $0x9] ss:$16 sm:%s5081_s8]   ;;  %5113 = vrot.lane.b32.xlu1 %v5112_v55, %s6939_s28  ;;  %s5127_s8 = smov 48  ;;  %v4287_v42 = vpop.permute.xlu1 %4286  }
 0x279   :  { %v6809_v29 = vld [vmem:[%s12712_s0 + $0x9] ss:$16 sm:%s5086_s12]   ;;  %v5084_v49 = vsel %vm490_vm1, %v6808_v39, %v5079_v32  ;;  %s5132_s12 = smov 192  ;;  %6621 = vst.msk [vmem:[%s12713_s1 + $0x40] sm:$0xff] %vm4174_vm10, %v4218_v58   ;;  %6636 = vst.msk [vmem:[%s12713_s1 + $0xa0] sm:$0xff] %vm4174_vm10, %v4287_v42  }
 0x27a   :  { %v6821_v57 = vld [vmem:[%s12712_s0 + $0x309] ss:$16 sm:%s5142_s10]   ;;  %v5089_v30 = vsel %vm495_vm2, %v6809_v29, %v5084_v49  ;;  %s5188_s10 = smov 3 }
 0x27b   :  { %v6822_v51 = vld [vmem:[%s12712_s0 + $0x309] ss:$16 sm:%s5145_s22]   ;;  %s5191_s22 = smov 12 }
 0x27c   :  { %v6823_v53 = vld [vmem:[%s12712_s0 + $0x309] ss:$16 sm:%s5150_s21]   ;;  %5090 = vrot.lane.b32.xlu0 %v5089_v30, %s6939_s28  ;;  %v5148_v33 = vsel %vm485_vm0, %v6822_v51, %v6821_v57  ;;  %s5196_s21 = smov 48  ;;  %v4264_v38 = vpop.permute.xlu0 %4263  }
 0x27d   :  { %v6824_v59 = vld [vmem:[%s12712_s0 + $0x309] ss:$16 sm:%s5155_s14]   ;;  %v5153_v2 = vsel %vm490_vm1, %v6823_v53, %v5148_v33  ;;  %s5201_s14 = smov 192  ;;  %6631 = vst.msk [vmem:[%s12713_s1 + $0x80] sm:$0xff] %vm4174_vm10, %v4264_v38  }
 0x27e   :  { %v6816_v22 = vld [vmem:[%s12712_s0 + $0x209] ss:$16 sm:%s5119_s30]   ;;  %v5158_v28 = vsel %vm495_vm2, %v6824_v59, %v5153_v2  ;;  %s5165_s30 = smov 3 }
 0x27f   :  { %v6817_v24 = vld [vmem:[%s12712_s0 + $0x209] ss:$16 sm:%s5122_s4]   ;;  %5159 = vrot.lane.b32.xlu1 %v5158_v28, %s6939_s28  ;;  %s5168_s4 = smov 12 }
 0x280   :  { %v5125_v31 = vsel %vm485_vm0, %v6817_v24, %v6816_v22  ;;  %v6818_v4 = vld [vmem:[%s12712_s0 + $0x209] ss:$16 sm:%s5127_s8]   ;;  %s5173_s8 = smov 48  ;;  %v4333_v15 = vpop.permute.xlu1 %4332  }
 0x281   :  { %v6819_v14 = vld [vmem:[%s12712_s0 + $0x209] ss:$16 sm:%s5132_s12]   ;;  %v5130_v60 = vsel %vm490_vm1, %v6818_v4, %v5125_v31  ;;  %s5178_s12 = smov 192  ;;  %6646 = vst.msk [vmem:[%s12713_s1 + $0xe0] sm:$0xff] %vm4174_vm10, %v4333_v15  }
 0x282   :  { %v6831_v3 = vld [vmem:[%s12712_s0 + $0x509] ss:$16 sm:%s5188_s10]   ;;  %v5135_v36 = vsel %vm495_vm2, %v6819_v14, %v5130_v60  ;;  %s5234_s10 = smov 3 }
 0x283   :  { %v6832_v63 = vld [vmem:[%s12712_s0 + $0x509] ss:$16 sm:%s5191_s22]   ;;  %5136 = vrot.lane.b32.xlu0 %v5135_v36, %s6939_s28  ;;  %s5237_s22 = smov 12 }
 0x284   :  { %v6833_v5 = vld [vmem:[%s12712_s0 + $0x509] ss:$16 sm:%s5196_s21]   ;;  %v5194_v10 = vsel %vm485_vm0, %v6832_v63, %v6831_v3  ;;  %s5242_s21 = smov 48  ;;  %v4310_v50 = vpop.permute.xlu0 %4309   ;;  %v4379_v40 = vpop.permute.xlu1 %4378  }
 0x285   :  { %v6834_v6 = vld [vmem:[%s12712_s0 + $0x509] ss:$16 sm:%s5201_s14]   ;;  %v5199_v16 = vsel %vm490_vm1, %v6833_v5, %v5194_v10  ;;  %s5247_s14 = smov 192  ;;  %6641 = vst.msk [vmem:[%s12713_s1 + $0xc0] sm:$0xff] %vm4174_vm10, %v4310_v50   ;;  %6656 = vst.msk [vmem:[%s12713_s1 + $0x28] sm:$0xff] %vm4174_vm10, %v4379_v40  }
 0x286   :  { %v6826_v1 = vld [vmem:[%s12712_s0 + $0x409] ss:$16 sm:%s5165_s30]   ;;  %v5204_v47 = vsel %vm495_vm2, %v6834_v6, %v5199_v16  ;;  %s5211_s30 = smov 3 }
 0x287   :  { %v6827_v41 = vld [vmem:[%s12712_s0 + $0x409] ss:$16 sm:%s5168_s4]   ;;  %5205 = vrot.lane.b32.xlu1 %v5204_v47, %s6939_s28  ;;  %s5214_s4 = smov 12 }
 0x288   :  { %v5171_v21 = vsel %vm485_vm0, %v6827_v41, %v6826_v1  ;;  %v6828_v23 = vld [vmem:[%s12712_s0 + $0x409] ss:$16 sm:%s5173_s8]   ;;  %s5219_s8 = smov 48  ;;  %v4356_v9 = vpop.permute.xlu0 %4355  }
 0x289   :  { %v6829_v48 = vld [vmem:[%s12712_s0 + $0x409] ss:$16 sm:%s5178_s12]   ;;  %v5176_v62 = vsel %vm490_vm1, %v6828_v23, %v5171_v21  ;;  %s5224_s12 = smov 192  ;;  %6651 = vst.msk [vmem:[%s12713_s1 + $0x8] sm:$0xff] %vm4174_vm10, %v4356_v9  }
 0x28a   :  { %v6841_v8 = vld [vmem:[%s12712_s0 + $0x709] ss:$16 sm:%s5234_s10]   ;;  %v5181_v34 = vsel %vm495_vm2, %v6829_v48, %v5176_v62  ;;  %s5280_s10 = smov 3 }
 0x28b   :  { %v6842_v12 = vld [vmem:[%s12712_s0 + $0x709] ss:$16 sm:%s5237_s22]   ;;  %5182 = vrot.lane.b32.xlu0 %v5181_v34, %s6939_s28  ;;  %s5283_s22 = smov 12  ;;  %v4425_v56 = vpop.permute.xlu1 %4424  }
 0x28c   :  { %v6843_v11 = vld [vmem:[%s12712_s0 + $0x709] ss:$16 sm:%s5242_s21]   ;;  %v5240_v17 = vsel %vm485_vm0, %v6842_v12, %v6841_v8  ;;  %s5288_s21 = smov 48  ;;  %v6851_v54 = vld [vmem:[%s12712_s0 + $0x181] ss:$16 sm:%s5280_s10]   ;;  %s5326_s10 = smov 3 }
 0x28d   :  { %v6844_v13 = vld [vmem:[%s12712_s0 + $0x709] ss:$16 sm:%s5247_s14]   ;;  %v5245_v18 = vsel %vm490_vm1, %v6843_v11, %v5240_v17  ;;  %s5293_s14 = smov 192  ;;  %v6852_v46 = vld [vmem:[%s12712_s0 + $0x181] ss:$16 sm:%s5283_s22]   ;;  %s5329_s22 = smov 12 }
 0x28e   :  { %v6836_v19 = vld [vmem:[%s12712_s0 + $0x609] ss:$16 sm:%s5211_s30]   ;;  %v5250_v26 = vsel %vm495_vm2, %v6844_v13, %v5245_v18  ;;  %s5257_s30 = smov 3  ;;  %v6853_v45 = vld [vmem:[%s12712_s0 + $0x181] ss:$16 sm:%s5288_s21]   ;;  %v5286_v25 = vsel %vm485_vm0, %v6852_v46, %v6851_v54  ;;  %s5334_s21 = smov 48 }
 0x28f   :  { %v6837_v20 = vld [vmem:[%s12712_s0 + $0x609] ss:$16 sm:%s5214_s4]   ;;  %5251 = vrot.lane.b32.xlu1 %v5250_v26, %s6939_s28  ;;  %s5260_s4 = smov 12  ;;  %v5291_v52 = vsel %vm490_vm1, %v6853_v45, %v5286_v25  ;;  %6666 = vst.msk [vmem:[%s12713_s1 + $0x68] sm:$0xff] %vm4174_vm10, %v4425_v56   ;;  %v4402_v58 = vpop.permute.xlu0 %4401  }
 0x290   :  { %v5217_v27 = vsel %vm485_vm0, %v6837_v20, %v6836_v19  ;;  %v6838_v35 = vld [vmem:[%s12712_s0 + $0x609] ss:$16 sm:%s5219_s8]   ;;  %s5265_s8 = smov 48  ;;  %v6854_v7 = vld [vmem:[%s12712_s0 + $0x181] ss:$16 sm:%s5293_s14]   ;;  %s5339_s14 = smov 192 }
 0x291   :  { %v6839_v37 = vld [vmem:[%s12712_s0 + $0x609] ss:$16 sm:%s5224_s12]   ;;  %v5222_v43 = vsel %vm490_vm1, %v6838_v35, %v5217_v27  ;;  %s5270_s12 = smov 192  ;;  %v6846_v0 = vld [vmem:[%s12712_s0 + $0x81] ss:$16 sm:%s5257_s30]   ;;  %v5296_v55 = vsel %vm495_vm2, %v6854_v7, %v5291_v52  ;;  %s5303_s30 = smov 3 }
 0x292   :  { %v5227_v61 = vsel %vm495_vm2, %v6839_v37, %v5222_v43  ;;  %v6847_v44 = vld [vmem:[%s12712_s0 + $0x81] ss:$16 sm:%s5260_s4]   ;;  %s5306_s4 = smov 12  ;;  %6661 = vst.msk [vmem:[%s12713_s1 + $0x48] sm:$0xff] %vm4174_vm10, %v4402_v58  }
 0x293   :  { %5228 = vrot.lane.b32.xlu0 %v5227_v61, %s6939_s28  ;;  %v5263_v32 = vsel %vm485_vm0, %v6847_v44, %v6846_v0  ;;  %v6848_v39 = vld [vmem:[%s12712_s0 + $0x81] ss:$16 sm:%s5265_s8]   ;;  %5297 = vrot.lane.b32.xlu1 %v5296_v55, %s6939_s28  ;;  %s5311_s8 = smov 48  ;;  %v4471_v42 = vpop.permute.xlu1 %4470  }
 0x294   :  { %v6849_v29 = vld [vmem:[%s12712_s0 + $0x81] ss:$16 sm:%s5270_s12]   ;;  %v5268_v49 = vsel %vm490_vm1, %v6848_v39, %v5263_v32  ;;  %s5316_s12 = smov 192  ;;  %6676 = vst.msk [vmem:[%s12713_s1 + $0xa8] sm:$0xff] %vm4174_vm10, %v4471_v42  }
 0x295   :  { %v6861_v57 = vld [vmem:[%s12712_s0 + $0x381] ss:$16 sm:%s5326_s10]   ;;  %v5273_v30 = vsel %vm495_vm2, %v6849_v29, %v5268_v49  ;;  %s5372_s10 = smov 3 }
 0x296   :  { %v6862_v51 = vld [vmem:[%s12712_s0 + $0x381] ss:$16 sm:%s5329_s22]   ;;  %s5375_s22 = smov 12 }
 0x297   :  { %v6863_v53 = vld [vmem:[%s12712_s0 + $0x381] ss:$16 sm:%s5334_s21]   ;;  %5274 = vrot.lane.b32.xlu0 %v5273_v30, %s6939_s28  ;;  %v5332_v33 = vsel %vm485_vm0, %v6862_v51, %v6861_v57  ;;  %s5380_s21 = smov 48  ;;  %v4448_v38 = vpop.permute.xlu0 %4447  }
 0x298   :  { %v6864_v59 = vld [vmem:[%s12712_s0 + $0x381] ss:$16 sm:%s5339_s14]   ;;  %v5337_v2 = vsel %vm490_vm1, %v6863_v53, %v5332_v33  ;;  %s5385_s14 = smov 192  ;;  %6671 = vst.msk [vmem:[%s12713_s1 + $0x88] sm:$0xff] %vm4174_vm10, %v4448_v38  }
 0x299   :  { %v6856_v22 = vld [vmem:[%s12712_s0 + $0x281] ss:$16 sm:%s5303_s30]   ;;  %v5342_v28 = vsel %vm495_vm2, %v6864_v59, %v5337_v2  ;;  %s5349_s30 = smov 3 }
 0x29a   :  { %v6857_v24 = vld [vmem:[%s12712_s0 + $0x281] ss:$16 sm:%s5306_s4]   ;;  %5343 = vrot.lane.b32.xlu1 %v5342_v28, %s6939_s28  ;;  %s5352_s4 = smov 12 }
 0x29b   :  { %v5309_v31 = vsel %vm485_vm0, %v6857_v24, %v6856_v22  ;;  %v6858_v4 = vld [vmem:[%s12712_s0 + $0x281] ss:$16 sm:%s5311_s8]   ;;  %s5357_s8 = smov 48  ;;  %v4517_v15 = vpop.permute.xlu1 %4516  }
 0x29c   :  { %v6859_v14 = vld [vmem:[%s12712_s0 + $0x281] ss:$16 sm:%s5316_s12]   ;;  %v5314_v60 = vsel %vm490_vm1, %v6858_v4, %v5309_v31  ;;  %s5362_s12 = smov 192  ;;  %6686 = vst.msk [vmem:[%s12713_s1 + $0xe8] sm:$0xff] %vm4174_vm10, %v4517_v15  }
 0x29d   :  { %v6871_v3 = vld [vmem:[%s12712_s0 + $0x581] ss:$16 sm:%s5372_s10]   ;;  %v5319_v36 = vsel %vm495_vm2, %v6859_v14, %v5314_v60  ;;  %s5418_s10 = smov 3 }
 0x29e   :  { %v6872_v63 = vld [vmem:[%s12712_s0 + $0x581] ss:$16 sm:%s5375_s22]   ;;  %5320 = vrot.lane.b32.xlu0 %v5319_v36, %s6939_s28  ;;  %s5421_s22 = smov 12 }
 0x29f   :  { %v6873_v5 = vld [vmem:[%s12712_s0 + $0x581] ss:$16 sm:%s5380_s21]   ;;  %v5378_v10 = vsel %vm485_vm0, %v6872_v63, %v6871_v3  ;;  %s5426_s21 = smov 48  ;;  %v4494_v50 = vpop.permute.xlu0 %4493   ;;  %v4563_v40 = vpop.permute.xlu1 %4562  }
 0x2a0   :  { %v6874_v6 = vld [vmem:[%s12712_s0 + $0x581] ss:$16 sm:%s5385_s14]   ;;  %v5383_v16 = vsel %vm490_vm1, %v6873_v5, %v5378_v10  ;;  %s5431_s14 = smov 192  ;;  %6681 = vst.msk [vmem:[%s12713_s1 + $0xc8] sm:$0xff] %vm4174_vm10, %v4494_v50   ;;  %6696 = vst.msk [vmem:[%s12713_s1 + $0x30] sm:$0xff] %vm4174_vm10, %v4563_v40  }
 0x2a1   :  { %v6866_v1 = vld [vmem:[%s12712_s0 + $0x481] ss:$16 sm:%s5349_s30]   ;;  %v5388_v47 = vsel %vm495_vm2, %v6874_v6, %v5383_v16  ;;  %s5395_s30 = smov 3 }
 0x2a2   :  { %v6867_v41 = vld [vmem:[%s12712_s0 + $0x481] ss:$16 sm:%s5352_s4]   ;;  %5389 = vrot.lane.b32.xlu1 %v5388_v47, %s6939_s28  ;;  %s5398_s4 = smov 12 }
 0x2a3   :  { %v5355_v21 = vsel %vm485_vm0, %v6867_v41, %v6866_v1  ;;  %v6868_v23 = vld [vmem:[%s12712_s0 + $0x481] ss:$16 sm:%s5357_s8]   ;;  %s5403_s8 = smov 48 }
 0x2a4   :  { %v6869_v48 = vld [vmem:[%s12712_s0 + $0x481] ss:$16 sm:%s5362_s12]   ;;  %v5360_v62 = vsel %vm490_vm1, %v6868_v23, %v5355_v21  ;;  %s5408_s12 = smov 192 }
 0x2a5   :  { %v6881_v8 = vld [vmem:[%s12712_s0 + $0x781] ss:$16 sm:%s5418_s10]   ;;  %v5365_v34 = vsel %vm495_vm2, %v6869_v48, %v5360_v62  ;;  %s5464_s10 = smov 3 }
 0x2a6   :  { %v6882_v12 = vld [vmem:[%s12712_s0 + $0x781] ss:$16 sm:%s5421_s22]   ;;  %5366 = vrot.lane.b32.xlu0 %v5365_v34, %s6939_s28  ;;  %s5467_s22 = smov 12 }
 0x2a7   :  { %v6883_v11 = vld [vmem:[%s12712_s0 + $0x781] ss:$16 sm:%s5426_s21]   ;;  %v5424_v17 = vsel %vm485_vm0, %v6882_v12, %v6881_v8  ;;  %s5472_s21 = smov 48  ;;  %v6891_v54 = vld [vmem:[%s12712_s0 + $0x189] ss:$16 sm:%s5464_s10]   ;;  %s5510_s10 = smov 3 }
 0x2a8   :  { %v6884_v13 = vld [vmem:[%s12712_s0 + $0x781] ss:$16 sm:%s5431_s14]   ;;  %v5429_v18 = vsel %vm490_vm1, %v6883_v11, %v5424_v17  ;;  %s5477_s14 = smov 192  ;;  %v6892_v46 = vld [vmem:[%s12712_s0 + $0x189] ss:$16 sm:%s5467_s22]   ;;  %s5513_s22 = smov 12 }
 0x2a9   :  { %v6876_v19 = vld [vmem:[%s12712_s0 + $0x681] ss:$16 sm:%s5395_s30]   ;;  %v5434_v26 = vsel %vm495_vm2, %v6884_v13, %v5429_v18  ;;  %s5441_s30 = smov 3  ;;  %v6893_v45 = vld [vmem:[%s12712_s0 + $0x189] ss:$16 sm:%s5472_s21]   ;;  %v5470_v25 = vsel %vm485_vm0, %v6892_v46, %v6891_v54  ;;  %s5518_s21 = smov 48  ;;  %v4609_v46 = vpop.permute.xlu1 %4608  }
 0x2aa   :  { %v6877_v20 = vld [vmem:[%s12712_s0 + $0x681] ss:$16 sm:%s5398_s4]   ;;  %5435 = vrot.lane.b32.xlu1 %v5434_v26, %s6939_s28  ;;  %s5444_s4 = smov 12  ;;  %v5475_v52 = vsel %vm490_vm1, %v6893_v45, %v5470_v25  ;;  %6706 = vst.msk [vmem:[%s12713_s1 + $0x70] sm:$0xff] %vm4174_vm10, %v4609_v46  }
 0x2ab   :  { %v5401_v27 = vsel %vm485_vm0, %v6877_v20, %v6876_v19  ;;  %v6878_v35 = vld [vmem:[%s12712_s0 + $0x681] ss:$16 sm:%s5403_s8]   ;;  %s5449_s8 = smov 48  ;;  %v6894_v7 = vld [vmem:[%s12712_s0 + $0x189] ss:$16 sm:%s5477_s14]   ;;  %s5523_s14 = smov 192 }
 0x2ac   :  { %v6879_v37 = vld [vmem:[%s12712_s0 + $0x681] ss:$16 sm:%s5408_s12]   ;;  %v5406_v43 = vsel %vm490_vm1, %v6878_v35, %v5401_v27  ;;  %s5454_s12 = smov 192  ;;  %v6886_v0 = vld [vmem:[%s12712_s0 + $0x89] ss:$16 sm:%s5441_s30]   ;;  %v5480_v55 = vsel %vm495_vm2, %v6894_v7, %v5475_v52  ;;  %s5487_s30 = smov 3 }
 0x2ad   :  { %v5411_v61 = vsel %vm495_vm2, %v6879_v37, %v5406_v43  ;;  %v6887_v44 = vld [vmem:[%s12712_s0 + $0x89] ss:$16 sm:%s5444_s4]   ;;  %s5490_s4 = smov 12 }
 0x2ae   :  { %5412 = vrot.lane.b32.xlu0 %v5411_v61, %s6939_s28  ;;  %v5447_v32 = vsel %vm485_vm0, %v6887_v44, %v6886_v0  ;;  %v6888_v39 = vld [vmem:[%s12712_s0 + $0x89] ss:$16 sm:%s5449_s8]   ;;  %5481 = vrot.lane.b32.xlu1 %v5480_v55, %s6939_s28  ;;  %s5495_s8 = smov 48  ;;  %v4540_v61 = vpop.permute.xlu0 %4539   ;;  %v4655_v9 = vpop.permute.xlu1 %4654  }
 0x2af   :  { %v6889_v29 = vld [vmem:[%s12712_s0 + $0x89] ss:$16 sm:%s5454_s12]   ;;  %v5452_v49 = vsel %vm490_vm1, %v6888_v39, %v5447_v32  ;;  %s5500_s12 = smov 192  ;;  %6691 = vst.msk [vmem:[%s12713_s1 + $0x10] sm:$0xff] %vm4174_vm10, %v4540_v61   ;;  %6716 = vst.msk [vmem:[%s12713_s1 + $0xb0] sm:$0xff] %vm4174_vm10, %v4655_v9  }
 0x2b0   :  { %v6901_v57 = vld [vmem:[%s12712_s0 + $0x389] ss:$16 sm:%s5510_s10]   ;;  %v5457_v30 = vsel %vm495_vm2, %v6889_v29, %v5452_v49  ;;  %s5556_s10 = smov 3 }
 0x2b1   :  { %v6902_v51 = vld [vmem:[%s12712_s0 + $0x389] ss:$16 sm:%s5513_s22]   ;;  %s5559_s22 = smov 12 }
 0x2b2   :  { %v6903_v53 = vld [vmem:[%s12712_s0 + $0x389] ss:$16 sm:%s5518_s21]   ;;  %5458 = vrot.lane.b32.xlu0 %v5457_v30, %s6939_s28  ;;  %v5516_v33 = vsel %vm485_vm0, %v6902_v51, %v6901_v57  ;;  %s5564_s21 = smov 48  ;;  %v4586_v45 = vpop.permute.xlu0 %4585  }
 0x2b3   :  { %v6904_v59 = vld [vmem:[%s12712_s0 + $0x389] ss:$16 sm:%s5523_s14]   ;;  %v5521_v2 = vsel %vm490_vm1, %v6903_v53, %v5516_v33  ;;  %s5569_s14 = smov 192  ;;  %6701 = vst.msk [vmem:[%s12713_s1 + $0x50] sm:$0xff] %vm4174_vm10, %v4586_v45  }
 0x2b4   :  { %v6896_v22 = vld [vmem:[%s12712_s0 + $0x289] ss:$16 sm:%s5487_s30]   ;;  %v5526_v28 = vsel %vm495_vm2, %v6904_v59, %v5521_v2  ;;  %s5533_s30 = smov 3 }
 0x2b5   :  { %v6897_v24 = vld [vmem:[%s12712_s0 + $0x289] ss:$16 sm:%s5490_s4]   ;;  %5527 = vrot.lane.b32.xlu1 %v5526_v28, %s6939_s28  ;;  %s5536_s4 = smov 12 }
 0x2b6   :  { %v5493_v31 = vsel %vm485_vm0, %v6897_v24, %v6896_v22  ;;  %v6898_v4 = vld [vmem:[%s12712_s0 + $0x289] ss:$16 sm:%s5495_s8]   ;;  %s5541_s8 = smov 48  ;;  %v4632_v25 = vpop.permute.xlu0 %4631   ;;  %v4701_v7 = vpop.permute.xlu1 %4700  }
 0x2b7   :  { %v6899_v14 = vld [vmem:[%s12712_s0 + $0x289] ss:$16 sm:%s5500_s12]   ;;  %v5498_v60 = vsel %vm490_vm1, %v6898_v4, %v5493_v31  ;;  %s5546_s12 = smov 192  ;;  %6711 = vst.msk [vmem:[%s12713_s1 + $0x90] sm:$0xff] %vm4174_vm10, %v4632_v25   ;;  %6726 = vst.msk [vmem:[%s12713_s1 + $0xf0] sm:$0xff] %vm4174_vm10, %v4701_v7  }
 0x2b8   :  { %v6911_v3 = vld [vmem:[%s12712_s0 + $0x589] ss:$16 sm:%s5556_s10]   ;;  %v5503_v36 = vsel %vm495_vm2, %v6899_v14, %v5498_v60  ;;  %s5602_s10 = smov 3 }
 0x2b9   :  { %v6912_v63 = vld [vmem:[%s12712_s0 + $0x589] ss:$16 sm:%s5559_s22]   ;;  %5504 = vrot.lane.b32.xlu0 %v5503_v36, %s6939_s28  ;;  %s5605_s22 = smov 12 }
 0x2ba   :  { %v6913_v5 = vld [vmem:[%s12712_s0 + $0x589] ss:$16 sm:%s5564_s21]   ;;  %v5562_v10 = vsel %vm485_vm0, %v6912_v63, %v6911_v3  ;;  %s5610_s21 = smov 48  ;;  %v4678_v52 = vpop.permute.xlu0 %4677   ;;  %v4747_v0 = vpop.permute.xlu1 %4746  }
 0x2bb   :  { %v6914_v6 = vld [vmem:[%s12712_s0 + $0x589] ss:$16 sm:%s5569_s14]   ;;  %v5567_v16 = vsel %vm490_vm1, %v6913_v5, %v5562_v10  ;;  %s5615_s14 = smov 192  ;;  %6721 = vst.msk [vmem:[%s12713_s1 + $0xd0] sm:$0xff] %vm4174_vm10, %v4678_v52   ;;  %6736 = vst.msk [vmem:[%s12713_s1 + $0x38] sm:$0xff] %vm4174_vm10, %v4747_v0  }
 0x2bc   :  { %v6906_v1 = vld [vmem:[%s12712_s0 + $0x489] ss:$16 sm:%s5533_s30]   ;;  %v5572_v47 = vsel %vm495_vm2, %v6914_v6, %v5567_v16  ;;  %s5579_s30 = smov 3 }
 0x2bd   :  { %v6907_v41 = vld [vmem:[%s12712_s0 + $0x489] ss:$16 sm:%s5536_s4]   ;;  %5573 = vrot.lane.b32.xlu1 %v5572_v47, %s6939_s28  ;;  %s5582_s4 = smov 12 }
 0x2be   :  { %v5539_v21 = vsel %vm485_vm0, %v6907_v41, %v6906_v1  ;;  %v6908_v23 = vld [vmem:[%s12712_s0 + $0x489] ss:$16 sm:%s5541_s8]   ;;  %s5587_s8 = smov 48  ;;  %v4724_v44 = vpop.permute.xlu0 %4723  }
 0x2bf   :  { %v6909_v48 = vld [vmem:[%s12712_s0 + $0x489] ss:$16 sm:%s5546_s12]   ;;  %v5544_v62 = vsel %vm490_vm1, %v6908_v23, %v5539_v21  ;;  %s5592_s12 = smov 192  ;;  %6731 = vst.msk [vmem:[%s12713_s1 + $0x18] sm:$0xff] %vm4174_vm10, %v4724_v44  }
 0x2c0   :  { %v6921_v8 = vld [vmem:[%s12712_s0 + $0x789] ss:$16 sm:%s5602_s10]   ;;  %v5549_v34 = vsel %vm495_vm2, %v6909_v48, %v5544_v62 }
 0x2c1   :  { %v6922_v12 = vld [vmem:[%s12712_s0 + $0x789] ss:$16 sm:%s5605_s22]   ;;  %5550 = vrot.lane.b32.xlu0 %v5549_v34, %s6939_s28  ;;  %v4793_v55 = vpop.permute.xlu1 %4792  }
 0x2c2   :  { %v6923_v11 = vld [vmem:[%s12712_s0 + $0x789] ss:$16 sm:%s5610_s21]   ;;  %v5608_v17 = vsel %vm485_vm0, %v6922_v12, %v6921_v8  ;;  %6746 = vst.msk [vmem:[%s12713_s1 + $0x78] sm:$0xff] %vm4174_vm10, %v4793_v55  }
 0x2c3   :  { %v6924_v13 = vld [vmem:[%s12712_s0 + $0x789] ss:$16 sm:%s5615_s14]   ;;  %v5613_v18 = vsel %vm490_vm1, %v6923_v11, %v5608_v17 }
 0x2c4   :  { %v6916_v19 = vld [vmem:[%s12712_s0 + $0x689] ss:$16 sm:%s5579_s30]   ;;  %v5618_v26 = vsel %vm495_vm2, %v6924_v13, %v5613_v18 }
 0x2c5   :  { %v6917_v20 = vld [vmem:[%s12712_s0 + $0x689] ss:$16 sm:%s5582_s4]   ;;  %5619 = vrot.lane.b32.xlu1 %v5618_v26, %s6939_s28  ;;  %v4770_v32 = vpop.permute.xlu0 %4769  }
 0x2c6   :  { %v5585_v27 = vsel %vm485_vm0, %v6917_v20, %v6916_v19  ;;  %v6918_v35 = vld [vmem:[%s12712_s0 + $0x689] ss:$16 sm:%s5587_s8]   ;;  %6741 = vst.msk [vmem:[%s12713_s1 + $0x58] sm:$0xff] %vm4174_vm10, %v4770_v32  }
 0x2c7   :  { %v6919_v37 = vld [vmem:[%s12712_s0 + $0x689] ss:$16 sm:%s5592_s12]   ;;  %v5590_v43 = vsel %vm490_vm1, %v6918_v35, %v5585_v27 }
 0x2c8   :  { %v5595_v54 = vsel %vm495_vm2, %v6919_v37, %v5590_v43 }
 0x2c9   :  { %5596 = vrot.lane.b32.xlu0 %v5595_v54, %s6939_s28  ;;  %v4839_v39 = vpop.permute.xlu1 %4838  }
 0x2ca   :  { %6756 = vst.msk [vmem:[%s12713_s1 + $0xb8] sm:$0xff] %vm4174_vm10, %v4839_v39  }
 0x2cd   :  { %v4816_v29 = vpop.permute.xlu0 %4815  }
 0x2ce   :  { %6751 = vst.msk [vmem:[%s12713_s1 + $0x98] sm:$0xff] %vm4174_vm10, %v4816_v29  }
 0x2d1   :  { %v4885_v56 = vpop.permute.xlu1 %4884  }
 0x2d2   :  { %6766 = vst.msk [vmem:[%s12713_s1 + $0xf8] sm:$0xff] %vm4174_vm10, %v4885_v56  }
 0x2d5   :  { %v4862_v49 = vpop.permute.xlu0 %4861   ;;  %v4930_v57 = vpop.permute.xlu1 %4929  }
 0x2d6   :  { %6761 = vst.msk [vmem:[%s12713_s1 + $0xd8] sm:$0xff] %vm4174_vm10, %v4862_v49  }
 0x2d7   :  { %6775 = vst.msk [vmem:[%s12713_s1 + $0x20] sm:$0xff] %vm4909_vm11, %v4930_v57  }
 0x2d9   :  { %v4908_v30 = vpop.permute.xlu0 %4907  }
 0x2da   :  { %4910 = vst.msk [vmem:[%s12713_s1] sm:$0xff] %vm4909_vm11, %v4908_v30   ;;  %v4976_v51 = vpop.permute.xlu1 %4975  }
 0x2db   :  { %6785 = vst.msk [vmem:[%s12713_s1 + $0x60] sm:$0xff] %vm4909_vm11, %v4976_v51  }
 0x2dd   :  { %v4953_v53 = vpop.permute.xlu0 %4952  }
 0x2de   :  { %6780 = vst.msk [vmem:[%s12713_s1 + $0x40] sm:$0xff] %vm4909_vm11, %v4953_v53  }
 0x2df   :  { %v5022_v58 = vpop.permute.xlu1 %5021  }
 0x2e0   :  { %6795 = vst.msk [vmem:[%s12713_s1 + $0xa0] sm:$0xff] %vm4909_vm11, %v5022_v58  }
 0x2e2   :  { %v4999_v33 = vpop.permute.xlu0 %4998  }
 0x2e3   :  { %6790 = vst.msk [vmem:[%s12713_s1 + $0x80] sm:$0xff] %vm4909_vm11, %v4999_v33  }
 0x2e6   :  { %v5068_v59 = vpop.permute.xlu1 %5067  }
 0x2e7   :  { %6805 = vst.msk [vmem:[%s12713_s1 + $0xe0] sm:$0xff] %vm4909_vm11, %v5068_v59  }
 0x2ea   :  { %v5045_v2 = vpop.permute.xlu0 %5044   ;;  %v5114_v22 = vpop.permute.xlu1 %5113  }
 0x2eb   :  { %6800 = vst.msk [vmem:[%s12713_s1 + $0xc0] sm:$0xff] %vm4909_vm11, %v5045_v2   ;;  %6815 = vst.msk [vmem:[%s12713_s1 + $0x28] sm:$0xff] %vm4909_vm11, %v5114_v22  }
 0x2ee   :  { %v5091_v24 = vpop.permute.xlu0 %5090  }
 0x2ef   :  { %6810 = vst.msk [vmem:[%s12713_s1 + $0x8] sm:$0xff] %vm4909_vm11, %v5091_v24  }
 0x2f1   :  { %v5160_v28 = vpop.permute.xlu1 %5159  }
 0x2f2   :  { %6825 = vst.msk [vmem:[%s12713_s1 + $0x68] sm:$0xff] %vm4909_vm11, %v5160_v28  }
 0x2f5   :  { %v5137_v31 = vpop.permute.xlu0 %5136  }
 0x2f6   :  { %6820 = vst.msk [vmem:[%s12713_s1 + $0x48] sm:$0xff] %vm4909_vm11, %v5137_v31  }
 0x2f9   :  { %v5206_v4 = vpop.permute.xlu1 %5205  }
 0x2fa   :  { %6835 = vst.msk [vmem:[%s12713_s1 + $0xa8] sm:$0xff] %vm4909_vm11, %v5206_v4  }
 0x2fd   :  { %v5183_v14 = vpop.permute.xlu0 %5182  }
 0x2fe   :  { %6830 = vst.msk [vmem:[%s12713_s1 + $0x88] sm:$0xff] %vm4909_vm11, %v5183_v14  }
 0x301   :  { %v5252_v42 = vpop.permute.xlu1 %5251  }
 0x302   :  { %6845 = vst.msk [vmem:[%s12713_s1 + $0xe8] sm:$0xff] %vm4909_vm11, %v5252_v42  }
 0x305   :  { %v5229_v60 = vpop.permute.xlu0 %5228   ;;  %v5298_v3 = vpop.permute.xlu1 %5297  }
 0x306   :  { %6840 = vst.msk [vmem:[%s12713_s1 + $0xc8] sm:$0xff] %vm4909_vm11, %v5229_v60   ;;  %6855 = vst.msk [vmem:[%s12713_s1 + $0x30] sm:$0xff] %vm4909_vm11, %v5298_v3  }
 0x309   :  { %v5275_v36 = vpop.permute.xlu0 %5274  }
 0x30a   :  { %6850 = vst.msk [vmem:[%s12713_s1 + $0x10] sm:$0xff] %vm4909_vm11, %v5275_v36  }
 0x30c   :  { %v5344_v63 = vpop.permute.xlu1 %5343  }
 0x30d   :  { %6865 = vst.msk [vmem:[%s12713_s1 + $0x70] sm:$0xff] %vm4909_vm11, %v5344_v63  }
 0x310   :  { %v5321_v5 = vpop.permute.xlu0 %5320  }
 0x311   :  { %6860 = vst.msk [vmem:[%s12713_s1 + $0x50] sm:$0xff] %vm4909_vm11, %v5321_v5  }
 0x314   :  { %v5390_v38 = vpop.permute.xlu1 %5389  }
 0x315   :  { %6875 = vst.msk [vmem:[%s12713_s1 + $0xb0] sm:$0xff] %vm4909_vm11, %v5390_v38  }
 0x318   :  { %v5367_v10 = vpop.permute.xlu0 %5366  }
 0x319   :  { %6870 = vst.msk [vmem:[%s12713_s1 + $0x90] sm:$0xff] %vm4909_vm11, %v5367_v10  }
 0x31c   :  { %v5436_v6 = vpop.permute.xlu1 %5435  }
 0x31d   :  { %6885 = vst.msk [vmem:[%s12713_s1 + $0xf0] sm:$0xff] %vm4909_vm11, %v5436_v6  }
 0x320   :  { %v5413_v16 = vpop.permute.xlu0 %5412   ;;  %v5482_v1 = vpop.permute.xlu1 %5481  }
 0x321   :  { %6880 = vst.msk [vmem:[%s12713_s1 + $0xd0] sm:$0xff] %vm4909_vm11, %v5413_v16   ;;  %6895 = vst.msk [vmem:[%s12713_s1 + $0x38] sm:$0xff] %vm4909_vm11, %v5482_v1  }
 0x324   :  { %v5459_v41 = vpop.permute.xlu0 %5458  }
 0x325   :  { %6890 = vst.msk [vmem:[%s12713_s1 + $0x18] sm:$0xff] %vm4909_vm11, %v5459_v41  }
 0x327   :  { %v5528_v47 = vpop.permute.xlu1 %5527  }
 0x328   :  { %6905 = vst.msk [vmem:[%s12713_s1 + $0x78] sm:$0xff] %vm4909_vm11, %v5528_v47  }
 0x32b   :  { %v5505_v21 = vpop.permute.xlu0 %5504  }
 0x32c   :  { %6900 = vst.msk [vmem:[%s12713_s1 + $0x58] sm:$0xff] %vm4909_vm11, %v5505_v21  }
 0x32f   :  { %v5574_v23 = vpop.permute.xlu1 %5573  }
 0x330   :  { %6915 = vst.msk [vmem:[%s12713_s1 + $0xb8] sm:$0xff] %vm4909_vm11, %v5574_v23  }
 0x333   :  { %v5551_v48 = vpop.permute.xlu0 %5550  }
 0x334   :  { %6910 = vst.msk [vmem:[%s12713_s1 + $0x98] sm:$0xff] %vm4909_vm11, %v5551_v48  }
 0x337   :  { %v5620_v15 = vpop.permute.xlu1 %5619  }
 0x338   :  { %6925 = vst.msk [vmem:[%s12713_s1 + $0xf8] sm:$0xff] %vm4909_vm11, %v5620_v15  }
 0x33b   :  { %v5597_v62 = vpop.permute.xlu0 %5596  }
 0x33c   :  { %6920 = vst.msk [vmem:[%s12713_s1 + $0xd8] sm:$0xff] %vm4909_vm11, %v5597_v62  }

// kernel: _lambda_.1
= control target key start
LH: loop header
LB: loop body
LE: loop exit
PB: predicated region body
PF: predicated region fallthrough
CT: control target
= control target key end

     0   :  { %13 = vsyncpa [#allocation11], 0  ;;  %s3671_s27 = smov 0   ;;  %s3673_s28 = smov 0   ;;  %s4650_s0 = inlined_call_operand.vmem [shape: f32[16,512], index: 0, kind: input, shape index: {}]   ;;  %s4651_s1 = inlined_call_operand.vmem [shape: bf16[2,16,16], index: 1, kind: input, shape index: {}]   ;;  %s4652_s2 = inlined_call_operand.vmem [shape: bf16[2,256,256], index: 2, kind: input, shape index: {}]   ;;  %s4653_s3 = inlined_call_operand.vmem [shape: f32[2,16,256], index: 3, kind: input, shape index: {}]   ;;  %s4654_s4 = inlined_call_operand.vmem [shape: f32[8,16,256], index: 4, kind: input, shape index: {}]   ;;  %s4655_s5 = inlined_call_operand.vmem [shape: f32[4], index: 5, kind: input, shape index: {}]   ;;  %s4656_s6 = inlined_call_operand.vmem [shape: bf16[256,128], index: 6, kind: input, shape index: {}]   ;;  %s4657_s7 = inlined_call_operand.vmem [shape: f32[1,128], index: 7, kind: input, shape index: {}]   ;;  %s4658_s8 = inlined_call_operand.vmem [shape: f32[32,128], index: 8, kind: output, shape index: {}]  }
   0x1   :  { %s3675_s29 = smov 0   ;;  %s3677_s30 = smov 0  }
   0x2   :  { %s3679_s9 = smov 0   ;;  %s3681_s10 = smov 0  }
   0x3   :  { %s3683_s11 = smov 0  }
   0x4 LB: > { %s3045_s12 = sadd.s32 4294967295, %s3612_s11   ;;  %s28_s13 = sadd.s32 1, %s3604_s9  ;;  %s3612_s11 = sphi %s3683_s11, %s19_s11   ;;  %s3608_s10 = sphi %s3681_s10, %s4889_s10   ;;  %s3604_s9 = sphi %s3679_s9, %s4888_s9   ;;  %s3600_s30 = sphi %s3677_s30, %s4887_s30   ;;  %s3596_s29 = sphi %s3675_s29, %s4886_s29   ;;  %s3592_s28 = sphi %s3673_s28, %s4885_s28   ;;  %s3588_s27 = sphi %s3671_s27, %s4884_s27  }
   0x5   : > { %p29_p0 = scmp.ge.s32.totalorder %s28_s13, 4  ;;  %s31_s14 = sadd.s32 1, %s3608_s10 }
   0x6   : > { %s38_s15 = sadd.s32 1, %s3592_s28  ;;  %p45_p1 = scmp.ne.s32.totalorder %s3592_s28, %s3588_s27 }
   0x7   : > { %s4891_s13 = smov (%p29_p0, %s28_s13), 0  ;;  %s4893_s14 = smov (!%p29_p0, %s31_s14), %s3608_s10 }
   0x8   : > { %p46_p2 = scmp.eq.s32.totalorder %s3612_s11, 0  ;;  %p3047_p3 = scmp.ge.s32.totalorder %s3612_s11, 1 }
   0x9   : > { %p33_p4 = scmp.ge.s32.totalorder %s4893_s14, 2  ;;  %p219_p5 = scmp.lt.s32.totalorder %s3612_s11, 9 }
   0xa   : > { %p3718_p6 = por %p46_p2, %p45_p1  ;;  %p3728_p8 = scmp.eq.s32.totalorder %s3045_s12, 0 }
   0xb   : > { %s4895_s14 = smov (%p33_p4, %s4893_s14), 0  ;;  %p3724_p7 = pnand %p3047_p3, %p219_p5 }
   0xc   : > { %s4748_s16 = scalar_select %p3718_p6, 1, 0 }
   0xd   : > { %s35_s19 = ssub.s32 %s3608_s10, %s4895_s14  ;;  %s241_s22 = sshll.u32 %s4655_s5, 4  ;;  %s242_s22 = int_to_ptr.vmem [resolvable:$true] %s241_s22 }
   0xe   : > { %p36_p9 = scmp.eq.s32.totalorder %s35_s19, 0  ;;  %p3349_p10 = pneg %p3724_p7 }
   0xf   : > { %s3537_s24 = scalar_lea.vmem %s242_s22, 16  ;;  %p3545_p2 = scmp.lt.s32.totalorder %s242_s22, %s242_s22 }
  0x10   : > { %s3740_s23 = scalar_select %p36_p9, %s3592_s28, %s38_s15  }
  0x11   : > { %p3350_p11 = pnand %p3728_p8, %p3349_p10  ;;  %p3538_p12 = scmp.ne.s32.totalorder %s242_s22, %s3537_s24 }
  0x12   : > { %p3546_p3 = scmp.lt.s32.totalorder %s3537_s24, %s3537_s24 }
  0x13   : > { %p3539_p13 = pneg %p3350_p11 }
  0x14   : > { %p3547_p4 = por %p3546_p3, %p3545_p2 }
  0x15   : > { %p3540_p0 = pnand %p3539_p13, %p3538_p12 }
  0x17   : > { %p3541_p1 = pneg %p3540_p0 }
  0x19   : > { %p3548_p5 = pnand %p3547_p4, %p3541_p1 }
  0x1b   : > { %3551 = shalt.err (!%p3548_p5)
}
  0x1c   : > { %s3614_s25 = smov [#allocation10]   ;;  %p3049_p6 = scmp.ge.s32.totalorder %s3612_s11, 8 }
  0x1d   : > { %3352 = dma.vmem_to_smem (!%p3350_p11), %s242_s22, 16, %s3614_s25, [#allocation11]  }
  0x1e   : > { %251 = sbr.rel (%p3049_p6) target bundleno = 44 (0x2c), region = 36  ;;  %p4751_p9 = scmp.ne.s32.totalorder (!%p3049_p6), %s4748_s16, 0 }
  0x25   : > { %254 = sbr.rel (!%p4751_p9) target bundleno = 44 (0x2c), region = 40  ;;  %s256_s26 = sand.u32 (%p4751_p9), 1, %s3592_s28  }
  0x26   : > { %s3199_s12 = sshll.u32 (%p4751_p9), %s3608_s10, 4  ;;  %s3050_s15 = sshll.u32 (%p4751_p9), %s256_s26, 5 }
  0x27   : > { %s261_s21 = scalar_lea.vmem (%p4751_p9), %s4650_s0, %s3199_s12  ;;  %s258_s24 = scalar_lea.vmem (%p4751_p9), [#allocation9], %s3050_s15 }
  0x28   : > { %v274_v0 = vld [vmem:[%s261_s21] sm:$0xff] (%p4751_p9)  ;;  %v276_v1 = vld [vmem:[%s261_s21 + $0x8] sm:$0xff] (%p4751_p9) }
  0x29   : > { %v278_v2 = vld [vmem:[%s261_s21 + $0x20] sm:$0xff] (%p4751_p9)  ;;  %275 = vst [vmem:[%s258_s24] sm:$0xff] (%p4751_p9), %v274_v0  ;;  %277 = vst [vmem:[%s258_s24 + $0x8] sm:$0xff] (%p4751_p9), %v276_v1  ;;  %v280_v3 = vld [vmem:[%s261_s21 + $0x28] sm:$0xff] (%p4751_p9) }
  0x2a   : > { %279 = vst [vmem:[%s258_s24 + $0x10] sm:$0xff] (%p4751_p9), %v278_v2  ;;  %281 = vst [vmem:[%s258_s24 + $0x18] sm:$0xff] (%p4751_p9), %v280_v3 }
  0x2c PF: > { %300 = sbr.rel (%p3724_p7) target bundleno = 1708 (0x6ac), region = 67 }
  0x33   : > { %s303_s16 = sand.u32 1, %s3588_s27  }
  0x34   : > { %s3054_s22 = sshll.u32 %s303_s16, 5 }
  0x35   : > { %s305_s25 = scalar_lea.vmem [#allocation9], %s3054_s22 }
  0x36   : > { %3581 = dma.done.wait (%p3728_p8), [#allocation11], 16  }
  0x37   : > { %3583 = vsyncadd (%p3728_p8), [#allocation11], 4294967280 }
  0x38   : > { %313 = sfence }
  0x39   : > { %s3056_s26 = sshll.u32 %s3596_s29, 1  ;;  %s3059_s12 = sshll.u32 %s3600_s30, 1 }
  0x3a   : > { %p347_p6 = scmp.lt.s32.totalorder %s3056_s26, 7  ;;  %p354_p10 = scmp.lt.s32.totalorder %s3059_s12, 3 }
  0x3b   : > { %p3061_p7 = scmp.ne.s32.totalorder %s3596_s29, 0 }
  0x3c   : > { %s4897_s26 = smov (!%p347_p6, %s3056_s26), 7  ;;  %s4899_s12 = smov (!%p354_p10, %s3059_s12), 3 }
  0x3d   : > { %s3200_s17 = sshll.u32 %s4897_s26, 5  ;;  %s3060_s20 = sshll.u32 %s4899_s12, 3  ;;  %v3772_v4 = vld [vmem:[%s305_s25] sm:$0xff] (!%p3061_p7)  ;;  %v3774_v5 = vld [vmem:[%s305_s25 + $0x8] sm:$0xff] (!%p3061_p7)  ;;  %v3776_v6 = vld [vmem:[%s305_s25 + $0x10] sm:$0xff] (!%p3061_p7)  ;;  %v3615_v8 = vmov (!%p3061_p7), 0.0  }
  0x3e   : > { %s3764_s27 = scalar_lea.vmem %s4654_s4, %s3200_s17  ;;  %s3769_s18 = scalar_lea.vmem %s4658_s8, %s3060_s20  ;;  %3423 = vrsqrt.f32 (!%p3061_p7), %v3772_v4  ;;  %v3779_v7 = vld [vmem:[%s305_s25 + $0x18] sm:$0xff] (!%p3061_p7)  ;;  %400 = vst [vmem:[#allocation3] sm:$0xff] (!%p3061_p7), %v3615_v8  ;;  %401 = vst [vmem:[#allocation3 + $0x8] sm:$0xff] (!%p3061_p7), %v3615_v8  ;;  %v444_v9 = vld [vmem:[%s4656_s6] sm:$0xff] (!%p3061_p7)  ;;  %vm370_vm0 = vcmp.eq.f32.partialorder (!%p3061_p7), %v3772_v4, inf  ;;  %vm372_vm1 = vcmp.eq.f32.partialorder (!%p3061_p7), %v3772_v4, 0.0 }
  0x3f   : > { %363 = sbr.rel (%p3061_p7) target bundleno = 82 (0x52), region = 79  ;;  %402 = vst [vmem:[#allocation3 + $0x10] sm:$0xff] (!%p3061_p7), %v3615_v8  ;;  %403 = vst [vmem:[#allocation3 + $0x18] sm:$0xff] (!%p3061_p7), %v3615_v8  ;;  %v446_v10 = vld [vmem:[%s4656_s6 + $0x8] sm:$0xff] (!%p3061_p7)  ;;  %3425 = vrsqrt.f32 (!%p3061_p7), %v3774_v5  ;;  %v448_v11 = vld [vmem:[%s4656_s6 + $0x10] sm:$0xff] (!%p3061_p7)  ;;  %v373_v26 = vand.u32 (!%p3061_p7), 2147483648, %v3772_v4 }
  0x40   : > { %404 = vst [vmem:[#allocation4] sm:$0xff] (!%p3061_p7), %v3615_v8  ;;  %405 = vst [vmem:[#allocation4 + $0x8] sm:$0xff] (!%p3061_p7), %v3615_v8  ;;  %v450_v12 = vld [vmem:[%s4656_s6 + $0x18] sm:$0xff] (!%p3061_p7)  ;;  %v452_v13 = vld [vmem:[%s4656_s6 + $0x20] sm:$0xff] (!%p3061_p7)  ;;  %3427 = vrsqrt.f32 (!%p3061_p7), %v3776_v6  ;;  %vm377_vm2 = vcmp.eq.f32.partialorder (!%p3061_p7), %v3774_v5, inf  ;;  %vm379_vm3 = vcmp.eq.f32.partialorder (!%p3061_p7), %v3774_v5, 0.0 }
  0x41   : > { %406 = vst [vmem:[#allocation4 + $0x10] sm:$0xff] (!%p3061_p7), %v3615_v8  ;;  %407 = vst [vmem:[#allocation4 + $0x18] sm:$0xff] (!%p3061_p7), %v3615_v8  ;;  %v454_v14 = vld [vmem:[%s4656_s6 + $0x28] sm:$0xff] (!%p3061_p7)  ;;  %v456_v15 = vld [vmem:[%s4656_s6 + $0x30] sm:$0xff] (!%p3061_p7)  ;;  %3429 = vrsqrt.f32 (!%p3061_p7), %v3779_v7  ;;  %v380_v29 = vand.u32 (!%p3061_p7), 2147483648, %v3774_v5  ;;  %vm384_vm4 = vcmp.eq.f32.partialorder (!%p3061_p7), %v3776_v6, inf }
  0x42   : > { %408 = vst [vmem:[#allocation5] sm:$0xff] (!%p3061_p7), %v3615_v8  ;;  %409 = vst [vmem:[#allocation5 + $0x8] sm:$0xff] (!%p3061_p7), %v3615_v8  ;;  %v458_v16 = vld [vmem:[%s4656_s6 + $0x38] sm:$0xff] (!%p3061_p7)  ;;  %v460_v17 = vld [vmem:[%s4656_s6 + $0x40] sm:$0xff] (!%p3061_p7)  ;;  %vm386_vm5 = vcmp.eq.f32.partialorder (!%p3061_p7), %v3776_v6, 0.0  ;;  %v387_v32 = vand.u32 (!%p3061_p7), 2147483648, %v3776_v6 }
  0x43   : > { %410 = vst [vmem:[#allocation5 + $0x10] sm:$0xff] (!%p3061_p7), %v3615_v8  ;;  %411 = vst [vmem:[#allocation5 + $0x18] sm:$0xff] (!%p3061_p7), %v3615_v8  ;;  %v462_v18 = vld [vmem:[%s4656_s6 + $0x48] sm:$0xff] (!%p3061_p7)  ;;  %v464_v19 = vld [vmem:[%s4656_s6 + $0x50] sm:$0xff] (!%p3061_p7)  ;;  %vm391_vm6 = vcmp.eq.f32.partialorder (!%p3061_p7), %v3779_v7, inf  ;;  %v394_v36 = vand.u32 (!%p3061_p7), 2147483648, %v3779_v7 }
  0x44   : > { %445 = vst [vmem:[#allocation7] sm:$0xff] (!%p3061_p7), %v444_v9  ;;  %447 = vst [vmem:[#allocation7 + $0x8] sm:$0xff] (!%p3061_p7), %v446_v10  ;;  %v466_v20 = vld [vmem:[%s4656_s6 + $0x58] sm:$0xff] (!%p3061_p7)  ;;  %v468_v21 = vld [vmem:[%s4656_s6 + $0x60] sm:$0xff] (!%p3061_p7)  ;;  %vm393_vm7 = vcmp.eq.f32.partialorder (!%p3061_p7), %v3779_v7, 0.0 }
  0x45   : > { %449 = vst [vmem:[#allocation7 + $0x10] sm:$0xff] (!%p3061_p7), %v448_v11  ;;  %451 = vst [vmem:[#allocation7 + $0x18] sm:$0xff] (!%p3061_p7), %v450_v12  ;;  %v470_v22 = vld [vmem:[%s4656_s6 + $0x68] sm:$0xff] (!%p3061_p7)  ;;  %v472_v23 = vld [vmem:[%s4656_s6 + $0x70] sm:$0xff] (!%p3061_p7) }
  0x46   : > { %453 = vst [vmem:[#allocation7 + $0x20] sm:$0xff] %v452_v13  ;;  %455 = vst [vmem:[#allocation7 + $0x28] sm:$0xff] %v454_v14  ;;  %v474_v24 = vld [vmem:[%s4656_s6 + $0x78] sm:$0xff] }
  0x47   : > { %457 = vst [vmem:[#allocation7 + $0x30] sm:$0xff] %v456_v15  ;;  %459 = vst [vmem:[#allocation7 + $0x38] sm:$0xff] %v458_v16 }
  0x48   : > { %461 = vst [vmem:[#allocation7 + $0x40] sm:$0xff] %v460_v17  ;;  %463 = vst [vmem:[#allocation7 + $0x48] sm:$0xff] %v462_v18  ;;  %v3424_v25 = vpop.eup %3423 }
  0x49   : > { %465 = vst [vmem:[#allocation7 + $0x50] sm:$0xff] %v464_v19  ;;  %467 = vst [vmem:[#allocation7 + $0x58] sm:$0xff] %v466_v20  ;;  %v3426_v27 = vpop.eup %3425  ;;  %v369_v28 = vmul.f32 %v3424_v25, %v3772_v4 }
  0x4a   : > { %469 = vst [vmem:[#allocation7 + $0x60] sm:$0xff] %v468_v21  ;;  %471 = vst [vmem:[#allocation7 + $0x68] sm:$0xff] %v470_v22  ;;  %v3428_v30 = vpop.eup %3427  ;;  %v376_v31 = vmul.f32 %v3426_v27, %v3774_v5 }
  0x4b   : > { %473 = vst [vmem:[#allocation7 + $0x70] sm:$0xff] %v472_v23  ;;  %475 = vst [vmem:[#allocation7 + $0x78] sm:$0xff] %v474_v24  ;;  %v3430_v33 = vpop.eup %3429  ;;  %v371_v34 = vsel %vm370_vm0, %v3772_v4, %v369_v28  ;;  %v383_v35 = vmul.f32 %v3428_v30, %v3776_v6 }
  0x4c   : > { %v374_v37 = vsel %vm372_vm1, %v373_v26, %v371_v34  ;;  %v378_v38 = vsel %vm377_vm2, %v3774_v5, %v376_v31  ;;  %v390_v39 = vmul.f32 %v3430_v33, %v3779_v7 }
  0x4d   : > { %396 = vst [vmem:[#allocation2] sm:$0xff] %v374_v37  ;;  %v381_v40 = vsel %vm379_vm3, %v380_v29, %v378_v38  ;;  %v385_v41 = vsel %vm384_vm4, %v3776_v6, %v383_v35 }
  0x4e   : > { %397 = vst [vmem:[#allocation2 + $0x8] sm:$0xff] %v381_v40  ;;  %v388_v42 = vsel %vm386_vm5, %v387_v32, %v385_v41  ;;  %v392_v43 = vsel %vm391_vm6, %v3779_v7, %v390_v39 }
  0x4f   : > { %398 = vst [vmem:[#allocation2 + $0x10] sm:$0xff] %v388_v42  ;;  %v395_v44 = vsel %vm393_vm7, %v394_v36, %v392_v43 }
  0x50   : > { %399 = vst [vmem:[#allocation2 + $0x18] sm:$0xff] %v395_v44 }
  0x51   : > { %483 = vsyncadd [#allocation8], 2048 }
  0x52 PF: > { %v4659_v50 = vmov 0   ;;  %v3861_v52 = vld [vmem:[%s4651_s1] sm:$0xff]   ;;  %v559_v53 = vld [vmem:[#allocation3 + $0x8] sm:$0xff]  ;;  %v561_v54 = vld [vmem:[#allocation3 + $0x18] sm:$0xff]  ;;  %vm571_vm8 = vcmask 130048   ;;  %s1693_s30 = sld [smem:[#allocation10 + %s3596_s29]] }
  0x53   : > { %607 = vmatprep.mubr.bf16.mxu1 %v4659_v50  ;;  %748 = vmatprep.mubr.bf16.mxu0 %v4659_v50  ;;  %4752 = vst [vmem:[#allocation15_spill] sm:$0xff] %v3861_v52  ;;  %v565_v55 = vpack.c.bf16 %v561_v54, %v559_v53  ;;  %v558_v56 = vld [vmem:[#allocation3] sm:$0xff]  ;;  %v560_v57 = vld [vmem:[#allocation3 + $0x10] sm:$0xff]  ;;  %v3881_v61 = vld [vmem:[%s4651_s1 + $0x8] sm:$0xff]   ;;  %p3178_p8 = scmp.ne.s32.totalorder %s3596_s29, 3 }
  0x54   : > { %v554_v47 = vld [vmem:[#allocation2] sm:$0xff]  ;;  %v564_v58 = vpack.c.bf16 %v560_v57, %v558_v56  ;;  %4753 = vst [vmem:[#allocation16_spill] sm:$0xff] %v3881_v61  ;;  %v3888_v62 = vld [vmem:[%s4652_s2 + $0x114] ss:$8 sps:$4 sm:$0xff]   ;;  %v3898_v0 = vld [vmem:[%s4652_s2 + $0x110] ss:$8 sps:$4 sm:$0xff]  }
  0x55   : > { %v555_v45 = vld [vmem:[#allocation2 + $0x8] sm:$0xff]  ;;  %716 = vmatprep.subr.bf16.mxu0 %v565_v55  ;;  %v3920_v3 = vld [vmem:[%s4652_s2 + $0x134] ss:$8 sps:$4 sm:$0xff]   ;;  %v3936_v6 = vld [vmem:[%s4652_s2 + $0x130] ss:$8 sps:$4 sm:$0xff]  }
  0x56   : > { %v556_v49 = vld [vmem:[#allocation2 + $0x10] sm:$0xff]  ;;  %717 = vmatpush1.bf16.msra.mxu0 %v564_v58  ;;  %v3871_v59 = vld [vmem:[%s4652_s2 + $0x104] ss:$8 sps:$4 sm:$0xff]   ;;  %v3876_v60 = vld [vmem:[%s4652_s2 + $0x100] ss:$8 sps:$4 sm:$0xff]  }
  0x57   : > { %v557_v46 = vld [vmem:[#allocation2 + $0x18] sm:$0xff]  ;;  %v562_v51 = vpack.c.bf16 %v556_v49, %v554_v47  ;;  %1126 = vmatprep.subr.bf16.mxu0 %v3871_v59  ;;  %v3893_v63 = vld [vmem:[%s4652_s2 + $0x4] ss:$8 sps:$4 sm:$0xff]   ;;  %v3914_v2 = vld [vmem:[%s4652_s2 + $0x120] ss:$8 sps:$4 sm:$0xff]  }
  0x58   : > { %v563_v48 = vpack.c.bf16 %v557_v46, %v555_v45  ;;  %4754 = vst [vmem:[#allocation17_spill] sm:$0xff] %v3893_v63  ;;  %v3904_v1 = vld [vmem:[%s4652_s2 + $0x124] ss:$8 sps:$4 sm:$0xff]   ;;  %v3925_v4 = vld [vmem:[%s4652_s2] ss:$8 sps:$4 sm:$0xff]  }
  0x59   : > { %3101 = vmatmul.mubr.msk.bf16.vlgmr.msra.gmra.mrb[0].mxu0 %vm571_vm8, %v3861_v52  ;;  %v3930_v5 = vld [vmem:[%s4652_s2 + $0x14] ss:$8 sps:$4 sm:$0xff]   ;;  %v3942_v7 = vld [vmem:[%s4652_s2 + $0x144] ss:$8 sps:$4 sm:$0xff]   ;;  %v3950_v8 = vld [vmem:[%s4652_s2 + $0x10] ss:$8 sps:$4 sm:$0xff]  }
  0x5a   : > { %575 = vmatprep.subr.bf16.mxu1 %v563_v48  ;;  %1127 = vmatpush1.bf16.msra.mxu0 %v3876_v60  ;;  %v3956_v9 = vld [vmem:[%s4652_s2 + $0x24] ss:$8 sps:$4 sm:$0xff]   ;;  %v3962_v10 = vld [vmem:[%s4652_s2 + $0x140] ss:$8 sps:$4 sm:$0xff]   ;;  %v3968_v11 = vld [vmem:[%s4652_s2 + $0x154] ss:$8 sps:$4 sm:$0xff]  }
  0x5b   : > { %576 = vmatpush1.bf16.msra.mxu1 %v562_v51  ;;  %1128 = vmatprep.subr.bf16.mxu0 %v3888_v62  ;;  %4755 = vst [vmem:[#allocation18_spill] sm:$0xff] %v3968_v11  ;;  %v3974_v12 = vld [vmem:[%s4652_s2 + $0x20] ss:$8 sps:$4 sm:$0xff]   ;;  %v3980_v13 = vld [vmem:[%s4652_s2 + $0x34] ss:$8 sps:$4 sm:$0xff]  }
  0x5c   : > { %626 = vmatprep.subr.bf16.mxu1 %v565_v55  ;;  %v3986_v14 = vld [vmem:[%s4652_s2 + $0x150] ss:$8 sps:$4 sm:$0xff]   ;;  %v3992_v15 = vld [vmem:[%s4652_s2 + $0x164] ss:$8 sps:$4 sm:$0xff]   ;;  %v4010_v18 = vld [vmem:[%s4652_s2 + $0x160] ss:$8 sps:$4 sm:$0xff]  }
  0x5d   : > { %4756 = vst [vmem:[#allocation19_spill] sm:$0xff] %v3986_v14  ;;  %4757 = vst [vmem:[#allocation20_spill] sm:$0xff] %v3992_v15  ;;  %v3998_v16 = vld [vmem:[%s4652_s2 + $0x30] ss:$8 sps:$4 sm:$0xff]   ;;  %v4003_v17 = vld [vmem:[%s4652_s2 + $0x44] ss:$8 sps:$4 sm:$0xff]  }
  0x5e   : > { %3097 = vmatmul.mubr.msk.bf16.vlgmr.msra.gmra.mrb[0].mxu1 %vm571_vm8, %v3861_v52  ;;  %1129 = vmatpush1.bf16.msra.mxu0 %v3898_v0  ;;  %4758 = vst [vmem:[#allocation21_spill] sm:$0xff] %v4010_v18  ;;  %v4015_v19 = vld [vmem:[%s4652_s2 + $0x174] ss:$8 sps:$4 sm:$0xff]   ;;  %v4020_v20 = vld [vmem:[%s4652_s2 + $0x40] ss:$8 sps:$4 sm:$0xff]  }
  0x5f   : > { %627 = vmatpush1.bf16.msra.mxu1 %v564_v58  ;;  %658 = vmatprep.mubr.bf16.mxu1 %v4659_v50  ;;  %4759 = vst [vmem:[#allocation22_spill] sm:$0xff] %v4015_v19  ;;  %v4026_v21 = vld [vmem:[%s4652_s2 + $0x54] ss:$8 sps:$4 sm:$0xff]   ;;  %v4031_v22 = vld [vmem:[%s4652_s2 + $0x170] ss:$8 sps:$4 sm:$0xff]  }
  0x60   : > { %669 = vmatprep.subr.bf16.mxu1 %v563_v48  ;;  %1130 = vmatprep.subr.bf16.mxu0 %v3904_v1  ;;  %4760 = vst [vmem:[#allocation23_spill] sm:$0xff] %v4026_v21  ;;  %4761 = vst [vmem:[#allocation24_spill] sm:$0xff] %v4031_v22  ;;  %v4037_v23 = vld [vmem:[%s4652_s2 + $0x184] ss:$8 sps:$4 sm:$0xff]   ;;  %v4046_v24 = vld [vmem:[%s4652_s2 + $0x50] ss:$8 sps:$4 sm:$0xff]  }
  0x61   : > { %4762 = vst [vmem:[#allocation25_spill] sm:$0xff] %v4037_v23  ;;  %4763 = vst [vmem:[#allocation26_spill] sm:$0xff] %v4046_v24  ;;  %v4052_v25 = vld [vmem:[%s4652_s2 + $0x64] ss:$8 sps:$4 sm:$0xff]   ;;  %v4058_v26 = vld [vmem:[%s4652_s2 + $0x180] ss:$8 sps:$4 sm:$0xff]  }
  0x62   : > { %1131 = vmatpush1.bf16.msra.mxu0 %v3914_v2  ;;  %4764 = vst [vmem:[#allocation27_spill] sm:$0xff] %v4052_v25  ;;  %4765 = vst [vmem:[#allocation28_spill] sm:$0xff] %v4058_v26  ;;  %v4064_v27 = vld [vmem:[%s4652_s2 + $0x194] ss:$8 sps:$4 sm:$0xff]   ;;  %v4070_v28 = vld [vmem:[%s4652_s2 + $0x60] ss:$8 sps:$4 sm:$0xff]  }
  0x63   : > { %1132 = vmatprep.subr.bf16.mxu0 %v3920_v3  ;;  %4766 = vst [vmem:[#allocation29_spill] sm:$0xff] %v4064_v27  ;;  %4767 = vst [vmem:[#allocation30_spill] sm:$0xff] %v4070_v28  ;;  %v4076_v29 = vld [vmem:[%s4652_s2 + $0x74] ss:$8 sps:$4 sm:$0xff]   ;;  %v4082_v30 = vld [vmem:[%s4652_s2 + $0x190] ss:$8 sps:$4 sm:$0xff]  }
  0x64   : > { %4768 = vst [vmem:[#allocation31_spill] sm:$0xff] %v4076_v29  ;;  %4769 = vst [vmem:[#allocation32_spill] sm:$0xff] %v4082_v30  ;;  %v4089_v31 = vld [vmem:[%s4652_s2 + $0x70] ss:$8 sps:$4 sm:$0xff]   ;;  %v4095_v32 = vld [vmem:[%s4652_s2 + $0x84] ss:$8 sps:$4 sm:$0xff]  }
  0x65   : > { %4770 = vst [vmem:[#allocation33_spill] sm:$0xff] %v4089_v31  ;;  %4771 = vst [vmem:[#allocation34_spill] sm:$0xff] %v4095_v32  ;;  %v4102_v33 = vld [vmem:[%s4652_s2 + $0x80] ss:$8 sps:$4 sm:$0xff]   ;;  %v4108_v34 = vld [vmem:[%s4652_s2 + $0x94] ss:$8 sps:$4 sm:$0xff]  }
  0x66   : > { %3099 = vmatmul.mubr.msk.bf16.vlgmr.msra.gmra.mrb[4].mxu1 %vm571_vm8, %v3881_v61  ;;  %1133 = vmatpush1.bf16.msra.mxu0 %v3936_v6  ;;  %4772 = vst [vmem:[#allocation35_spill] sm:$0xff] %v4102_v33  ;;  %4773 = vst [vmem:[#allocation36_spill] sm:$0xff] %v4108_v34  ;;  %v4114_v35 = vld [vmem:[%s4652_s2 + $0x90] ss:$8 sps:$4 sm:$0xff]   ;;  %v4120_v36 = vld [vmem:[%s4652_s2 + $0xa4] ss:$8 sps:$4 sm:$0xff]  }
  0x67   : > { %670 = vmatpush1.bf16.msra.mxu1 %v562_v51  ;;  %701 = vmatprep.mubr.bf16.mxu1 %v4659_v50  ;;  %4774 = vst [vmem:[#allocation37_spill] sm:$0xff] %v4114_v35  ;;  %4775 = vst [vmem:[#allocation38_spill] sm:$0xff] %v4120_v36  ;;  %v4126_v37 = vld [vmem:[%s4652_s2 + $0xa0] ss:$8 sps:$4 sm:$0xff]   ;;  %v4132_v38 = vld [vmem:[%s4652_s2 + $0xb4] ss:$8 sps:$4 sm:$0xff]  }
  0x68   : > { %923 = vmatprep.subr.bf16.mxu1 %v3893_v63  ;;  %1134 = vmatprep.subr.bf16.mxu0 %v3942_v7  ;;  %4776 = vst [vmem:[#allocation39_spill] sm:$0xff] %v4126_v37  ;;  %4777 = vst [vmem:[#allocation40_spill] sm:$0xff] %v4132_v38  ;;  %v4138_v39 = vld [vmem:[%s4652_s2 + $0xb0] ss:$8 sps:$4 sm:$0xff]   ;;  %v4145_v40 = vld [vmem:[%s4652_s2 + $0xc4] ss:$8 sps:$4 sm:$0xff]  }
  0x69   : > { %4778 = vst [vmem:[#allocation41_spill] sm:$0xff] %v4138_v39  ;;  %4779 = vst [vmem:[#allocation42_spill] sm:$0xff] %v4145_v40  ;;  %v4150_v41 = vld [vmem:[%s4652_s2 + $0xc0] ss:$8 sps:$4 sm:$0xff]   ;;  %v4155_v42 = vld [vmem:[%s4652_s2 + $0x1a4] ss:$8 sps:$4 sm:$0xff]  }
  0x6a   : > { %1135 = vmatpush1.bf16.msra.mxu0 %v3962_v10  ;;  %4780 = vst [vmem:[#allocation43_spill] sm:$0xff] %v4150_v41  ;;  %4781 = vst [vmem:[#allocation44_spill] sm:$0xff] %v4155_v42  ;;  %v4161_v43 = vld [vmem:[%s4652_s2 + $0x1a0] ss:$8 sps:$4 sm:$0xff]   ;;  %v4169_v44 = vld [vmem:[%s4652_s2 + $0xd4] ss:$8 sps:$4 sm:$0xff]  }
  0x6b   : > { %1136 = vmatprep.subr.bf16.mxu0 %v3968_v11  ;;  %4782 = vst [vmem:[#allocation45_spill] sm:$0xff] %v4161_v43  ;;  %4783 = vst [vmem:[#allocation46_spill] sm:$0xff] %v4169_v44  ;;  %v4174_v45 = vld [vmem:[%s4652_s2 + $0xd0] ss:$8 sps:$4 sm:$0xff]   ;;  %v4179_v46 = vld [vmem:[%s4652_s2 + $0x1b4] ss:$8 sps:$4 sm:$0xff]  }
  0x6c   : > { %4784 = vst [vmem:[#allocation47_spill] sm:$0xff] %v4174_v45  ;;  %4785 = vst [vmem:[#allocation48_spill] sm:$0xff] %v4179_v46  ;;  %v4184_v47 = vld [vmem:[%s4652_s2 + $0x1b0] ss:$8 sps:$4 sm:$0xff]   ;;  %v4193_v48 = vld [vmem:[%s4652_s2 + $0xe4] ss:$8 sps:$4 sm:$0xff]  }
  0x6d   : > { %4786 = vst [vmem:[#allocation49_spill] sm:$0xff] %v4184_v47  ;;  %4787 = vst [vmem:[#allocation50_spill] sm:$0xff] %v4193_v48  ;;  %v4198_v49 = vld [vmem:[%s4652_s2 + $0xe0] ss:$8 sps:$4 sm:$0xff]   ;;  %v4203_v51 = vld [vmem:[%s4652_s2 + $0x1c4] ss:$8 sps:$4 sm:$0xff]  }
  0x6e   : > { %3100 = vmatmul.mubr.msk.bf16.vlgmr.msra.gmra.mrb[8].mxu1 %vm571_vm8, %v3881_v61  ;;  %1137 = vmatpush1.bf16.msra.mxu0 %v3986_v14  ;;  %4788 = vst [vmem:[#allocation51_spill] sm:$0xff] %v4198_v49  ;;  %4789 = vst [vmem:[#allocation52_spill] sm:$0xff] %v4203_v51  ;;  %v4209_v53 = vld [vmem:[%s4652_s2 + $0x1c0] ss:$8 sps:$4 sm:$0xff]   ;;  %v4217_v54 = vld [vmem:[%s4652_s2 + $0xf4] ss:$8 sps:$4 sm:$0xff]  }
  0x6f   : > { %924 = vmatpush1.bf16.msra.mxu1 %v3925_v4  ;;  %1138 = vmatprep.subr.bf16.mxu0 %v3992_v15  ;;  %4790 = vst [vmem:[#allocation53_spill] sm:$0xff] %v4209_v53  ;;  %4791 = vst [vmem:[#allocation54_spill] sm:$0xff] %v4217_v54  ;;  %v4222_v55 = vld [vmem:[%s4652_s2 + $0xf0] ss:$8 sps:$4 sm:$0xff]   ;;  %v4227_v56 = vld [vmem:[%s4652_s2 + $0x1d4] ss:$8 sps:$4 sm:$0xff]  }
  0x70   : > { %925 = vmatprep.subr.bf16.mxu1 %v3930_v5  ;;  %4792 = vst [vmem:[#allocation55_spill] sm:$0xff] %v4222_v55  ;;  %4793 = vst [vmem:[#allocation56_spill] sm:$0xff] %v4227_v56  ;;  %v4233_v57 = vld [vmem:[%s4652_s2 + $0x1d0] ss:$8 sps:$4 sm:$0xff]   ;;  %v4242_v58 = vld [vmem:[%s4652_s2 + $0x1e4] ss:$8 sps:$4 sm:$0xff]  }
  0x71   : > { %4794 = vst [vmem:[#allocation57_spill] sm:$0xff] %v4233_v57  ;;  %4795 = vst [vmem:[#allocation58_spill] sm:$0xff] %v4242_v58  ;;  %v4248_v50 = vld [vmem:[%s4652_s2 + $0x1e0] ss:$8 sps:$4 sm:$0xff]   ;;  %v4254_v61 = vld [vmem:[%s4652_s2 + $0x1f4] ss:$8 sps:$4 sm:$0xff]  }
  0x72   : > { %1139 = vmatpush1.bf16.msra.mxu0 %v4010_v18  ;;  %4796 = vst [vmem:[#allocation59_spill] sm:$0xff] %v4248_v50  ;;  %4797 = vst [vmem:[#allocation60_spill] sm:$0xff] %v4254_v61  ;;  %v4259_v52 = vld [vmem:[%s4652_s2 + $0x1f0] ss:$8 sps:$4 sm:$0xff]  }
  0x73   : > { %926 = vmatpush1.bf16.msra.mxu1 %v3950_v8  ;;  %1140 = vmatprep.subr.bf16.mxu0 %v4015_v19  ;;  %4798 = vst [vmem:[#allocation61_spill] sm:$0xff] %v4259_v52 }
  0x74   : > { %927 = vmatprep.subr.bf16.mxu1 %v3956_v9 }
  0x76   : > { %1141 = vmatpush1.bf16.msra.mxu0 %v4031_v22 }
  0x77   : > { %928 = vmatpush1.bf16.msra.mxu1 %v3974_v12  ;;  %1142 = vmatprep.subr.bf16.mxu0 %v4037_v23 }
  0x78   : > { %929 = vmatprep.subr.bf16.mxu1 %v3980_v13 }
  0x7a   : > { %1143 = vmatpush1.bf16.msra.mxu0 %v4058_v26 }
  0x7b   : > { %930 = vmatpush1.bf16.msra.mxu1 %v3998_v16  ;;  %1144 = vmatprep.subr.bf16.mxu0 %v4064_v27 }
  0x7c   : > { %931 = vmatprep.subr.bf16.mxu1 %v4003_v17 }
  0x7e   : > { %1145 = vmatpush1.bf16.msra.mxu0 %v4082_v30 }
  0x7f   : > { %932 = vmatpush1.bf16.msra.mxu1 %v4020_v20  ;;  %1146 = vmatprep.subr.bf16.mxu0 %v4155_v42 }
  0x80   : > { %933 = vmatprep.subr.bf16.mxu1 %v4026_v21 }
  0x82   : > { %1147 = vmatpush1.bf16.msra.mxu0 %v4161_v43 }
  0x83   : > { %934 = vmatpush1.bf16.msra.mxu1 %v4046_v24  ;;  %1148 = vmatprep.subr.bf16.mxu0 %v4179_v46 }
  0x84   : > { %935 = vmatprep.subr.bf16.mxu1 %v4052_v25 }
  0x86   : > { %1149 = vmatpush1.bf16.msra.mxu0 %v4184_v47 }
  0x87   : > { %936 = vmatpush1.bf16.msra.mxu1 %v4070_v28  ;;  %1150 = vmatprep.subr.bf16.mxu0 %v4203_v51 }
  0x88   : > { %937 = vmatprep.subr.bf16.mxu1 %v4076_v29 }
  0x8a   : > { %1151 = vmatpush1.bf16.msra.mxu0 %v4209_v53 }
  0x8b   : > { %938 = vmatpush1.bf16.msra.mxu1 %v4089_v31  ;;  %1152 = vmatprep.subr.bf16.mxu0 %v4227_v56 }
  0x8c   : > { %939 = vmatprep.subr.bf16.mxu1 %v4095_v32 }
  0x8e   : > { %1153 = vmatpush1.bf16.msra.mxu0 %v4233_v57 }
  0x8f   : > { %940 = vmatpush1.bf16.msra.mxu1 %v4102_v33  ;;  %1154 = vmatprep.subr.bf16.mxu0 %v4242_v58 }
  0x90   : > { %941 = vmatprep.subr.bf16.mxu1 %v4108_v34 }
  0x92   : > { %1155 = vmatpush1.bf16.msra.mxu0 %v4248_v50 }
  0x93   : > { %942 = vmatpush1.bf16.msra.mxu1 %v4114_v35  ;;  %1156 = vmatprep.subr.bf16.mxu0 %v4254_v61 }
  0x94   : > { %943 = vmatprep.subr.bf16.mxu1 %v4120_v36 }
  0x96   : > { %1157 = vmatpush1.bf16.msra.mxu0 %v4259_v52 }
  0x97   : > { %944 = vmatpush1.bf16.msra.mxu1 %v4126_v37 }
  0x98   : > { %945 = vmatprep.subr.bf16.mxu1 %v4132_v38 }
  0x9b   : > { %946 = vmatpush1.bf16.msra.mxu1 %v4138_v39 }
  0x9c   : > { %947 = vmatprep.subr.bf16.mxu1 %v4145_v40 }
  0x9f   : > { %948 = vmatpush1.bf16.msra.mxu1 %v4150_v41 }
  0xa0   : > { %949 = vmatprep.subr.bf16.mxu1 %v4169_v44 }
  0xa3   : > { %950 = vmatpush1.bf16.msra.mxu1 %v4174_v45 }
  0xa4   : > { %951 = vmatprep.subr.bf16.mxu1 %v4193_v48 }
  0xa7   : > { %952 = vmatpush1.bf16.msra.mxu1 %v4198_v49 }
  0xa8   : > { %953 = vmatprep.subr.bf16.mxu1 %v4217_v54 }
  0xab   : > { %954 = vmatpush1.bf16.msra.mxu1 %v4222_v55 }
  0xac   : > { %1169 = vmatprep.subr.bf16.mxu1 %v3893_v63 }
 0x12c   : > { %v750_v56 = vpop.f32.mrb[0].mxu0 }
 0x12d   : > { %v752_v50 = vpop.f32.mrb[1].mxu0 }
 0x12e   : > { %v754_v51 = vpop.f32.mrb[2].mxu0 }
 0x12f   : > { %v756_v47 = vpop.f32.mrb[3].mxu0 }
 0x131   : > { %v609_v63 = vpop.f32.mrb[0].mxu1 }
 0x132   : > { %v611_v58 = vpop.f32.mrb[1].mxu1 }
 0x133   : > { %v613_v57 = vpop.f32.mrb[2].mxu1 }
 0x134   : > { %v615_v53 = vpop.f32.mrb[3].mxu1 }
 0x139   : > { %v660_v46 = vpop.f32.mrb[4].mxu1 }
 0x13a   : > { %v712_v43 = vsub.f32 %v609_v63, %v660_v46  ;;  %v662_v42 = vpop.f32.mrb[5].mxu1 }
 0x13b   : > { %v713_v30 = vsub.f32 %v611_v58, %v662_v42  ;;  %v664_v27 = vpop.f32.mrb[6].mxu1  ;;  %v4815_v58 = vld [vmem:[#allocation53_spill] sm:$0xff] }
 0x13c   : > { %v714_v26 = vsub.f32 %v613_v57, %v664_v27  ;;  %v666_v23 = vpop.f32.mrb[7].mxu1  ;;  %v4814_v57 = vld [vmem:[#allocation52_spill] sm:$0xff] }
 0x13d   : > { %v715_v22 = vsub.f32 %v615_v53, %v666_v23  ;;  %v4812_v53 = vld [vmem:[#allocation48_spill] sm:$0xff] }
 0x13e   : > { %v4263_v19 = vpack.c.bf16 %v714_v26, %v712_v43  ;;  %v4807_v26 = vld [vmem:[#allocation28_spill] sm:$0xff] }
 0x13f   : > { %v760_v61 = vpack.c.bf16 %v715_v22, %v713_v30  ;;  %v4806_v22 = vld [vmem:[#allocation25_spill] sm:$0xff]  ;;  %v4809_v43 = vld [vmem:[#allocation32_spill] sm:$0xff] }
 0x140   : > { %v4808_v30 = vld [vmem:[#allocation29_spill] sm:$0xff] }
 0x141   : > { %v703_v52 = vpop.f32.mrb[8].mxu1  ;;  %955 = vmatprep.mubr.bf16.mxu1 %v760_v61 }
 0x142   : > { %v751_v18 = vadd.f32 %v750_v56, %v703_v52  ;;  %v705_v15 = vpop.f32.mrb[9].mxu1  ;;  %956 = vmatmul.mubr.bf16.vlgmr.msra.gmra.mrb[12].mxu1 %v4263_v19  ;;  %v4800_v52 = vld [vmem:[#allocation18_spill] sm:$0xff]  ;;  %v4813_v56 = vld [vmem:[#allocation49_spill] sm:$0xff] }
 0x143   : > { %v753_v14 = vadd.f32 %v752_v50, %v705_v15  ;;  %1170 = vmatpush1.bf16.msra.mxu1 %v3925_v4  ;;  %v707_v11 = vpop.f32.mrb[10].mxu1  ;;  %v4799_v50 = vmov 0   ;;  %v4804_v15 = vld [vmem:[#allocation22_spill] sm:$0xff] }
 0x144   : > { %v755_v63 = vadd.f32 %v754_v51, %v707_v11  ;;  %v709_v46 = vpop.f32.mrb[11].mxu1  ;;  %1171 = vmatprep.subr.bf16.mxu1 %v3930_v5  ;;  %v4801_v11 = vld [vmem:[#allocation19_spill] sm:$0xff]  ;;  %v4811_v51 = vld [vmem:[#allocation45_spill] sm:$0xff] }
 0x145   : > { %v757_v27 = vadd.f32 %v756_v47, %v709_v46  ;;  %v4810_v47 = vld [vmem:[#allocation44_spill] sm:$0xff]  ;;  %v4817_v46 = vld [vmem:[#allocation57_spill] sm:$0xff] }
 0x146   : > { %v761_v42 = vpack.c.bf16 %v755_v63, %v751_v18  ;;  %v4805_v18 = vld [vmem:[#allocation24_spill] sm:$0xff] }
 0x147   : > { %v762_v23 = vpack.c.bf16 %v757_v27, %v753_v14  ;;  %1172 = vmatpush1.bf16.msra.mxu1 %v3950_v8  ;;  %v4803_v14 = vld [vmem:[#allocation21_spill] sm:$0xff]  ;;  %v4816_v63 = vld [vmem:[#allocation56_spill] sm:$0xff]  ;;  %v4818_v27 = vld [vmem:[#allocation58_spill] sm:$0xff] }
 0x148   : > { %1173 = vmatprep.subr.bf16.mxu1 %v3956_v9 }
 0x149   : > { %1158 = vmatprep.mubr.bf16.mxu0 %v762_v23  ;;  %1201 = vmatprep.mubr.bf16.mxu1 %v762_v23  ;;  %v4820_v23 = vld [vmem:[#allocation60_spill] sm:$0xff] }
 0x14a   : > { %1159 = vmatmul.mubr.bf16.vlgmr.msra.gmra.mrb[4].mxu0 %v761_v42 }
 0x14b   : > { %1174 = vmatpush1.bf16.msra.mxu1 %v3974_v12  ;;  %1371 = vmatprep.mubr.bf16.mxu0 %v4799_v50 }
 0x14c   : > { %1175 = vmatprep.subr.bf16.mxu1 %v3980_v13 }
 0x14f   : > { %1176 = vmatpush1.bf16.msra.mxu1 %v3998_v16 }
 0x150   : > { %1177 = vmatprep.subr.bf16.mxu1 %v4003_v17 }
 0x153   : > { %1178 = vmatpush1.bf16.msra.mxu1 %v4020_v20 }
 0x154   : > { %1179 = vmatprep.subr.bf16.mxu1 %v4026_v21 }
 0x157   : > { %1180 = vmatpush1.bf16.msra.mxu1 %v4046_v24 }
 0x158   : > { %1181 = vmatprep.subr.bf16.mxu1 %v4052_v25 }
 0x15b   : > { %1182 = vmatpush1.bf16.msra.mxu1 %v4070_v28 }
 0x15c   : > { %1183 = vmatprep.subr.bf16.mxu1 %v4076_v29 }
 0x15f   : > { %1184 = vmatpush1.bf16.msra.mxu1 %v4089_v31 }
 0x160   : > { %1185 = vmatprep.subr.bf16.mxu1 %v4095_v32 }
 0x163   : > { %1186 = vmatpush1.bf16.msra.mxu1 %v4102_v33 }
 0x164   : > { %1187 = vmatprep.subr.bf16.mxu1 %v4108_v34 }
 0x167   : > { %1188 = vmatpush1.bf16.msra.mxu1 %v4114_v35 }
 0x168   : > { %1189 = vmatprep.subr.bf16.mxu1 %v4120_v36 }
 0x16b   : > { %1190 = vmatpush1.bf16.msra.mxu1 %v4126_v37 }
 0x16c   : > { %1191 = vmatprep.subr.bf16.mxu1 %v4132_v38 }
 0x16f   : > { %1192 = vmatpush1.bf16.msra.mxu1 %v4138_v39 }
 0x170   : > { %1193 = vmatprep.subr.bf16.mxu1 %v4145_v40 }
 0x173   : > { %1194 = vmatpush1.bf16.msra.mxu1 %v4150_v41 }
 0x174   : > { %1195 = vmatprep.subr.bf16.mxu1 %v4169_v44 }
 0x177   : > { %1196 = vmatpush1.bf16.msra.mxu1 %v4174_v45 }
 0x178   : > { %1197 = vmatprep.subr.bf16.mxu1 %v4193_v48 }
 0x17b   : > { %1198 = vmatpush1.bf16.msra.mxu1 %v4198_v49 }
 0x17c   : > { %1199 = vmatprep.subr.bf16.mxu1 %v4217_v54 }
 0x17f   : > { %1200 = vmatpush1.bf16.msra.mxu1 %v4222_v55  ;;  %v4821_v55 = vld [vmem:[#allocation61_spill] sm:$0xff] }
 0x180   : > { %1216 = vmatprep.subr.bf16.mxu1 %v3871_v59 }
 0x182   : > { %1202 = vmatmul.mubr.bf16.vlgmr.msra.gmra.mrb[16].mxu1 %v761_v42  ;;  %v4819_v42 = vld [vmem:[#allocation59_spill] sm:$0xff] }
 0x183   : > { %1217 = vmatpush1.bf16.msra.mxu1 %v3876_v60  ;;  %1248 = vmatprep.mubr.bf16.mxu1 %v760_v61  ;;  %v4802_v61 = vld [vmem:[#allocation20_spill] sm:$0xff] }
 0x184   : > { %1218 = vmatprep.subr.bf16.mxu1 %v3888_v62 }
 0x187   : > { %1219 = vmatpush1.bf16.msra.mxu1 %v3898_v0 }
 0x188   : > { %1220 = vmatprep.subr.bf16.mxu1 %v3904_v1 }
 0x18b   : > { %1221 = vmatpush1.bf16.msra.mxu1 %v3914_v2 }
 0x18c   : > { %1222 = vmatprep.subr.bf16.mxu1 %v3920_v3 }
 0x18f   : > { %1223 = vmatpush1.bf16.msra.mxu1 %v3936_v6 }
 0x190   : > { %1224 = vmatprep.subr.bf16.mxu1 %v3942_v7 }
 0x193   : > { %1225 = vmatpush1.bf16.msra.mxu1 %v3962_v10 }
 0x194   : > { %1226 = vmatprep.subr.bf16.mxu1 %v4800_v52 }
 0x197   : > { %1227 = vmatpush1.bf16.msra.mxu1 %v4801_v11 }
 0x198   : > { %1228 = vmatprep.subr.bf16.mxu1 %v4802_v61 }
 0x19b   : > { %1229 = vmatpush1.bf16.msra.mxu1 %v4803_v14 }
 0x19c   : > { %1230 = vmatprep.subr.bf16.mxu1 %v4804_v15 }
 0x19f   : > { %1231 = vmatpush1.bf16.msra.mxu1 %v4805_v18 }
 0x1a0   : > { %1232 = vmatprep.subr.bf16.mxu1 %v4806_v22 }
 0x1a3   : > { %1233 = vmatpush1.bf16.msra.mxu1 %v4807_v26 }
 0x1a4   : > { %1234 = vmatprep.subr.bf16.mxu1 %v4808_v30 }
 0x1a7   : > { %1235 = vmatpush1.bf16.msra.mxu1 %v4809_v43 }
 0x1a8   : > { %1236 = vmatprep.subr.bf16.mxu1 %v4810_v47 }
 0x1ab   : > { %1237 = vmatpush1.bf16.msra.mxu1 %v4811_v51 }
 0x1ac   : > { %1238 = vmatprep.subr.bf16.mxu1 %v4812_v53 }
 0x1af   : > { %1239 = vmatpush1.bf16.msra.mxu1 %v4813_v56 }
 0x1b0   : > { %1240 = vmatprep.subr.bf16.mxu1 %v4814_v57 }
 0x1b3   : > { %1241 = vmatpush1.bf16.msra.mxu1 %v4815_v58 }
 0x1b4   : > { %1242 = vmatprep.subr.bf16.mxu1 %v4816_v63 }
 0x1b7   : > { %1243 = vmatpush1.bf16.msra.mxu1 %v4817_v46 }
 0x1b8   : > { %1244 = vmatprep.subr.bf16.mxu1 %v4818_v27 }
 0x1bb   : > { %1245 = vmatpush1.bf16.msra.mxu1 %v4819_v42 }
 0x1bc   : > { %1246 = vmatprep.subr.bf16.mxu1 %v4820_v23  ;;  %v1260_v23 = vld [vmem:[%s4653_s3 + $0x8] sm:$0xff] }
 0x1bf   : > { %1247 = vmatpush1.bf16.msra.mxu1 %v4821_v55  ;;  %v1259_v55 = vld [vmem:[%s4653_s3] sm:$0xff] }
 0x1c2   : > { %1249 = vmatmul.mubr.bf16.vlgmr.msra.gmra.mrb[16].mxu1 %v4263_v19  ;;  %v3166_v19 = vld [vmem:[%s4653_s3 + $0x20] sm:$0xff] }
 0x1c3   : > { %1328 = vmatprep.mubr.bf16.mxu1 %v4799_v50 }
 0x215   : > { %v957_v56 = vpop.f32.mrb[12].mxu1 }
 0x216   : > { %v959_v57 = vpop.f32.mrb[13].mxu1 }
 0x217   : > { %v961_v54 = vpop.f32.mrb[14].mxu1 }
 0x218   : > { %v963_v58 = vpop.f32.mrb[15].mxu1 }
 0x21d   : > { %v1160_v49 = vpop.f32.mrb[4].mxu0 }
 0x21e   : > { %v1212_v63 = vsub.f32 %v957_v56, %v1160_v49  ;;  %v1162_v53 = vpop.f32.mrb[5].mxu0  ;;  %v3167_v49 = vld [vmem:[%s4653_s3 + $0x28] sm:$0xff] }
 0x21f   : > { %v1213_v46 = vsub.f32 %v959_v57, %v1162_v53  ;;  %v1164_v51 = vpop.f32.mrb[6].mxu0  ;;  %v3169_v53 = vld [vmem:[%s4653_s3 + $0x38] sm:$0xff] }
 0x220   : > { %v1214_v27 = vsub.f32 %v961_v54, %v1164_v51  ;;  %v1166_v48 = vpop.f32.mrb[7].mxu0  ;;  %v3168_v54 = vld [vmem:[%s4653_s3 + $0x30] sm:$0xff]  ;;  %v1262_v51 = vld [vmem:[%s4653_s3 + $0x18] sm:$0xff]  ;;  %v1268_v56 = vmul.f32 %v1259_v55, %v1212_v63  ;;  %v1280_v57 = vmul.f32 %v3166_v19, %v1212_v63 }
 0x221   : > { %v1215_v42 = vsub.f32 %v963_v58, %v1166_v48  ;;  %v1261_v48 = vld [vmem:[%s4653_s3 + $0x10] sm:$0xff]  ;;  %v1269_v58 = vmul.f32 %v1260_v23, %v1213_v46  ;;  %v1281_v45 = vmul.f32 %v3167_v49, %v1213_v46 }
 0x222   : > { %v1270_v43 = vmul.f32 %v1261_v48, %v1214_v27  ;;  %v1282_v44 = vmul.f32 %v3168_v54, %v1214_v27 }
 0x223   : > { %v1271_v40 = vmul.f32 %v1262_v51, %v1215_v42  ;;  %v1283_v39 = vmul.f32 %v3169_v53, %v1215_v42 }
 0x295   : > { %v1250_v47 = vpop.f32.mrb[16].mxu1 }
 0x296   : > { %v1272_v41 = vmul.f32 %v3166_v19, %v1250_v47  ;;  %v1284_v30 = vmul.f32 %v1259_v55, %v1250_v47  ;;  %v1252_v26 = vpop.f32.mrb[17].mxu1 }
 0x297   : > { %v1273_v22 = vmul.f32 %v3167_v49, %v1252_v26  ;;  %v1285_v18 = vmul.f32 %v1260_v23, %v1252_v26  ;;  %v1254_v38 = vpop.f32.mrb[18].mxu1  ;;  %v4841_v26 = vld [vmem:[#allocation29_spill] sm:$0xff]  ;;  %v4844_v23 = vld [vmem:[#allocation32_spill] sm:$0xff] }
 0x298   : > { %v1276_v37 = vsub.f32 %v1268_v56, %v1272_v41  ;;  %v1288_v15 = vadd.f32 %v1284_v30, %v1280_v57  ;;  %v1274_v14 = vmul.f32 %v3168_v54, %v1254_v38  ;;  %v1286_v36 = vmul.f32 %v1261_v48, %v1254_v38  ;;  %v1256_v35 = vpop.f32.mrb[19].mxu1  ;;  %v4822_v41 = vld [vmem:[#allocation17_spill] sm:$0xff]  ;;  %v4823_v38 = vld [vmem:[#allocation15_spill] sm:$0xff]  ;;  %v4845_v49 = vld [vmem:[#allocation44_spill] sm:$0xff] }
 0x299   : > { %v1277_v61 = vsub.f32 %v1269_v58, %v1273_v22  ;;  %v1289_v63 = vadd.f32 %v1285_v18, %v1281_v45  ;;  %v1275_v11 = vmul.f32 %v3169_v53, %v1256_v35  ;;  %v1287_v46 = vmul.f32 %v1262_v51, %v1256_v35  ;;  %v4824_v45 = vld [vmem:[#allocation16_spill] sm:$0xff]  ;;  %v4839_v18 = vld [vmem:[#allocation42_spill] sm:$0xff]  ;;  %v4842_v30 = vld [vmem:[#allocation43_spill] sm:$0xff] }
 0x29a   : > { %v1278_v34 = vsub.f32 %v1270_v43, %v1274_v14  ;;  %v1290_v33 = vadd.f32 %v1286_v36, %v1282_v44  ;;  %v4827_v35 = vld [vmem:[#allocation36_spill] sm:$0xff]  ;;  %v4828_v36 = vld [vmem:[#allocation19_spill] sm:$0xff]  ;;  %v4832_v44 = vld [vmem:[#allocation21_spill] sm:$0xff] }
 0x29b   : > { %v1279_v27 = vsub.f32 %v1271_v40, %v1275_v11  ;;  %v1291_v19 = vadd.f32 %v1287_v46, %v1283_v39  ;;  %v4830_v39 = vld [vmem:[#allocation37_spill] sm:$0xff]  ;;  %v4831_v40 = vld [vmem:[#allocation38_spill] sm:$0xff]  ;;  %v4835_v11 = vld [vmem:[#allocation40_spill] sm:$0xff] }
 0x29c   : > { %v1292_v55 = vpack.c.bf16 %v1278_v34, %v1276_v37  ;;  %v1294_v47 = vpack.c.bf16 %v1290_v33, %v1288_v15  ;;  %v4825_v33 = vld [vmem:[#allocation18_spill] sm:$0xff]  ;;  %v4826_v34 = vld [vmem:[#allocation35_spill] sm:$0xff]  ;;  %v4829_v37 = vld [vmem:[#allocation20_spill] sm:$0xff] }
 0x29d   : > { %v1295_v52 = vpack.c.bf16 %v1291_v19, %v1289_v63  ;;  %v1293_v42 = vpack.c.bf16 %v1279_v27, %v1277_v61  ;;  %v4836_v61 = vld [vmem:[#allocation24_spill] sm:$0xff]  ;;  %v4837_v14 = vld [vmem:[#allocation25_spill] sm:$0xff]  ;;  %v4843_v43 = vld [vmem:[#allocation46_spill] sm:$0xff] }
 0x29e   : > { %v4838_v15 = vld [vmem:[#allocation41_spill] sm:$0xff]  ;;  %v4840_v22 = vld [vmem:[#allocation28_spill] sm:$0xff]  ;;  %v4846_v48 = vld [vmem:[#allocation47_spill] sm:$0xff] }
 0x29f   : > { %1296 = vmatprep.subr.bf16.mxu1 %v1295_v52  ;;  %1339 = vmatprep.subr.bf16.mxu0 %v1295_v52  ;;  %v4834_v52 = vld [vmem:[#allocation39_spill] sm:$0xff]  ;;  %v4847_v54 = vld [vmem:[#allocation50_spill] sm:$0xff]  ;;  %v4848_v51 = vld [vmem:[#allocation45_spill] sm:$0xff] }
 0x2a0   : > { %1297 = vmatpush1.bf16.msra.mxu1 %v1294_v47  ;;  %1340 = vmatpush1.bf16.msra.mxu0 %v1294_v47  ;;  %v4849_v53 = vld [vmem:[#allocation48_spill] sm:$0xff]  ;;  %v4850_v56 = vld [vmem:[#allocation51_spill] sm:$0xff]  ;;  %v4851_v57 = vld [vmem:[#allocation54_spill] sm:$0xff] }
 0x2a1   : > { %1382 = vmatprep.subr.bf16.mxu0 %v1293_v42  ;;  %1562 = vmatprep.subr.bf16.mxu1 %v4822_v41  ;;  %v4852_v58 = vld [vmem:[#allocation49_spill] sm:$0xff]  ;;  %v4853_v63 = vld [vmem:[#allocation52_spill] sm:$0xff]  ;;  %v4854_v46 = vld [vmem:[#allocation55_spill] sm:$0xff] }
 0x2a2   : > { %v4855_v27 = vld [vmem:[#allocation53_spill] sm:$0xff]  ;;  %v4856_v19 = vld [vmem:[#allocation56_spill] sm:$0xff]  ;;  %v4858_v47 = vld [vmem:[#allocation58_spill] sm:$0xff] }
 0x2a3   : > { %3171 = vmatmul.mubr.msk.bf16.vlgmr.msra.gmra.mrb[8].mxu0 %vm571_vm8, %v4823_v38  ;;  %3170 = vmatmul.mubr.msk.bf16.vlgmr.msra.gmra.mrb[20].mxu1 %vm571_vm8, %v4824_v45 }
 0x2a4   : > { %1383 = vmatpush1.bf16.msra.mxu0 %v1292_v55  ;;  %1414 = vmatprep.mubr.bf16.mxu0 %v4799_v50 }
 0x2a5   : > { %1425 = vmatprep.subr.bf16.mxu0 %v1293_v42  ;;  %1563 = vmatpush1.bf16.msra.mxu1 %v3925_v4  ;;  %v4859_v42 = vld [vmem:[#allocation59_spill] sm:$0xff] }
 0x2a6   : > { %1564 = vmatprep.subr.bf16.mxu1 %v3930_v5 }
 0x2a9   : > { %1565 = vmatpush1.bf16.msra.mxu1 %v3950_v8 }
 0x2aa   : > { %1566 = vmatprep.subr.bf16.mxu1 %v3956_v9 }
 0x2ab   : > { %3172 = vmatmul.mubr.msk.bf16.vlgmr.msra.gmra.mrb[12].mxu0 %vm571_vm8, %v4824_v45  ;;  %v4861_v45 = vld [vmem:[#allocation61_spill] sm:$0xff] }
 0x2ac   : > { %1426 = vmatpush1.bf16.msra.mxu0 %v1292_v55  ;;  %1457 = vmatprep.mubr.bf16.mxu0 %v4799_v50  ;;  %v4833_v50 = vld [vmem:[#allocation22_spill] sm:$0xff]  ;;  %v4857_v55 = vld [vmem:[#allocation57_spill] sm:$0xff] }
 0x2ad   : > { %1476 = vmatprep.subr.bf16.mxu0 %v3871_v59  ;;  %1567 = vmatpush1.bf16.msra.mxu1 %v3974_v12 }
 0x2ae   : > { %1568 = vmatprep.subr.bf16.mxu1 %v3980_v13 }
 0x2b1   : > { %1569 = vmatpush1.bf16.msra.mxu1 %v3998_v16 }
 0x2b2   : > { %1570 = vmatprep.subr.bf16.mxu1 %v4003_v17 }
 0x2b3   : > { %3173 = vmatmul.mubr.msk.bf16.vlgmr.msra.gmra.mrb[16].mxu0 %vm571_vm8, %v4823_v38  ;;  %v4860_v38 = vld [vmem:[#allocation60_spill] sm:$0xff] }
 0x2b4   : > { %1477 = vmatpush1.bf16.msra.mxu0 %v3876_v60 }
 0x2b5   : > { %1478 = vmatprep.subr.bf16.mxu0 %v3888_v62  ;;  %1571 = vmatpush1.bf16.msra.mxu1 %v4020_v20 }
 0x2b6   : > { %1572 = vmatprep.subr.bf16.mxu1 %v4026_v21 }
 0x2b8   : > { %1479 = vmatpush1.bf16.msra.mxu0 %v3898_v0 }
 0x2b9   : > { %1480 = vmatprep.subr.bf16.mxu0 %v3904_v1  ;;  %1573 = vmatpush1.bf16.msra.mxu1 %v4046_v24 }
 0x2ba   : > { %1574 = vmatprep.subr.bf16.mxu1 %v4052_v25 }
 0x2bc   : > { %1481 = vmatpush1.bf16.msra.mxu0 %v3914_v2 }
 0x2bd   : > { %1482 = vmatprep.subr.bf16.mxu0 %v3920_v3  ;;  %1575 = vmatpush1.bf16.msra.mxu1 %v4070_v28 }
 0x2be   : > { %1576 = vmatprep.subr.bf16.mxu1 %v4076_v29 }
 0x2c0   : > { %1483 = vmatpush1.bf16.msra.mxu0 %v3936_v6 }
 0x2c1   : > { %1484 = vmatprep.subr.bf16.mxu0 %v3942_v7  ;;  %1577 = vmatpush1.bf16.msra.mxu1 %v4089_v31 }
 0x2c2   : > { %1578 = vmatprep.subr.bf16.mxu1 %v4095_v32 }
 0x2c4   : > { %1485 = vmatpush1.bf16.msra.mxu0 %v3962_v10 }
 0x2c5   : > { %1486 = vmatprep.subr.bf16.mxu0 %v4825_v33  ;;  %1579 = vmatpush1.bf16.msra.mxu1 %v4826_v34 }
 0x2c6   : > { %1580 = vmatprep.subr.bf16.mxu1 %v4827_v35 }
 0x2c8   : > { %1487 = vmatpush1.bf16.msra.mxu0 %v4828_v36 }
 0x2c9   : > { %1488 = vmatprep.subr.bf16.mxu0 %v4829_v37  ;;  %1581 = vmatpush1.bf16.msra.mxu1 %v4830_v39 }
 0x2ca   : > { %1582 = vmatprep.subr.bf16.mxu1 %v4831_v40 }
 0x2cc   : > { %1489 = vmatpush1.bf16.msra.mxu0 %v4832_v44 }
 0x2cd   : > { %1490 = vmatprep.subr.bf16.mxu0 %v4833_v50  ;;  %1583 = vmatpush1.bf16.msra.mxu1 %v4834_v52 }
 0x2ce   : > { %1584 = vmatprep.subr.bf16.mxu1 %v4835_v11 }
 0x2d0   : > { %1491 = vmatpush1.bf16.msra.mxu0 %v4836_v61 }
 0x2d1   : > { %1492 = vmatprep.subr.bf16.mxu0 %v4837_v14  ;;  %1585 = vmatpush1.bf16.msra.mxu1 %v4838_v15 }
 0x2d2   : > { %1586 = vmatprep.subr.bf16.mxu1 %v4839_v18 }
 0x2d4   : > { %1493 = vmatpush1.bf16.msra.mxu0 %v4840_v22 }
 0x2d5   : > { %1494 = vmatprep.subr.bf16.mxu0 %v4841_v26  ;;  %1587 = vmatpush1.bf16.msra.mxu1 %v4842_v30 }
 0x2d6   : > { %1588 = vmatprep.subr.bf16.mxu1 %v4843_v43 }
 0x2d8   : > { %1495 = vmatpush1.bf16.msra.mxu0 %v4844_v23 }
 0x2d9   : > { %1496 = vmatprep.subr.bf16.mxu0 %v4845_v49  ;;  %1589 = vmatpush1.bf16.msra.mxu1 %v4846_v48 }
 0x2da   : > { %1590 = vmatprep.subr.bf16.mxu1 %v4847_v54 }
 0x2dc   : > { %1497 = vmatpush1.bf16.msra.mxu0 %v4848_v51 }
 0x2dd   : > { %1498 = vmatprep.subr.bf16.mxu0 %v4849_v53  ;;  %1591 = vmatpush1.bf16.msra.mxu1 %v4850_v56 }
 0x2de   : > { %1592 = vmatprep.subr.bf16.mxu1 %v4851_v57 }
 0x2e0   : > { %1499 = vmatpush1.bf16.msra.mxu0 %v4852_v58 }
 0x2e1   : > { %1500 = vmatprep.subr.bf16.mxu0 %v4853_v63  ;;  %1593 = vmatpush1.bf16.msra.mxu1 %v4854_v46 }
 0x2e4   : > { %1501 = vmatpush1.bf16.msra.mxu0 %v4855_v27 }
 0x2e5   : > { %1502 = vmatprep.subr.bf16.mxu0 %v4856_v19 }
 0x2e8   : > { %1503 = vmatpush1.bf16.msra.mxu0 %v4857_v55 }
 0x2e9   : > { %1504 = vmatprep.subr.bf16.mxu0 %v4858_v47 }
 0x2ec   : > { %1505 = vmatpush1.bf16.msra.mxu0 %v4859_v42 }
 0x2ed   : > { %1506 = vmatprep.subr.bf16.mxu0 %v4860_v38 }
 0x2f0   : > { %1507 = vmatpush1.bf16.msra.mxu0 %v4861_v45 }
 0x2f1   : > { %1519 = vmatprep.subr.bf16.mxu0 %v3871_v59 }
 0x376   : > { %v1373_v57 = vpop.f32.mrb[8].mxu0  ;;  %v1330_v56 = vpop.f32.mrb[20].mxu1 }
 0x377   : > { %v1375_v54 = vpop.f32.mrb[9].mxu0  ;;  %v1332_v46 = vpop.f32.mrb[21].mxu1 }
 0x378   : > { %v1377_v48 = vpop.f32.mrb[10].mxu0  ;;  %v1334_v43 = vpop.f32.mrb[22].mxu1 }
 0x379   : > { %v1379_v30 = vpop.f32.mrb[11].mxu0  ;;  %v1336_v18 = vpop.f32.mrb[23].mxu1 }
 0x37e   : > { %v1416_v15 = vpop.f32.mrb[12].mxu0 }
 0x37f   : > { %v1468_v11 = vsub.f32 %v1373_v57, %v1416_v15  ;;  %v1418_v52 = vpop.f32.mrb[13].mxu0 }
 0x380   : > { %v1469_v40 = vsub.f32 %v1375_v54, %v1418_v52  ;;  %v1420_v39 = vpop.f32.mrb[14].mxu0 }
 0x381   : > { %v1470_v35 = vsub.f32 %v1377_v48, %v1420_v39  ;;  %v1422_v34 = vpop.f32.mrb[15].mxu0 }
 0x382   : > { %v1471_v32 = vsub.f32 %v1379_v30, %v1422_v34  ;;  %v3176_v30 = vld [vmem:[%s3764_s27 + $0x30] sm:$0xff] }
 0x383   : > { %v1474_v31 = vpack.c.bf16 %v1470_v35, %v1468_v11 }
 0x384   : > { %v1475_v29 = vpack.c.bf16 %v1471_v32, %v1469_v40 }
 0x386   : > { %1508 = vmatprep.mubr.bf16.mxu0 %v1475_v29  ;;  %1594 = vmatprep.mubr.bf16.mxu1 %v1475_v29  ;;  %v1459_v59 = vpop.f32.mrb[16].mxu0 }
 0x387   : > { %1509 = vmatmul.mubr.bf16.vlgmr.msra.gmra.mrb[20].mxu0 %v1474_v31  ;;  %1595 = vmatmul.mubr.bf16.vlgmr.msra.gmra.mrb[24].mxu1 %v1474_v31  ;;  %v1460_v28 = vadd.f32 %v1459_v59, %v1330_v56  ;;  %v1461_v25 = vpop.f32.mrb[17].mxu0 }
 0x388   : > { %1520 = vmatpush1.bf16.msra.mxu0 %v3876_v60  ;;  %v1462_v24 = vadd.f32 %v1461_v25, %v1332_v46  ;;  %v1463_v21 = vpop.f32.mrb[18].mxu0  ;;  %v4862_v60 = vld [vmem:[#allocation23_spill] sm:$0xff]  ;;  %v4882_v25 = vld [vmem:[#allocation54_spill] sm:$0xff] }
 0x389   : > { %1521 = vmatprep.subr.bf16.mxu0 %v3888_v62  ;;  %v1464_v52 = vadd.f32 %v1463_v21, %v1334_v43  ;;  %v1465_v15 = vpop.f32.mrb[19].mxu0  ;;  %v4863_v62 = vld [vmem:[#allocation26_spill] sm:$0xff]  ;;  %v1698_v43 = vstv %s1693_s30 }
 0x38a   : > { %v1466_v39 = vadd.f32 %v1465_v15, %v1336_v18  ;;  %v4880_v21 = vld [vmem:[#allocation50_spill] sm:$0xff]  ;;  %v1653_v18 = vld [vmem:[%s3764_s27 + $0x8] sm:$0xff] }
 0x38b   : > { %v4433_v48 = vpack.c.bf16 %v1464_v52, %v1460_v28  ;;  %v4883_v28 = vld [vmem:[#allocation55_spill] sm:$0xff] }
 0x38c   : > { %1522 = vmatpush1.bf16.msra.mxu0 %v3898_v0  ;;  %v1473_v32 = vpack.c.bf16 %v1466_v39, %v1462_v24  ;;  %v4864_v0 = vld [vmem:[#allocation27_spill] sm:$0xff] }
 0x38d   : > { %1523 = vmatprep.subr.bf16.mxu0 %v3904_v1  ;;  %v4865_v1 = vld [vmem:[#allocation30_spill] sm:$0xff]  ;;  %v4881_v24 = vld [vmem:[#allocation51_spill] sm:$0xff] }
 0x38e   : > { %1551 = vmatprep.mubr.bf16.mxu0 %v1473_v32 }
 0x390   : > { %1524 = vmatpush1.bf16.msra.mxu0 %v3914_v2  ;;  %v4866_v2 = vld [vmem:[#allocation31_spill] sm:$0xff] }
 0x391   : > { %1525 = vmatprep.subr.bf16.mxu0 %v3920_v3  ;;  %v4867_v3 = vld [vmem:[#allocation33_spill] sm:$0xff] }
 0x394   : > { %1526 = vmatpush1.bf16.msra.mxu0 %v3936_v6  ;;  %v4870_v6 = vld [vmem:[#allocation36_spill] sm:$0xff] }
 0x395   : > { %1527 = vmatprep.subr.bf16.mxu0 %v3942_v7  ;;  %v4871_v7 = vld [vmem:[#allocation37_spill] sm:$0xff] }
 0x398   : > { %1528 = vmatpush1.bf16.msra.mxu0 %v3962_v10  ;;  %v4874_v10 = vld [vmem:[#allocation40_spill] sm:$0xff] }
 0x399   : > { %1529 = vmatprep.subr.bf16.mxu0 %v4825_v33 }
 0x39c   : > { %1530 = vmatpush1.bf16.msra.mxu0 %v4828_v36 }
 0x39d   : > { %1531 = vmatprep.subr.bf16.mxu0 %v4829_v37 }
 0x3a0   : > { %1532 = vmatpush1.bf16.msra.mxu0 %v4832_v44 }
 0x3a1   : > { %1533 = vmatprep.subr.bf16.mxu0 %v4833_v50 }
 0x3a4   : > { %1534 = vmatpush1.bf16.msra.mxu0 %v4836_v61  ;;  %v1652_v61 = vld [vmem:[%s3764_s27] sm:$0xff] }
 0x3a5   : > { %1535 = vmatprep.subr.bf16.mxu0 %v4837_v14  ;;  %v3174_v14 = vld [vmem:[%s3764_s27 + $0x20] sm:$0xff] }
 0x3a8   : > { %1536 = vmatpush1.bf16.msra.mxu0 %v4840_v22  ;;  %v3175_v22 = vld [vmem:[%s3764_s27 + $0x28] sm:$0xff] }
 0x3a9   : > { %1537 = vmatprep.subr.bf16.mxu0 %v4841_v26  ;;  %v1654_v26 = vld [vmem:[%s3764_s27 + $0x10] sm:$0xff] }
 0x3ac   : > { %1538 = vmatpush1.bf16.msra.mxu0 %v4844_v23  ;;  %v1655_v23 = vld [vmem:[%s3764_s27 + $0x18] sm:$0xff] }
 0x3ad   : > { %1539 = vmatprep.subr.bf16.mxu0 %v4845_v49  ;;  %v3177_v49 = vld [vmem:[%s3764_s27 + $0x38] sm:$0xff] }
 0x3b0   : > { %1540 = vmatpush1.bf16.msra.mxu0 %v4848_v51 }
 0x3b1   : > { %1541 = vmatprep.subr.bf16.mxu0 %v4849_v53 }
 0x3b4   : > { %1542 = vmatpush1.bf16.msra.mxu0 %v4852_v58 }
 0x3b5   : > { %1543 = vmatprep.subr.bf16.mxu0 %v4853_v63 }
 0x3b8   : > { %1544 = vmatpush1.bf16.msra.mxu0 %v4855_v27 }
 0x3b9   : > { %1545 = vmatprep.subr.bf16.mxu0 %v4856_v19 }
 0x3bc   : > { %1546 = vmatpush1.bf16.msra.mxu0 %v4857_v55 }
 0x3bd   : > { %1547 = vmatprep.subr.bf16.mxu0 %v4858_v47 }
 0x3c0   : > { %1548 = vmatpush1.bf16.msra.mxu0 %v4859_v42 }
 0x3c1   : > { %1549 = vmatprep.subr.bf16.mxu0 %v4860_v38 }
 0x3c4   : > { %1550 = vmatpush1.bf16.msra.mxu0 %v4861_v45 }
 0x3c5   : > { %1605 = vmatprep.subr.bf16.mxu0 %v4822_v41 }
 0x3c7   : > { %1552 = vmatmul.mubr.bf16.vlgmr.msra.gmra.mrb[24].mxu0 %v4433_v48 }
 0x3c8   : > { %1606 = vmatpush1.bf16.msra.mxu0 %v3925_v4  ;;  %1637 = vmatprep.mubr.bf16.mxu0 %v1473_v32  ;;  %v4868_v4 = vld [vmem:[#allocation34_spill] sm:$0xff]  ;;  %v1694_v32 = vld [vmem:[#allocation4] sm:$0xff] }
 0x3c9   : > { %1607 = vmatprep.subr.bf16.mxu0 %v3930_v5  ;;  %v4869_v5 = vld [vmem:[#allocation35_spill] sm:$0xff] }
 0x3cc   : > { %1608 = vmatpush1.bf16.msra.mxu0 %v3950_v8  ;;  %v4872_v8 = vld [vmem:[#allocation38_spill] sm:$0xff] }
 0x3cd   : > { %1609 = vmatprep.subr.bf16.mxu0 %v3956_v9  ;;  %v4873_v9 = vld [vmem:[#allocation39_spill] sm:$0xff] }
 0x3d0   : > { %1610 = vmatpush1.bf16.msra.mxu0 %v3974_v12  ;;  %v4875_v12 = vld [vmem:[#allocation41_spill] sm:$0xff] }
 0x3d1   : > { %1611 = vmatprep.subr.bf16.mxu0 %v3980_v13  ;;  %v4876_v13 = vld [vmem:[#allocation42_spill] sm:$0xff] }
 0x3d4   : > { %1612 = vmatpush1.bf16.msra.mxu0 %v3998_v16  ;;  %v4877_v16 = vld [vmem:[#allocation43_spill] sm:$0xff] }
 0x3d5   : > { %1613 = vmatprep.subr.bf16.mxu0 %v4003_v17  ;;  %v4878_v17 = vld [vmem:[#allocation46_spill] sm:$0xff] }
 0x3d8   : > { %1614 = vmatpush1.bf16.msra.mxu0 %v4020_v20  ;;  %v4879_v20 = vld [vmem:[#allocation47_spill] sm:$0xff] }
 0x3d9   : > { %1615 = vmatprep.subr.bf16.mxu0 %v4862_v60  ;;  %v1711_v60 = vld [vmem:[#allocation5] sm:$0xff] }
 0x3dc   : > { %1616 = vmatpush1.bf16.msra.mxu0 %v4863_v62 }
 0x3dd   : > { %1617 = vmatprep.subr.bf16.mxu0 %v4864_v0 }
 0x3e0   : > { %1618 = vmatpush1.bf16.msra.mxu0 %v4865_v1 }
 0x3e1   : > { %1619 = vmatprep.subr.bf16.mxu0 %v4866_v2 }
 0x3e4   : > { %1620 = vmatpush1.bf16.msra.mxu0 %v4867_v3 }
 0x3e5   : > { %1621 = vmatprep.subr.bf16.mxu0 %v4868_v4 }
 0x3e8   : > { %1622 = vmatpush1.bf16.msra.mxu0 %v4869_v5  ;;  %v1695_v5 = vld [vmem:[#allocation4 + $0x8] sm:$0xff] }
 0x3e9   : > { %1623 = vmatprep.subr.bf16.mxu0 %v4870_v6  ;;  %v1712_v6 = vld [vmem:[#allocation5 + $0x8] sm:$0xff] }
 0x3ec   : > { %1624 = vmatpush1.bf16.msra.mxu0 %v4871_v7 }
 0x3ed   : > { %1625 = vmatprep.subr.bf16.mxu0 %v4872_v8 }
 0x3f0   : > { %1626 = vmatpush1.bf16.msra.mxu0 %v4873_v9 }
 0x3f1   : > { %1627 = vmatprep.subr.bf16.mxu0 %v4874_v10 }
 0x3f4   : > { %1628 = vmatpush1.bf16.msra.mxu0 %v4875_v12  ;;  %v1696_v12 = vld [vmem:[#allocation4 + $0x10] sm:$0xff] }
 0x3f5   : > { %1629 = vmatprep.subr.bf16.mxu0 %v4876_v13  ;;  %v1713_v13 = vld [vmem:[#allocation5 + $0x10] sm:$0xff] }
 0x3f8   : > { %1630 = vmatpush1.bf16.msra.mxu0 %v4877_v16 }
 0x3f9   : > { %1631 = vmatprep.subr.bf16.mxu0 %v4878_v17 }
 0x3fc   : > { %1632 = vmatpush1.bf16.msra.mxu0 %v4879_v20 }
 0x3fd   : > { %1633 = vmatprep.subr.bf16.mxu0 %v4880_v21 }
 0x400   : > { %1634 = vmatpush1.bf16.msra.mxu0 %v4881_v24 }
 0x401   : > { %1635 = vmatprep.subr.bf16.mxu0 %v4882_v25 }
 0x404   : > { %1636 = vmatpush1.bf16.msra.mxu0 %v4883_v28  ;;  %v1697_v28 = vld [vmem:[#allocation4 + $0x18] sm:$0xff] }
 0x407   : > { %1638 = vmatmul.mubr.bf16.vlgmr.msra.gmra.mrb[20].mxu0 %v4433_v48 }
 0x45a   : > { %v1596_v29 = vpop.f32.mrb[24].mxu1 }
 0x45b   : > { %v1598_v31 = vpop.f32.mrb[25].mxu1 }
 0x45c   : > { %v1600_v41 = vpop.f32.mrb[26].mxu1 }
 0x45d   : > { %v1602_v33 = vpop.f32.mrb[27].mxu1 }
 0x49a   : > { %v1553_v34 = vpop.f32.mrb[24].mxu0 }
 0x49b   : > { %v1648_v35 = vsub.f32 %v1596_v29, %v1553_v34  ;;  %v1555_v36 = vpop.f32.mrb[25].mxu0  ;;  %v1714_v29 = vld [vmem:[#allocation5 + $0x18] sm:$0xff] }
 0x49c   : > { %v1649_v37 = vsub.f32 %v1598_v31, %v1555_v36  ;;  %v1557_v40 = vpop.f32.mrb[26].mxu0 }
 0x49d   : > { %v1650_v44 = vsub.f32 %v1600_v41, %v1557_v40  ;;  %v1559_v50 = vpop.f32.mrb[27].mxu0  ;;  %v1665_v54 = vmul.f32 %v3174_v14, %v1648_v35  ;;  %v1677_v51 = vmul.f32 %v1652_v61, %v1648_v35 }
 0x49e   : > { %v1651_v11 = vsub.f32 %v1602_v33, %v1559_v50  ;;  %v1666_v53 = vmul.f32 %v3175_v22, %v1649_v37  ;;  %v1678_v56 = vmul.f32 %v1653_v18, %v1649_v37 }
 0x49f   : > { %v1667_v58 = vmul.f32 %v3176_v30, %v1650_v44  ;;  %v1679_v63 = vmul.f32 %v1654_v26, %v1650_v44 }
 0x4a0   : > { %v1668_v38 = vmul.f32 %v3177_v49, %v1651_v11  ;;  %v1680_v45 = vmul.f32 %v1655_v23, %v1651_v11 }
 0x4da   : > { %v1639_v57 = vpop.f32.mrb[20].mxu0 }
 0x4db   : > { %v1661_v46 = vmul.f32 %v1652_v61, %v1639_v57  ;;  %v1673_v27 = vmul.f32 %v3174_v14, %v1639_v57  ;;  %v1641_v19 = vpop.f32.mrb[21].mxu0 }
 0x4dc   : > { %v1662_v55 = vmul.f32 %v1653_v18, %v1641_v19  ;;  %v1674_v47 = vmul.f32 %v3175_v22, %v1641_v19  ;;  %v1643_v42 = vpop.f32.mrb[22].mxu0 }
 0x4dd   : > { %v1669_v59 = vsub.f32 %v1661_v46, %v1665_v54  ;;  %v1681_v52 = vadd.f32 %v1677_v51, %v1673_v27  ;;  %v1663_v15 = vmul.f32 %v1654_v26, %v1643_v42  ;;  %v1675_v39 = vmul.f32 %v3176_v30, %v1643_v42  ;;  %v1645_v48 = vpop.f32.mrb[23].mxu0 }
 0x4de   : > { %v1670_v62 = vsub.f32 %v1662_v55, %v1666_v53  ;;  %v1682_v0 = vadd.f32 %v1678_v56, %v1674_v47  ;;  %v1664_v1 = vmul.f32 %v1655_v23, %v1645_v48  ;;  %v1676_v2 = vmul.f32 %v3177_v49, %v1645_v48 }
 0x4df   : > { %1685 = vst [vmem:[#allocation2] sm:$0xff] %v1669_v59  ;;  %1689 = vst [vmem:[#allocation3] sm:$0xff] %v1681_v52  ;;  %v1699_v3 = vmul.f32 %v1698_v43, %v1669_v59  ;;  %v1715_v4 = vmul.f32 %v1698_v43, %v1681_v52  ;;  %v1671_v7 = vsub.f32 %v1663_v15, %v1667_v58 }
 0x4e0   : > { %v1683_v8 = vadd.f32 %v1679_v63, %v1675_v39  ;;  %1686 = vst [vmem:[#allocation2 + $0x8] sm:$0xff] %v1670_v62  ;;  %1690 = vst [vmem:[#allocation3 + $0x8] sm:$0xff] %v1682_v0  ;;  %v1700_v9 = vmul.f32 %v1698_v43, %v1670_v62  ;;  %v1716_v10 = vmul.f32 %v1698_v43, %v1682_v0 }
 0x4e1   : > { %v1672_v16 = vsub.f32 %v1664_v1, %v1668_v38  ;;  %v1684_v17 = vadd.f32 %v1680_v45, %v1676_v2  ;;  %v1703_v20 = vadd.f32 %v1699_v3, %v1694_v32  ;;  %v1719_v21 = vadd.f32 %v1715_v4, %v1711_v60  ;;  %1687 = vst [vmem:[#allocation2 + $0x10] sm:$0xff] %v1671_v7  ;;  %1730 = sbr.rel (%p3178_p8) target bundleno = 1708 (0x6ac), region = 117 }
 0x4e2   : > { %1691 = vst [vmem:[#allocation3 + $0x10] sm:$0xff] %v1683_v8  ;;  %v1701_v24 = vmul.f32 %v1698_v43, %v1671_v7  ;;  %v1717_v25 = vmul.f32 %v1698_v43, %v1683_v8  ;;  %v1704_v31 = vadd.f32 %v1700_v9, %v1695_v5  ;;  %v1720_v41 = vadd.f32 %v1716_v10, %v1712_v6 }
 0x4e3   : > { %1688 = vst [vmem:[#allocation2 + $0x18] sm:$0xff] %v1672_v16  ;;  %1692 = vst [vmem:[#allocation3 + $0x18] sm:$0xff] %v1684_v17  ;;  %v1702_v33 = vmul.f32 %v1698_v43, %v1672_v16  ;;  %v1718_v34 = vmul.f32 %v1698_v43, %v1684_v17 }
 0x4e4   : > { %1707 = vst [vmem:[#allocation4] sm:$0xff] %v1703_v20  ;;  %1723 = vst [vmem:[#allocation5] sm:$0xff] %v1719_v21  ;;  %v1705_v35 = vadd.f32 %v1701_v24, %v1696_v12  ;;  %v1721_v36 = vadd.f32 %v1717_v25, %v1713_v13 }
 0x4e5   : > { %1708 = vst [vmem:[#allocation4 + $0x8] sm:$0xff] %v1704_v31  ;;  %1724 = vst [vmem:[#allocation5 + $0x8] sm:$0xff] %v1720_v41  ;;  %v1706_v37 = vadd.f32 %v1702_v33, %v1697_v28  ;;  %v1722_v40 = vadd.f32 %v1718_v34, %v1714_v29 }
 0x4e6   : > { %1709 = vst [vmem:[#allocation4 + $0x10] sm:$0xff] %v1705_v35  ;;  %1725 = vst [vmem:[#allocation5 + $0x10] sm:$0xff] %v1721_v36 }
 0x4e7   : > { %1710 = vst [vmem:[#allocation4 + $0x18] sm:$0xff] %v1706_v37  ;;  %1726 = vst [vmem:[#allocation5 + $0x18] sm:$0xff] %v1722_v40 }
 0x4e8   : > { %3584 = dma.done.wait [#allocation8], 2048 }
 0x4e9   : > { %3585 = vsyncadd [#allocation8], 4294965248  ;;  %s3617_s29 = smov 80   ;;  %s3618_s27 = smov 112   ;;  %v3622_v5 = vmov 0.0   ;;  %v1937_v6 = vld [vmem:[#allocation7 + $0x8] sm:$0xff] }
 0x4ea   : > { %s3619_s16 = smov 96   ;;  %s3620_s22 = smov 48   ;;  %3233 = vmatprep.subr.bf16.mxu0 %v3622_v5  ;;  %3239 = vmatprep.subr.bf16.mxu1 %v3622_v5  ;;  %v1919_v7 = vld [vmem:[#allocation7] sm:$0xff]  ;;  %vm3625_vm1 = vmmov 0  }
 0x4eb   : > { %v1735_v44 = vld [vmem:[#allocation4] sm:$0xff]  ;;  %s3621_s25 = smov 64   ;;  %s3623_s26 = smov 16   ;;  %3234 = vmatpush3.bf16.msra.mxu0 %v1937_v6  ;;  %3240 = vmatpush3.bf16.msra.mxu1 %v1919_v7 }
 0x4ec   : > { %v1739_v50 = vld [vmem:[#allocation5] sm:$0xff]  ;;  %v1736_v11 = vld [vmem:[#allocation4 + $0x8] sm:$0xff]  ;;  %v1743_v61 = vmul.f32 %v1735_v44, %v1735_v44  ;;  %s3624_s12 = smov 32   ;;  %3235 = vmatprep.mubr.msk.bf16.mxu0 %vm3625_vm1, %v3622_v5  ;;  %3241 = vmatprep.mubr.msk.bf16.mxu1 %vm3625_vm1, %v3622_v5 }
 0x4ed   : > { %v1747_v14 = vmul.f32 %v1739_v50, %v1739_v50  ;;  %v1740_v18 = vld [vmem:[#allocation5 + $0x8] sm:$0xff]  ;;  %v1744_v22 = vmul.f32 %v1736_v11, %v1736_v11  ;;  %v1737_v26 = vld [vmem:[#allocation4 + $0x10] sm:$0xff]  ;;  %3245 = vmatprep.subr.bf16.mxu0 %v3622_v5  ;;  %3251 = vmatprep.subr.bf16.mxu1 %v3622_v5 }
 0x4ee   : > { %v1741_v30 = vld [vmem:[#allocation5 + $0x10] sm:$0xff]  ;;  %v1748_v43 = vmul.f32 %v1740_v18, %v1740_v18  ;;  %v1745_v23 = vmul.f32 %v1737_v26, %v1737_v26  ;;  %v1738_v54 = vld [vmem:[#allocation4 + $0x18] sm:$0xff] }
 0x4ef   : > { %v1749_v49 = vmul.f32 %v1741_v30, %v1741_v30  ;;  %v1742_v51 = vld [vmem:[#allocation5 + $0x18] sm:$0xff]  ;;  %v1751_v53 = vadd.f32 %v1747_v14, %v1743_v61  ;;  %v1746_v58 = vmul.f32 %v1738_v54, %v1738_v54 }
 0x4f0   : > { %v1752_v56 = vadd.f32 %v1748_v43, %v1744_v22  ;;  %v1750_v63 = vmul.f32 %v1742_v51, %v1742_v51 }
 0x4f1   : > { %v1753_v57 = vadd.f32 %v1749_v49, %v1745_v23  ;;  %3529 = vrsqrt.f32 %v1751_v53  ;;  %vm1757_vm9 = vcmp.eq.f32.partialorder %v1751_v53, inf  ;;  %v1760_v19 = vand.u32 2147483648, %v1751_v53 }
 0x4f2   : > { %3531 = vrsqrt.f32 %v1752_v56  ;;  %v1754_v46 = vadd.f32 %v1750_v63, %v1746_v58  ;;  %vm1759_vm10 = vcmp.eq.f32.partialorder %v1751_v53, 0.0  ;;  %vm1764_vm11 = vcmp.eq.f32.partialorder %v1752_v56, inf }
 0x4f3   : > { %3533 = vrsqrt.f32 %v1753_v57  ;;  %v1767_v42 = vand.u32 2147483648, %v1752_v56  ;;  %vm1766_vm12 = vcmp.eq.f32.partialorder %v1752_v56, 0.0  ;;  %vm1771_vm13 = vcmp.eq.f32.partialorder %v1753_v57, inf }
 0x4f4   : > { %3535 = vrsqrt.f32 %v1754_v46  ;;  %v1774_v59 = vand.u32 2147483648, %v1753_v57  ;;  %vm1773_vm14 = vcmp.eq.f32.partialorder %v1753_v57, 0.0  ;;  %vm1778_vm15 = vcmp.eq.f32.partialorder %v1754_v46, inf }
 0x4f5   : > { %v1781_v0 = vand.u32 2147483648, %v1754_v46  ;;  %vm1780_vm0 = vcmp.eq.f32.partialorder %v1754_v46, 0.0 }
 0x4fb   : > { %v3530_v27 = vpop.eup %3529 }
 0x4fc   : > { %v3532_v55 = vpop.eup %3531  ;;  %v1756_v47 = vmul.f32 %v3530_v27, %v1751_v53 }
 0x4fd   : > { %v3534_v38 = vpop.eup %3533  ;;  %v1763_v45 = vmul.f32 %v3532_v55, %v1752_v56 }
 0x4fe   : > { %v1758_v52 = vsel %vm1757_vm9, %v1751_v53, %v1756_v47  ;;  %v1770_v15 = vmul.f32 %v3534_v38, %v1753_v57  ;;  %v3536_v32 = vpop.eup %3535 }
 0x4ff   : > { %v1761_v39 = vsel %vm1759_vm10, %v1760_v19, %v1758_v52  ;;  %v1765_v48 = vsel %vm1764_vm11, %v1752_v56, %v1763_v45  ;;  %v1777_v2 = vmul.f32 %v3536_v32, %v1754_v46 }
 0x500   : > { %1803 = vrot.lane.b32.xlu1 %v1761_v39, %s3617_s29  ;;  %1783 = vst.msk [vmem:[#allocation6] sm:$0xff] %vm571_vm8, %v1761_v39  ;;  %1787 = vrot.lane.b32.xlu0 %v1761_v39, %s3618_s27  ;;  %v1768_v60 = vsel %vm1766_vm12, %v1767_v42, %v1765_v48  ;;  %v1772_v62 = vsel %vm1771_vm13, %v1753_v57, %v1770_v15  ;;  %v2043_v15 = vld [vmem:[#allocation7 + $0x10] sm:$0xff] }
 0x501   : > { %1843 = vst.msk [vmem:[#allocation6 + $0x80] sm:$0xff] %vm571_vm8, %v1768_v60  ;;  %v1775_v1 = vsel %vm1773_vm14, %v1774_v59, %v1772_v62  ;;  %v1779_v3 = vsel %vm1778_vm15, %v1754_v46, %v1777_v2 }
 0x502   : > { %1784 = vst.msk [vmem:[#allocation6 + $0x8] sm:$0xff] %vm571_vm8, %v1775_v1  ;;  %v1782_v4 = vsel %vm1780_vm0, %v1781_v0, %v1779_v3 }
 0x503   : > { %1844 = vst.msk [vmem:[#allocation6 + $0x88] sm:$0xff] %vm571_vm8, %v1782_v4 }
 0x504   : > { %1847 = vrot.lane.b32.xlu1 %v1768_v60, %s3618_s27  ;;  %1795 = vrot.lane.b32.xlu0 %v1761_v39, %s3619_s16 }
 0x508   : > { %1863 = vrot.lane.b32.xlu1 %v1768_v60, %s3617_s29  ;;  %1855 = vrot.lane.b32.xlu0 %v1768_v60, %s3619_s16 }
 0x50c   : > { %1819 = vrot.lane.b32.xlu1 %v1761_v39, %s3620_s22  ;;  %1811 = vrot.lane.b32.xlu0 %v1761_v39, %s3621_s25 }
 0x510   : > { %1879 = vrot.lane.b32.xlu1 %v1768_v60, %s3620_s22  ;;  %1871 = vrot.lane.b32.xlu0 %v1768_v60, %s3621_s25 }
 0x514   : > { %1835 = vrot.lane.b32.xlu1 %v1761_v39, %s3623_s26  ;;  %1827 = vrot.lane.b32.xlu0 %v1761_v39, %s3624_s12  ;;  %v2107_v39 = vld [vmem:[#allocation7 + $0x18] sm:$0xff] }
 0x518   : > { %1895 = vrot.lane.b32.xlu1 %v1768_v60, %s3623_s26  ;;  %1887 = vrot.lane.b32.xlu0 %v1768_v60, %s3624_s12 }
 0x51c   : > { %1797 = vrot.lane.b32.xlu1 %v1775_v1, %s3619_s16  ;;  %1789 = vrot.lane.b32.xlu0 %v1775_v1, %s3618_s27 }
 0x520   : > { %1849 = vrot.lane.b32.xlu1 %v1782_v4, %s3618_s27  ;;  %1805 = vrot.lane.b32.xlu0 %v1775_v1, %s3617_s29 }
 0x524   : > { %1865 = vrot.lane.b32.xlu1 %v1782_v4, %s3617_s29  ;;  %1857 = vrot.lane.b32.xlu0 %v1782_v4, %s3619_s16 }
 0x528   : > { %1821 = vrot.lane.b32.xlu1 %v1775_v1, %s3620_s22  ;;  %1813 = vrot.lane.b32.xlu0 %v1775_v1, %s3621_s25 }
 0x52c   : > { %1881 = vrot.lane.b32.xlu1 %v1782_v4, %s3620_s22  ;;  %1873 = vrot.lane.b32.xlu0 %v1782_v4, %s3621_s25 }
 0x530   : > { %1837 = vrot.lane.b32.xlu1 %v1775_v1, %s3623_s26  ;;  %1829 = vrot.lane.b32.xlu0 %v1775_v1, %s3624_s12 }
 0x534   : > { %1897 = vrot.lane.b32.xlu1 %v1782_v4, %s3623_s26  ;;  %1889 = vrot.lane.b32.xlu0 %v1782_v4, %s3624_s12 }
 0x572   : > { %v1804_v8 = vpop.permute.xlu1 %1803  ;;  %v1788_v9 = vpop.permute.xlu0 %1787 }
 0x573   : > { %1809 = vst.msk [vmem:[#allocation6 + $0x30] sm:$0xff] %vm571_vm8, %v1804_v8  ;;  %1793 = vst.msk [vmem:[#allocation6 + $0x10] sm:$0xff] %vm571_vm8, %v1788_v9 }
 0x576   : > { %v1848_v10 = vpop.permute.xlu1 %1847  ;;  %v1796_v12 = vpop.permute.xlu0 %1795 }
 0x577   : > { %1853 = vst.msk [vmem:[#allocation6 + $0x90] sm:$0xff] %vm571_vm8, %v1848_v10  ;;  %1801 = vst.msk [vmem:[#allocation6 + $0x20] sm:$0xff] %vm571_vm8, %v1796_v12 }
 0x57a   : > { %v1864_v13 = vpop.permute.xlu1 %1863  ;;  %v1856_v16 = vpop.permute.xlu0 %1855  ;;  %v1921_v34 = vld [vmem:[#allocation6 + $0x1] ss:$16 sm:$0x3]  ;;  %v1903_v37 = vld [vmem:[#allocation6] ss:$16 sm:$0x3] }
 0x57b   : > { %1869 = vst.msk [vmem:[#allocation6 + $0xb0] sm:$0xff] %vm571_vm8, %v1864_v13  ;;  %1861 = vst.msk [vmem:[#allocation6 + $0xa0] sm:$0xff] %vm571_vm8, %v1856_v16  ;;  %v2027_v48 = vld [vmem:[#allocation6 + $0x2] ss:$16 sm:$0x3] }
 0x57c   : > { %v2091_v0 = vld [vmem:[#allocation6 + $0x3] ss:$16 sm:$0x3] }
 0x57e   : > { %v1820_v17 = vpop.permute.xlu1 %1819  ;;  %v1812_v20 = vpop.permute.xlu0 %1811  ;;  %v1922_v41 = vld [vmem:[#allocation6 + $0x1] ss:$16 sm:$0xc]  ;;  %v1904_v33 = vld [vmem:[#allocation6] ss:$16 sm:$0xc] }
 0x57f   : > { %1825 = vst.msk [vmem:[#allocation6 + $0x50] sm:$0xff] %vm571_vm8, %v1820_v17  ;;  %1817 = vst.msk [vmem:[#allocation6 + $0x40] sm:$0xff] %vm571_vm8, %v1812_v20  ;;  %v1929_v35 = vld [vmem:[#allocation6 + $0x81] ss:$16 sm:$0x3]  ;;  %v1923_v26 = vor.u32 %v1922_v41, %v1921_v34  ;;  %v1905_v43 = vor.u32 %v1904_v33, %v1903_v37 }
 0x580   : > { %v1911_v40 = vld [vmem:[#allocation6 + $0x80] ss:$16 sm:$0x3]  ;;  %v2028_v58 = vld [vmem:[#allocation6 + $0x2] ss:$16 sm:$0xc] }
 0x581   : > { %v2035_v42 = vld [vmem:[#allocation6 + $0x82] ss:$16 sm:$0x3]  ;;  %v2092_v32 = vld [vmem:[#allocation6 + $0x3] ss:$16 sm:$0xc]  ;;  %v2029_v12 = vor.u32 %v2028_v58, %v2027_v48 }
 0x582   : > { %v1880_v21 = vpop.permute.xlu1 %1879  ;;  %v1872_v24 = vpop.permute.xlu0 %1871  ;;  %v1930_v36 = vld [vmem:[#allocation6 + $0x81] ss:$16 sm:$0xc]  ;;  %v1912_v44 = vld [vmem:[#allocation6 + $0x80] ss:$16 sm:$0xc]  ;;  %v2093_v20 = vor.u32 %v2092_v32, %v2091_v0 }
 0x583   : > { %1885 = vst.msk [vmem:[#allocation6 + $0xd0] sm:$0xff] %vm571_vm8, %v1880_v21  ;;  %1877 = vst.msk [vmem:[#allocation6 + $0xc0] sm:$0xff] %vm571_vm8, %v1872_v24  ;;  %v1931_v30 = vor.u32 %v1930_v36, %v1929_v35  ;;  %v1913_v23 = vor.u32 %v1912_v44, %v1911_v40  ;;  %v2036_v63 = vld [vmem:[#allocation6 + $0x82] ss:$16 sm:$0xc] }
 0x584   : > { %v2100_v46 = vld [vmem:[#allocation6 + $0x83] ss:$16 sm:$0xc]  ;;  %v2037_v6 = vor.u32 %v2036_v63, %v2035_v42  ;;  %v2156_v33 = vld [vmem:[#allocation6 + $0x4] ss:$16 sm:$0xc] }
 0x585   : > { %v2099_v60 = vld [vmem:[#allocation6 + $0x83] ss:$16 sm:$0x3]  ;;  %v2163_v36 = vld [vmem:[#allocation6 + $0x84] ss:$16 sm:$0x3] }
 0x586   : > { %v1836_v25 = vpop.permute.xlu1 %1835  ;;  %v1828_v28 = vpop.permute.xlu0 %1827  ;;  %v1924_v50 = vld [vmem:[#allocation6 + $0x1] ss:$16 sm:$0x30]  ;;  %v1906_v11 = vld [vmem:[#allocation6] ss:$16 sm:$0x30]  ;;  %v2101_v8 = vor.u32 %v2100_v46, %v2099_v60 }
 0x587   : > { %1841 = vst.msk [vmem:[#allocation6 + $0x70] sm:$0xff] %vm571_vm8, %v1836_v25  ;;  %1833 = vst.msk [vmem:[#allocation6 + $0x60] sm:$0xff] %vm571_vm8, %v1828_v28  ;;  %v1925_v51 = vor.u32 %v1924_v50, %v1923_v26  ;;  %v1907_v56 = vor.u32 %v1906_v11, %v1905_v43  ;;  %v2030_v4 = vld [vmem:[#allocation6 + $0x2] ss:$16 sm:$0x30] }
 0x588   : > { %v2094_v7 = vld [vmem:[#allocation6 + $0x3] ss:$16 sm:$0x30]  ;;  %v2031_v24 = vor.u32 %v2030_v4, %v2029_v12  ;;  %v2164_v37 = vld [vmem:[#allocation6 + $0x84] ss:$16 sm:$0xc] }
 0x589   : > { %v2228_v40 = vld [vmem:[#allocation6 + $0x85] ss:$16 sm:$0xc]  ;;  %v2291_v60 = vld [vmem:[#allocation6 + $0x86] ss:$16 sm:$0x3] }
 0x58a   : > { %v1896_v29 = vpop.permute.xlu1 %1895  ;;  %v1888_v31 = vpop.permute.xlu0 %1887  ;;  %v1932_v18 = vld [vmem:[#allocation6 + $0x81] ss:$16 sm:$0x30]  ;;  %v1914_v22 = vld [vmem:[#allocation6 + $0x80] ss:$16 sm:$0x30] }
 0x58b   : > { %1901 = vst.msk [vmem:[#allocation6 + $0xf0] sm:$0xff] %vm571_vm8, %v1896_v29  ;;  %1893 = vst.msk [vmem:[#allocation6 + $0xe0] sm:$0xff] %vm571_vm8, %v1888_v31  ;;  %v1933_v53 = vor.u32 %v1932_v18, %v1931_v30  ;;  %v1915_v57 = vor.u32 %v1914_v22, %v1913_v23  ;;  %v2038_v62 = vld [vmem:[#allocation6 + $0x82] ss:$16 sm:$0x30]  ;;  %v2095_v31 = vor.u32 %v2094_v7, %v2093_v20  ;;  %v2363_v4 = vld [vmem:[#allocation7 + $0x38] sm:$0xff] }
 0x58c   : > { %v2102_v1 = vld [vmem:[#allocation6 + $0x83] ss:$16 sm:$0x30]  ;;  %v2039_v17 = vor.u32 %v2038_v62, %v2037_v6  ;;  %v2220_v18 = vld [vmem:[#allocation6 + $0x5] ss:$16 sm:$0xc] }
 0x58d   : > { %v2103_v21 = vor.u32 %v2102_v1, %v2101_v8  ;;  %v2171_v11 = vld [vmem:[#allocation7 + $0x20] sm:$0xff] }
 0x58e   : > { %v1798_v61 = vpop.permute.xlu1 %1797  ;;  %v1790_v14 = vpop.permute.xlu0 %1789  ;;  %v1926_v49 = vld [vmem:[#allocation6 + $0x1] ss:$16 sm:$0xc0]  ;;  %v1908_v54 = vld [vmem:[#allocation6] ss:$16 sm:$0xc0] }
 0x58f   : > { %1802 = vst.msk [vmem:[#allocation6 + $0x28] sm:$0xff] %vm571_vm8, %v1798_v61  ;;  %1794 = vst.msk [vmem:[#allocation6 + $0x18] sm:$0xff] %vm571_vm8, %v1790_v14  ;;  %v1927_v38 = vor.u32 %v1926_v49, %v1925_v51  ;;  %v1909_v59 = vor.u32 %v1908_v54, %v1907_v56  ;;  %v2032_v25 = vld [vmem:[#allocation6 + $0x2] ss:$16 sm:$0xc0]  ;;  %v2235_v61 = vld [vmem:[#allocation7 + $0x28] sm:$0xff]  ;;  %v2165_v51 = vor.u32 %v2164_v37, %v2163_v36 }
 0x590   : > { %v2096_v28 = vld [vmem:[#allocation6 + $0x3] ss:$16 sm:$0xc0]  ;;  %v2033_v44 = vor.u32 %v2032_v25, %v2031_v24  ;;  %v2155_v14 = vld [vmem:[#allocation6 + $0x4] ss:$16 sm:$0x3] }
 0x591   : > { %v2097_v50 = vor.u32 %v2096_v28, %v2095_v31  ;;  %v2227_v22 = vld [vmem:[#allocation6 + $0x85] ss:$16 sm:$0x3]  ;;  %v2166_v26 = vld [vmem:[#allocation6 + $0x84] ss:$16 sm:$0x30]  ;;  %v2157_v63 = vor.u32 %v2156_v33, %v2155_v14 }
 0x592   : > { %v1850_v27 = vpop.permute.xlu1 %1849  ;;  %v1806_v19 = vpop.permute.xlu0 %1805  ;;  %v1934_v55 = vld [vmem:[#allocation6 + $0x81] ss:$16 sm:$0xc0]  ;;  %v1916_v47 = vld [vmem:[#allocation6 + $0x80] ss:$16 sm:$0xc0]  ;;  %v2229_v56 = vor.u32 %v2228_v40, %v2227_v22 }
 0x593   : > { %1854 = vst.msk [vmem:[#allocation6 + $0x98] sm:$0xff] %vm571_vm8, %v1850_v27  ;;  %1810 = vst.msk [vmem:[#allocation6 + $0x38] sm:$0xff] %vm571_vm8, %v1806_v19  ;;  %v1935_v45 = vor.u32 %v1934_v55, %v1933_v53  ;;  %v1917_v52 = vor.u32 %v1916_v47, %v1915_v57  ;;  %v2040_v13 = vld [vmem:[#allocation6 + $0x82] ss:$16 sm:$0xc0]  ;;  %v2167_v19 = vor.u32 %v2166_v26, %v2165_v51 }
 0x594   : > { %v2104_v16 = vld [vmem:[#allocation6 + $0x83] ss:$16 sm:$0xc0]  ;;  %v2041_v29 = vor.u32 %v2040_v13, %v2039_v17  ;;  %v2219_v30 = vld [vmem:[#allocation6 + $0x5] ss:$16 sm:$0x3] }
 0x595   : > { %v1936_v2 = vpack.c.bf16 %v1935_v45, %v1927_v38  ;;  %v1918_v3 = vpack.c.bf16 %v1917_v52, %v1909_v59  ;;  %v2105_v41 = vor.u32 %v2104_v16, %v2103_v21  ;;  %v2230_v43 = vld [vmem:[#allocation6 + $0x85] ss:$16 sm:$0x30]  ;;  %v2158_v54 = vld [vmem:[#allocation6 + $0x4] ss:$16 sm:$0x30]  ;;  %v2221_v55 = vor.u32 %v2220_v18, %v2219_v30 }
 0x596   : > { %v1866_v9 = vpop.permute.xlu1 %1865  ;;  %v1858_v10 = vpop.permute.xlu0 %1857  ;;  %v2042_v23 = vpack.c.bf16 %v2041_v29, %v2033_v44  ;;  %v2222_v53 = vld [vmem:[#allocation6 + $0x5] ss:$16 sm:$0x30]  ;;  %v2168_v46 = vld [vmem:[#allocation6 + $0x84] ss:$16 sm:$0xc0]  ;;  %v2231_v47 = vor.u32 %v2230_v43, %v2229_v56  ;;  %v2159_v42 = vor.u32 %v2158_v54, %v2157_v63 }
 0x597   : > { %1870 = vst.msk [vmem:[#allocation6 + $0xb8] sm:$0xff] %vm571_vm8, %v1866_v9  ;;  %1862 = vst.msk [vmem:[#allocation6 + $0xa8] sm:$0xff] %vm571_vm8, %v1858_v10  ;;  %3236 = vmatmul.mubr.msk.bf16.vlgmr.msra.gmra.mrb[0].mxu0 %vm571_vm8, %v1936_v2  ;;  %3242 = vmatmul.mubr.msk.bf16.vlgmr.msra.gmra.mrb[0].mxu1 %vm571_vm8, %v1918_v3  ;;  %v2106_v49 = vpack.c.bf16 %v2105_v41, %v2097_v50  ;;  %v2232_v27 = vld [vmem:[#allocation6 + $0x85] ss:$16 sm:$0xc0]  ;;  %v2169_v59 = vor.u32 %v2168_v46, %v2167_v19  ;;  %v2491_v54 = vld [vmem:[#allocation7 + $0x48] sm:$0xff] }
 0x598   : > { %3246 = vmatpush3.bf16.msra.mxu0 %v2043_v15  ;;  %3252 = vmatpush3.bf16.msra.mxu1 %v2107_v39  ;;  %v2160_v38 = vld [vmem:[#allocation6 + $0x4] ss:$16 sm:$0xc0]  ;;  %v2224_v45 = vld [vmem:[#allocation6 + $0x5] ss:$16 sm:$0xc0]  ;;  %v2223_v52 = vor.u32 %v2222_v53, %v2221_v55  ;;  %v2233_v15 = vor.u32 %v2232_v27, %v2231_v47 }
 0x599   : > { %3247 = vmatprep.mubr.msk.bf16.mxu0 %vm3625_vm1, %v3622_v5  ;;  %3253 = vmatprep.mubr.msk.bf16.mxu1 %vm3625_vm1, %v3622_v5  ;;  %v2284_v39 = vld [vmem:[#allocation6 + $0x6] ss:$16 sm:$0xc]  ;;  %v2356_v0 = vld [vmem:[#allocation6 + $0x87] ss:$16 sm:$0xc]  ;;  %v2161_v1 = vor.u32 %v2160_v38, %v2159_v42 }
 0x59a   : > { %v1822_v34 = vpop.permute.xlu1 %1821  ;;  %v1814_v35 = vpop.permute.xlu0 %1813  ;;  %3257 = vmatprep.subr.bf16.mxu0 %v3622_v5  ;;  %3263 = vmatprep.subr.bf16.mxu1 %v3622_v5  ;;  %v2292_v62 = vld [vmem:[#allocation6 + $0x86] ss:$16 sm:$0xc]  ;;  %v2225_v2 = vor.u32 %v2224_v45, %v2223_v52  ;;  %v2348_v8 = vld [vmem:[#allocation6 + $0x7] ss:$16 sm:$0xc] }
 0x59b   : > { %1826 = vst.msk [vmem:[#allocation6 + $0x58] sm:$0xff] %vm571_vm8, %v1822_v34  ;;  %1818 = vst.msk [vmem:[#allocation6 + $0x48] sm:$0xff] %vm571_vm8, %v1814_v35  ;;  %v2299_v3 = vld [vmem:[#allocation7 + $0x30] sm:$0xff]  ;;  %v2170_v13 = vpack.c.bf16 %v2169_v59, %v2161_v1  ;;  %v2293_v20 = vor.u32 %v2292_v62, %v2291_v60  ;;  %v2412_v14 = vld [vmem:[#allocation6 + $0x8] ss:$16 sm:$0xc] }
 0x59c   : > { %v2283_v6 = vld [vmem:[#allocation6 + $0x6] ss:$16 sm:$0x3]  ;;  %v2347_v9 = vld [vmem:[#allocation6 + $0x7] ss:$16 sm:$0x3]  ;;  %v2234_v16 = vpack.c.bf16 %v2233_v15, %v2225_v2 }
 0x59d   : > { %v2294_v7 = vld [vmem:[#allocation6 + $0x86] ss:$16 sm:$0x30]  ;;  %v2355_v10 = vld [vmem:[#allocation6 + $0x87] ss:$16 sm:$0x3]  ;;  %v2285_v29 = vor.u32 %v2284_v39, %v2283_v6  ;;  %v2349_v34 = vor.u32 %v2348_v8, %v2347_v9 }
 0x59e   : > { %v1882_v57 = vpop.permute.xlu1 %1881  ;;  %v1874_v58 = vpop.permute.xlu0 %1873  ;;  %v2358_v12 = vld [vmem:[#allocation6 + $0x87] ss:$16 sm:$0x30]  ;;  %v2286_v17 = vld [vmem:[#allocation6 + $0x6] ss:$16 sm:$0x30]  ;;  %v2357_v24 = vor.u32 %v2356_v0, %v2355_v10  ;;  %v2295_v33 = vor.u32 %v2294_v7, %v2293_v20 }
 0x59f   : > { %1886 = vst.msk [vmem:[#allocation6 + $0xd8] sm:$0xff] %vm571_vm8, %v1882_v57  ;;  %1878 = vst.msk [vmem:[#allocation6 + $0xc8] sm:$0xff] %vm571_vm8, %v1874_v58  ;;  %3248 = vmatmul.mubr.msk.bf16.vlgmr.msra.gmra.mrb[4].mxu0 %vm571_vm8, %v2042_v23  ;;  %3254 = vmatmul.mubr.msk.bf16.vlgmr.msra.gmra.mrb[4].mxu1 %vm571_vm8, %v2106_v49  ;;  %v2296_v21 = vld [vmem:[#allocation6 + $0x86] ss:$16 sm:$0xc0]  ;;  %v2287_v36 = vor.u32 %v2286_v17, %v2285_v29  ;;  %v2619_v10 = vld [vmem:[#allocation7 + $0x58] sm:$0xff] }
 0x5a0   : > { %3258 = vmatpush3.bf16.msra.mxu0 %v2171_v11  ;;  %3264 = vmatpush3.bf16.msra.mxu1 %v2235_v61  ;;  %v2350_v31 = vld [vmem:[#allocation6 + $0x7] ss:$16 sm:$0x30]  ;;  %v2359_v35 = vor.u32 %v2358_v12, %v2357_v24  ;;  %v2288_v37 = vld [vmem:[#allocation6 + $0x6] ss:$16 sm:$0xc0]  ;;  %v2297_v44 = vor.u32 %v2296_v21, %v2295_v33 }
 0x5a1   : > { %3259 = vmatprep.mubr.msk.bf16.mxu0 %vm3625_vm1, %v3622_v5  ;;  %3265 = vmatprep.mubr.msk.bf16.mxu1 %vm3625_vm1, %v3622_v5  ;;  %v2360_v41 = vld [vmem:[#allocation6 + $0x87] ss:$16 sm:$0xc0]  ;;  %v2351_v50 = vor.u32 %v2350_v31, %v2349_v34  ;;  %v2411_v61 = vld [vmem:[#allocation6 + $0x8] ss:$16 sm:$0x3]  ;;  %v2289_v43 = vor.u32 %v2288_v37, %v2287_v36 }
 0x5a2   : > { %v1838_v48 = vpop.permute.xlu1 %1837  ;;  %v1830_v32 = vpop.permute.xlu0 %1829  ;;  %3269 = vmatprep.subr.bf16.mxu0 %v3622_v5  ;;  %3275 = vmatprep.subr.bf16.mxu1 %v3622_v5  ;;  %v2352_v40 = vld [vmem:[#allocation6 + $0x7] ss:$16 sm:$0xc0]  ;;  %v2361_v11 = vor.u32 %v2360_v41, %v2359_v35  ;;  %v2419_v18 = vld [vmem:[#allocation6 + $0x88] ss:$16 sm:$0x3]  ;;  %v2413_v47 = vor.u32 %v2412_v14, %v2411_v61 }
 0x5a3   : > { %1842 = vst.msk [vmem:[#allocation6 + $0x78] sm:$0xff] %vm571_vm8, %v1838_v48  ;;  %1834 = vst.msk [vmem:[#allocation6 + $0x68] sm:$0xff] %vm571_vm8, %v1830_v32  ;;  %v2483_v22 = vld [vmem:[#allocation6 + $0x89] ss:$16 sm:$0x3]  ;;  %v2353_v23 = vor.u32 %v2352_v40, %v2351_v50  ;;  %v2427_v49 = vld [vmem:[#allocation7 + $0x40] sm:$0xff]  ;;  %v2298_v58 = vpack.c.bf16 %v2297_v44, %v2289_v43 }
 0x5a4   : > { %v2420_v26 = vld [vmem:[#allocation6 + $0x88] ss:$16 sm:$0xc]  ;;  %v2484_v30 = vld [vmem:[#allocation6 + $0x89] ss:$16 sm:$0xc] }
 0x5a5   : > { %v2475_v51 = vld [vmem:[#allocation6 + $0x9] ss:$16 sm:$0x3]  ;;  %v2362_v63 = vpack.c.bf16 %v2361_v11, %v2353_v23  ;;  %v2414_v46 = vld [vmem:[#allocation6 + $0x8] ss:$16 sm:$0x30]  ;;  %v2421_v27 = vor.u32 %v2420_v26, %v2419_v18  ;;  %v2485_v55 = vor.u32 %v2484_v30, %v2483_v22 }
 0x5a6   : > { %v1898_v25 = vpop.permute.xlu1 %1897  ;;  %v1890_v28 = vpop.permute.xlu0 %1889  ;;  %v2476_v53 = vld [vmem:[#allocation6 + $0x9] ss:$16 sm:$0xc]  ;;  %v2422_v56 = vld [vmem:[#allocation6 + $0x88] ss:$16 sm:$0x30]  ;;  %v2415_v15 = vor.u32 %v2414_v46, %v2413_v47 }
 0x5a7   : > { %1902 = vst.msk [vmem:[#allocation6 + $0xf8] sm:$0xff] %vm571_vm8, %v1898_v25  ;;  %1894 = vst.msk [vmem:[#allocation6 + $0xe8] sm:$0xff] %vm571_vm8, %v1890_v28  ;;  %3260 = vmatmul.mubr.msk.bf16.vlgmr.msra.gmra.mrb[8].mxu0 %vm571_vm8, %v2170_v13  ;;  %3266 = vmatmul.mubr.msk.bf16.vlgmr.msra.gmra.mrb[8].mxu1 %vm571_vm8, %v2234_v16  ;;  %v2486_v57 = vld [vmem:[#allocation6 + $0x89] ss:$16 sm:$0x30]  ;;  %v2423_v45 = vor.u32 %v2422_v56, %v2421_v27  ;;  %v2477_v59 = vor.u32 %v2476_v53, %v2475_v51  ;;  %v2555_v9 = vld [vmem:[#allocation7 + $0x50] sm:$0xff] }
 0x5a8   : > { %3270 = vmatpush3.bf16.msra.mxu0 %v2299_v3  ;;  %3276 = vmatpush3.bf16.msra.mxu1 %v2363_v4  ;;  %v2478_v19 = vld [vmem:[#allocation6 + $0x9] ss:$16 sm:$0x30]  ;;  %v2487_v52 = vor.u32 %v2486_v57, %v2485_v55  ;;  %v2539_v0 = vld [vmem:[#allocation6 + $0xa] ss:$16 sm:$0x3] }
 0x5a9   : > { %3271 = vmatprep.mubr.msk.bf16.mxu0 %vm3625_vm1, %v3622_v5  ;;  %3277 = vmatprep.mubr.msk.bf16.mxu1 %vm3625_vm1, %v3622_v5  ;;  %v2479_v60 = vor.u32 %v2478_v19, %v2477_v59  ;;  %v2540_v1 = vld [vmem:[#allocation6 + $0xa] ss:$16 sm:$0xc]  ;;  %v2611_v4 = vld [vmem:[#allocation6 + $0x8b] ss:$16 sm:$0x3] }
 0x5aa   : > { %3281 = vmatprep.subr.bf16.mxu0 %v3622_v5  ;;  %3287 = vmatprep.subr.bf16.mxu1 %v3622_v5  ;;  %v2416_v39 = vld [vmem:[#allocation6 + $0x8] ss:$16 sm:$0xc0]  ;;  %v2480_v48 = vld [vmem:[#allocation6 + $0x9] ss:$16 sm:$0xc0]  ;;  %v2541_v31 = vor.u32 %v2540_v1, %v2539_v0 }
 0x5ab   : > { %v2547_v2 = vld [vmem:[#allocation6 + $0x8a] ss:$16 sm:$0x3]  ;;  %v2612_v6 = vld [vmem:[#allocation6 + $0x8b] ss:$16 sm:$0xc]  ;;  %v2417_v7 = vor.u32 %v2416_v39, %v2415_v15  ;;  %v2481_v8 = vor.u32 %v2480_v48, %v2479_v60 }
 0x5ac   : > { %v2548_v3 = vld [vmem:[#allocation6 + $0x8a] ss:$16 sm:$0xc]  ;;  %v2603_v12 = vld [vmem:[#allocation6 + $0xb] ss:$16 sm:$0x3]  ;;  %v2613_v29 = vor.u32 %v2612_v6, %v2611_v4 }
 0x5ad   : > { %v2604_v13 = vld [vmem:[#allocation6 + $0xb] ss:$16 sm:$0xc]  ;;  %v2550_v16 = vld [vmem:[#allocation6 + $0x8a] ss:$16 sm:$0x30]  ;;  %v2549_v25 = vor.u32 %v2548_v3, %v2547_v2 }
 0x5ae   : > { %v2424_v42 = vld [vmem:[#allocation6 + $0x88] ss:$16 sm:$0xc0]  ;;  %v2488_v38 = vld [vmem:[#allocation6 + $0x89] ss:$16 sm:$0xc0]  ;;  %v2605_v35 = vor.u32 %v2604_v13, %v2603_v12 }
 0x5af   : > { %3272 = vmatmul.mubr.msk.bf16.vlgmr.msra.gmra.mrb[12].mxu0 %vm571_vm8, %v2298_v58  ;;  %3278 = vmatmul.mubr.msk.bf16.vlgmr.msra.gmra.mrb[12].mxu1 %vm571_vm8, %v2362_v63  ;;  %v2425_v32 = vor.u32 %v2424_v42, %v2423_v45  ;;  %v2489_v62 = vor.u32 %v2488_v38, %v2487_v52  ;;  %v2614_v17 = vld [vmem:[#allocation6 + $0x8b] ss:$16 sm:$0x30]  ;;  %v2542_v24 = vld [vmem:[#allocation6 + $0xa] ss:$16 sm:$0x30]  ;;  %v2551_v34 = vor.u32 %v2550_v16, %v2549_v25 }
 0x5b0   : > { %3282 = vmatpush3.bf16.msra.mxu0 %v2427_v49  ;;  %3288 = vmatpush3.bf16.msra.mxu1 %v2491_v54  ;;  %v2606_v28 = vld [vmem:[#allocation6 + $0xb] ss:$16 sm:$0x30]  ;;  %v2552_v41 = vld [vmem:[#allocation6 + $0x8a] ss:$16 sm:$0xc0]  ;;  %v2615_v36 = vor.u32 %v2614_v17, %v2613_v29  ;;  %v2543_v37 = vor.u32 %v2542_v24, %v2541_v31 }
 0x5b1   : > { %3283 = vmatprep.mubr.msk.bf16.mxu0 %vm3625_vm1, %v3622_v5  ;;  %3289 = vmatprep.mubr.msk.bf16.mxu1 %vm3625_vm1, %v3622_v5  ;;  %v2426_v20 = vpack.c.bf16 %v2425_v32, %v2417_v7  ;;  %v2490_v21 = vpack.c.bf16 %v2489_v62, %v2481_v8  ;;  %v2616_v33 = vld [vmem:[#allocation6 + $0x8b] ss:$16 sm:$0xc0]  ;;  %v2544_v40 = vld [vmem:[#allocation6 + $0xa] ss:$16 sm:$0xc0]  ;;  %v2553_v50 = vor.u32 %v2552_v41, %v2551_v34 }
 0x5b2   : > { %3293 = vmatprep.subr.bf16.mxu0 %v3622_v5  ;;  %3299 = vmatprep.subr.bf16.mxu1 %v3622_v5  ;;  %v2608_v44 = vld [vmem:[#allocation6 + $0xb] ss:$16 sm:$0xc0]  ;;  %v2607_v11 = vor.u32 %v2606_v28, %v2605_v35  ;;  %v2617_v61 = vor.u32 %v2616_v33, %v2615_v36  ;;  %v2667_v14 = vld [vmem:[#allocation6 + $0xc] ss:$16 sm:$0x3]  ;;  %v2545_v23 = vor.u32 %v2544_v40, %v2543_v37 }
 0x5b3   : > { %v2668_v18 = vld [vmem:[#allocation6 + $0xc] ss:$16 sm:$0xc]  ;;  %v2739_v30 = vld [vmem:[#allocation6 + $0x8d] ss:$16 sm:$0x3] }
 0x5b4   : > { %v2675_v22 = vld [vmem:[#allocation6 + $0x8c] ss:$16 sm:$0x3]  ;;  %v2740_v43 = vld [vmem:[#allocation6 + $0x8d] ss:$16 sm:$0xc]  ;;  %v2609_v49 = vor.u32 %v2608_v44, %v2607_v11  ;;  %v2554_v63 = vpack.c.bf16 %v2553_v50, %v2545_v23  ;;  %v2669_v42 = vor.u32 %v2668_v18, %v2667_v14 }
 0x5b5   : > { %v2676_v26 = vld [vmem:[#allocation6 + $0x8c] ss:$16 sm:$0xc]  ;;  %v2683_v54 = vld [vmem:[#allocation7 + $0x60] sm:$0xff]  ;;  %v2741_v47 = vor.u32 %v2740_v43, %v2739_v30 }
 0x5b6   : > { %v2747_v51 = vld [vmem:[#allocation7 + $0x68] sm:$0xff]  ;;  %v2618_v46 = vpack.c.bf16 %v2617_v61, %v2609_v49  ;;  %v2677_v19 = vor.u32 %v2676_v26, %v2675_v22  ;;  %v2875_v12 = vld [vmem:[#allocation7 + $0x78] sm:$0xff] }
 0x5b7   : > { %3284 = vmatmul.mubr.msk.bf16.vlgmr.msra.gmra.mrb[16].mxu0 %vm571_vm8, %v2426_v20  ;;  %3290 = vmatmul.mubr.msk.bf16.vlgmr.msra.gmra.mrb[16].mxu1 %vm571_vm8, %v2490_v21  ;;  %v2678_v53 = vld [vmem:[#allocation6 + $0x8c] ss:$16 sm:$0x30]  ;;  %v2731_v56 = vld [vmem:[#allocation6 + $0xd] ss:$16 sm:$0x3] }
 0x5b8   : > { %3294 = vmatpush3.bf16.msra.mxu0 %v2555_v9  ;;  %3300 = vmatpush3.bf16.msra.mxu1 %v2619_v10  ;;  %v2732_v57 = vld [vmem:[#allocation6 + $0xd] ss:$16 sm:$0xc]  ;;  %v2670_v27 = vld [vmem:[#allocation6 + $0xc] ss:$16 sm:$0x30]  ;;  %v2679_v59 = vor.u32 %v2678_v53, %v2677_v19 }
 0x5b9   : > { %3295 = vmatprep.mubr.msk.bf16.mxu0 %vm3625_vm1, %v3622_v5  ;;  %3301 = vmatprep.mubr.msk.bf16.mxu1 %vm3625_vm1, %v3622_v5  ;;  %v2742_v58 = vld [vmem:[#allocation6 + $0x8d] ss:$16 sm:$0x30]  ;;  %v2680_v38 = vld [vmem:[#allocation6 + $0x8c] ss:$16 sm:$0xc0]  ;;  %v2733_v52 = vor.u32 %v2732_v57, %v2731_v56  ;;  %v2671_v39 = vor.u32 %v2670_v27, %v2669_v42 }
 0x5ba   : > { %3305 = vmatprep.subr.bf16.mxu0 %v3622_v5  ;;  %3311 = vmatprep.subr.bf16.mxu1 %v3622_v5  ;;  %v2734_v55 = vld [vmem:[#allocation6 + $0xd] ss:$16 sm:$0x30]  ;;  %v2743_v15 = vor.u32 %v2742_v58, %v2741_v47  ;;  %v2672_v48 = vld [vmem:[#allocation6 + $0xc] ss:$16 sm:$0xc0]  ;;  %v2681_v60 = vor.u32 %v2680_v38, %v2679_v59 }
 0x5bb   : > { %v2744_v45 = vld [vmem:[#allocation6 + $0x8d] ss:$16 sm:$0xc0]  ;;  %v2735_v62 = vor.u32 %v2734_v55, %v2733_v52  ;;  %v2795_v1 = vld [vmem:[#allocation6 + $0xe] ss:$16 sm:$0x3]  ;;  %v2673_v8 = vor.u32 %v2672_v48, %v2671_v39 }
 0x5bc   : > { %v2736_v32 = vld [vmem:[#allocation6 + $0xd] ss:$16 sm:$0xc0]  ;;  %v2745_v0 = vor.u32 %v2744_v45, %v2743_v15  ;;  %v2796_v2 = vld [vmem:[#allocation6 + $0xe] ss:$16 sm:$0xc] }
 0x5bd   : > { %v2803_v3 = vld [vmem:[#allocation6 + $0x8e] ss:$16 sm:$0x3]  ;;  %v2867_v6 = vld [vmem:[#allocation6 + $0x8f] ss:$16 sm:$0x3]  ;;  %v2737_v9 = vor.u32 %v2736_v32, %v2735_v62  ;;  %v2682_v21 = vpack.c.bf16 %v2681_v60, %v2673_v8  ;;  %v2797_v41 = vor.u32 %v2796_v2, %v2795_v1 }
 0x5be   : > { %v2804_v4 = vld [vmem:[#allocation6 + $0x8e] ss:$16 sm:$0xc]  ;;  %v2868_v7 = vld [vmem:[#allocation6 + $0x8f] ss:$16 sm:$0xc] }
 0x5bf   : > { %3296 = vmatmul.mubr.msk.bf16.vlgmr.msra.gmra.mrb[20].mxu0 %vm571_vm8, %v2554_v63  ;;  %3302 = vmatmul.mubr.msk.bf16.vlgmr.msra.gmra.mrb[20].mxu1 %vm571_vm8, %v2618_v46  ;;  %v2811_v10 = vld [vmem:[#allocation7 + $0x70] sm:$0xff]  ;;  %v2806_v13 = vld [vmem:[#allocation6 + $0x8e] ss:$16 sm:$0x30]  ;;  %v2746_v24 = vpack.c.bf16 %v2745_v0, %v2737_v9  ;;  %v2805_v28 = vor.u32 %v2804_v4, %v2803_v3  ;;  %v2869_v31 = vor.u32 %v2868_v7, %v2867_v6 }
 0x5c0   : > { %3306 = vmatpush3.bf16.msra.mxu0 %v2683_v54  ;;  %3312 = vmatpush3.bf16.msra.mxu1 %v2747_v51  ;;  %v2859_v16 = vld [vmem:[#allocation6 + $0xf] ss:$16 sm:$0x3]  ;;  %v2798_v25 = vld [vmem:[#allocation6 + $0xe] ss:$16 sm:$0x30] }
 0x5c1   : > { %3307 = vmatprep.mubr.msk.bf16.mxu0 %vm3625_vm1, %v3622_v5  ;;  %3313 = vmatprep.mubr.msk.bf16.mxu1 %vm3625_vm1, %v3622_v5  ;;  %v2860_v17 = vld [vmem:[#allocation6 + $0xf] ss:$16 sm:$0xc]  ;;  %v2808_v29 = vld [vmem:[#allocation6 + $0x8e] ss:$16 sm:$0xc0]  ;;  %v2807_v35 = vor.u32 %v2806_v13, %v2805_v28  ;;  %v2799_v40 = vor.u32 %v2798_v25, %v2797_v41 }
 0x5c2   : > { %3317 = vmatprep.subr.bf16.mxu0 %v3622_v5  ;;  %3323 = vmatprep.subr.bf16.mxu1 %v3622_v5  ;;  %v2870_v20 = vld [vmem:[#allocation6 + $0x8f] ss:$16 sm:$0x30]  ;;  %v2861_v36 = vor.u32 %v2860_v17, %v2859_v16  ;;  %v2800_v44 = vld [vmem:[#allocation6 + $0xe] ss:$16 sm:$0xc0] }
 0x5c3   : > { %v2862_v33 = vld [vmem:[#allocation6 + $0xf] ss:$16 sm:$0x30]  ;;  %v2871_v37 = vor.u32 %v2870_v20, %v2869_v31  ;;  %v2809_v11 = vor.u32 %v2808_v29, %v2807_v35  ;;  %v2801_v18 = vor.u32 %v2800_v44, %v2799_v40 }
 0x5c4   : > { %v2872_v34 = vld [vmem:[#allocation6 + $0x8f] ss:$16 sm:$0xc0]  ;;  %v2863_v61 = vor.u32 %v2862_v33, %v2861_v36 }
 0x5c5   : > { %v2864_v50 = vld [vmem:[#allocation6 + $0xf] ss:$16 sm:$0xc0]  ;;  %v2873_v14 = vor.u32 %v2872_v34, %v2871_v37  ;;  %v2810_v26 = vpack.c.bf16 %v2809_v11, %v2801_v18 }
 0x5c6   : > { %v2865_v22 = vor.u32 %v2864_v50, %v2863_v61 }
 0x5c7   : > { %3308 = vmatmul.mubr.msk.bf16.vlgmr.msra.gmra.mrb[24].mxu0 %vm571_vm8, %v2682_v21  ;;  %3314 = vmatmul.mubr.msk.bf16.vlgmr.msra.gmra.mrb[24].mxu1 %vm571_vm8, %v2746_v24 }
 0x5c8   : > { %3318 = vmatpush3.bf16.msra.mxu0 %v2811_v10  ;;  %3324 = vmatpush3.bf16.msra.mxu1 %v2875_v12  ;;  %v2874_v30 = vpack.c.bf16 %v2873_v14, %v2865_v22 }
 0x5c9   : > { %3319 = vmatprep.mubr.msk.bf16.mxu0 %vm3625_vm1, %v3622_v5  ;;  %3325 = vmatprep.mubr.msk.bf16.mxu1 %vm3625_vm1, %v3622_v5 }
 0x5cf   : > { %3320 = vmatmul.mubr.msk.bf16.vlgmr.msra.gmra.mrb[28].mxu0 %vm571_vm8, %v2810_v26  ;;  %3326 = vmatmul.mubr.msk.bf16.vlgmr.msra.gmra.mrb[28].mxu1 %vm571_vm8, %v2874_v30 }
 0x66a   : > { %v1975_v43 = vpop.f32.mrb[0].mxu0  ;;  %v2019_v23 = vpop.f32.mrb[0].mxu1 }
 0x66b   : > { %v2020_v49 = vadd.f32 %v2019_v23, %v1975_v43  ;;  %v3237_v54 = vpop.f32.mrb[1].mxu0  ;;  %v3243_v51 = vpop.f32.mrb[1].mxu1 }
 0x66c   : > { %v1978_v53 = vpop.f32.mrb[2].mxu0  ;;  %v2022_v56 = vpop.f32.mrb[2].mxu1 }
 0x66d   : > { %v2023_v57 = vadd.f32 %v2022_v56, %v1978_v53  ;;  %v3238_v5 = vpop.f32.mrb[3].mxu0  ;;  %v3244_v58 = vpop.f32.mrb[3].mxu1 }
 0x672   : > { %v2081_v63 = vpop.f32.mrb[4].mxu0  ;;  %v2145_v46 = vpop.f32.mrb[4].mxu1 }
 0x673   : > { %v2088_v27 = vadd.f32 %v2081_v63, %v2020_v49  ;;  %v3249_v19 = vpop.f32.mrb[5].mxu0  ;;  %v3255_v55 = vpop.f32.mrb[5].mxu1 }
 0x674   : > { %v2084_v47 = vpop.f32.mrb[6].mxu0  ;;  %v2148_v42 = vpop.f32.mrb[6].mxu1 }
 0x675   : > { %v2152_v38 = vadd.f32 %v2145_v46, %v2088_v27  ;;  %v2089_v45 = vadd.f32 %v2084_v47, %v2023_v57  ;;  %v3250_v59 = vpop.f32.mrb[7].mxu0  ;;  %v3256_v52 = vpop.f32.mrb[7].mxu1 }
 0x677   : > { %v2153_v15 = vadd.f32 %v2148_v42, %v2089_v45 }
 0x67a   : > { %v2209_v39 = vpop.f32.mrb[8].mxu0  ;;  %v2273_v48 = vpop.f32.mrb[8].mxu1 }
 0x67b   : > { %v2216_v32 = vadd.f32 %v2209_v39, %v2152_v38  ;;  %v3261_v60 = vpop.f32.mrb[9].mxu0  ;;  %v3267_v62 = vpop.f32.mrb[9].mxu1 }
 0x67c   : > { %v2212_v0 = vpop.f32.mrb[10].mxu0  ;;  %v2276_v1 = vpop.f32.mrb[10].mxu1 }
 0x67d   : > { %v2280_v2 = vadd.f32 %v2273_v48, %v2216_v32  ;;  %v2217_v3 = vadd.f32 %v2212_v0, %v2153_v15  ;;  %v3262_v4 = vpop.f32.mrb[11].mxu0  ;;  %v3268_v6 = vpop.f32.mrb[11].mxu1  ;;  %v3195_v48 = vld [vmem:[%s4657_s7] ss:$0 sm:$0xff] }
 0x67f   : > { %v2281_v7 = vadd.f32 %v2276_v1, %v2217_v3 }
 0x682   : > { %v2337_v8 = vpop.f32.mrb[12].mxu0  ;;  %v2401_v9 = vpop.f32.mrb[12].mxu1 }
 0x683   : > { %v2344_v10 = vadd.f32 %v2337_v8, %v2280_v2  ;;  %v3273_v12 = vpop.f32.mrb[13].mxu0  ;;  %v3279_v13 = vpop.f32.mrb[13].mxu1 }
 0x684   : > { %v2340_v16 = vpop.f32.mrb[14].mxu0  ;;  %v2404_v17 = vpop.f32.mrb[14].mxu1 }
 0x685   : > { %v2408_v20 = vadd.f32 %v2401_v9, %v2344_v10  ;;  %v2345_v21 = vadd.f32 %v2340_v16, %v2281_v7  ;;  %v3274_v24 = vpop.f32.mrb[15].mxu0  ;;  %v3280_v25 = vpop.f32.mrb[15].mxu1 }
 0x687   : > { %v2409_v28 = vadd.f32 %v2404_v17, %v2345_v21 }
 0x68a   : > { %v2465_v29 = vpop.f32.mrb[16].mxu0  ;;  %v2529_v31 = vpop.f32.mrb[16].mxu1 }
 0x68b   : > { %v2472_v41 = vadd.f32 %v2465_v29, %v2408_v20  ;;  %v3285_v33 = vpop.f32.mrb[17].mxu0  ;;  %v3291_v34 = vpop.f32.mrb[17].mxu1 }
 0x68c   : > { %v2468_v35 = vpop.f32.mrb[18].mxu0  ;;  %v2532_v36 = vpop.f32.mrb[18].mxu1 }
 0x68d   : > { %v2536_v37 = vadd.f32 %v2529_v31, %v2472_v41  ;;  %v2473_v40 = vadd.f32 %v2468_v35, %v2409_v28  ;;  %v3286_v44 = vpop.f32.mrb[19].mxu0  ;;  %v3292_v50 = vpop.f32.mrb[19].mxu1 }
 0x68f   : > { %v2537_v11 = vadd.f32 %v2532_v36, %v2473_v40 }
 0x692   : > { %v2593_v61 = vpop.f32.mrb[20].mxu0  ;;  %v2657_v14 = vpop.f32.mrb[20].mxu1 }
 0x693   : > { %v2600_v18 = vadd.f32 %v2593_v61, %v2536_v37  ;;  %v3297_v22 = vpop.f32.mrb[21].mxu0  ;;  %v3303_v26 = vpop.f32.mrb[21].mxu1 }
 0x694   : > { %v2596_v30 = vpop.f32.mrb[22].mxu0  ;;  %v2660_v43 = vpop.f32.mrb[22].mxu1 }
 0x695   : > { %v2664_v23 = vadd.f32 %v2657_v14, %v2600_v18  ;;  %v2601_v49 = vadd.f32 %v2596_v30, %v2537_v11  ;;  %v3298_v54 = vpop.f32.mrb[23].mxu0  ;;  %v3304_v51 = vpop.f32.mrb[23].mxu1 }
 0x697   : > { %v2665_v53 = vadd.f32 %v2660_v43, %v2601_v49 }
 0x69a   : > { %v2721_v56 = vpop.f32.mrb[24].mxu0  ;;  %v2785_v57 = vpop.f32.mrb[24].mxu1 }
 0x69b   : > { %v2728_v5 = vadd.f32 %v2721_v56, %v2664_v23  ;;  %v3309_v58 = vpop.f32.mrb[25].mxu0  ;;  %v3315_v63 = vpop.f32.mrb[25].mxu1 }
 0x69c   : > { %v2724_v46 = vpop.f32.mrb[26].mxu0  ;;  %v2788_v27 = vpop.f32.mrb[26].mxu1 }
 0x69d   : > { %v2792_v19 = vadd.f32 %v2785_v57, %v2728_v5  ;;  %v2729_v55 = vadd.f32 %v2724_v46, %v2665_v53  ;;  %v3310_v47 = vpop.f32.mrb[27].mxu0  ;;  %v3316_v42 = vpop.f32.mrb[27].mxu1 }
 0x69f   : > { %v2793_v38 = vadd.f32 %v2788_v27, %v2729_v55 }
 0x6a2   : > { %v2849_v45 = vpop.f32.mrb[28].mxu0  ;;  %v2913_v59 = vpop.f32.mrb[28].mxu1 }
 0x6a3   : > { %v2856_v52 = vadd.f32 %v2849_v45, %v2792_v19  ;;  %v3321_v15 = vpop.f32.mrb[29].mxu0  ;;  %v3327_v39 = vpop.f32.mrb[29].mxu1 }
 0x6a4   : > { %v2852_v32 = vpop.f32.mrb[30].mxu0  ;;  %v2916_v60 = vpop.f32.mrb[30].mxu1 }
 0x6a5   : > { %v2920_v62 = vadd.f32 %v2913_v59, %v2856_v52  ;;  %v2857_v0 = vadd.f32 %v2852_v32, %v2793_v38  ;;  %v3322_v1 = vpop.f32.mrb[31].mxu0  ;;  %v3328_v2 = vpop.f32.mrb[31].mxu1 }
 0x6a7   : > { %v2929_v3 = vadd.f32 %v3195_v48, %v2920_v62  ;;  %v2921_v4 = vadd.f32 %v2916_v60, %v2857_v0 }
 0x6a9   : > { %2931 = vst [vmem:[%s3769_s18] sm:$0xff] %v2929_v3  ;;  %v2930_v6 = vadd.f32 %v3195_v48, %v2921_v4 }
 0x6ab   : > { %2932 = vst [vmem:[%s3769_s18 + $0x8] sm:$0xff] %v2930_v6 }
 0x6ac PF: > { %s19_s11 = sadd.s32 1, %s3612_s11   ;;  %s4884_s27 = smov %s3592_s28 }
 0x6ad   : > { %p16_p11 = scmp.ge.s32.totalorder %s19_s11, 10   ;;  %s4885_s28 = smov %s3740_s23 }
 0x6ae   : > { %s4886_s29 = smov %s3604_s9  ;;  %s4887_s30 = smov %s3608_s10 }
 0x6af   : > { %s4888_s9 = smov %s4891_s13  ;;  %s4889_s10 = smov %s4895_s14 }
 0x6b0   :  { %18 = sbr.rel (!%p16_p11) target bundleno = 4 (0x4), region = 199 }
 0x6b7   :  { %2955 = vsyncpa [#allocation11], 1 }
 0x6b8   :  { %2957 = vsyncpa [#allocation11 + $0x1], 1 }
 0x6b9   :  { %2958 = vsyncmov [#allocation8] }
 0x6bc   :  { %s2959_s18 = vpop.sfrf %2958 }
 0x6bd   :  { %p3198_p12 = scmp.ne.s32.totalorder %s2959_s18, 0 }
 0x6bf   :  { %2963 = shalt.err (%p3198_p12)  }

</bundles_post_ra>
